<compile_context>
chip_gen: v7x
topology: tpu7x:2x2x1
jax: 0.10.0
libtpu: 0.0.40
codegen_flags: <defaults>
</compile_context>

<pallas_src>
import jax
import jax.numpy as jnp
from jax.experimental import pallas as pl
from jax.experimental.pallas import tpu as pltpu

D_CLIP = 1024   # CLIP ViT-L/14 hidden size  (matches nn.Linear(1024, 1024))
D_LLM = 2048    # Llama-3.2-1B hidden size   (matches nn.Linear(1024, 2048))
LN_EPS = 1e-5   # nn.LayerNorm default eps


# ----------------------------- projector MLP kernel -------------------------
def mlp_ln_kernel(x_ref, w1_ref, b1_ref, w2_ref, b2_ref, g_ref, be_ref, o_ref):
    x = x_ref[...]                                              # (tm, 1024) bf16
    # MXU matmul: bf16 operands, f32 accumulation.
    h = jnp.dot(x, w1_ref[...], preferred_element_type=jnp.float32) + b1_ref[...]
    # tanh-approximate GELU lowers to EUP transcendentals (otherwise-idle slot)
    # instead of an erf polynomial expanded on the VPU.
    # TODO(synk): slight numeric deviation from PyTorch nn.GELU() exact-erf.
    h = jax.nn.gelu(h, approximate=True)
    # TODO(synk): nn.Dropout(0.1) treated as identity (eval-mode semantics).
    y = jnp.dot(h.astype(jnp.bfloat16), w2_ref[...],
                preferred_element_type=jnp.float32) + b2_ref[...]
    # LayerNorm in f32, single-pass stats (mean and mean-of-squares).
    mean = jnp.mean(y, axis=-1, keepdims=True)
    msq = jnp.mean(y * y, axis=-1, keepdims=True)
    var = jnp.maximum(msq - mean * mean, 0.0)
    y = (y - mean) * jax.lax.rsqrt(var + LN_EPS)
    o_ref[...] = (y * g_ref[...] + be_ref[...]).astype(o_ref.dtype)   # (tm, 2048) bf16


def _pick_row_tile(n, tm=256):
    """Row-tile choice: fill the 256-wide MXU M dimension, prefer an even
    number of grid steps (>=2) so v7x's two TensorCores both get work, and
    minimise padding.  Small inputs collapse to one bf16-sublane-aligned tile."""
    if n <= tm:
        return max(16, ((n + 15) // 16) * 16)
    candidates = (288, 256, 224, 192, 160, 128) if tm >= 256 else (tm,)
    best = None
    for c in candidates:
        steps = pl.cdiv(n, c)
        key = (0 if steps % 2 == 0 else 1, steps * c - n, -c)
        if best is None or key < best[0]:
            best = (key, c)
    return best[1]


def mlp_projector(x, w1, b1, w2, b2, gamma, beta, *, tm=256):
    n, d = x.shape
    assert d == D_CLIP
    tm = _pick_row_tile(n, tm)
    n_pad = pl.cdiv(n, tm) * tm

    x = x.astype(jnp.bfloat16)
    if n_pad != n:
        x = jnp.pad(x, ((0, n_pad - n), (0, 0)))
    w1 = w1.astype(jnp.bfloat16)
    w2 = w2.astype(jnp.bfloat16)

    out = pl.pallas_call(
        mlp_ln_kernel,
        # bf16 output: halves HBM writeback and vector-store pressure; the
        # downstream (bf16) Llama decoder consumes it anyway.
        out_shape=jax.ShapeDtypeStruct((n_pad, D_LLM), jnp.bfloat16),
        grid_spec=pltpu.PrefetchScalarGridSpec(
            num_scalar_prefetch=0,
            grid=(n_pad // tm,),
            in_specs=[
                pl.BlockSpec((tm, D_CLIP), lambda i: (i, 0)),     # x rows
                pl.BlockSpec((D_CLIP, D_CLIP), lambda i: (0, 0)), # W1 (resident)
                pl.BlockSpec((1, D_CLIP), lambda i: (0, 0)),      # b1
                pl.BlockSpec((D_CLIP, D_LLM), lambda i: (0, 0)),  # W2 (resident)
                pl.BlockSpec((1, D_LLM), lambda i: (0, 0)),       # b2
                pl.BlockSpec((1, D_LLM), lambda i: (0, 0)),       # LN gamma
                pl.BlockSpec((1, D_LLM), lambda i: (0, 0)),       # LN beta
            ],
            out_specs=pl.BlockSpec((tm, D_LLM), lambda i: (i, 0)),
        ),
        compiler_params=pltpu.CompilerParams(
            dimension_semantics=("parallel",),
            # bf16 weights ~6 MiB (x2 for default double buffering) + tm<=288
            # bf16 x/out tiles + f32 intermediates stays well under ~25 MiB:
            # fits v7x's 64 MiB per-TC VMEM and v5e/v6e's 128 MiB with room.
            vmem_limit_bytes=48 << 20,
        ),
    )(x, w1, b1, w2, b2, gamma, beta)
    return out[:n] if n_pad != n else out


# ----------------------------- embed_tokens gather kernel --------------------
def embed_gather_kernel(ids_ref, table_ref, o_ref, sem):
    # ids_ref: SMEM scalar-prefetched token ids; table_ref: HBM (V, D) table.
    rows = o_ref.shape[0]
    base = pl.program_id(0) * rows
    # Issue all row DMAs (HBM table row -> output VMEM row).  Keep the
    # descriptors so the wait loop does not rebuild them / re-read SMEM ids
    # after a .wait() (which breaks sst->sld forwarding).
    copies = []
    for j in range(rows):
        cp = pltpu.make_async_copy(
            table_ref.at[ids_ref[base + j]], o_ref.at[j], sem.at[j])
        cp.start()
        copies.append(cp)
    for cp in copies:
        cp.wait()


def embed_tokens(ids_flat, table, *, rows_per_step=32):
    n = ids_flat.shape[0]
    v, d = table.shape
    # TODO(synk): PyTorch nn.Embedding errors on out-of-range ids; here we clamp.
    ids = jnp.clip(ids_flat.astype(jnp.int32), 0, v - 1)
    n_pad = pl.cdiv(n, rows_per_step) * rows_per_step
    if n_pad != n:
        ids = jnp.pad(ids, (0, n_pad - n))

    out = pl.pallas_call(
        embed_gather_kernel,
        out_shape=jax.ShapeDtypeStruct((n_pad, d), table.dtype),
        grid_spec=pltpu.PrefetchScalarGridSpec(
            num_scalar_prefetch=1,                          # ids -> SMEM
            grid=(n_pad // rows_per_step,),
            in_specs=[pl.BlockSpec(memory_space=pl.ANY)],   # table stays in HBM
            out_specs=pl.BlockSpec((rows_per_step, d), lambda i, ids: (i, 0)),
            scratch_shapes=[pltpu.SemaphoreType.DMA((rows_per_step,))],
        ),
        compiler_params=pltpu.CompilerParams(
            # Each grid step gathers independent rows -> shardable across
            # v7x's two TensorCores.
            dimension_semantics=("parallel",),
        ),
    )(ids, table)
    return out[:n] if n_pad != n else out


# ----------------------------- captioning.forward ----------------------------
def captioning_forward(params, image_embed, input_ids, attention_mask):
    """image_embed plays the role of CLIP.vision_model(image).last_hidden_state[:, 1:, :]."""
    b, s_img, _ = image_embed.shape
    x = image_embed.reshape(b * s_img, D_CLIP)
    image_token = mlp_projector(x, params["w1"], params["b1"], params["w2"],
                                params["b2"], params["ln_g"], params["ln_b"])
    image_token = image_token.reshape(b, s_img, D_LLM)

    bt, t = input_ids.shape
    input_embeds = embed_tokens(input_ids.reshape(-1), params["embed_table"])
    input_embeds = input_embeds.reshape(bt, t, D_LLM)

    assert image_token.ndim == 3 and input_embeds.ndim == 3
    inputs_embeds = jnp.concatenate([image_token, input_embeds], axis=1)
    extended_mask = jnp.concatenate(
        [jnp.ones((b, s_img), dtype=attention_mask.dtype), attention_mask], axis=1)
    # TODO(synk): final self.llama(inputs_embeds=...) decoder forward is an
    # external pretrained transformer and is not reproduced here.
    return inputs_embeds, extended_mask


# ----------------------------- reference (plain JAX) -------------------------
def mlp_reference(x, p):
    # Mirrors the kernel's numerics: bf16 matmul operands, f32 accumulation,
    # tanh-approx GELU and f32 LayerNorm (kept in f32 here; kernel stores bf16).
    xb = x.astype(jnp.bfloat16)
    w1 = p["w1"].astype(jnp.bfloat16)
    w2 = p["w2"].astype(jnp.bfloat16)
    h = jnp.dot(xb, w1, preferred_element_type=jnp.float32) + p["b1"][0]
    h = jax.nn.gelu(h, approximate=True)
    y = jnp.dot(h.astype(jnp.bfloat16), w2,
                preferred_element_type=jnp.float32) + p["b2"][0]
    mean = jnp.mean(y, axis=-1, keepdims=True)
    var = jnp.mean(jnp.square(y - mean), axis=-1, keepdims=True)
    return (y - mean) * jax.lax.rsqrt(var + LN_EPS) * p["ln_g"][0] + p["ln_b"][0]


if __name__ == "__main__":
    key = jax.random.PRNGKey(0)
    k_img, k_w1, k_b1, k_w2, k_b2, k_tab, k_ids, k_raw = jax.random.split(key, 8)

    B = 2          # batch
    S_IMG = 16     # image patch tokens (scaled down from CLIP ViT-L/336's 576)
    T = 8          # text sequence length
    VOCAB = 256    # synthetic vocab (scaled down from Llama's 128256)

    # Deterministic parameter init (shapes per the module's __init__).
    params = {
        "w1": jax.random.normal(k_w1, (D_CLIP, D_CLIP), jnp.float32) * 0.02,
        "b1": jnp.zeros((1, D_CLIP), jnp.float32),
        "w2": jax.random.normal(k_w2, (D_CLIP, D_LLM), jnp.float32) * 0.02,
        "b2": jnp.zeros((1, D_LLM), jnp.float32),
        "ln_g": jnp.ones((1, D_LLM), jnp.float32),
        "ln_b": jnp.zeros((1, D_LLM), jnp.float32),
        # bf16 embedding table: matches the Llama bf16 checkpoint and halves
        # the bytes moved by the (purely memory/latency-bound) row gather.
        "embed_table": (jax.random.normal(k_tab, (VOCAB, D_LLM), jnp.float32)
                        * 0.02).astype(jnp.bfloat16),
    }

    # TODO(synk): frozen CLIP vision tower not reproduced; `image_embed` stands
    # in for CLIP.vision_model(image).last_hidden_state[:, 1:, :].
    image = jax.random.normal(k_raw, (B, 3, 32, 32), jnp.float32)   # unused placeholder
    image_embed = jax.random.normal(k_img, (B, S_IMG, D_CLIP), jnp.float32)
    input_ids = jax.random.randint(k_ids, (B, T), 0, VOCAB, jnp.int32)
    attention_mask = jnp.ones((B, T), jnp.float32)

    inputs_embeds, extended_mask = captioning_forward(
        params, image_embed, input_ids, attention_mask)
    jax.block_until_ready((inputs_embeds, extended_mask))

    # Sanity checks vs. plain-JAX reference.
    assert inputs_embeds.shape == (B, S_IMG + T, D_LLM)
    assert inputs_embeds.dtype == jnp.bfloat16
    assert extended_mask.shape == (B, S_IMG + T)

    ref_img_tok = mlp_reference(image_embed.reshape(B * S_IMG, D_CLIP),
                                params).reshape(B, S_IMG, D_LLM)
    ref_txt = params["embed_table"][input_ids]
    assert jnp.allclose(inputs_embeds[:, :S_IMG, :].astype(jnp.float32),
                        ref_img_tok, atol=3e-2, rtol=3e-2)
    assert jnp.array_equal(inputs_embeds[:, S_IMG:, :], ref_txt)

    print("KERNEL_OK")
</pallas_src>

<mosaic_0001>
module attributes {stable_mosaic.version = 11 : i64} {
  func.func @mlp_ln_kernel(%arg0: i32, %arg1: memref<32x1024xbf16, #tpu.memory_space<vmem>>, %arg2: memref<1024x1024xbf16, #tpu.memory_space<vmem>>, %arg3: memref<1x1024xf32, #tpu.memory_space<vmem>>, %arg4: memref<1024x2048xbf16, #tpu.memory_space<vmem>>, %arg5: memref<1x2048xf32, #tpu.memory_space<vmem>>, %arg6: memref<1x2048xf32, #tpu.memory_space<vmem>>, %arg7: memref<1x2048xf32, #tpu.memory_space<vmem>>, %arg8: memref<32x2048xbf16, #tpu.memory_space<vmem>>) attributes {dimension_semantics = [#tpu.dimension_semantics<parallel>], iteration_bounds = array<i64: 1>, scalar_prefetch = 0 : i64, scratch_operands = 0 : i64, tpu.core_type = #tpu.core_type<tc>, window_params = [{transform_indices = @transform_0, window_bounds = array<i64: 32, 1024>}, {pipeline_mode = #tpu.pipeline_mode<synchronous>, transform_indices = @transform_1, window_bounds = array<i64: 1024, 1024>}, {pipeline_mode = #tpu.pipeline_mode<synchronous>, transform_indices = @transform_2, window_bounds = array<i64: 1, 1024>}, {pipeline_mode = #tpu.pipeline_mode<synchronous>, transform_indices = @transform_3, window_bounds = array<i64: 1024, 2048>}, {pipeline_mode = #tpu.pipeline_mode<synchronous>, transform_indices = @transform_4, window_bounds = array<i64: 1, 2048>}, {pipeline_mode = #tpu.pipeline_mode<synchronous>, transform_indices = @transform_5, window_bounds = array<i64: 1, 2048>}, {pipeline_mode = #tpu.pipeline_mode<synchronous>, transform_indices = @transform_6, window_bounds = array<i64: 1, 2048>}, {transform_indices = @transform_7, window_bounds = array<i64: 32, 2048>}]} {
    %c0 = arith.constant 0 : index
    %c0_0 = arith.constant 0 : index
    %0 = vector.load %arg1[%c0, %c0_0] : memref<32x1024xbf16, #tpu.memory_space<vmem>>, vector<32x1024xbf16>
    %c0_1 = arith.constant 0 : index
    %c0_2 = arith.constant 0 : index
    %1 = vector.load %arg2[%c0_1, %c0_2] : memref<1024x1024xbf16, #tpu.memory_space<vmem>>, vector<1024x1024xbf16>
    %cst = arith.constant dense<0.000000e+00> : vector<32x1024xf32>
    %2 = tpu.matmul %0, %1, %cst {dimension_numbers = #tpu.dot_dimension_numbers<[1], [0], [0], [1], [0, 0, 1, 1], [], []>} : vector<32x1024xbf16>, vector<1024x1024xbf16>, vector<32x1024xf32> -> vector<32x1024xf32>
    %c0_3 = arith.constant 0 : index
    %c0_4 = arith.constant 0 : index
    %3 = vector.load %arg3[%c0_3, %c0_4] : memref<1x1024xf32, #tpu.memory_space<vmem>>, vector<1x1024xf32>
    %4 = vector.broadcast %3 : vector<1x1024xf32> to vector<32x1024xf32>
    %5 = arith.addf %2, %4 : vector<32x1024xf32>
    %6 = arith.mulf %5, %5 : vector<32x1024xf32>
    %7 = arith.mulf %5, %6 : vector<32x1024xf32>
    %cst_5 = arith.constant 4.471500e-02 : f32
    %8 = vector.broadcast %cst_5 : f32 to vector<32x1024xf32>
    %9 = arith.mulf %8, %7 : vector<32x1024xf32>
    %10 = arith.addf %5, %9 : vector<32x1024xf32>
    %cst_6 = arith.constant 0.797884583 : f32
    %11 = vector.broadcast %cst_6 : f32 to vector<32x1024xf32>
    %12 = arith.mulf %11, %10 : vector<32x1024xf32>
    %13 = math.tanh %12 : vector<32x1024xf32>
    %cst_7 = arith.constant 1.000000e+00 : f32
    %14 = vector.broadcast %cst_7 : f32 to vector<32x1024xf32>
    %15 = arith.addf %14, %13 : vector<32x1024xf32>
    %cst_8 = arith.constant 5.000000e-01 : f32
    %16 = vector.broadcast %cst_8 : f32 to vector<32x1024xf32>
    %17 = arith.mulf %16, %15 : vector<32x1024xf32>
    %18 = arith.mulf %5, %17 : vector<32x1024xf32>
    %19 = arith.truncf %18 : vector<32x1024xf32> to vector<32x1024xbf16>
    %c0_9 = arith.constant 0 : index
    %c0_10 = arith.constant 0 : index
    %20 = vector.load %arg4[%c0_9, %c0_10] : memref<1024x2048xbf16, #tpu.memory_space<vmem>>, vector<1024x2048xbf16>
    %cst_11 = arith.constant dense<0.000000e+00> : vector<32x2048xf32>
    %21 = tpu.matmul %19, %20, %cst_11 {dimension_numbers = #tpu.dot_dimension_numbers<[1], [0], [0], [1], [0, 0, 1, 1], [], []>} : vector<32x1024xbf16>, vector<1024x2048xbf16>, vector<32x2048xf32> -> vector<32x2048xf32>
    %c0_12 = arith.constant 0 : index
    %c0_13 = arith.constant 0 : index
    %22 = vector.load %arg5[%c0_12, %c0_13] : memref<1x2048xf32, #tpu.memory_space<vmem>>, vector<1x2048xf32>
    %23 = vector.broadcast %22 : vector<1x2048xf32> to vector<32x2048xf32>
    %24 = arith.addf %21, %23 : vector<32x2048xf32>
    %cst_14 = arith.constant dense<0.000000e+00> : vector<32xf32>
    %25 = vector.multi_reduction <add>, %24, %cst_14 [1] : vector<32x2048xf32> to vector<32xf32>
    %26 = vector.shape_cast %25 : vector<32xf32> to vector<32x1xf32>
    %cst_15 = arith.constant 2.048000e+03 : f32
    %27 = vector.broadcast %cst_15 : f32 to vector<32x1xf32>
    %28 = arith.divf %26, %27 : vector<32x1xf32>
    %29 = arith.mulf %24, %24 : vector<32x2048xf32>
    %cst_16 = arith.constant dense<0.000000e+00> : vector<32xf32>
    %30 = vector.multi_reduction <add>, %29, %cst_16 [1] : vector<32x2048xf32> to vector<32xf32>
    %31 = vector.shape_cast %30 : vector<32xf32> to vector<32x1xf32>
    %cst_17 = arith.constant 2.048000e+03 : f32
    %32 = vector.broadcast %cst_17 : f32 to vector<32x1xf32>
    %33 = arith.divf %31, %32 : vector<32x1xf32>
    %34 = arith.mulf %28, %28 : vector<32x1xf32>
    %35 = arith.subf %33, %34 : vector<32x1xf32>
    %cst_18 = arith.constant 0.000000e+00 : f32
    %36 = vector.broadcast %cst_18 : f32 to vector<32x1xf32>
    %37 = arith.maximumf %35, %36 : vector<32x1xf32>
    %38 = vector.broadcast %28 : vector<32x1xf32> to vector<32x2048xf32>
    %39 = arith.subf %24, %38 : vector<32x2048xf32>
    %cst_19 = arith.constant 9.99999974E-6 : f32
    %40 = vector.broadcast %cst_19 : f32 to vector<32x1xf32>
    %41 = arith.addf %37, %40 : vector<32x1xf32>
    %42 = math.rsqrt %41 : vector<32x1xf32>
    %43 = vector.broadcast %42 : vector<32x1xf32> to vector<32x2048xf32>
    %44 = arith.mulf %39, %43 : vector<32x2048xf32>
    %c0_20 = arith.constant 0 : index
    %c0_21 = arith.constant 0 : index
    %45 = vector.load %arg6[%c0_20, %c0_21] : memref<1x2048xf32, #tpu.memory_space<vmem>>, vector<1x2048xf32>
    %46 = vector.broadcast %45 : vector<1x2048xf32> to vector<32x2048xf32>
    %47 = arith.mulf %44, %46 : vector<32x2048xf32>
    %c0_22 = arith.constant 0 : index
    %c0_23 = arith.constant 0 : index
    %48 = vector.load %arg7[%c0_22, %c0_23] : memref<1x2048xf32, #tpu.memory_space<vmem>>, vector<1x2048xf32>
    %49 = vector.broadcast %48 : vector<1x2048xf32> to vector<32x2048xf32>
    %50 = arith.addf %47, %49 : vector<32x2048xf32>
    %51 = arith.truncf %50 : vector<32x2048xf32> to vector<32x2048xbf16>
    %c0_24 = arith.constant 0 : index
    %c0_25 = arith.constant 0 : index
    %52 = vector.load %arg8[%c0_24, %c0_25] : memref<32x2048xbf16, #tpu.memory_space<vmem>>, vector<32x2048xbf16>
    tpu.vector_store %arg8[%c0_24, %c0_25], %51 {strides = array<i32>} : memref<32x2048xbf16, #tpu.memory_space<vmem>>, vector<32x2048xbf16>,
    return
  }
  func.func @transform_0(%arg0: i32) -> (i32, i32) {
    %c0_i32 = arith.constant 0 : i32
    %c0_i32_0 = arith.constant 0 : i32
    return %arg0, %c0_i32 : i32, i32
  }
  func.func @transform_1(%arg0: i32) -> (i32, i32) {
    %c0_i32 = arith.constant 0 : i32
    %c0_i32_0 = arith.constant 0 : i32
    %c0_i32_1 = arith.constant 0 : i32
    return %c0_i32, %c0_i32_0 : i32, i32
  }
  func.func @transform_2(%arg0: i32) -> (i32, i32) {
    %c0_i32 = arith.constant 0 : i32
    %c0_i32_0 = arith.constant 0 : i32
    %c0_i32_1 = arith.constant 0 : i32
    return %c0_i32, %c0_i32_0 : i32, i32
  }
  func.func @transform_3(%arg0: i32) -> (i32, i32) {
    %c0_i32 = arith.constant 0 : i32
    %c0_i32_0 = arith.constant 0 : i32
    %c0_i32_1 = arith.constant 0 : i32
    return %c0_i32, %c0_i32_0 : i32, i32
  }
  func.func @transform_4(%arg0: i32) -> (i32, i32) {
    %c0_i32 = arith.constant 0 : i32
    %c0_i32_0 = arith.constant 0 : i32
    %c0_i32_1 = arith.constant 0 : i32
    return %c0_i32, %c0_i32_0 : i32, i32
  }
  func.func @transform_5(%arg0: i32) -> (i32, i32) {
    %c0_i32 = arith.constant 0 : i32
    %c0_i32_0 = arith.constant 0 : i32
    %c0_i32_1 = arith.constant 0 : i32
    return %c0_i32, %c0_i32_0 : i32, i32
  }
  func.func @transform_6(%arg0: i32) -> (i32, i32) {
    %c0_i32 = arith.constant 0 : i32
    %c0_i32_0 = arith.constant 0 : i32
    %c0_i32_1 = arith.constant 0 : i32
    return %c0_i32, %c0_i32_0 : i32, i32
  }
  func.func @transform_7(%arg0: i32) -> (i32, i32) {
    %c0_i32 = arith.constant 0 : i32
    %c0_i32_0 = arith.constant 0 : i32
    return %arg0, %c0_i32 : i32, i32
  }
}

</mosaic_0001>

<bundles_post_ra>
// kernel: tpu_custom_call.1
= control target key start
LH: loop header
LB: loop body
LE: loop exit
PB: predicated region body
PF: predicated region fallthrough
CT: control target
= control target key end

     0   :  { %12 = vsyncpa [#allocation3], 0  ;;  %s17832_s0 = inlined_call_operand.hbm [shape: bf16[32,1024], index: 0, kind: input, shape index: {}]   ;;  %s17833_s1 = inlined_call_operand.hbm [shape: bf16[1024,1024], index: 1, kind: input, shape index: {}]   ;;  %s17834_s2 = inlined_call_operand.hbm [shape: f32[1,1024], index: 2, kind: input, shape index: {}]   ;;  %s17835_s3 = inlined_call_operand.hbm [shape: bf16[1024,2048], index: 3, kind: input, shape index: {}]   ;;  %s17836_s4 = inlined_call_operand.hbm [shape: f32[1,2048], index: 4, kind: input, shape index: {}]   ;;  %s17837_s5 = inlined_call_operand.hbm [shape: f32[1,2048], index: 5, kind: input, shape index: {}]   ;;  %s17838_s6 = inlined_call_operand.hbm [shape: f32[1,2048], index: 6, kind: input, shape index: {}]   ;;  %s17839_s7 = inlined_call_operand.hbm [shape: bf16[32,2048], index: 7, kind: output, shape index: {}]  }
   0x1   :  { %13 = vsyncpa [#allocation6], 0 }
   0x2   :  { %14 = vsyncpa [#allocation9], 0 }
   0x3   :  { %15 = vsyncpa [#allocation12], 0 }
   0x4   :  { %16 = vsyncpa [#allocation4], 0  ;;  %s15568_s24 = smov [#allocation5]   ;;  %s15569_s26 = smov [#allocation8]  }
   0x5   :  { %s34_s25 = sshll.u32 %s15568_s24, 4  ;;  %s56_s27 = sshll.u32 %s15569_s26, 4  ;;  %s35_s25 = int_to_ptr.vmem [resolvable:$true] %s34_s25  ;;  %s15620_s27 = int_to_ptr.vmem [resolvable:$true] %s56_s27 }
   0x6   :  { %s15382_s30 = scalar_lea.hbm %s17833_s1, 65536 }
   0x7   :  { %p15383_p0 = scmp.ne.s32.totalorder %s17833_s1, %s15382_s30  ;;  %p15386_p1 = scmp.lt.u32.totalorder %s15382_s30, %s17833_s1 }
   0x9   :  { %p15388_p2 = pnand %p15386_p1, %p15383_p0 }
   0xb   :  { %15391 = shalt.err (!%p15388_p2)
}
   0xc   :  { %s15392_s12 = scalar_lea.vmem %s35_s25, 65536  ;;  %p15397_p4 = scmp.lt.s32.totalorder %s35_s25, %s35_s25 }
   0xd   :  { %p15393_p3 = scmp.ne.s32.totalorder %s35_s25, %s15392_s12  ;;  %p15398_p5 = scmp.lt.s32.totalorder %s15392_s12, %s15392_s12 }
   0xf   :  { %p15399_p6 = por %p15398_p5, %p15397_p4 }
  0x11   :  { %p15400_p7 = pnand %p15399_p6, %p15393_p3 }
  0x13   :  { %15403 = shalt.err (!%p15400_p7)
}
  0x14   :  { %s15570_s13 = smov 512   ;;  %s15571_s14 = smov 32  }
  0x15   :  { %40 = dma.hbm_to_vmem [thread:$0]  %s17833_s1, 65536, %s35_s25, [#allocation6], %s15570_s13, %s15570_s13, %s15571_s14  }
  0x16   :  { %s15404_s19 = scalar_lea.hbm %s17835_s3, 131072 }
  0x17   :  { %p15405_p8 = scmp.ne.s32.totalorder %s17835_s3, %s15404_s19  ;;  %p15408_p9 = scmp.lt.u32.totalorder %s15404_s19, %s17835_s3 }
  0x19   :  { %p15410_p10 = pnand %p15408_p9, %p15405_p8 }
  0x1b   :  { %15413 = shalt.err (!%p15410_p10)
}
  0x1c   :  { %s15414_s24 = scalar_lea.vmem %s15620_s27, 131072  ;;  %p15419_p12 = scmp.lt.s32.totalorder %s15620_s27, %s15620_s27 }
  0x1d   :  { %p15415_p11 = scmp.ne.s32.totalorder %s15620_s27, %s15414_s24  ;;  %p15420_p13 = scmp.lt.s32.totalorder %s15414_s24, %s15414_s24 }
  0x1f   :  { %p15421_p0 = por %p15420_p13, %p15419_p12 }
  0x21   :  { %p15422_p1 = pnand %p15421_p0, %p15415_p11 }
  0x23   :  { %15425 = shalt.err (!%p15422_p1)
}
  0x24   :  { %s15572_s1 = smov 1024   ;;  %s15573_s25 = smov 64  }
  0x25   :  { %62 = dma.hbm_to_vmem [thread:$0]  %s17835_s3, 131072, %s15620_s27, [#allocation9], %s15572_s1, %s15572_s1, %s15573_s25  }
  0x26   :  { %s15574_s29 = smov [#allocation11]   ;;  %s15575_s8 = smov [#allocation2]  }
  0x27   :  { %s79_s30 = sshll.u32 %s15574_s29, 4  ;;  %s22_s9 = sshll.u32 %s15575_s8, 4  ;;  %s80_s30 = int_to_ptr.vmem [resolvable:$true] %s79_s30  ;;  %s15657_s9 = int_to_ptr.vmem [resolvable:$true] %s22_s9 }
  0x28   :  { %s15426_s12 = scalar_lea.hbm %s17837_s5, 256 }
  0x29   :  { %p15427_p2 = scmp.ne.s32.totalorder %s17837_s5, %s15426_s12  ;;  %p15430_p3 = scmp.lt.u32.totalorder %s15426_s12, %s17837_s5 }
  0x2b   :  { %p15432_p4 = pnand %p15430_p3, %p15427_p2 }
  0x2d   :  { %15435 = shalt.err (!%p15432_p4)
}
  0x2e   :  { %s15436_s3 = scalar_lea.vmem %s80_s30, 256  ;;  %p15441_p6 = scmp.lt.s32.totalorder %s80_s30, %s80_s30 }
  0x2f   :  { %p15437_p5 = scmp.ne.s32.totalorder %s80_s30, %s15436_s3  ;;  %p15442_p7 = scmp.lt.s32.totalorder %s15436_s3, %s15436_s3 }
  0x31   :  { %p15443_p8 = por %p15442_p7, %p15441_p6 }
  0x33   :  { %p15444_p9 = pnand %p15443_p8, %p15437_p5 }
  0x35   :  { %15447 = shalt.err (!%p15444_p9)
}
  0x36   :  { %82 = dma.hbm_to_vmem [thread:$0]  %s17837_s5, 256, %s80_s30, [#allocation12]  }
  0x37   :  { %s15448_s22 = scalar_lea.hbm %s17832_s0, 2048 }
  0x38   :  { %p15449_p10 = scmp.ne.s32.totalorder %s17832_s0, %s15448_s22  ;;  %p15452_p11 = scmp.lt.u32.totalorder %s15448_s22, %s17832_s0 }
  0x3a   :  { %p15454_p12 = pnand %p15452_p11, %p15449_p10 }
  0x3c   :  { %15457 = shalt.err (!%p15454_p12)
}
  0x3d   :  { %s15458_s29 = scalar_lea.vmem %s15657_s9, 2048  ;;  %p15463_p0 = scmp.lt.s32.totalorder %s15657_s9, %s15657_s9 }
  0x3e   :  { %p15459_p13 = scmp.ne.s32.totalorder %s15657_s9, %s15458_s29  ;;  %p15464_p1 = scmp.lt.s32.totalorder %s15458_s29, %s15458_s29 }
  0x40   :  { %p15465_p2 = por %p15464_p1, %p15463_p0 }
  0x42   :  { %p15466_p3 = pnand %p15465_p2, %p15459_p13 }
  0x44   :  { %15469 = shalt.err (!%p15466_p3)
}
  0x45   :  { %28 = dma.hbm_to_vmem [thread:$0]  %s17832_s0, 2048, %s15657_s9, [#allocation3], %s15570_s13, %s15570_s13, %s15571_s14  }
  0x46   :  { %s15576_s8 = smov [#allocation7]   ;;  %s15577_s11 = smov [#allocation10]  }
  0x47   :  { %s47_s10 = sshll.u32 %s15576_s8, 4  ;;  %s69_s12 = sshll.u32 %s15577_s11, 4  ;;  %s48_s10 = int_to_ptr.vmem [resolvable:$true] %s47_s10  ;;  %s70_s12 = int_to_ptr.vmem [resolvable:$true] %s69_s12 }
  0x48   :  { %s15470_s17 = scalar_lea.hbm %s17834_s2, 128 }
  0x49   :  { %p15471_p4 = scmp.ne.s32.totalorder %s17834_s2, %s15470_s17  ;;  %p15474_p5 = scmp.lt.u32.totalorder %s15470_s17, %s17834_s2 }
  0x4b   :  { %p15476_p6 = pnand %p15474_p5, %p15471_p4 }
  0x4d   :  { %15479 = shalt.err (!%p15476_p6)
}
  0x4e   :  { %s15480_s0 = scalar_lea.vmem %s48_s10, 128  ;;  %p15485_p8 = scmp.lt.s32.totalorder %s48_s10, %s48_s10 }
  0x4f   :  { %p15481_p7 = scmp.ne.s32.totalorder %s48_s10, %s15480_s0  ;;  %p15486_p9 = scmp.lt.s32.totalorder %s15480_s0, %s15480_s0 }
  0x51   :  { %p15487_p10 = por %p15486_p9, %p15485_p8 }
  0x53   :  { %p15488_p11 = pnand %p15487_p10, %p15481_p7 }
  0x55   :  { %15491 = shalt.err (!%p15488_p11)
}
  0x56   :  { %50 = dma.hbm_to_vmem [thread:$0]  %s17834_s2, 128, %s48_s10, [#allocation6]  }
  0x57   :  { %s15492_s21 = scalar_lea.hbm %s17836_s4, 256 }
  0x58   :  { %p15493_p12 = scmp.ne.s32.totalorder %s17836_s4, %s15492_s21  ;;  %p15496_p13 = scmp.lt.u32.totalorder %s15492_s21, %s17836_s4 }
  0x5a   :  { %p15498_p0 = pnand %p15496_p13, %p15493_p12 }
  0x5c   :  { %15501 = shalt.err (!%p15498_p0)
}
  0x5d   :  { %s15502_s28 = scalar_lea.vmem %s70_s12, 256  ;;  %p15507_p2 = scmp.lt.s32.totalorder %s70_s12, %s70_s12 }
  0x5e   :  { %p15503_p1 = scmp.ne.s32.totalorder %s70_s12, %s15502_s28  ;;  %p15508_p3 = scmp.lt.s32.totalorder %s15502_s28, %s15502_s28 }
  0x60   :  { %p15509_p4 = por %p15508_p3, %p15507_p2 }
  0x62   :  { %p15510_p5 = pnand %p15509_p4, %p15503_p1 }
  0x64   :  { %15513 = shalt.err (!%p15510_p5)
}
  0x65   :  { %72 = dma.hbm_to_vmem [thread:$0]  %s17836_s4, 256, %s70_s12, [#allocation9]  }
  0x66   :  { %s15578_s5 = smov [#allocation13]   ;;  %s15514_s11 = scalar_lea.hbm %s17838_s6, 256 }
  0x67   :  { %s89_s30 = sshll.u32 %s15578_s5, 4  ;;  %p15515_p6 = scmp.ne.s32.totalorder %s17838_s6, %s15514_s11  ;;  %s90_s30 = int_to_ptr.vmem [resolvable:$true] %s89_s30 }
  0x68   :  { %p15518_p7 = scmp.lt.u32.totalorder %s15514_s11, %s17838_s6 }
  0x6a   :  { %p15520_p8 = pnand %p15518_p7, %p15515_p6 }
  0x6c   :  { %15523 = shalt.err (!%p15520_p8)
}
  0x6d   :  { %s15524_s3 = scalar_lea.vmem %s90_s30, 256  ;;  %p15529_p10 = scmp.lt.s32.totalorder %s90_s30, %s90_s30 }
  0x6e   :  { %p15525_p9 = scmp.ne.s32.totalorder %s90_s30, %s15524_s3  ;;  %p15530_p11 = scmp.lt.s32.totalorder %s15524_s3, %s15524_s3 }
  0x70   :  { %p15531_p12 = por %p15530_p11, %p15529_p10 }
  0x72   :  { %p15532_p13 = pnand %p15531_p12, %p15525_p9 }
  0x74   :  { %15535 = shalt.err (!%p15532_p13)
}
  0x75   :  { %92 = dma.hbm_to_vmem [thread:$0]  %s17838_s6, 256, %s90_s30, [#allocation12]  }
  0x76   :  { %15558 = dma.done.wait [#allocation3], 2048  }
  0x77   :  { %15559 = vsyncadd [#allocation3], 4294965248 }
  0x78   :  { %15560 = dma.done.wait [#allocation6], 65664  }
  0x79   :  { %15561 = vsyncadd [#allocation6], 4294901632 }
  0x7a   :  { %15562 = dma.done.wait [#allocation9], 131328  }
  0x7b   :  { %15563 = vsyncadd [#allocation9], 4294835968 }
  0x7c   :  { %15564 = dma.done.wait [#allocation12], 512  }
  0x7d   :  { %15565 = vsyncadd [#allocation12], 4294966784  ;;  %v130_v0 = vld [vmem:[#allocation5] sm:$0xff]  ;;  %v131_v2 = vld [vmem:[#allocation5 + $0x8] sm:$0xff]  ;;  %s15579_s6 = smov [#allocation14]  }
  0x7e   :  { %v134_v1 = vld [vmem:[#allocation5 + $0x20] sm:$0xff]  ;;  %v135_v4 = vld [vmem:[#allocation5 + $0x28] sm:$0xff]  ;;  %s13282_s27 = sshll.u32 %s15579_s6, 4  ;;  %s13283_s27 = int_to_ptr.vmem [resolvable:$true] %s13282_s27 }
  0x7f   :  { %v13314_v3 = vcombine.high %v130_v0, %v134_v1  ;;  %v13313_v5 = vcombine.low %v130_v0, %v134_v1  ;;  %v138_v6 = vld [vmem:[#allocation5 + $0x40] sm:$0xff]  ;;  %v13316_v8 = vcombine.high %v131_v2, %v135_v4  ;;  %v13315_v9 = vcombine.low %v131_v2, %v135_v4  ;;  %v139_v11 = vld [vmem:[#allocation5 + $0x48] sm:$0xff]  ;;  %s15536_s19 = scalar_lea.vmem %s13283_s27, 4096  ;;  %p15541_p1 = scmp.lt.s32.totalorder %s13283_s27, %s13283_s27 }
  0x80   :  { %v142_v7 = vld [vmem:[#allocation5 + $0x60] sm:$0xff]  ;;  %v143_v12 = vld [vmem:[#allocation5 + $0x68] sm:$0xff]  ;;  %p15537_p0 = scmp.ne.s32.totalorder %s13283_s27, %s15536_s19  ;;  %p15542_p2 = scmp.lt.s32.totalorder %s15536_s19, %s15536_s19 }
  0x81   :  { %v13322_v10 = vcombine.high %v138_v6, %v142_v7  ;;  %v146_v13 = vld [vmem:[#allocation5 + $0x80] sm:$0xff]  ;;  %3324 = vmatprep.subr.bf16.mxu0 %v13314_v3  ;;  %v13324_v14 = vcombine.high %v139_v11, %v143_v12  ;;  %v147_v16 = vld [vmem:[#allocation5 + $0x88] sm:$0xff]  ;;  %3536 = vmatprep.subr.bf16.mxu1 %v13316_v8  ;;  %v13321_v18 = vcombine.low %v138_v6, %v142_v7 }
  0x82   :  { %v150_v15 = vld [vmem:[#allocation5 + $0xa0] sm:$0xff]  ;;  %v151_v17 = vld [vmem:[#allocation5 + $0xa8] sm:$0xff]  ;;  %3325 = vmatpush1.bf16.msra.mxu0 %v13313_v5  ;;  %3537 = vmatpush1.bf16.msra.mxu1 %v13315_v9  ;;  %v13323_v19 = vcombine.low %v139_v11, %v143_v12  ;;  %p15543_p3 = por %p15542_p2, %p15541_p1 }
  0x83   :  { %3326 = vmatprep.subr.bf16.mxu0 %v13322_v10  ;;  %v13330_v20 = vcombine.high %v146_v13, %v150_v15  ;;  %3538 = vmatprep.subr.bf16.mxu1 %v13324_v14  ;;  %v13332_v21 = vcombine.high %v147_v16, %v151_v17  ;;  %v154_v22 = vld [vmem:[#allocation5 + $0xc0] sm:$0xff]  ;;  %v155_v24 = vld [vmem:[#allocation5 + $0xc8] sm:$0xff]  ;;  %v13329_v26 = vcombine.low %v146_v13, %v150_v15 }
  0x84   :  { %v158_v23 = vld [vmem:[#allocation5 + $0xe0] sm:$0xff]  ;;  %v159_v25 = vld [vmem:[#allocation5 + $0xe8] sm:$0xff]  ;;  %v13331_v27 = vcombine.low %v147_v16, %v151_v17  ;;  %p15544_p4 = pnand %p15543_p3, %p15537_p0 }
  0x85   :  { %v13338_v28 = vcombine.high %v154_v22, %v158_v23  ;;  %v13340_v29 = vcombine.high %v155_v24, %v159_v25  ;;  %v162_v30 = vld [vmem:[#allocation5 + $0x100] sm:$0xff]  ;;  %v163_v32 = vld [vmem:[#allocation5 + $0x108] sm:$0xff]  ;;  %v13337_v34 = vcombine.low %v154_v22, %v158_v23  ;;  %v13339_v35 = vcombine.low %v155_v24, %v159_v25 }
  0x86   :  { %3327 = vmatpush1.bf16.msra.mxu0 %v13321_v18  ;;  %3539 = vmatpush1.bf16.msra.mxu1 %v13323_v19  ;;  %v166_v31 = vld [vmem:[#allocation5 + $0x120] sm:$0xff]  ;;  %v167_v33 = vld [vmem:[#allocation5 + $0x128] sm:$0xff] }
  0x87   :  { %3328 = vmatprep.subr.bf16.mxu0 %v13330_v20  ;;  %3540 = vmatprep.subr.bf16.mxu1 %v13332_v21  ;;  %v13346_v36 = vcombine.high %v162_v30, %v166_v31  ;;  %v13348_v37 = vcombine.high %v163_v32, %v167_v33  ;;  %v170_v38 = vld [vmem:[#allocation5 + $0x140] sm:$0xff]  ;;  %v171_v40 = vld [vmem:[#allocation5 + $0x148] sm:$0xff]  ;;  %v13345_v42 = vcombine.low %v162_v30, %v166_v31 }
  0x88   :  { %v174_v39 = vld [vmem:[#allocation5 + $0x160] sm:$0xff]  ;;  %v175_v41 = vld [vmem:[#allocation5 + $0x168] sm:$0xff]  ;;  %v13347_v43 = vcombine.low %v163_v32, %v167_v33 }
  0x89   :  { %v13354_v44 = vcombine.high %v170_v38, %v174_v39  ;;  %v13356_v45 = vcombine.high %v171_v40, %v175_v41  ;;  %v178_v46 = vld [vmem:[#allocation5 + $0x180] sm:$0xff]  ;;  %v179_v48 = vld [vmem:[#allocation5 + $0x188] sm:$0xff]  ;;  %v13353_v50 = vcombine.low %v170_v38, %v174_v39  ;;  %v13355_v51 = vcombine.low %v171_v40, %v175_v41 }
  0x8a   :  { %3329 = vmatpush1.bf16.msra.mxu0 %v13329_v26  ;;  %3541 = vmatpush1.bf16.msra.mxu1 %v13331_v27  ;;  %v182_v47 = vld [vmem:[#allocation5 + $0x1a0] sm:$0xff]  ;;  %v183_v49 = vld [vmem:[#allocation5 + $0x1a8] sm:$0xff] }
  0x8b   :  { %3330 = vmatprep.subr.bf16.mxu0 %v13338_v28  ;;  %3542 = vmatprep.subr.bf16.mxu1 %v13340_v29  ;;  %v13362_v52 = vcombine.high %v178_v46, %v182_v47  ;;  %v15727_v53 = vld [vmem:[#allocation2] sm:$0xff]  ;;  %v13364_v55 = vcombine.high %v179_v48, %v183_v49  ;;  %v187_v59 = vld [vmem:[#allocation5 + $0x1c8] sm:$0xff]  ;;  %v13361_v61 = vcombine.low %v178_v46, %v182_v47 }
  0x8c   :  { %v15729_v54 = vld [vmem:[#allocation2 + $0x20] sm:$0xff]  ;;  %v191_v60 = vld [vmem:[#allocation5 + $0x1e8] sm:$0xff]  ;;  %v13363_v62 = vcombine.low %v179_v48, %v183_v49 }
  0x8d   :  { %v186_v56 = vld [vmem:[#allocation5 + $0x1c0] sm:$0xff]  ;;  %v15733_v58 = vcombine.high %v15727_v53, %v15729_v54  ;;  %v13372_v0 = vcombine.high %v187_v59, %v191_v60  ;;  %v195_v3 = vld [vmem:[#allocation5 + $0x208] sm:$0xff]  ;;  %v13371_v6 = vcombine.low %v187_v59, %v191_v60 }
  0x8e   :  { %3331 = vmatpush1.bf16.msra.mxu0 %v13337_v34  ;;  %3543 = vmatpush1.bf16.msra.mxu1 %v13339_v35  ;;  %v190_v57 = vld [vmem:[#allocation5 + $0x1e0] sm:$0xff]  ;;  %v199_v4 = vld [vmem:[#allocation5 + $0x228] sm:$0xff] }
  0x8f   :  { %3332 = vmatprep.subr.bf16.mxu0 %v13346_v36  ;;  %3544 = vmatprep.subr.bf16.mxu1 %v13348_v37  ;;  %v13370_v63 = vcombine.high %v186_v56, %v190_v57  ;;  %v194_v1 = vld [vmem:[#allocation5 + $0x200] sm:$0xff]  ;;  %v13369_v5 = vcombine.low %v186_v56, %v190_v57  ;;  %v13380_v8 = vcombine.high %v195_v3, %v199_v4  ;;  %v203_v11 = vld [vmem:[#allocation5 + $0x248] sm:$0xff] }
  0x90   :  { %3356 = vmatprep.mubr.bf16.mxu0 %v15733_v58  ;;  %v198_v2 = vld [vmem:[#allocation5 + $0x220] sm:$0xff]  ;;  %3568 = vmatprep.mubr.bf16.mxu1 %v15733_v58  ;;  %v207_v12 = vld [vmem:[#allocation5 + $0x268] sm:$0xff]  ;;  %v13379_v14 = vcombine.low %v195_v3, %v199_v4 }
  0x91   :  { %v13378_v7 = vcombine.high %v194_v1, %v198_v2  ;;  %v202_v9 = vld [vmem:[#allocation5 + $0x240] sm:$0xff]  ;;  %v13377_v13 = vcombine.low %v194_v1, %v198_v2  ;;  %v13388_v16 = vcombine.high %v203_v11, %v207_v12  ;;  %v211_v19 = vld [vmem:[#allocation5 + $0x288] sm:$0xff]  ;;  %v13387_v22 = vcombine.low %v203_v11, %v207_v12 }
  0x92   :  { %3333 = vmatpush1.bf16.msra.mxu0 %v13345_v42  ;;  %3545 = vmatpush1.bf16.msra.mxu1 %v13347_v43  ;;  %v206_v10 = vld [vmem:[#allocation5 + $0x260] sm:$0xff]  ;;  %v215_v20 = vld [vmem:[#allocation5 + $0x2a8] sm:$0xff] }
  0x93   :  { %3334 = vmatprep.subr.bf16.mxu0 %v13354_v44  ;;  %3546 = vmatprep.subr.bf16.mxu1 %v13356_v45  ;;  %v13386_v15 = vcombine.high %v202_v9, %v206_v10  ;;  %v210_v17 = vld [vmem:[#allocation5 + $0x280] sm:$0xff]  ;;  %v13385_v21 = vcombine.low %v202_v9, %v206_v10  ;;  %v13396_v24 = vcombine.high %v211_v19, %v215_v20  ;;  %v219_v27 = vld [vmem:[#allocation5 + $0x2c8] sm:$0xff] }
  0x94   :  { %v214_v18 = vld [vmem:[#allocation5 + $0x2a0] sm:$0xff]  ;;  %v223_v28 = vld [vmem:[#allocation5 + $0x2e8] sm:$0xff]  ;;  %v13395_v30 = vcombine.low %v211_v19, %v215_v20 }
  0x95   :  { %v13394_v23 = vcombine.high %v210_v17, %v214_v18  ;;  %v218_v25 = vld [vmem:[#allocation5 + $0x2c0] sm:$0xff]  ;;  %v13393_v29 = vcombine.low %v210_v17, %v214_v18  ;;  %v13404_v32 = vcombine.high %v219_v27, %v223_v28  ;;  %v227_v35 = vld [vmem:[#allocation5 + $0x308] sm:$0xff]  ;;  %v13403_v38 = vcombine.low %v219_v27, %v223_v28 }
  0x96   :  { %3335 = vmatpush1.bf16.msra.mxu0 %v13353_v50  ;;  %3547 = vmatpush1.bf16.msra.mxu1 %v13355_v51  ;;  %v222_v26 = vld [vmem:[#allocation5 + $0x2e0] sm:$0xff]  ;;  %v231_v36 = vld [vmem:[#allocation5 + $0x328] sm:$0xff] }
  0x97   :  { %3336 = vmatprep.subr.bf16.mxu0 %v13362_v52  ;;  %3548 = vmatprep.subr.bf16.mxu1 %v13364_v55  ;;  %v13402_v31 = vcombine.high %v218_v25, %v222_v26  ;;  %v226_v33 = vld [vmem:[#allocation5 + $0x300] sm:$0xff]  ;;  %v13401_v37 = vcombine.low %v218_v25, %v222_v26  ;;  %v13412_v40 = vcombine.high %v227_v35, %v231_v36  ;;  %v235_v43 = vld [vmem:[#allocation5 + $0x348] sm:$0xff] }
  0x98   :  { %v230_v34 = vld [vmem:[#allocation5 + $0x320] sm:$0xff]  ;;  %v239_v44 = vld [vmem:[#allocation5 + $0x368] sm:$0xff]  ;;  %v13411_v46 = vcombine.low %v227_v35, %v231_v36 }
  0x99   :  { %v13410_v39 = vcombine.high %v226_v33, %v230_v34  ;;  %v234_v41 = vld [vmem:[#allocation5 + $0x340] sm:$0xff]  ;;  %v13409_v45 = vcombine.low %v226_v33, %v230_v34  ;;  %v13420_v48 = vcombine.high %v235_v43, %v239_v44  ;;  %v243_v51 = vld [vmem:[#allocation5 + $0x388] sm:$0xff]  ;;  %v13419_v56 = vcombine.low %v235_v43, %v239_v44 }
  0x9a   :  { %3337 = vmatpush1.bf16.msra.mxu0 %v13361_v61  ;;  %3549 = vmatpush1.bf16.msra.mxu1 %v13363_v62  ;;  %v238_v42 = vld [vmem:[#allocation5 + $0x360] sm:$0xff]  ;;  %v247_v52 = vld [vmem:[#allocation5 + $0x3a8] sm:$0xff] }
  0x9b   :  { %3338 = vmatprep.subr.bf16.mxu0 %v13370_v63  ;;  %3550 = vmatprep.subr.bf16.mxu1 %v13372_v0  ;;  %v13418_v47 = vcombine.high %v234_v41, %v238_v42  ;;  %v242_v49 = vld [vmem:[#allocation5 + $0x380] sm:$0xff]  ;;  %v13417_v55 = vcombine.low %v234_v41, %v238_v42  ;;  %v13428_v59 = vcombine.high %v243_v51, %v247_v52  ;;  %v251_v62 = vld [vmem:[#allocation5 + $0x3c8] sm:$0xff] }
  0x9c   :  { %v246_v50 = vld [vmem:[#allocation5 + $0x3a0] sm:$0xff]  ;;  %v255_v63 = vld [vmem:[#allocation5 + $0x3e8] sm:$0xff]  ;;  %v13427_v1 = vcombine.low %v243_v51, %v247_v52 }
  0x9d   :  { %v13426_v57 = vcombine.high %v242_v49, %v246_v50  ;;  %v250_v60 = vld [vmem:[#allocation5 + $0x3c0] sm:$0xff]  ;;  %v13425_v0 = vcombine.low %v242_v49, %v246_v50  ;;  %v13436_v3 = vcombine.high %v251_v62, %v255_v63  ;;  %v13435_v9 = vcombine.low %v251_v62, %v255_v63  ;;  %v275_v26 = vld [vmem:[#allocation5 + $0x488] sm:$0xff] }
  0x9e   :  { %3339 = vmatpush1.bf16.msra.mxu0 %v13369_v5  ;;  %3551 = vmatpush1.bf16.msra.mxu1 %v13371_v6  ;;  %v254_v61 = vld [vmem:[#allocation5 + $0x3e0] sm:$0xff]  ;;  %v259_v6 = vld [vmem:[#allocation5 + $0x408] sm:$0xff] }
  0x9f   :  { %3340 = vmatprep.subr.bf16.mxu0 %v13378_v7  ;;  %3552 = vmatprep.subr.bf16.mxu1 %v13380_v8  ;;  %v13434_v2 = vcombine.high %v250_v60, %v254_v61  ;;  %v258_v4 = vld [vmem:[#allocation5 + $0x400] sm:$0xff]  ;;  %v263_v7 = vld [vmem:[#allocation5 + $0x428] sm:$0xff]  ;;  %v13433_v8 = vcombine.low %v250_v60, %v254_v61 }
  0xa0   :  { %v262_v5 = vld [vmem:[#allocation5 + $0x420] sm:$0xff]  ;;  %v13444_v11 = vcombine.high %v259_v6, %v263_v7  ;;  %v13443_v20 = vcombine.low %v259_v6, %v263_v7  ;;  %v287_v33 = vld [vmem:[#allocation5 + $0x4e8] sm:$0xff] }
  0xa1   :  { %v13442_v10 = vcombine.high %v258_v4, %v262_v5  ;;  %v266_v12 = vld [vmem:[#allocation5 + $0x440] sm:$0xff]  ;;  %v13441_v19 = vcombine.low %v258_v4, %v262_v5  ;;  %v15749_v35 = vld [vmem:[#allocation2 + $0x8] sm:$0xff] }
  0xa2   :  { %3341 = vmatpush1.bf16.msra.mxu0 %v13377_v13  ;;  %3553 = vmatpush1.bf16.msra.mxu1 %v13379_v14  ;;  %v270_v13 = vld [vmem:[#allocation5 + $0x460] sm:$0xff]  ;;  %v267_v14 = vld [vmem:[#allocation5 + $0x448] sm:$0xff] }
  0xa3   :  { %3342 = vmatprep.subr.bf16.mxu0 %v13386_v15  ;;  %3554 = vmatprep.subr.bf16.mxu1 %v13388_v16  ;;  %v15739_v15 = vcombine.low %v15727_v53, %v15729_v54  ;;  %v271_v16 = vld [vmem:[#allocation5 + $0x468] sm:$0xff]  ;;  %v122_v17 = vld [vmem:[#allocation2 + $0x40] sm:$0xff]  ;;  %v13449_v54 = vcombine.low %v266_v12, %v270_v13 }
  0xa4   :  { %v126_v18 = vld [vmem:[#allocation2 + $0x60] sm:$0xff]  ;;  %v279_v53 = vld [vmem:[#allocation5 + $0x4a8] sm:$0xff]  ;;  %v13451_v27 = vcombine.low %v267_v14, %v271_v16 }
  0xa5   :  { %v15741_v25 = vcombine.high %v122_v17, %v126_v18  ;;  %v15747_v34 = vcombine.low %v122_v17, %v126_v18  ;;  %v15751_v36 = vld [vmem:[#allocation2 + $0x28] sm:$0xff]  ;;  %v290_v41 = vld [vmem:[#allocation5 + $0x500] sm:$0xff] }
  0xa6   :  { %3343 = vmatpush1.bf16.msra.mxu0 %v13385_v21  ;;  %3555 = vmatpush1.bf16.msra.mxu1 %v13387_v22  ;;  %v13450_v21 = vcombine.high %v266_v12, %v270_v13  ;;  %v13452_v22 = vcombine.high %v267_v14, %v271_v16  ;;  %v294_v42 = vld [vmem:[#allocation5 + $0x520] sm:$0xff]  ;;  %v15755_v43 = vcombine.high %v15749_v35, %v15751_v36  ;;  %v291_v44 = vld [vmem:[#allocation5 + $0x508] sm:$0xff] }
  0xa7   :  { %3344 = vmatprep.subr.bf16.mxu0 %v13394_v23  ;;  %3556 = vmatprep.subr.bf16.mxu1 %v13396_v24  ;;  %v274_v23 = vld [vmem:[#allocation5 + $0x480] sm:$0xff]  ;;  %v299_v52 = vld [vmem:[#allocation5 + $0x548] sm:$0xff] }
  0xa8   :  { %v278_v24 = vld [vmem:[#allocation5 + $0x4a0] sm:$0xff]  ;;  %v307_v63 = vld [vmem:[#allocation5 + $0x588] sm:$0xff] }
  0xa9   :  { %v13458_v28 = vcombine.high %v274_v23, %v278_v24  ;;  %v298_v50 = vld [vmem:[#allocation5 + $0x540] sm:$0xff]  ;;  %v315_v7 = vld [vmem:[#allocation5 + $0x5c8] sm:$0xff] }
  0xaa   :  { %3345 = vmatpush1.bf16.msra.mxu0 %v13393_v29  ;;  %3557 = vmatpush1.bf16.msra.mxu1 %v13395_v30  ;;  %v13460_v29 = vcombine.high %v275_v26, %v279_v53  ;;  %v282_v30 = vld [vmem:[#allocation5 + $0x4c0] sm:$0xff]  ;;  %v323_v16 = vld [vmem:[#allocation5 + $0x608] sm:$0xff] }
  0xab   :  { %3346 = vmatprep.subr.bf16.mxu0 %v13402_v31  ;;  %3558 = vmatprep.subr.bf16.mxu1 %v13404_v32  ;;  %v286_v31 = vld [vmem:[#allocation5 + $0x4e0] sm:$0xff]  ;;  %v283_v32 = vld [vmem:[#allocation5 + $0x4c8] sm:$0xff] }
  0xac   :  { %v302_v51 = vld [vmem:[#allocation5 + $0x560] sm:$0xff]  ;;  %v327_v17 = vld [vmem:[#allocation5 + $0x628] sm:$0xff] }
  0xad   :  { %v306_v61 = vld [vmem:[#allocation5 + $0x580] sm:$0xff] }
  0xae   :  { %3347 = vmatpush1.bf16.msra.mxu0 %v13401_v37  ;;  %3559 = vmatpush1.bf16.msra.mxu1 %v13403_v38  ;;  %v13457_v37 = vcombine.low %v274_v23, %v278_v24  ;;  %v13459_v38 = vcombine.low %v275_v26, %v279_v53  ;;  %v310_v62 = vld [vmem:[#allocation5 + $0x5a0] sm:$0xff]  ;;  %v331_v24 = vld [vmem:[#allocation5 + $0x648] sm:$0xff] }
  0xaf   :  { %3348 = vmatprep.subr.bf16.mxu0 %v13410_v39  ;;  %3560 = vmatprep.subr.bf16.mxu1 %v13412_v40  ;;  %v13466_v39 = vcombine.high %v282_v30, %v286_v31  ;;  %v13468_v40 = vcombine.high %v283_v32, %v287_v33  ;;  %v314_v5 = vld [vmem:[#allocation5 + $0x5c0] sm:$0xff]  ;;  %v335_v26 = vld [vmem:[#allocation5 + $0x668] sm:$0xff] }
  0xb0   :  { %v318_v6 = vld [vmem:[#allocation5 + $0x5e0] sm:$0xff] }
  0xb1   :  { %v322_v13 = vld [vmem:[#allocation5 + $0x600] sm:$0xff]  ;;  %v13497_v18 = vcombine.low %v314_v5, %v318_v6 }
  0xb2   :  { %3349 = vmatpush1.bf16.msra.mxu0 %v13409_v45  ;;  %3561 = vmatpush1.bf16.msra.mxu1 %v13411_v46  ;;  %v295_v45 = vld [vmem:[#allocation5 + $0x528] sm:$0xff]  ;;  %v13465_v46 = vcombine.low %v282_v30, %v286_v31  ;;  %v326_v14 = vld [vmem:[#allocation5 + $0x620] sm:$0xff] }
  0xb3   :  { %3350 = vmatprep.subr.bf16.mxu0 %v13418_v47  ;;  %3562 = vmatprep.subr.bf16.mxu1 %v13420_v48  ;;  %v13467_v47 = vcombine.low %v283_v32, %v287_v33  ;;  %v13474_v48 = vcombine.high %v290_v41, %v294_v42  ;;  %v13476_v49 = vcombine.high %v291_v44, %v295_v45  ;;  %v334_v23 = vld [vmem:[#allocation5 + $0x660] sm:$0xff]  ;;  %v339_v31 = vld [vmem:[#allocation5 + $0x688] sm:$0xff] }
  0xb4   :  { %v13505_v53 = vcombine.low %v322_v13, %v326_v14  ;;  %v342_v30 = vld [vmem:[#allocation5 + $0x6a0] sm:$0xff]  ;;  %v343_v32 = vld [vmem:[#allocation5 + $0x6a8] sm:$0xff] }
  0xb6   :  { %3351 = vmatpush1.bf16.msra.mxu0 %v13417_v55  ;;  %3563 = vmatpush1.bf16.msra.mxu1 %v13419_v56  ;;  %v303_v55 = vld [vmem:[#allocation5 + $0x568] sm:$0xff]  ;;  %v13473_v56 = vcombine.low %v290_v41, %v294_v42  ;;  %v350_v41 = vld [vmem:[#allocation5 + $0x6e0] sm:$0xff] }
  0xb7   :  { %3352 = vmatprep.subr.bf16.mxu0 %v13426_v57  ;;  %3564 = vmatprep.subr.bf16.mxu1 %v13428_v59  ;;  %v13475_v57 = vcombine.low %v291_v44, %v295_v45  ;;  %v13482_v59 = vcombine.high %v298_v50, %v302_v51  ;;  %v13484_v60 = vcombine.high %v299_v52, %v303_v55  ;;  %v347_v42 = vld [vmem:[#allocation5 + $0x6c8] sm:$0xff] }
  0xb8   :  { %v351_v44 = vld [vmem:[#allocation5 + $0x6e8] sm:$0xff] }
  0xba   :  { %3353 = vmatpush1.bf16.msra.mxu0 %v13425_v0  ;;  %3565 = vmatpush1.bf16.msra.mxu1 %v13427_v1  ;;  %v311_v0 = vld [vmem:[#allocation5 + $0x5a8] sm:$0xff]  ;;  %v13481_v1 = vcombine.low %v298_v50, %v302_v51  ;;  %v358_v50 = vld [vmem:[#allocation5 + $0x720] sm:$0xff] }
  0xbb   :  { %3354 = vmatprep.subr.bf16.mxu0 %v13434_v2  ;;  %3566 = vmatprep.subr.bf16.mxu1 %v13436_v3  ;;  %v13483_v2 = vcombine.low %v299_v52, %v303_v55  ;;  %v13490_v3 = vcombine.high %v306_v61, %v310_v62  ;;  %v13492_v4 = vcombine.high %v307_v63, %v311_v0  ;;  %v355_v51 = vld [vmem:[#allocation5 + $0x708] sm:$0xff] }
  0xbc   :  { %v359_v52 = vld [vmem:[#allocation5 + $0x728] sm:$0xff] }
  0xbe   :  { %3355 = vmatpush1.bf16.msra.mxu0 %v13433_v8  ;;  %3567 = vmatpush1.bf16.msra.mxu1 %v13435_v9  ;;  %v319_v8 = vld [vmem:[#allocation5 + $0x5e8] sm:$0xff]  ;;  %v13489_v9 = vcombine.low %v306_v61, %v310_v62  ;;  %v366_v61 = vld [vmem:[#allocation5 + $0x760] sm:$0xff] }
  0xbf   :  { %3377 = vmatprep.subr.bf16.mxu0 %v13442_v10  ;;  %3589 = vmatprep.subr.bf16.mxu1 %v13444_v11  ;;  %v13491_v10 = vcombine.low %v307_v63, %v311_v0  ;;  %v13498_v11 = vcombine.high %v314_v5, %v318_v6  ;;  %v13500_v12 = vcombine.high %v315_v7, %v319_v8  ;;  %v363_v62 = vld [vmem:[#allocation5 + $0x748] sm:$0xff]  ;;  %v374_v5 = vld [vmem:[#allocation5 + $0x7a0] sm:$0xff] }
  0xc0   :  { %v367_v63 = vld [vmem:[#allocation5 + $0x768] sm:$0xff] }
  0xc1   :  { %3357 = vmatmul.mubr.bf16.vlgmr.msra.gmra.mrb[0].mxu0 %v15739_v15  ;;  %3569 = vmatmul.mubr.bf16.vlgmr.msra.gmra.mrb[0].mxu1 %v15739_v15  ;;  %v371_v6 = vld [vmem:[#allocation5 + $0x788] sm:$0xff] }
  0xc2   :  { %3378 = vmatpush1.bf16.msra.mxu0 %v13441_v19  ;;  %3590 = vmatpush1.bf16.msra.mxu1 %v13443_v20  ;;  %v13499_v19 = vcombine.low %v315_v7, %v319_v8  ;;  %v13506_v20 = vcombine.high %v322_v13, %v326_v14  ;;  %v375_v7 = vld [vmem:[#allocation5 + $0x7a8] sm:$0xff]  ;;  %v382_v13 = vld [vmem:[#allocation5 + $0x7e0] sm:$0xff] }
  0xc3   :  { %3379 = vmatprep.subr.bf16.mxu0 %v13450_v21  ;;  %3591 = vmatprep.subr.bf16.mxu1 %v13452_v22  ;;  %v13508_v21 = vcombine.high %v323_v16, %v327_v17  ;;  %v330_v22 = vld [vmem:[#allocation5 + $0x640] sm:$0xff]  ;;  %v379_v14 = vld [vmem:[#allocation5 + $0x7c8] sm:$0xff] }
  0xc4   :  { %3366 = vmatprep.mubr.bf16.mxu0 %v15741_v25  ;;  %3578 = vmatprep.mubr.bf16.mxu1 %v15741_v25  ;;  %v13513_v33 = vcombine.low %v330_v22, %v334_v23 }
  0xc6   :  { %3380 = vmatpush1.bf16.msra.mxu0 %v13449_v54  ;;  %3592 = vmatpush1.bf16.msra.mxu1 %v13451_v27  ;;  %v13507_v54 = vcombine.low %v323_v16, %v327_v17  ;;  %v13514_v27 = vcombine.high %v330_v22, %v334_v23  ;;  %v383_v16 = vld [vmem:[#allocation5 + $0x7e8] sm:$0xff]  ;;  %v390_v22 = vld [vmem:[#allocation5 + $0x820] sm:$0xff] }
  0xc7   :  { %3381 = vmatprep.subr.bf16.mxu0 %v13458_v28  ;;  %3593 = vmatprep.subr.bf16.mxu1 %v13460_v29  ;;  %v13516_v28 = vcombine.high %v331_v24, %v335_v26  ;;  %v338_v29 = vld [vmem:[#allocation5 + $0x680] sm:$0xff]  ;;  %v387_v23 = vld [vmem:[#allocation5 + $0x808] sm:$0xff] }
  0xc8   :  { %v13521_v45 = vcombine.low %v338_v29, %v342_v30 }
  0xc9   :  { %3367 = vmatmul.mubr.bf16.gmra.mrb[4].mxu0 %v15747_v34  ;;  %3579 = vmatmul.mubr.bf16.gmra.mrb[4].mxu1 %v15747_v34 }
  0xca   :  { %3382 = vmatpush1.bf16.msra.mxu0 %v13457_v37  ;;  %3594 = vmatpush1.bf16.msra.mxu1 %v13459_v38  ;;  %v13515_v37 = vcombine.low %v331_v24, %v335_v26  ;;  %v13522_v38 = vcombine.high %v338_v29, %v342_v30  ;;  %v391_v24 = vld [vmem:[#allocation5 + $0x828] sm:$0xff]  ;;  %v398_v29 = vld [vmem:[#allocation5 + $0x860] sm:$0xff] }
  0xcb   :  { %3383 = vmatprep.subr.bf16.mxu0 %v13466_v39  ;;  %3595 = vmatprep.subr.bf16.mxu1 %v13468_v40  ;;  %v13524_v39 = vcombine.high %v339_v31, %v343_v32  ;;  %v346_v40 = vld [vmem:[#allocation5 + $0x6c0] sm:$0xff]  ;;  %v395_v30 = vld [vmem:[#allocation5 + $0x848] sm:$0xff] }
  0xcc   :  { %3409 = vmatprep.mubr.bf16.mxu0 %v15755_v43  ;;  %3621 = vmatprep.mubr.bf16.mxu1 %v15755_v43  ;;  %v13529_v55 = vcombine.low %v346_v40, %v350_v41 }
  0xce   :  { %3384 = vmatpush1.bf16.msra.mxu0 %v13465_v46  ;;  %3596 = vmatpush1.bf16.msra.mxu1 %v13467_v47  ;;  %v13523_v46 = vcombine.low %v339_v31, %v343_v32  ;;  %v13530_v47 = vcombine.high %v346_v40, %v350_v41  ;;  %v15763_v31 = vcombine.low %v15749_v35, %v15751_v36  ;;  %v399_v32 = vld [vmem:[#allocation5 + $0x868] sm:$0xff] }
  0xcf   :  { %3385 = vmatprep.subr.bf16.mxu0 %v13474_v48  ;;  %3597 = vmatprep.subr.bf16.mxu1 %v13476_v49  ;;  %v13532_v48 = vcombine.high %v347_v42, %v351_v44  ;;  %v354_v49 = vld [vmem:[#allocation5 + $0x700] sm:$0xff]  ;;  %v13580_v41 = vcombine.high %v395_v30, %v399_v32  ;;  %v407_v35 = vld [vmem:[#allocation5 + $0x8a8] sm:$0xff] }
  0xd0   :  { %v13537_v0 = vcombine.low %v354_v49, %v358_v50 }
  0xd2   :  { %3386 = vmatpush1.bf16.msra.mxu0 %v13473_v56  ;;  %3598 = vmatpush1.bf16.msra.mxu1 %v13475_v57  ;;  %v13531_v56 = vcombine.low %v347_v42, %v351_v44  ;;  %v13538_v57 = vcombine.high %v354_v49, %v358_v50  ;;  %v402_v42 = vld [vmem:[#allocation5 + $0x880] sm:$0xff] }
  0xd3   :  { %3387 = vmatprep.subr.bf16.mxu0 %v13482_v59  ;;  %3599 = vmatprep.subr.bf16.mxu1 %v13484_v60  ;;  %v13540_v59 = vcombine.high %v355_v51, %v359_v52  ;;  %v362_v60 = vld [vmem:[#allocation5 + $0x740] sm:$0xff] }
  0xd4   :  { %v13545_v8 = vcombine.low %v362_v60, %v366_v61  ;;  %v406_v44 = vld [vmem:[#allocation5 + $0x8a0] sm:$0xff] }
  0xd5   :  { %v410_v50 = vld [vmem:[#allocation5 + $0x8c0] sm:$0xff] }
  0xd6   :  { %3388 = vmatpush1.bf16.msra.mxu0 %v13481_v1  ;;  %3600 = vmatpush1.bf16.msra.mxu1 %v13483_v2  ;;  %v13539_v1 = vcombine.low %v355_v51, %v359_v52  ;;  %v13546_v2 = vcombine.high %v362_v60, %v366_v61  ;;  %v414_v51 = vld [vmem:[#allocation5 + $0x8e0] sm:$0xff]  ;;  %v411_v52 = vld [vmem:[#allocation5 + $0x8c8] sm:$0xff]  ;;  %v13585_v60 = vcombine.low %v402_v42, %v406_v44 }
  0xd7   :  { %3389 = vmatprep.subr.bf16.mxu0 %v13490_v3  ;;  %3601 = vmatprep.subr.bf16.mxu1 %v13492_v4  ;;  %v13548_v3 = vcombine.high %v363_v62, %v367_v63  ;;  %v370_v4 = vld [vmem:[#allocation5 + $0x780] sm:$0xff] }
  0xd8   :  { %v13553_v17 = vcombine.low %v370_v4, %v374_v5 }
  0xda   :  { %3390 = vmatpush1.bf16.msra.mxu0 %v13489_v9  ;;  %3602 = vmatpush1.bf16.msra.mxu1 %v13491_v10  ;;  %v13547_v9 = vcombine.low %v363_v62, %v367_v63  ;;  %v13554_v10 = vcombine.high %v370_v4, %v374_v5  ;;  %v13594_v62 = vcombine.high %v410_v50, %v414_v51  ;;  %v423_v4 = vld [vmem:[#allocation5 + $0x928] sm:$0xff] }
  0xdb   :  { %3391 = vmatprep.subr.bf16.mxu0 %v13498_v11  ;;  %3603 = vmatprep.subr.bf16.mxu1 %v13500_v12  ;;  %v13556_v11 = vcombine.high %v371_v6, %v375_v7  ;;  %v378_v12 = vld [vmem:[#allocation5 + $0x7c0] sm:$0xff]  ;;  %v13593_v5 = vcombine.low %v410_v50, %v414_v51 }
  0xdc   :  { %v13561_v26 = vcombine.low %v378_v12, %v382_v13 }
  0xde   :  { %3392 = vmatpush1.bf16.msra.mxu0 %v13497_v18  ;;  %3604 = vmatpush1.bf16.msra.mxu1 %v13499_v19  ;;  %v13555_v18 = vcombine.low %v371_v6, %v375_v7  ;;  %v13562_v19 = vcombine.high %v378_v12, %v382_v13  ;;  %v431_v12 = vld [vmem:[#allocation5 + $0x968] sm:$0xff] }
  0xdf   :  { %3393 = vmatprep.subr.bf16.mxu0 %v13506_v20  ;;  %3605 = vmatprep.subr.bf16.mxu1 %v13508_v21  ;;  %v13564_v20 = vcombine.high %v379_v14, %v383_v16  ;;  %v386_v21 = vld [vmem:[#allocation5 + $0x800] sm:$0xff] }
  0xe2   :  { %3394 = vmatpush1.bf16.msra.mxu0 %v13505_v53  ;;  %3606 = vmatpush1.bf16.msra.mxu1 %v13507_v54  ;;  %v13563_v53 = vcombine.low %v379_v14, %v383_v16  ;;  %v13570_v54 = vcombine.high %v386_v21, %v390_v22 }
  0xe3   :  { %3395 = vmatprep.subr.bf16.mxu0 %v13514_v27  ;;  %3607 = vmatprep.subr.bf16.mxu1 %v13516_v28  ;;  %v13572_v27 = vcombine.high %v387_v23, %v391_v24  ;;  %v394_v28 = vld [vmem:[#allocation5 + $0x840] sm:$0xff] }
  0xe4   :  { %v13578_v40 = vcombine.high %v394_v28, %v398_v29  ;;  %v13577_v36 = vcombine.low %v394_v28, %v398_v29  ;;  %v447_v28 = vld [vmem:[#allocation5 + $0x9e8] sm:$0xff] }
  0xe6   :  { %3396 = vmatpush1.bf16.msra.mxu0 %v13513_v33  ;;  %3608 = vmatpush1.bf16.msra.mxu1 %v13515_v37  ;;  %v123_v33 = vld [vmem:[#allocation2 + $0x48] sm:$0xff] }
  0xe7   :  { %3397 = vmatprep.subr.bf16.mxu0 %v13522_v38  ;;  %3609 = vmatprep.subr.bf16.mxu1 %v13524_v39  ;;  %v127_v37 = vld [vmem:[#allocation2 + $0x68] sm:$0xff]  ;;  %v13569_v38 = vcombine.low %v386_v21, %v390_v22  ;;  %v13571_v39 = vcombine.low %v387_v23, %v391_v24 }
  0xe8   :  { %v439_v21 = vld [vmem:[#allocation5 + $0x9a8] sm:$0xff] }
  0xea   :  { %3398 = vmatpush1.bf16.msra.mxu0 %v13521_v45  ;;  %3610 = vmatpush1.bf16.msra.mxu1 %v13523_v46  ;;  %v15765_v45 = vcombine.high %v123_v33, %v127_v37  ;;  %v403_v46 = vld [vmem:[#allocation5 + $0x888] sm:$0xff] }
  0xeb   :  { %3399 = vmatprep.subr.bf16.mxu0 %v13530_v47  ;;  %3611 = vmatprep.subr.bf16.mxu1 %v13532_v48  ;;  %v13579_v47 = vcombine.low %v395_v30, %v399_v32  ;;  %v13586_v48 = vcombine.high %v402_v42, %v406_v44  ;;  %v13588_v49 = vcombine.high %v403_v46, %v407_v35 }
  0xec   :  { %v13587_v61 = vcombine.low %v403_v46, %v407_v35  ;;  %v458_v35 = vld [vmem:[#allocation5 + $0xa40] sm:$0xff] }
  0xee   :  { %3400 = vmatpush1.bf16.msra.mxu0 %v13529_v55  ;;  %3612 = vmatpush1.bf16.msra.mxu1 %v13531_v56  ;;  %v415_v55 = vld [vmem:[#allocation5 + $0x8e8] sm:$0xff]  ;;  %v15771_v56 = vcombine.low %v123_v33, %v127_v37  ;;  %v450_v37 = vld [vmem:[#allocation5 + $0xa00] sm:$0xff] }
  0xef   :  { %3401 = vmatprep.subr.bf16.mxu0 %v13538_v57  ;;  %3613 = vmatprep.subr.bf16.mxu1 %v13540_v59  ;;  %v15773_v57 = vld [vmem:[#allocation2 + $0x10] sm:$0xff]  ;;  %v13596_v63 = vcombine.high %v411_v52, %v415_v55  ;;  %v13595_v6 = vcombine.low %v411_v52, %v415_v55  ;;  %v466_v55 = vld [vmem:[#allocation5 + $0xa80] sm:$0xff] }
  0xf0   :  { %v15775_v59 = vld [vmem:[#allocation2 + $0x30] sm:$0xff] }
  0xf2   :  { %3402 = vmatpush1.bf16.msra.mxu0 %v13537_v0  ;;  %3614 = vmatpush1.bf16.msra.mxu1 %v13539_v1  ;;  %v418_v0 = vld [vmem:[#allocation5 + $0x900] sm:$0xff] }
  0xf3   :  { %3403 = vmatprep.subr.bf16.mxu0 %v13546_v2  ;;  %3615 = vmatprep.subr.bf16.mxu1 %v13548_v3  ;;  %v422_v1 = vld [vmem:[#allocation5 + $0x920] sm:$0xff]  ;;  %v15779_v2 = vcombine.high %v15773_v57, %v15775_v59  ;;  %v419_v3 = vld [vmem:[#allocation5 + $0x908] sm:$0xff] }
  0xf4   :  { %v13602_v7 = vcombine.high %v418_v0, %v422_v1  ;;  %v13601_v13 = vcombine.low %v418_v0, %v422_v1  ;;  %v13603_v14 = vcombine.low %v419_v3, %v423_v4 }
  0xf6   :  { %3404 = vmatpush1.bf16.msra.mxu0 %v13545_v8  ;;  %3616 = vmatpush1.bf16.msra.mxu1 %v13547_v9  ;;  %v13604_v8 = vcombine.high %v419_v3, %v423_v4  ;;  %v426_v9 = vld [vmem:[#allocation5 + $0x940] sm:$0xff] }
  0xf7   :  { %3405 = vmatprep.subr.bf16.mxu0 %v13554_v10  ;;  %3617 = vmatprep.subr.bf16.mxu1 %v13556_v11  ;;  %v430_v10 = vld [vmem:[#allocation5 + $0x960] sm:$0xff]  ;;  %v427_v11 = vld [vmem:[#allocation5 + $0x948] sm:$0xff] }
  0xf8   :  { %v13610_v16 = vcombine.high %v426_v9, %v430_v10  ;;  %v13609_v22 = vcombine.low %v426_v9, %v430_v10  ;;  %v13611_v23 = vcombine.low %v427_v11, %v431_v12  ;;  %v474_v4 = vld [vmem:[#allocation5 + $0xac0] sm:$0xff] }
  0xfa   :  { %3406 = vmatpush1.bf16.msra.mxu0 %v13553_v17  ;;  %3618 = vmatpush1.bf16.msra.mxu1 %v13555_v18  ;;  %v13612_v17 = vcombine.high %v427_v11, %v431_v12  ;;  %v434_v18 = vld [vmem:[#allocation5 + $0x980] sm:$0xff] }
  0xfb   :  { %3407 = vmatprep.subr.bf16.mxu0 %v13562_v19  ;;  %3619 = vmatprep.subr.bf16.mxu1 %v13564_v20  ;;  %v438_v19 = vld [vmem:[#allocation5 + $0x9a0] sm:$0xff]  ;;  %v435_v20 = vld [vmem:[#allocation5 + $0x988] sm:$0xff] }
  0xfc   :  { %v13618_v24 = vcombine.high %v434_v18, %v438_v19  ;;  %v13617_v29 = vcombine.low %v434_v18, %v438_v19  ;;  %v13619_v30 = vcombine.low %v435_v20, %v439_v21  ;;  %v482_v12 = vld [vmem:[#allocation5 + $0xb00] sm:$0xff] }
  0xfe   :  { %3408 = vmatpush1.bf16.msra.mxu0 %v13561_v26  ;;  %3620 = vmatpush1.bf16.msra.mxu1 %v13563_v53  ;;  %v13620_v26 = vcombine.high %v435_v20, %v439_v21  ;;  %v442_v53 = vld [vmem:[#allocation5 + $0x9c0] sm:$0xff] }
  0xff   :  { %3430 = vmatprep.subr.bf16.mxu0 %v13570_v54  ;;  %3642 = vmatprep.subr.bf16.mxu1 %v13572_v27  ;;  %v446_v54 = vld [vmem:[#allocation5 + $0x9e0] sm:$0xff]  ;;  %v443_v27 = vld [vmem:[#allocation5 + $0x9c8] sm:$0xff] }
 0x100   :  { %v13626_v32 = vcombine.high %v442_v53, %v446_v54  ;;  %v13628_v33 = vcombine.high %v443_v27, %v447_v28  ;;  %v13627_v42 = vcombine.low %v443_v27, %v447_v28  ;;  %v490_v21 = vld [vmem:[#allocation5 + $0xb40] sm:$0xff] }
 0x101   :  { %3410 = vmatmul.mubr.bf16.vlgmr.msra.gmra.mrb[0].mxu0 %v15763_v31  ;;  %3622 = vmatmul.mubr.bf16.vlgmr.msra.gmra.mrb[0].mxu1 %v15763_v31  ;;  %v498_v28 = vld [vmem:[#allocation5 + $0xb80] sm:$0xff] }
 0x102   :  { %3431 = vmatpush1.bf16.msra.mxu0 %v13569_v38  ;;  %3643 = vmatpush1.bf16.msra.mxu1 %v13571_v39  ;;  %v454_v38 = vld [vmem:[#allocation5 + $0xa20] sm:$0xff]  ;;  %v451_v39 = vld [vmem:[#allocation5 + $0xa08] sm:$0xff] }
 0x103   :  { %3432 = vmatprep.subr.bf16.mxu0 %v13578_v40  ;;  %3644 = vmatprep.subr.bf16.mxu1 %v13580_v41  ;;  %v455_v40 = vld [vmem:[#allocation5 + $0xa28] sm:$0xff]  ;;  %v13625_v41 = vcombine.low %v442_v53, %v446_v54  ;;  %v13634_v44 = vcombine.high %v450_v37, %v454_v38 }
 0x104   :  { %3419 = vmatprep.mubr.bf16.mxu0 %v15765_v45  ;;  %3631 = vmatprep.mubr.bf16.mxu1 %v15765_v45  ;;  %v13636_v46 = vcombine.high %v451_v39, %v455_v40  ;;  %v13635_v50 = vcombine.low %v451_v39, %v455_v40  ;;  %v506_v40 = vld [vmem:[#allocation5 + $0xbc0] sm:$0xff] }
 0x106   :  { %3433 = vmatpush1.bf16.msra.mxu0 %v13577_v36  ;;  %3645 = vmatpush1.bf16.msra.mxu1 %v13579_v47  ;;  %v462_v36 = vld [vmem:[#allocation5 + $0xa60] sm:$0xff]  ;;  %v459_v47 = vld [vmem:[#allocation5 + $0xa48] sm:$0xff] }
 0x107   :  { %3434 = vmatprep.subr.bf16.mxu0 %v13586_v48  ;;  %3646 = vmatprep.subr.bf16.mxu1 %v13588_v49  ;;  %v463_v48 = vld [vmem:[#allocation5 + $0xa68] sm:$0xff]  ;;  %v13633_v49 = vcombine.low %v450_v37, %v454_v38  ;;  %v13642_v51 = vcombine.high %v458_v35, %v462_v36 }
 0x108   :  { %v13644_v52 = vcombine.high %v459_v47, %v463_v48  ;;  %v13643_v0 = vcombine.low %v459_v47, %v463_v48  ;;  %v514_v48 = vld [vmem:[#allocation5 + $0xc00] sm:$0xff] }
 0x109   :  { %3420 = vmatmul.mubr.bf16.gmra.mrb[4].mxu0 %v15771_v56  ;;  %3632 = vmatmul.mubr.bf16.gmra.mrb[4].mxu1 %v15771_v56 }
 0x10a   :  { %3435 = vmatpush1.bf16.msra.mxu0 %v13585_v60  ;;  %3647 = vmatpush1.bf16.msra.mxu1 %v13587_v61  ;;  %v470_v60 = vld [vmem:[#allocation5 + $0xaa0] sm:$0xff]  ;;  %v467_v61 = vld [vmem:[#allocation5 + $0xa88] sm:$0xff] }
 0x10b   :  { %3436 = vmatprep.subr.bf16.mxu0 %v13594_v62  ;;  %3648 = vmatprep.subr.bf16.mxu1 %v13596_v63  ;;  %v471_v62 = vld [vmem:[#allocation5 + $0xaa8] sm:$0xff]  ;;  %v13641_v63 = vcombine.low %v458_v35, %v462_v36  ;;  %v13650_v1 = vcombine.high %v466_v55, %v470_v60 }
 0x10c   :  { %3462 = vmatprep.mubr.bf16.mxu0 %v15779_v2  ;;  %3674 = vmatprep.mubr.bf16.mxu1 %v15779_v2  ;;  %v13652_v3 = vcombine.high %v467_v61, %v471_v62  ;;  %v13651_v9 = vcombine.low %v467_v61, %v471_v62  ;;  %v522_v62 = vld [vmem:[#allocation5 + $0xc40] sm:$0xff] }
 0x10e   :  { %3437 = vmatpush1.bf16.msra.mxu0 %v13593_v5  ;;  %3649 = vmatpush1.bf16.msra.mxu1 %v13595_v6  ;;  %v478_v5 = vld [vmem:[#allocation5 + $0xae0] sm:$0xff]  ;;  %v475_v6 = vld [vmem:[#allocation5 + $0xac8] sm:$0xff] }
 0x10f   :  { %3438 = vmatprep.subr.bf16.mxu0 %v13602_v7  ;;  %3650 = vmatprep.subr.bf16.mxu1 %v13604_v8  ;;  %v479_v7 = vld [vmem:[#allocation5 + $0xae8] sm:$0xff]  ;;  %v13649_v8 = vcombine.low %v466_v55, %v470_v60  ;;  %v13658_v10 = vcombine.high %v474_v4, %v478_v5 }
 0x110   :  { %v13660_v11 = vcombine.high %v475_v6, %v479_v7  ;;  %v13659_v18 = vcombine.low %v475_v6, %v479_v7 }
 0x112   :  { %3439 = vmatpush1.bf16.msra.mxu0 %v13601_v13  ;;  %3651 = vmatpush1.bf16.msra.mxu1 %v13603_v14  ;;  %v486_v13 = vld [vmem:[#allocation5 + $0xb20] sm:$0xff]  ;;  %v483_v14 = vld [vmem:[#allocation5 + $0xb08] sm:$0xff] }
 0x113   :  { %3440 = vmatprep.subr.bf16.mxu0 %v13610_v16  ;;  %3652 = vmatprep.subr.bf16.mxu1 %v13612_v17  ;;  %v487_v16 = vld [vmem:[#allocation5 + $0xb28] sm:$0xff]  ;;  %v13657_v17 = vcombine.low %v474_v4, %v478_v5  ;;  %v13666_v19 = vcombine.high %v482_v12, %v486_v13  ;;  %v124_v4 = vld [vmem:[#allocation2 + $0x50] sm:$0xff] }
 0x114   :  { %v13668_v20 = vcombine.high %v483_v14, %v487_v16  ;;  %v13667_v53 = vcombine.low %v483_v14, %v487_v16  ;;  %v128_v5 = vld [vmem:[#allocation2 + $0x70] sm:$0xff] }
 0x116   :  { %3441 = vmatpush1.bf16.msra.mxu0 %v13609_v22  ;;  %3653 = vmatpush1.bf16.msra.mxu1 %v13611_v23  ;;  %v494_v22 = vld [vmem:[#allocation5 + $0xb60] sm:$0xff]  ;;  %v491_v23 = vld [vmem:[#allocation5 + $0xb48] sm:$0xff] }
 0x117   :  { %3442 = vmatprep.subr.bf16.mxu0 %v13618_v24  ;;  %3654 = vmatprep.subr.bf16.mxu1 %v13620_v26  ;;  %v495_v24 = vld [vmem:[#allocation5 + $0xb68] sm:$0xff]  ;;  %v13665_v26 = vcombine.low %v482_v12, %v486_v13  ;;  %v13674_v54 = vcombine.high %v490_v21, %v494_v22  ;;  %v15789_v12 = vcombine.high %v124_v4, %v128_v5 }
 0x118   :  { %v13676_v27 = vcombine.high %v491_v23, %v495_v24  ;;  %v13675_v37 = vcombine.low %v491_v23, %v495_v24  ;;  %v531_v13 = vld [vmem:[#allocation5 + $0xc88] sm:$0xff]  ;;  %v15797_v23 = vld [vmem:[#allocation2 + $0x18] sm:$0xff] }
 0x119   :  { %v15799_v24 = vld [vmem:[#allocation2 + $0x38] sm:$0xff] }
 0x11a   :  { %3443 = vmatpush1.bf16.msra.mxu0 %v13617_v29  ;;  %3655 = vmatpush1.bf16.msra.mxu1 %v13619_v30  ;;  %v502_v29 = vld [vmem:[#allocation5 + $0xba0] sm:$0xff]  ;;  %v499_v30 = vld [vmem:[#allocation5 + $0xb88] sm:$0xff] }
 0x11b   :  { %3444 = vmatprep.subr.bf16.mxu0 %v13626_v32  ;;  %3656 = vmatprep.subr.bf16.mxu1 %v13628_v33  ;;  %v503_v32 = vld [vmem:[#allocation5 + $0xba8] sm:$0xff]  ;;  %v13673_v33 = vcombine.low %v490_v21, %v494_v22  ;;  %v13682_v38 = vcombine.high %v498_v28, %v502_v29  ;;  %v15795_v22 = vcombine.low %v124_v4, %v128_v5 }
 0x11c   :  { %v13684_v39 = vcombine.high %v499_v30, %v503_v32  ;;  %v13683_v35 = vcombine.low %v499_v30, %v503_v32  ;;  %v543_v21 = vld [vmem:[#allocation5 + $0xce8] sm:$0xff]  ;;  %v15803_v30 = vcombine.high %v15797_v23, %v15799_v24 }
 0x11d   :  { %v547_v32 = vld [vmem:[#allocation5 + $0xd08] sm:$0xff] }
 0x11e   :  { %3445 = vmatpush1.bf16.msra.mxu0 %v13625_v41  ;;  %3657 = vmatpush1.bf16.msra.mxu1 %v13627_v42  ;;  %v510_v41 = vld [vmem:[#allocation5 + $0xbe0] sm:$0xff]  ;;  %v507_v42 = vld [vmem:[#allocation5 + $0xbc8] sm:$0xff] }
 0x11f   :  { %3446 = vmatprep.subr.bf16.mxu0 %v13634_v44  ;;  %3658 = vmatprep.subr.bf16.mxu1 %v13636_v46  ;;  %v511_v44 = vld [vmem:[#allocation5 + $0xbe8] sm:$0xff]  ;;  %v13681_v46 = vcombine.low %v498_v28, %v502_v29  ;;  %v13690_v36 = vcombine.high %v506_v40, %v510_v41  ;;  %v546_v28 = vld [vmem:[#allocation5 + $0xd00] sm:$0xff] }
 0x120   :  { %v13692_v47 = vcombine.high %v507_v42, %v511_v44  ;;  %v13691_v55 = vcombine.low %v507_v42, %v511_v44  ;;  %v550_v29 = vld [vmem:[#allocation5 + $0xd20] sm:$0xff]  ;;  %v555_v44 = vld [vmem:[#allocation5 + $0xd48] sm:$0xff] }
 0x121   :  { %v558_v42 = vld [vmem:[#allocation5 + $0xd60] sm:$0xff]  ;;  %v575_v4 = vld [vmem:[#allocation5 + $0xde8] sm:$0xff] }
 0x122   :  { %3447 = vmatpush1.bf16.msra.mxu0 %v13633_v49  ;;  %3659 = vmatpush1.bf16.msra.mxu1 %v13635_v50  ;;  %v518_v49 = vld [vmem:[#allocation5 + $0xc20] sm:$0xff]  ;;  %v515_v50 = vld [vmem:[#allocation5 + $0xc08] sm:$0xff] }
 0x123   :  { %3448 = vmatprep.subr.bf16.mxu0 %v13642_v51  ;;  %3660 = vmatprep.subr.bf16.mxu1 %v13644_v52  ;;  %v519_v51 = vld [vmem:[#allocation5 + $0xc28] sm:$0xff]  ;;  %v13689_v52 = vcombine.low %v506_v40, %v510_v41  ;;  %v13698_v60 = vcombine.high %v514_v48, %v518_v49  ;;  %v13697_v6 = vcombine.low %v514_v48, %v518_v49  ;;  %v554_v41 = vld [vmem:[#allocation5 + $0xd40] sm:$0xff] }
 0x124   :  { %v13700_v61 = vcombine.high %v515_v50, %v519_v51  ;;  %v13699_v7 = vcombine.low %v515_v50, %v519_v51  ;;  %v562_v49 = vld [vmem:[#allocation5 + $0xd80] sm:$0xff]  ;;  %v563_v51 = vld [vmem:[#allocation5 + $0xd88] sm:$0xff] }
 0x125   :  { %v566_v50 = vld [vmem:[#allocation5 + $0xda0] sm:$0xff] }
 0x126   :  { %3449 = vmatpush1.bf16.msra.mxu0 %v13641_v63  ;;  %3661 = vmatpush1.bf16.msra.mxu1 %v13643_v0  ;;  %v526_v63 = vld [vmem:[#allocation5 + $0xc60] sm:$0xff]  ;;  %v523_v0 = vld [vmem:[#allocation5 + $0xc48] sm:$0xff]  ;;  %v13745_v5 = vcombine.low %v562_v49, %v566_v50 }
 0x127   :  { %3450 = vmatprep.subr.bf16.mxu0 %v13650_v1  ;;  %3662 = vmatprep.subr.bf16.mxu1 %v13652_v3  ;;  %v15787_v1 = vcombine.low %v15773_v57, %v15775_v59  ;;  %v527_v3 = vld [vmem:[#allocation5 + $0xc68] sm:$0xff]  ;;  %v13705_v59 = vcombine.low %v522_v62, %v526_v63 }
 0x128   :  { %v535_v57 = vld [vmem:[#allocation5 + $0xca8] sm:$0xff]  ;;  %v13707_v14 = vcombine.low %v523_v0, %v527_v3 }
 0x12a   :  { %3451 = vmatpush1.bf16.msra.mxu0 %v13649_v8  ;;  %3663 = vmatpush1.bf16.msra.mxu1 %v13651_v9  ;;  %v13706_v8 = vcombine.high %v522_v62, %v526_v63  ;;  %v13708_v9 = vcombine.high %v523_v0, %v527_v3  ;;  %v570_v63 = vld [vmem:[#allocation5 + $0xdc0] sm:$0xff]  ;;  %v571_v3 = vld [vmem:[#allocation5 + $0xdc8] sm:$0xff] }
 0x12b   :  { %3452 = vmatprep.subr.bf16.mxu0 %v13658_v10  ;;  %3664 = vmatprep.subr.bf16.mxu1 %v13660_v11  ;;  %v530_v10 = vld [vmem:[#allocation5 + $0xc80] sm:$0xff] }
 0x12c   :  { %v534_v11 = vld [vmem:[#allocation5 + $0xca0] sm:$0xff] }
 0x12d   :  { %v13714_v16 = vcombine.high %v530_v10, %v534_v11  ;;  %v574_v0 = vld [vmem:[#allocation5 + $0xde0] sm:$0xff] }
 0x12e   :  { %3453 = vmatpush1.bf16.msra.mxu0 %v13657_v17  ;;  %3665 = vmatpush1.bf16.msra.mxu1 %v13659_v18  ;;  %v13716_v17 = vcombine.high %v531_v13, %v535_v57  ;;  %v538_v18 = vld [vmem:[#allocation5 + $0xcc0] sm:$0xff] }
 0x12f   :  { %3454 = vmatprep.subr.bf16.mxu0 %v13666_v19  ;;  %3666 = vmatprep.subr.bf16.mxu1 %v13668_v20  ;;  %v542_v19 = vld [vmem:[#allocation5 + $0xce0] sm:$0xff]  ;;  %v539_v20 = vld [vmem:[#allocation5 + $0xcc8] sm:$0xff] }
 0x132   :  { %3455 = vmatpush1.bf16.msra.mxu0 %v13665_v26  ;;  %3667 = vmatpush1.bf16.msra.mxu1 %v13667_v53  ;;  %v13713_v26 = vcombine.low %v530_v10, %v534_v11  ;;  %v13715_v53 = vcombine.low %v531_v13, %v535_v57  ;;  %v582_v10 = vld [vmem:[#allocation5 + $0xe20] sm:$0xff]  ;;  %v579_v11 = vld [vmem:[#allocation5 + $0xe08] sm:$0xff]  ;;  %v13753_v57 = vcombine.low %v570_v63, %v574_v0 }
 0x133   :  { %3456 = vmatprep.subr.bf16.mxu0 %v13674_v54  ;;  %3668 = vmatprep.subr.bf16.mxu1 %v13676_v27  ;;  %v13722_v54 = vcombine.high %v538_v18, %v542_v19  ;;  %v13724_v27 = vcombine.high %v539_v20, %v543_v21  ;;  %v583_v13 = vld [vmem:[#allocation5 + $0xe28] sm:$0xff] }
 0x136   :  { %3457 = vmatpush1.bf16.msra.mxu0 %v13673_v33  ;;  %3669 = vmatpush1.bf16.msra.mxu1 %v13675_v37  ;;  %v551_v33 = vld [vmem:[#allocation5 + $0xd28] sm:$0xff]  ;;  %v13721_v37 = vcombine.low %v538_v18, %v542_v19  ;;  %v590_v18 = vld [vmem:[#allocation5 + $0xe60] sm:$0xff] }
 0x137   :  { %3458 = vmatprep.subr.bf16.mxu0 %v13682_v38  ;;  %3670 = vmatprep.subr.bf16.mxu1 %v13684_v39  ;;  %v13723_v38 = vcombine.low %v539_v20, %v543_v21  ;;  %v13730_v39 = vcombine.high %v546_v28, %v550_v29  ;;  %v13732_v40 = vcombine.high %v547_v32, %v551_v33  ;;  %v587_v19 = vld [vmem:[#allocation5 + $0xe48] sm:$0xff] }
 0x138   :  { %v591_v20 = vld [vmem:[#allocation5 + $0xe68] sm:$0xff] }
 0x13a   :  { %3459 = vmatpush1.bf16.msra.mxu0 %v13681_v46  ;;  %3671 = vmatpush1.bf16.msra.mxu1 %v13683_v35  ;;  %v559_v46 = vld [vmem:[#allocation5 + $0xd68] sm:$0xff]  ;;  %v13729_v35 = vcombine.low %v546_v28, %v550_v29  ;;  %v598_v28 = vld [vmem:[#allocation5 + $0xea0] sm:$0xff] }
 0x13b   :  { %3460 = vmatprep.subr.bf16.mxu0 %v13690_v36  ;;  %3672 = vmatprep.subr.bf16.mxu1 %v13692_v47  ;;  %v13731_v36 = vcombine.low %v547_v32, %v551_v33  ;;  %v13738_v47 = vcombine.high %v554_v41, %v558_v42  ;;  %v13740_v48 = vcombine.high %v555_v44, %v559_v46  ;;  %v595_v29 = vld [vmem:[#allocation5 + $0xe88] sm:$0xff] }
 0x13c   :  { %v599_v32 = vld [vmem:[#allocation5 + $0xea8] sm:$0xff] }
 0x13e   :  { %3461 = vmatpush1.bf16.msra.mxu0 %v13689_v52  ;;  %3673 = vmatpush1.bf16.msra.mxu1 %v13691_v55  ;;  %v567_v52 = vld [vmem:[#allocation5 + $0xda8] sm:$0xff]  ;;  %v13737_v55 = vcombine.low %v554_v41, %v558_v42  ;;  %v606_v41 = vld [vmem:[#allocation5 + $0xee0] sm:$0xff] }
 0x13f   :  { %3483 = vmatprep.subr.bf16.mxu0 %v13698_v60  ;;  %3695 = vmatprep.subr.bf16.mxu1 %v13700_v61  ;;  %v13739_v60 = vcombine.low %v555_v44, %v559_v46  ;;  %v13746_v61 = vcombine.high %v562_v49, %v566_v50  ;;  %v13748_v62 = vcombine.high %v563_v51, %v567_v52  ;;  %v603_v42 = vld [vmem:[#allocation5 + $0xec8] sm:$0xff]  ;;  %v614_v49 = vld [vmem:[#allocation5 + $0xf20] sm:$0xff] }
 0x140   :  { %v607_v44 = vld [vmem:[#allocation5 + $0xee8] sm:$0xff] }
 0x141   :  { %3463 = vmatmul.mubr.bf16.vlgmr.msra.gmra.mrb[0].mxu0 %v15787_v1  ;;  %3675 = vmatmul.mubr.bf16.vlgmr.msra.gmra.mrb[0].mxu1 %v15787_v1  ;;  %v611_v50 = vld [vmem:[#allocation5 + $0xf08] sm:$0xff] }
 0x142   :  { %3484 = vmatpush1.bf16.msra.mxu0 %v13697_v6  ;;  %3696 = vmatpush1.bf16.msra.mxu1 %v13699_v7  ;;  %v13747_v6 = vcombine.low %v563_v51, %v567_v52  ;;  %v13754_v7 = vcombine.high %v570_v63, %v574_v0  ;;  %v615_v51 = vld [vmem:[#allocation5 + $0xf28] sm:$0xff]  ;;  %v622_v63 = vld [vmem:[#allocation5 + $0xf60] sm:$0xff] }
 0x143   :  { %3485 = vmatprep.subr.bf16.mxu0 %v13706_v8  ;;  %3697 = vmatprep.subr.bf16.mxu1 %v13708_v9  ;;  %v13756_v8 = vcombine.high %v571_v3, %v575_v4  ;;  %v578_v9 = vld [vmem:[#allocation5 + $0xe00] sm:$0xff]  ;;  %v619_v0 = vld [vmem:[#allocation5 + $0xf48] sm:$0xff] }
 0x144   :  { %3472 = vmatprep.mubr.bf16.mxu0 %v15789_v12  ;;  %3684 = vmatprep.mubr.bf16.mxu1 %v15789_v12  ;;  %v13761_v21 = vcombine.low %v578_v9, %v582_v10 }
 0x146   :  { %3486 = vmatpush1.bf16.msra.mxu0 %v13705_v59  ;;  %3698 = vmatpush1.bf16.msra.mxu1 %v13707_v14  ;;  %v13755_v59 = vcombine.low %v571_v3, %v575_v4  ;;  %v13762_v14 = vcombine.high %v578_v9, %v582_v10  ;;  %v623_v3 = vld [vmem:[#allocation5 + $0xf68] sm:$0xff]  ;;  %v630_v9 = vld [vmem:[#allocation5 + $0xfa0] sm:$0xff] }
 0x147   :  { %3487 = vmatprep.subr.bf16.mxu0 %v13714_v16  ;;  %3699 = vmatprep.subr.bf16.mxu1 %v13716_v17  ;;  %v13764_v16 = vcombine.high %v579_v11, %v583_v13  ;;  %v586_v17 = vld [vmem:[#allocation5 + $0xe40] sm:$0xff]  ;;  %v627_v10 = vld [vmem:[#allocation5 + $0xf88] sm:$0xff] }
 0x148   :  { %v13769_v33 = vcombine.low %v586_v17, %v590_v18 }
 0x149   :  { %3473 = vmatmul.mubr.bf16.gmra.mrb[4].mxu0 %v15795_v22  ;;  %3685 = vmatmul.mubr.bf16.gmra.mrb[4].mxu1 %v15795_v22 }
 0x14a   :  { %3488 = vmatpush1.bf16.msra.mxu0 %v13713_v26  ;;  %3700 = vmatpush1.bf16.msra.mxu1 %v13715_v53  ;;  %v13763_v26 = vcombine.low %v579_v11, %v583_v13  ;;  %v13770_v53 = vcombine.high %v586_v17, %v590_v18  ;;  %v631_v11 = vld [vmem:[#allocation5 + $0xfa8] sm:$0xff]  ;;  %v638_v17 = vld [vmem:[#allocation5 + $0xfe0] sm:$0xff] }
 0x14b   :  { %3489 = vmatprep.subr.bf16.mxu0 %v13722_v54  ;;  %3701 = vmatprep.subr.bf16.mxu1 %v13724_v27  ;;  %v13772_v54 = vcombine.high %v587_v19, %v591_v20  ;;  %v594_v27 = vld [vmem:[#allocation5 + $0xe80] sm:$0xff]  ;;  %v635_v18 = vld [vmem:[#allocation5 + $0xfc8] sm:$0xff] }
 0x14c   :  { %3515 = vmatprep.mubr.bf16.mxu0 %v15803_v30  ;;  %3727 = vmatprep.mubr.bf16.mxu1 %v15803_v30  ;;  %v13777_v46 = vcombine.low %v594_v27, %v598_v28 }
 0x14e   :  { %3490 = vmatpush1.bf16.msra.mxu0 %v13721_v37  ;;  %3702 = vmatpush1.bf16.msra.mxu1 %v13723_v38  ;;  %v13771_v37 = vcombine.low %v587_v19, %v591_v20  ;;  %v13778_v38 = vcombine.high %v594_v27, %v598_v28  ;;  %v639_v19 = vld [vmem:[#allocation5 + $0xfe8] sm:$0xff]  ;;  %v136_v27 = vld [vmem:[#allocation5 + $0x30] sm:$0xff]  ;;  %v133_v28 = vld [vmem:[#allocation5 + $0x18] sm:$0xff] }
 0x14f   :  { %3491 = vmatprep.subr.bf16.mxu0 %v13730_v39  ;;  %3703 = vmatprep.subr.bf16.mxu1 %v13732_v40  ;;  %v13780_v39 = vcombine.high %v595_v29, %v599_v32  ;;  %v602_v40 = vld [vmem:[#allocation5 + $0xec0] sm:$0xff] }
 0x150   :  { %v13785_v52 = vcombine.low %v602_v40, %v606_v41 }
 0x152   :  { %3492 = vmatpush1.bf16.msra.mxu0 %v13729_v35  ;;  %3704 = vmatpush1.bf16.msra.mxu1 %v13731_v36  ;;  %v13779_v35 = vcombine.low %v595_v29, %v599_v32  ;;  %v13786_v36 = vcombine.high %v602_v40, %v606_v41  ;;  %v137_v29 = vld [vmem:[#allocation5 + $0x38] sm:$0xff]  ;;  %v144_v40 = vld [vmem:[#allocation5 + $0x70] sm:$0xff] }
 0x153   :  { %3493 = vmatprep.subr.bf16.mxu0 %v13738_v47  ;;  %3705 = vmatprep.subr.bf16.mxu1 %v13740_v48  ;;  %v13788_v47 = vcombine.high %v603_v42, %v607_v44  ;;  %v610_v48 = vld [vmem:[#allocation5 + $0xf00] sm:$0xff]  ;;  %v141_v41 = vld [vmem:[#allocation5 + $0x58] sm:$0xff] }
 0x154   :  { %v13793_v4 = vcombine.low %v610_v48, %v614_v49 }
 0x156   :  { %3494 = vmatpush1.bf16.msra.mxu0 %v13737_v55  ;;  %3706 = vmatpush1.bf16.msra.mxu1 %v13739_v60  ;;  %v13787_v55 = vcombine.low %v603_v42, %v607_v44  ;;  %v13794_v60 = vcombine.high %v610_v48, %v614_v49  ;;  %v15811_v42 = vcombine.low %v15797_v23, %v15799_v24  ;;  %v145_v44 = vld [vmem:[#allocation5 + $0x78] sm:$0xff] }
 0x157   :  { %3495 = vmatprep.subr.bf16.mxu0 %v13746_v61  ;;  %3707 = vmatprep.subr.bf16.mxu1 %v13748_v62  ;;  %v13796_v61 = vcombine.high %v611_v50, %v615_v51  ;;  %v618_v62 = vld [vmem:[#allocation5 + $0xf40] sm:$0xff]  ;;  %v13328_v49 = vcombine.high %v141_v41, %v145_v44  ;;  %v153_v23 = vld [vmem:[#allocation5 + $0xb8] sm:$0xff] }
 0x158   :  { %v13801_v13 = vcombine.low %v618_v62, %v622_v63  ;;  %17984 = vst [vmem:[#allocation20_spill] sm:$0xff] %v15811_v42 }
 0x15a   :  { %3496 = vmatpush1.bf16.msra.mxu0 %v13745_v5  ;;  %3708 = vmatpush1.bf16.msra.mxu1 %v13747_v6  ;;  %v13795_v5 = vcombine.low %v611_v50, %v615_v51  ;;  %v13802_v6 = vcombine.high %v618_v62, %v622_v63  ;;  %v148_v51 = vld [vmem:[#allocation5 + $0x90] sm:$0xff] }
 0x15b   :  { %3497 = vmatprep.subr.bf16.mxu0 %v13754_v7  ;;  %3709 = vmatprep.subr.bf16.mxu1 %v13756_v8  ;;  %v13804_v7 = vcombine.high %v619_v0, %v623_v3  ;;  %v626_v8 = vld [vmem:[#allocation5 + $0xf80] sm:$0xff]  ;;  %v156_v63 = vld [vmem:[#allocation5 + $0xd0] sm:$0xff] }
 0x15c   :  { %v13809_v20 = vcombine.low %v626_v8, %v630_v9 }
 0x15e   :  { %3498 = vmatpush1.bf16.msra.mxu0 %v13753_v57  ;;  %3710 = vmatpush1.bf16.msra.mxu1 %v13755_v59  ;;  %v13803_v57 = vcombine.low %v619_v0, %v623_v3  ;;  %v13810_v59 = vcombine.high %v626_v8, %v630_v9  ;;  %v160_v0 = vld [vmem:[#allocation5 + $0xf0] sm:$0xff] }
 0x15f   :  { %3499 = vmatprep.subr.bf16.mxu0 %v13762_v14  ;;  %3711 = vmatprep.subr.bf16.mxu1 %v13764_v16  ;;  %v13812_v14 = vcombine.high %v627_v10, %v631_v11  ;;  %v634_v16 = vld [vmem:[#allocation5 + $0xfc0] sm:$0xff]  ;;  %v13342_v8 = vcombine.high %v156_v63, %v160_v0 }
 0x160   :  { %v13817_v32 = vcombine.low %v634_v16, %v638_v17 }
 0x162   :  { %3500 = vmatpush1.bf16.msra.mxu0 %v13761_v21  ;;  %3712 = vmatpush1.bf16.msra.mxu1 %v13763_v26  ;;  %v13811_v21 = vcombine.low %v627_v10, %v631_v11  ;;  %v13818_v26 = vcombine.high %v634_v16, %v638_v17  ;;  %v164_v10 = vld [vmem:[#allocation5 + $0x110] sm:$0xff] }
 0x163   :  { %3501 = vmatprep.subr.bf16.mxu0 %v13770_v53  ;;  %3713 = vmatprep.subr.bf16.mxu1 %v13772_v54  ;;  %v13820_v53 = vcombine.high %v635_v18, %v639_v19  ;;  %v132_v54 = vld [vmem:[#allocation5 + $0x10] sm:$0xff] }
 0x164   :  { %v168_v11 = vld [vmem:[#allocation5 + $0x130] sm:$0xff] }
 0x165   :  { %v13350_v16 = vcombine.high %v164_v10, %v168_v11 }
 0x166   :  { %3502 = vmatpush1.bf16.msra.mxu0 %v13769_v33  ;;  %3714 = vmatpush1.bf16.msra.mxu1 %v13771_v37  ;;  %v13819_v33 = vcombine.low %v635_v18, %v639_v19  ;;  %v13318_v37 = vcombine.high %v132_v54, %v136_v27  ;;  %v172_v18 = vld [vmem:[#allocation5 + $0x150] sm:$0xff] }
 0x167   :  { %3503 = vmatprep.subr.bf16.mxu0 %v13778_v38  ;;  %3715 = vmatprep.subr.bf16.mxu1 %v13780_v39  ;;  %v13320_v38 = vcombine.high %v133_v28, %v137_v29  ;;  %v140_v39 = vld [vmem:[#allocation5 + $0x50] sm:$0xff] }
 0x168   :  { %v13326_v48 = vcombine.high %v140_v39, %v144_v40  ;;  %v13325_v24 = vcombine.low %v140_v39, %v144_v40  ;;  %v176_v19 = vld [vmem:[#allocation5 + $0x170] sm:$0xff] }
 0x169   :  { %v188_v40 = vld [vmem:[#allocation5 + $0x1d0] sm:$0xff] }
 0x16a   :  { %3504 = vmatpush1.bf16.msra.mxu0 %v13777_v46  ;;  %3716 = vmatpush1.bf16.msra.mxu1 %v13779_v35  ;;  %v125_v46 = vld [vmem:[#allocation2 + $0x58] sm:$0xff] }
 0x16b   :  { %3505 = vmatprep.subr.bf16.mxu0 %v13786_v36  ;;  %3717 = vmatprep.subr.bf16.mxu1 %v13788_v47  ;;  %v129_v35 = vld [vmem:[#allocation2 + $0x78] sm:$0xff]  ;;  %v13317_v36 = vcombine.low %v132_v54, %v136_v27  ;;  %v13319_v47 = vcombine.low %v133_v28, %v137_v29  ;;  %v13358_v54 = vcombine.high %v172_v18, %v176_v19  ;;  %v180_v28 = vld [vmem:[#allocation5 + $0x190] sm:$0xff] }
 0x16c   :  { %v15813_v50 = vcombine.high %v125_v46, %v129_v35  ;;  %v15819_v3 = vcombine.low %v125_v46, %v129_v35  ;;  %v184_v29 = vld [vmem:[#allocation5 + $0x1b0] sm:$0xff]  ;;  %v193_v46 = vld [vmem:[#allocation5 + $0x1f8] sm:$0xff] }
 0x16d   :  { %v13366_v39 = vcombine.high %v180_v28, %v184_v29  ;;  %v13365_v35 = vcombine.low %v180_v28, %v184_v29  ;;  %v232_v28 = vld [vmem:[#allocation5 + $0x330] sm:$0xff]  ;;  %v229_v29 = vld [vmem:[#allocation5 + $0x318] sm:$0xff] }
 0x16e   :  { %3506 = vmatpush1.bf16.msra.mxu0 %v13785_v52  ;;  %3718 = vmatpush1.bf16.msra.mxu1 %v13787_v55  ;;  %17985 = vst [vmem:[#allocation21_spill] sm:$0xff] %v15813_v50  ;;  %v152_v52 = vld [vmem:[#allocation5 + $0xb0] sm:$0xff]  ;;  %v149_v55 = vld [vmem:[#allocation5 + $0x98] sm:$0xff]  ;;  %17986 = vst [vmem:[#allocation22_spill] sm:$0xff] %v15819_v3 }
 0x16f   :  { %3507 = vmatprep.subr.bf16.mxu0 %v13794_v60  ;;  %3719 = vmatprep.subr.bf16.mxu1 %v13796_v61  ;;  %v13327_v60 = vcombine.low %v141_v41, %v145_v44  ;;  %v13334_v61 = vcombine.high %v148_v51, %v152_v52  ;;  %v13336_v62 = vcombine.high %v149_v55, %v153_v23  ;;  %v192_v41 = vld [vmem:[#allocation5 + $0x1f0] sm:$0xff]  ;;  %v189_v44 = vld [vmem:[#allocation5 + $0x1d8] sm:$0xff] }
 0x172   :  { %3508 = vmatpush1.bf16.msra.mxu0 %v13793_v4  ;;  %3720 = vmatpush1.bf16.msra.mxu1 %v13795_v5  ;;  %v157_v4 = vld [vmem:[#allocation5 + $0xd8] sm:$0xff] }
 0x173   :  { %3509 = vmatprep.subr.bf16.mxu0 %v13802_v6  ;;  %3721 = vmatprep.subr.bf16.mxu1 %v13804_v7  ;;  %v161_v5 = vld [vmem:[#allocation5 + $0xf8] sm:$0xff]  ;;  %v13333_v6 = vcombine.low %v148_v51, %v152_v52  ;;  %v13335_v7 = vcombine.low %v149_v55, %v153_v23  ;;  %v200_v51 = vld [vmem:[#allocation5 + $0x230] sm:$0xff]  ;;  %v13373_v23 = vcombine.low %v188_v40, %v192_v41 }
 0x174   :  { %v13344_v9 = vcombine.high %v157_v4, %v161_v5  ;;  %v197_v52 = vld [vmem:[#allocation5 + $0x218] sm:$0xff] }
 0x175   :  { %v201_v55 = vld [vmem:[#allocation5 + $0x238] sm:$0xff] }
 0x176   :  { %3510 = vmatpush1.bf16.msra.mxu0 %v13801_v13  ;;  %3722 = vmatpush1.bf16.msra.mxu1 %v13803_v57  ;;  %v165_v13 = vld [vmem:[#allocation5 + $0x118] sm:$0xff] }
 0x177   :  { %3511 = vmatprep.subr.bf16.mxu0 %v13810_v59  ;;  %3723 = vmatprep.subr.bf16.mxu1 %v13812_v14  ;;  %v169_v57 = vld [vmem:[#allocation5 + $0x138] sm:$0xff]  ;;  %v13341_v59 = vcombine.low %v156_v63, %v160_v0  ;;  %v13343_v14 = vcombine.low %v157_v4, %v161_v5  ;;  %v208_v63 = vld [vmem:[#allocation5 + $0x270] sm:$0xff] }
 0x178   :  { %v13352_v17 = vcombine.high %v165_v13, %v169_v57  ;;  %v205_v0 = vld [vmem:[#allocation5 + $0x258] sm:$0xff] }
 0x179   :  { %v209_v4 = vld [vmem:[#allocation5 + $0x278] sm:$0xff] }
 0x17a   :  { %3512 = vmatpush1.bf16.msra.mxu0 %v13809_v20  ;;  %3724 = vmatpush1.bf16.msra.mxu1 %v13811_v21  ;;  %v173_v20 = vld [vmem:[#allocation5 + $0x158] sm:$0xff] }
 0x17b   :  { %3513 = vmatprep.subr.bf16.mxu0 %v13818_v26  ;;  %3725 = vmatprep.subr.bf16.mxu1 %v13820_v53  ;;  %v177_v21 = vld [vmem:[#allocation5 + $0x178] sm:$0xff]  ;;  %v13349_v26 = vcombine.low %v164_v10, %v168_v11  ;;  %v13351_v53 = vcombine.low %v165_v13, %v169_v57  ;;  %v216_v10 = vld [vmem:[#allocation5 + $0x2b0] sm:$0xff] }
 0x17c   :  { %v13360_v27 = vcombine.high %v173_v20, %v177_v21  ;;  %v213_v11 = vld [vmem:[#allocation5 + $0x298] sm:$0xff] }
 0x17d   :  { %v217_v13 = vld [vmem:[#allocation5 + $0x2b8] sm:$0xff] }
 0x17e   :  { %3514 = vmatpush1.bf16.msra.mxu0 %v13817_v32  ;;  %3726 = vmatpush1.bf16.msra.mxu1 %v13819_v33  ;;  %v181_v32 = vld [vmem:[#allocation5 + $0x198] sm:$0xff] }
 0x17f   :  { %3748 = vmatprep.subr.bf16.mxu0 %v13318_v37  ;;  %3960 = vmatprep.subr.bf16.mxu1 %v13320_v38  ;;  %v185_v33 = vld [vmem:[#allocation5 + $0x1b8] sm:$0xff]  ;;  %v13357_v37 = vcombine.low %v172_v18, %v176_v19  ;;  %v13359_v38 = vcombine.low %v173_v20, %v177_v21  ;;  %v224_v18 = vld [vmem:[#allocation5 + $0x2f0] sm:$0xff] }
 0x180   :  { %v221_v19 = vld [vmem:[#allocation5 + $0x2d8] sm:$0xff] }
 0x181   :  { %3516 = vmatmul.mubr.bf16.vlgmr.msra.gmra.mrb[0].mxu0 %v15811_v42  ;;  %3728 = vmatmul.mubr.bf16.vlgmr.msra.gmra.mrb[0].mxu1 %v15811_v42  ;;  %v225_v20 = vld [vmem:[#allocation5 + $0x2f8] sm:$0xff] }
 0x182   :  { %3749 = vmatpush1.bf16.msra.mxu0 %v13317_v36  ;;  %3961 = vmatpush1.bf16.msra.mxu1 %v13319_v47  ;;  %v13367_v36 = vcombine.low %v181_v32, %v185_v33  ;;  %v13374_v47 = vcombine.high %v188_v40, %v192_v41  ;;  %v240_v40 = vld [vmem:[#allocation5 + $0x370] sm:$0xff]  ;;  %v237_v41 = vld [vmem:[#allocation5 + $0x358] sm:$0xff] }
 0x183   :  { %3750 = vmatprep.subr.bf16.mxu0 %v13326_v48  ;;  %3962 = vmatprep.subr.bf16.mxu1 %v13328_v49  ;;  %v13376_v48 = vcombine.high %v189_v44, %v193_v46  ;;  %v196_v49 = vld [vmem:[#allocation5 + $0x210] sm:$0xff] }
 0x184   :  { %3525 = vmatprep.mubr.bf16.mxu0 %v15813_v50  ;;  %3737 = vmatprep.mubr.bf16.mxu1 %v15813_v50  ;;  %v13381_v5 = vcombine.low %v196_v49, %v200_v51 }
 0x186   :  { %3751 = vmatpush1.bf16.msra.mxu0 %v13325_v24  ;;  %3963 = vmatpush1.bf16.msra.mxu1 %v13327_v60  ;;  %v13375_v24 = vcombine.low %v189_v44, %v193_v46  ;;  %v13382_v60 = vcombine.high %v196_v49, %v200_v51  ;;  %v241_v44 = vld [vmem:[#allocation5 + $0x378] sm:$0xff]  ;;  %v248_v49 = vld [vmem:[#allocation5 + $0x3b0] sm:$0xff] }
 0x187   :  { %3752 = vmatprep.subr.bf16.mxu0 %v13334_v61  ;;  %3964 = vmatprep.subr.bf16.mxu1 %v13336_v62  ;;  %v13384_v61 = vcombine.high %v197_v52, %v201_v55  ;;  %v204_v62 = vld [vmem:[#allocation5 + $0x250] sm:$0xff]  ;;  %v245_v51 = vld [vmem:[#allocation5 + $0x398] sm:$0xff] }
 0x188   :  { %v13389_v57 = vcombine.low %v204_v62, %v208_v63 }
 0x189   :  { %3526 = vmatmul.mubr.bf16.gmra.mrb[4].mxu0 %v15819_v3  ;;  %3738 = vmatmul.mubr.bf16.gmra.mrb[4].mxu1 %v15819_v3 }
 0x18a   :  { %3753 = vmatpush1.bf16.msra.mxu0 %v13333_v6  ;;  %3965 = vmatpush1.bf16.msra.mxu1 %v13335_v7  ;;  %v13383_v6 = vcombine.low %v197_v52, %v201_v55  ;;  %v13390_v7 = vcombine.high %v204_v62, %v208_v63  ;;  %v249_v52 = vld [vmem:[#allocation5 + $0x3b8] sm:$0xff]  ;;  %v256_v62 = vld [vmem:[#allocation5 + $0x3f0] sm:$0xff] }
 0x18b   :  { %3754 = vmatprep.subr.bf16.mxu0 %v13342_v8  ;;  %3966 = vmatprep.subr.bf16.mxu1 %v13344_v9  ;;  %v13392_v8 = vcombine.high %v205_v0, %v209_v4  ;;  %v212_v9 = vld [vmem:[#allocation5 + $0x290] sm:$0xff]  ;;  %v253_v63 = vld [vmem:[#allocation5 + $0x3d8] sm:$0xff] }
 0x18c   :  { %3780 = vmatprep.mubr.bf16.mxu0 %v15733_v58  ;;  %3992 = vmatprep.mubr.bf16.mxu1 %v15733_v58  ;;  %v13368_v58 = vcombine.high %v181_v32, %v185_v33  ;;  %v13397_v21 = vcombine.low %v212_v9, %v216_v10  ;;  %v233_v32 = vld [vmem:[#allocation5 + $0x338] sm:$0xff] }
 0x18e   :  { %3755 = vmatpush1.bf16.msra.mxu0 %v13341_v59  ;;  %3967 = vmatpush1.bf16.msra.mxu1 %v13343_v14  ;;  %v13391_v59 = vcombine.low %v205_v0, %v209_v4  ;;  %v13398_v14 = vcombine.high %v212_v9, %v216_v10  ;;  %v257_v0 = vld [vmem:[#allocation5 + $0x3f8] sm:$0xff]  ;;  %v264_v9 = vld [vmem:[#allocation5 + $0x430] sm:$0xff] }
 0x18f   :  { %3756 = vmatprep.subr.bf16.mxu0 %v13350_v16  ;;  %3968 = vmatprep.subr.bf16.mxu1 %v13352_v17  ;;  %v13400_v16 = vcombine.high %v213_v11, %v217_v13  ;;  %v220_v17 = vld [vmem:[#allocation5 + $0x2d0] sm:$0xff]  ;;  %v261_v10 = vld [vmem:[#allocation5 + $0x418] sm:$0xff] }
 0x190   :  { %v13405_v33 = vcombine.low %v220_v17, %v224_v18 }
 0x192   :  { %3757 = vmatpush1.bf16.msra.mxu0 %v13349_v26  ;;  %3969 = vmatpush1.bf16.msra.mxu1 %v13351_v53  ;;  %v13399_v26 = vcombine.low %v213_v11, %v217_v13  ;;  %v13406_v53 = vcombine.high %v220_v17, %v224_v18  ;;  %v265_v11 = vld [vmem:[#allocation5 + $0x438] sm:$0xff]  ;;  %v272_v17 = vld [vmem:[#allocation5 + $0x470] sm:$0xff] }
 0x193   :  { %3758 = vmatprep.subr.bf16.mxu0 %v13358_v54  ;;  %3970 = vmatprep.subr.bf16.mxu1 %v13360_v27  ;;  %v13408_v54 = vcombine.high %v221_v19, %v225_v20  ;;  %v228_v27 = vld [vmem:[#allocation5 + $0x310] sm:$0xff]  ;;  %v269_v18 = vld [vmem:[#allocation5 + $0x458] sm:$0xff] }
 0x194   :  { %v13413_v46 = vcombine.low %v228_v27, %v232_v28 }
 0x196   :  { %3759 = vmatpush1.bf16.msra.mxu0 %v13357_v37  ;;  %3971 = vmatpush1.bf16.msra.mxu1 %v13359_v38  ;;  %v13407_v37 = vcombine.low %v221_v19, %v225_v20  ;;  %v13414_v38 = vcombine.high %v228_v27, %v232_v28  ;;  %v273_v19 = vld [vmem:[#allocation5 + $0x478] sm:$0xff]  ;;  %v280_v27 = vld [vmem:[#allocation5 + $0x4b0] sm:$0xff] }
 0x197   :  { %3760 = vmatprep.subr.bf16.mxu0 %v13366_v39  ;;  %3972 = vmatprep.subr.bf16.mxu1 %v13368_v58  ;;  %v13416_v39 = vcombine.high %v229_v29, %v233_v32  ;;  %v236_v58 = vld [vmem:[#allocation5 + $0x350] sm:$0xff]  ;;  %v277_v28 = vld [vmem:[#allocation5 + $0x498] sm:$0xff] }
 0x198   :  { %v13421_v55 = vcombine.low %v236_v58, %v240_v40 }
 0x19a   :  { %3761 = vmatpush1.bf16.msra.mxu0 %v13365_v35  ;;  %3973 = vmatpush1.bf16.msra.mxu1 %v13367_v36  ;;  %v13415_v35 = vcombine.low %v229_v29, %v233_v32  ;;  %v13422_v36 = vcombine.high %v236_v58, %v240_v40  ;;  %v281_v29 = vld [vmem:[#allocation5 + $0x4b8] sm:$0xff]  ;;  %v288_v58 = vld [vmem:[#allocation5 + $0x4f0] sm:$0xff] }
 0x19b   :  { %3762 = vmatprep.subr.bf16.mxu0 %v13374_v47  ;;  %3974 = vmatprep.subr.bf16.mxu1 %v13376_v48  ;;  %v13424_v47 = vcombine.high %v237_v41, %v241_v44  ;;  %v244_v48 = vld [vmem:[#allocation5 + $0x390] sm:$0xff]  ;;  %v285_v40 = vld [vmem:[#allocation5 + $0x4d8] sm:$0xff] }
 0x19c   :  { %v13429_v4 = vcombine.low %v244_v48, %v248_v49 }
 0x19e   :  { %3763 = vmatpush1.bf16.msra.mxu0 %v13373_v23  ;;  %3975 = vmatpush1.bf16.msra.mxu1 %v13375_v24  ;;  %v13423_v23 = vcombine.low %v237_v41, %v241_v44  ;;  %v13430_v24 = vcombine.high %v244_v48, %v248_v49  ;;  %v289_v41 = vld [vmem:[#allocation5 + $0x4f8] sm:$0xff] }
 0x19f   :  { %3764 = vmatprep.subr.bf16.mxu0 %v13382_v60  ;;  %3976 = vmatprep.subr.bf16.mxu1 %v13384_v61  ;;  %v13432_v60 = vcombine.high %v245_v51, %v249_v52  ;;  %v252_v61 = vld [vmem:[#allocation5 + $0x3d0] sm:$0xff]  ;;  %v293_v48 = vld [vmem:[#allocation5 + $0x518] sm:$0xff] }
 0x1a0   :  { %v13437_v13 = vcombine.low %v252_v61, %v256_v62  ;;  %v297_v49 = vld [vmem:[#allocation5 + $0x538] sm:$0xff] }
 0x1a2   :  { %3765 = vmatpush1.bf16.msra.mxu0 %v13381_v5  ;;  %3977 = vmatpush1.bf16.msra.mxu1 %v13383_v6  ;;  %v13431_v5 = vcombine.low %v245_v51, %v249_v52  ;;  %v13438_v6 = vcombine.high %v252_v61, %v256_v62  ;;  %v305_v61 = vld [vmem:[#allocation5 + $0x578] sm:$0xff] }
 0x1a3   :  { %3766 = vmatprep.subr.bf16.mxu0 %v13390_v7  ;;  %3978 = vmatprep.subr.bf16.mxu1 %v13392_v8  ;;  %v13440_v7 = vcombine.high %v253_v63, %v257_v0  ;;  %v260_v8 = vld [vmem:[#allocation5 + $0x410] sm:$0xff] }
 0x1a4   :  { %v13445_v20 = vcombine.low %v260_v8, %v264_v9 }
 0x1a6   :  { %3767 = vmatpush1.bf16.msra.mxu0 %v13389_v57  ;;  %3979 = vmatpush1.bf16.msra.mxu1 %v13391_v59  ;;  %v13439_v57 = vcombine.low %v253_v63, %v257_v0  ;;  %v13446_v59 = vcombine.high %v260_v8, %v264_v9  ;;  %v13479_v63 = vcombine.low %v293_v48, %v297_v49 }
 0x1a7   :  { %3768 = vmatprep.subr.bf16.mxu0 %v13398_v14  ;;  %3980 = vmatprep.subr.bf16.mxu1 %v13400_v16  ;;  %v13448_v14 = vcombine.high %v261_v10, %v265_v11  ;;  %v268_v16 = vld [vmem:[#allocation5 + $0x450] sm:$0xff] }
 0x1a8   :  { %v13453_v32 = vcombine.low %v268_v16, %v272_v17 }
 0x1aa   :  { %3769 = vmatpush1.bf16.msra.mxu0 %v13397_v21  ;;  %3981 = vmatpush1.bf16.msra.mxu1 %v13399_v26  ;;  %v13447_v21 = vcombine.low %v261_v10, %v265_v11  ;;  %v13454_v26 = vcombine.high %v268_v16, %v272_v17  ;;  %v316_v11 = vld [vmem:[#allocation5 + $0x5d0] sm:$0xff] }
 0x1ab   :  { %3770 = vmatprep.subr.bf16.mxu0 %v13406_v53  ;;  %3982 = vmatprep.subr.bf16.mxu1 %v13408_v54  ;;  %v13456_v53 = vcombine.high %v269_v18, %v273_v19  ;;  %v276_v54 = vld [vmem:[#allocation5 + $0x490] sm:$0xff] }
 0x1ac   :  { %v13461_v44 = vcombine.low %v276_v54, %v280_v27 }
 0x1ae   :  { %3771 = vmatpush1.bf16.msra.mxu0 %v13405_v33  ;;  %3983 = vmatpush1.bf16.msra.mxu1 %v13407_v37  ;;  %v13455_v33 = vcombine.low %v269_v18, %v273_v19  ;;  %v13462_v37 = vcombine.high %v276_v54, %v280_v27  ;;  %v324_v19 = vld [vmem:[#allocation5 + $0x610] sm:$0xff] }
 0x1af   :  { %3772 = vmatprep.subr.bf16.mxu0 %v13414_v38  ;;  %3984 = vmatprep.subr.bf16.mxu1 %v13416_v39  ;;  %v13464_v38 = vcombine.high %v277_v28, %v281_v29  ;;  %v284_v39 = vld [vmem:[#allocation5 + $0x4d0] sm:$0xff] }
 0x1b0   :  { %v13469_v51 = vcombine.low %v284_v39, %v288_v58 }
 0x1b2   :  { %3773 = vmatpush1.bf16.msra.mxu0 %v13413_v46  ;;  %3985 = vmatpush1.bf16.msra.mxu1 %v13415_v35  ;;  %v13470_v46 = vcombine.high %v284_v39, %v288_v58  ;;  %v13472_v35 = vcombine.high %v285_v40, %v289_v41 }
 0x1b3   :  { %3774 = vmatprep.subr.bf16.mxu0 %v13422_v36  ;;  %3986 = vmatprep.subr.bf16.mxu1 %v13424_v47  ;;  %v292_v36 = vld [vmem:[#allocation5 + $0x510] sm:$0xff] }
 0x1b4   :  { %v296_v47 = vld [vmem:[#allocation5 + $0x530] sm:$0xff] }
 0x1b5   :  { %v13478_v52 = vcombine.high %v292_v36, %v296_v47  ;;  %v13477_v62 = vcombine.low %v292_v36, %v296_v47 }
 0x1b6   :  { %3775 = vmatpush1.bf16.msra.mxu0 %v13421_v55  ;;  %3987 = vmatpush1.bf16.msra.mxu1 %v13423_v23  ;;  %v13480_v55 = vcombine.high %v293_v48, %v297_v49  ;;  %v300_v23 = vld [vmem:[#allocation5 + $0x550] sm:$0xff] }
 0x1b7   :  { %3776 = vmatprep.subr.bf16.mxu0 %v13430_v24  ;;  %3988 = vmatprep.subr.bf16.mxu1 %v13432_v60  ;;  %v304_v24 = vld [vmem:[#allocation5 + $0x570] sm:$0xff]  ;;  %v301_v60 = vld [vmem:[#allocation5 + $0x558] sm:$0xff] }
 0x1b8   :  { %v13488_v0 = vcombine.high %v301_v60, %v305_v61  ;;  %v13485_v8 = vcombine.low %v300_v23, %v304_v24  ;;  %v13487_v9 = vcombine.low %v301_v60, %v305_v61  ;;  %v348_v49 = vld [vmem:[#allocation5 + $0x6d0] sm:$0xff] }
 0x1b9   :  { %v356_v61 = vld [vmem:[#allocation5 + $0x710] sm:$0xff] }
 0x1ba   :  { %3777 = vmatpush1.bf16.msra.mxu0 %v13429_v4  ;;  %3989 = vmatpush1.bf16.msra.mxu1 %v13431_v5  ;;  %v308_v4 = vld [vmem:[#allocation5 + $0x590] sm:$0xff] }
 0x1bb   :  { %3778 = vmatprep.subr.bf16.mxu0 %v13438_v6  ;;  %3990 = vmatprep.subr.bf16.mxu1 %v13440_v7  ;;  %v312_v5 = vld [vmem:[#allocation5 + $0x5b0] sm:$0xff]  ;;  %v309_v6 = vld [vmem:[#allocation5 + $0x598] sm:$0xff] }
 0x1bc   :  { %v313_v7 = vld [vmem:[#allocation5 + $0x5b8] sm:$0xff]  ;;  %v13494_v10 = vcombine.high %v308_v4, %v312_v5 }
 0x1bd   :  { %v13495_v16 = vcombine.low %v309_v6, %v313_v7 }
 0x1be   :  { %3779 = vmatpush1.bf16.msra.mxu0 %v13437_v13  ;;  %3991 = vmatpush1.bf16.msra.mxu1 %v13439_v57  ;;  %v320_v13 = vld [vmem:[#allocation5 + $0x5f0] sm:$0xff]  ;;  %v317_v57 = vld [vmem:[#allocation5 + $0x5d8] sm:$0xff] }
 0x1bf   :  { %3801 = vmatprep.subr.bf16.mxu0 %v13446_v59  ;;  %4013 = vmatprep.subr.bf16.mxu1 %v13448_v14  ;;  %v321_v59 = vld [vmem:[#allocation5 + $0x5f8] sm:$0xff]  ;;  %v13493_v14 = vcombine.low %v308_v4, %v312_v5  ;;  %v13502_v17 = vcombine.high %v316_v11, %v320_v13 }
 0x1c0   :  { %v13504_v18 = vcombine.high %v317_v57, %v321_v59  ;;  %v13503_v54 = vcombine.low %v317_v57, %v321_v59  ;;  %v372_v59 = vld [vmem:[#allocation5 + $0x790] sm:$0xff] }
 0x1c1   :  { %3781 = vmatmul.mubr.bf16.vlgmr.msra.gmra.mrb[8].mxu0 %v15739_v15  ;;  %3993 = vmatmul.mubr.bf16.vlgmr.msra.gmra.mrb[8].mxu1 %v15739_v15  ;;  %v13463_v15 = vcombine.low %v277_v28, %v281_v29  ;;  %v332_v29 = vld [vmem:[#allocation5 + $0x650] sm:$0xff] }
 0x1c2   :  { %3802 = vmatpush1.bf16.msra.mxu0 %v13445_v20  ;;  %4014 = vmatpush1.bf16.msra.mxu1 %v13447_v21  ;;  %v328_v20 = vld [vmem:[#allocation5 + $0x630] sm:$0xff]  ;;  %v325_v21 = vld [vmem:[#allocation5 + $0x618] sm:$0xff] }
 0x1c3   :  { %3803 = vmatprep.subr.bf16.mxu0 %v13454_v26  ;;  %4015 = vmatprep.subr.bf16.mxu1 %v13456_v53  ;;  %v329_v26 = vld [vmem:[#allocation5 + $0x638] sm:$0xff]  ;;  %v13501_v53 = vcombine.low %v316_v11, %v320_v13  ;;  %v13510_v27 = vcombine.high %v324_v19, %v328_v20 }
 0x1c4   :  { %3790 = vmatprep.mubr.bf16.mxu0 %v15741_v25  ;;  %4002 = vmatprep.mubr.bf16.mxu1 %v15741_v25  ;;  %v13471_v25 = vcombine.low %v285_v40, %v289_v41  ;;  %v13512_v28 = vcombine.high %v325_v21, %v329_v26  ;;  %v13511_v39 = vcombine.low %v325_v21, %v329_v26  ;;  %v340_v41 = vld [vmem:[#allocation5 + $0x690] sm:$0xff] }
 0x1c5   :  { %v380_v26 = vld [vmem:[#allocation5 + $0x7d0] sm:$0xff] }
 0x1c6   :  { %3804 = vmatpush1.bf16.msra.mxu0 %v13453_v32  ;;  %4016 = vmatpush1.bf16.msra.mxu1 %v13455_v33  ;;  %v336_v32 = vld [vmem:[#allocation5 + $0x670] sm:$0xff]  ;;  %v333_v33 = vld [vmem:[#allocation5 + $0x658] sm:$0xff] }
 0x1c7   :  { %3805 = vmatprep.subr.bf16.mxu0 %v13462_v37  ;;  %4017 = vmatprep.subr.bf16.mxu1 %v13464_v38  ;;  %v337_v37 = vld [vmem:[#allocation5 + $0x678] sm:$0xff]  ;;  %v13509_v38 = vcombine.low %v324_v19, %v328_v20  ;;  %v13518_v58 = vcombine.high %v332_v29, %v336_v32 }
 0x1c8   :  { %v13520_v40 = vcombine.high %v333_v33, %v337_v37  ;;  %v13519_v36 = vcombine.low %v333_v33, %v337_v37  ;;  %v388_v37 = vld [vmem:[#allocation5 + $0x810] sm:$0xff] }
 0x1c9   :  { %3791 = vmatmul.mubr.bf16.gmra.mrb[12].mxu0 %v15747_v34  ;;  %4003 = vmatmul.mubr.bf16.gmra.mrb[12].mxu1 %v15747_v34  ;;  %v13486_v34 = vcombine.high %v300_v23, %v304_v24 }
 0x1ca   :  { %3806 = vmatpush1.bf16.msra.mxu0 %v13461_v44  ;;  %4018 = vmatpush1.bf16.msra.mxu1 %v13463_v15  ;;  %v344_v44 = vld [vmem:[#allocation5 + $0x6b0] sm:$0xff]  ;;  %v341_v15 = vld [vmem:[#allocation5 + $0x698] sm:$0xff] }
 0x1cb   :  { %3807 = vmatprep.subr.bf16.mxu0 %v13470_v46  ;;  %4019 = vmatprep.subr.bf16.mxu1 %v13472_v35  ;;  %v345_v46 = vld [vmem:[#allocation5 + $0x6b8] sm:$0xff]  ;;  %v13517_v35 = vcombine.low %v332_v29, %v336_v32  ;;  %v13526_v47 = vcombine.high %v340_v41, %v344_v44 }
 0x1cc   :  { %3833 = vmatprep.mubr.bf16.mxu0 %v15755_v43  ;;  %4045 = vmatprep.mubr.bf16.mxu1 %v15755_v43  ;;  %v13496_v43 = vcombine.high %v309_v6, %v313_v7  ;;  %v13528_v48 = vcombine.high %v341_v15, %v345_v46  ;;  %v13527_v23 = vcombine.low %v341_v15, %v345_v46  ;;  %v364_v7 = vld [vmem:[#allocation5 + $0x750] sm:$0xff] }
 0x1cd   :  { %v396_v46 = vld [vmem:[#allocation5 + $0x850] sm:$0xff] }
 0x1ce   :  { %3808 = vmatpush1.bf16.msra.mxu0 %v13469_v51  ;;  %4020 = vmatpush1.bf16.msra.mxu1 %v13471_v25  ;;  %v352_v51 = vld [vmem:[#allocation5 + $0x6f0] sm:$0xff]  ;;  %v349_v25 = vld [vmem:[#allocation5 + $0x6d8] sm:$0xff] }
 0x1cf   :  { %3809 = vmatprep.subr.bf16.mxu0 %v13478_v52  ;;  %4021 = vmatprep.subr.bf16.mxu1 %v13480_v55  ;;  %v353_v52 = vld [vmem:[#allocation5 + $0x6f8] sm:$0xff]  ;;  %v13525_v55 = vcombine.low %v340_v41, %v344_v44  ;;  %v13534_v24 = vcombine.high %v348_v49, %v352_v51 }
 0x1d0   :  { %v13536_v60 = vcombine.high %v349_v25, %v353_v52  ;;  %v13535_v4 = vcombine.low %v349_v25, %v353_v52  ;;  %v404_v52 = vld [vmem:[#allocation5 + $0x890] sm:$0xff] }
 0x1d2   :  { %3810 = vmatpush1.bf16.msra.mxu0 %v13477_v62  ;;  %4022 = vmatpush1.bf16.msra.mxu1 %v13479_v63  ;;  %v360_v62 = vld [vmem:[#allocation5 + $0x730] sm:$0xff]  ;;  %v357_v63 = vld [vmem:[#allocation5 + $0x718] sm:$0xff] }
 0x1d3   :  { %3811 = vmatprep.subr.bf16.mxu0 %v13486_v34  ;;  %4023 = vmatprep.subr.bf16.mxu1 %v13488_v0  ;;  %v361_v34 = vld [vmem:[#allocation5 + $0x738] sm:$0xff]  ;;  %v13533_v0 = vcombine.low %v348_v49, %v352_v51  ;;  %v13542_v5 = vcombine.high %v356_v61, %v360_v62 }
 0x1d4   :  { %v13544_v6 = vcombine.high %v357_v63, %v361_v34  ;;  %v13543_v11 = vcombine.low %v357_v63, %v361_v34  ;;  %v412_v34 = vld [vmem:[#allocation5 + $0x8d0] sm:$0xff] }
 0x1d6   :  { %3812 = vmatpush1.bf16.msra.mxu0 %v13485_v8  ;;  %4024 = vmatpush1.bf16.msra.mxu1 %v13487_v9  ;;  %v368_v8 = vld [vmem:[#allocation5 + $0x770] sm:$0xff]  ;;  %v365_v9 = vld [vmem:[#allocation5 + $0x758] sm:$0xff] }
 0x1d7   :  { %3813 = vmatprep.subr.bf16.mxu0 %v13494_v10  ;;  %4025 = vmatprep.subr.bf16.mxu1 %v13496_v43  ;;  %v369_v10 = vld [vmem:[#allocation5 + $0x778] sm:$0xff]  ;;  %v13541_v43 = vcombine.low %v356_v61, %v360_v62  ;;  %v13550_v13 = vcombine.high %v364_v7, %v368_v8 }
 0x1d8   :  { %v13552_v57 = vcombine.high %v365_v9, %v369_v10  ;;  %v13551_v19 = vcombine.low %v365_v9, %v369_v10  ;;  %v420_v9 = vld [vmem:[#allocation5 + $0x910] sm:$0xff] }
 0x1d9   :  { %v424_v10 = vld [vmem:[#allocation5 + $0x930] sm:$0xff] }
 0x1da   :  { %3814 = vmatpush1.bf16.msra.mxu0 %v13493_v14  ;;  %4026 = vmatpush1.bf16.msra.mxu1 %v13495_v16  ;;  %v376_v14 = vld [vmem:[#allocation5 + $0x7b0] sm:$0xff]  ;;  %v373_v16 = vld [vmem:[#allocation5 + $0x798] sm:$0xff] }
 0x1db   :  { %3815 = vmatprep.subr.bf16.mxu0 %v13502_v17  ;;  %4027 = vmatprep.subr.bf16.mxu1 %v13504_v18  ;;  %v377_v17 = vld [vmem:[#allocation5 + $0x7b8] sm:$0xff]  ;;  %v13549_v18 = vcombine.low %v364_v7, %v368_v8  ;;  %v13558_v20 = vcombine.high %v372_v59, %v376_v14 }
 0x1dc   :  { %v13560_v21 = vcombine.high %v373_v16, %v377_v17  ;;  %v13559_v29 = vcombine.low %v373_v16, %v377_v17  ;;  %v432_v16 = vld [vmem:[#allocation5 + $0x970] sm:$0xff]  ;;  %v429_v17 = vld [vmem:[#allocation5 + $0x958] sm:$0xff] }
 0x1de   :  { %3816 = vmatpush1.bf16.msra.mxu0 %v13501_v53  ;;  %4028 = vmatpush1.bf16.msra.mxu1 %v13503_v54  ;;  %v384_v53 = vld [vmem:[#allocation5 + $0x7f0] sm:$0xff]  ;;  %v381_v54 = vld [vmem:[#allocation5 + $0x7d8] sm:$0xff] }
 0x1df   :  { %3817 = vmatprep.subr.bf16.mxu0 %v13510_v27  ;;  %4029 = vmatprep.subr.bf16.mxu1 %v13512_v28  ;;  %v385_v27 = vld [vmem:[#allocation5 + $0x7f8] sm:$0xff]  ;;  %v13557_v28 = vcombine.low %v372_v59, %v376_v14  ;;  %v13566_v32 = vcombine.high %v380_v26, %v384_v53  ;;  %v428_v14 = vld [vmem:[#allocation5 + $0x950] sm:$0xff] }
 0x1e0   :  { %v13568_v33 = vcombine.high %v381_v54, %v385_v27  ;;  %v13567_v41 = vcombine.low %v381_v54, %v385_v27  ;;  %v437_v54 = vld [vmem:[#allocation5 + $0x998] sm:$0xff] }
 0x1e1   :  { %v441_v27 = vld [vmem:[#allocation5 + $0x9b8] sm:$0xff] }
 0x1e2   :  { %3818 = vmatpush1.bf16.msra.mxu0 %v13509_v38  ;;  %4030 = vmatpush1.bf16.msra.mxu1 %v13511_v39  ;;  %v392_v38 = vld [vmem:[#allocation5 + $0x830] sm:$0xff]  ;;  %v389_v39 = vld [vmem:[#allocation5 + $0x818] sm:$0xff] }
 0x1e3   :  { %3819 = vmatprep.subr.bf16.mxu0 %v13518_v58  ;;  %4031 = vmatprep.subr.bf16.mxu1 %v13520_v40  ;;  %v393_v58 = vld [vmem:[#allocation5 + $0x838] sm:$0xff]  ;;  %v13565_v40 = vcombine.low %v380_v26, %v384_v53  ;;  %v13574_v44 = vcombine.high %v388_v37, %v392_v38  ;;  %v436_v26 = vld [vmem:[#allocation5 + $0x990] sm:$0xff] }
 0x1e4   :  { %v13576_v15 = vcombine.high %v389_v39, %v393_v58  ;;  %v13575_v49 = vcombine.low %v389_v39, %v393_v58  ;;  %v440_v53 = vld [vmem:[#allocation5 + $0x9b0] sm:$0xff]  ;;  %v449_v39 = vld [vmem:[#allocation5 + $0x9f8] sm:$0xff] }
 0x1e5   :  { %v13621_v58 = vcombine.low %v436_v26, %v440_v53 }
 0x1e6   :  { %3820 = vmatpush1.bf16.msra.mxu0 %v13517_v35  ;;  %4032 = vmatpush1.bf16.msra.mxu1 %v13519_v36  ;;  %v400_v35 = vld [vmem:[#allocation5 + $0x870] sm:$0xff]  ;;  %v397_v36 = vld [vmem:[#allocation5 + $0x858] sm:$0xff] }
 0x1e7   :  { %3821 = vmatprep.subr.bf16.mxu0 %v13526_v47  ;;  %4033 = vmatprep.subr.bf16.mxu1 %v13528_v48  ;;  %v401_v47 = vld [vmem:[#allocation5 + $0x878] sm:$0xff]  ;;  %v13573_v48 = vcombine.low %v388_v37, %v392_v38  ;;  %v13582_v51 = vcombine.high %v396_v46, %v400_v35  ;;  %v448_v37 = vld [vmem:[#allocation5 + $0x9f0] sm:$0xff] }
 0x1e8   :  { %v13584_v25 = vcombine.high %v397_v36, %v401_v47  ;;  %v13583_v61 = vcombine.low %v397_v36, %v401_v47  ;;  %v445_v38 = vld [vmem:[#allocation5 + $0x9d8] sm:$0xff] }
 0x1e9   :  { %v457_v36 = vld [vmem:[#allocation5 + $0xa38] sm:$0xff] }
 0x1ea   :  { %3822 = vmatpush1.bf16.msra.mxu0 %v13525_v55  ;;  %4034 = vmatpush1.bf16.msra.mxu1 %v13527_v23  ;;  %v408_v55 = vld [vmem:[#allocation5 + $0x8b0] sm:$0xff]  ;;  %v405_v23 = vld [vmem:[#allocation5 + $0x898] sm:$0xff] }
 0x1eb   :  { %3823 = vmatprep.subr.bf16.mxu0 %v13534_v24  ;;  %4035 = vmatprep.subr.bf16.mxu1 %v13536_v60  ;;  %v409_v24 = vld [vmem:[#allocation5 + $0x8b8] sm:$0xff]  ;;  %v13581_v60 = vcombine.low %v396_v46, %v400_v35  ;;  %v13590_v62 = vcombine.high %v404_v52, %v408_v55  ;;  %v456_v46 = vld [vmem:[#allocation5 + $0xa30] sm:$0xff] }
 0x1ec   :  { %v13592_v63 = vcombine.high %v405_v23, %v409_v24  ;;  %v453_v35 = vld [vmem:[#allocation5 + $0xa18] sm:$0xff] }
 0x1ee   :  { %3824 = vmatpush1.bf16.msra.mxu0 %v13533_v0  ;;  %4036 = vmatpush1.bf16.msra.mxu1 %v13535_v4  ;;  %v416_v0 = vld [vmem:[#allocation5 + $0x8f0] sm:$0xff]  ;;  %v413_v4 = vld [vmem:[#allocation5 + $0x8d8] sm:$0xff] }
 0x1ef   :  { %3825 = vmatprep.subr.bf16.mxu0 %v13542_v5  ;;  %4037 = vmatprep.subr.bf16.mxu1 %v13544_v6  ;;  %v417_v5 = vld [vmem:[#allocation5 + $0x8f8] sm:$0xff]  ;;  %v13589_v6 = vcombine.low %v404_v52, %v408_v55  ;;  %v13598_v7 = vcombine.high %v412_v34, %v416_v0  ;;  %v464_v52 = vld [vmem:[#allocation5 + $0xa70] sm:$0xff] }
 0x1f0   :  { %v13600_v8 = vcombine.high %v413_v4, %v417_v5  ;;  %v461_v55 = vld [vmem:[#allocation5 + $0xa58] sm:$0xff] }
 0x1f2   :  { %3826 = vmatpush1.bf16.msra.mxu0 %v13541_v43  ;;  %4038 = vmatpush1.bf16.msra.mxu1 %v13543_v11  ;;  %v421_v43 = vld [vmem:[#allocation5 + $0x918] sm:$0xff] }
 0x1f3   :  { %3827 = vmatprep.subr.bf16.mxu0 %v13550_v13  ;;  %4039 = vmatprep.subr.bf16.mxu1 %v13552_v57  ;;  %v425_v11 = vld [vmem:[#allocation5 + $0x938] sm:$0xff]  ;;  %v13597_v13 = vcombine.low %v412_v34, %v416_v0  ;;  %v13606_v57 = vcombine.high %v420_v9, %v424_v10  ;;  %v472_v34 = vld [vmem:[#allocation5 + $0xab0] sm:$0xff] }
 0x1f4   :  { %v13608_v59 = vcombine.high %v421_v43, %v425_v11  ;;  %v469_v0 = vld [vmem:[#allocation5 + $0xa98] sm:$0xff] }
 0x1f6   :  { %3828 = vmatpush1.bf16.msra.mxu0 %v13549_v18  ;;  %4040 = vmatpush1.bf16.msra.mxu1 %v13551_v19  ;;  %v433_v18 = vld [vmem:[#allocation5 + $0x978] sm:$0xff]  ;;  %v13605_v19 = vcombine.low %v420_v9, %v424_v10  ;;  %v480_v9 = vld [vmem:[#allocation5 + $0xaf0] sm:$0xff] }
 0x1f7   :  { %3829 = vmatprep.subr.bf16.mxu0 %v13558_v20  ;;  %4041 = vmatprep.subr.bf16.mxu1 %v13560_v21  ;;  %v13607_v20 = vcombine.low %v421_v43, %v425_v11  ;;  %v13616_v21 = vcombine.high %v429_v17, %v433_v18  ;;  %v477_v10 = vld [vmem:[#allocation5 + $0xad8] sm:$0xff] }
 0x1f8   :  { %v481_v43 = vld [vmem:[#allocation5 + $0xaf8] sm:$0xff] }
 0x1fa   :  { %3830 = vmatpush1.bf16.msra.mxu0 %v13557_v28  ;;  %4042 = vmatpush1.bf16.msra.mxu1 %v13559_v29  ;;  %v13613_v28 = vcombine.low %v428_v14, %v432_v16  ;;  %v13615_v29 = vcombine.low %v429_v17, %v433_v18  ;;  %v489_v17 = vld [vmem:[#allocation5 + $0xb38] sm:$0xff] }
 0x1fb   :  { %3831 = vmatprep.subr.bf16.mxu0 %v13566_v32  ;;  %4043 = vmatprep.subr.bf16.mxu1 %v13568_v33  ;;  %v13622_v32 = vcombine.high %v436_v26, %v440_v53  ;;  %v444_v33 = vld [vmem:[#allocation5 + $0x9d0] sm:$0xff]  ;;  %v493_v53 = vld [vmem:[#allocation5 + $0xb58] sm:$0xff] }
 0x1fc   :  { %v13629_v47 = vcombine.low %v444_v33, %v448_v37  ;;  %v496_v26 = vld [vmem:[#allocation5 + $0xb70] sm:$0xff] }
 0x1fe   :  { %3832 = vmatpush1.bf16.msra.mxu0 %v13565_v40  ;;  %4044 = vmatpush1.bf16.msra.mxu1 %v13567_v41  ;;  %v13623_v40 = vcombine.low %v437_v54, %v441_v27  ;;  %v13630_v41 = vcombine.high %v444_v33, %v448_v37  ;;  %v504_v33 = vld [vmem:[#allocation5 + $0xbb0] sm:$0xff]  ;;  %v501_v37 = vld [vmem:[#allocation5 + $0xb98] sm:$0xff] }
 0x1ff   :  { %3854 = vmatprep.subr.bf16.mxu0 %v13574_v44  ;;  %4066 = vmatprep.subr.bf16.mxu1 %v13576_v15  ;;  %v13632_v44 = vcombine.high %v445_v38, %v449_v39  ;;  %v452_v15 = vld [vmem:[#allocation5 + $0xa10] sm:$0xff] }
 0x201   :  { %3834 = vmatmul.mubr.bf16.vlgmr.msra.gmra.mrb[8].mxu0 %v15763_v31  ;;  %4046 = vmatmul.mubr.bf16.vlgmr.msra.gmra.mrb[8].mxu1 %v15763_v31  ;;  %v13591_v31 = vcombine.low %v405_v23, %v409_v24  ;;  %v465_v23 = vld [vmem:[#allocation5 + $0xa78] sm:$0xff]  ;;  %v13637_v24 = vcombine.low %v452_v15, %v456_v46 }
 0x202   :  { %3855 = vmatpush1.bf16.msra.mxu0 %v13573_v48  ;;  %4067 = vmatpush1.bf16.msra.mxu1 %v13575_v49  ;;  %v13631_v48 = vcombine.low %v445_v38, %v449_v39  ;;  %v13638_v49 = vcombine.high %v452_v15, %v456_v46  ;;  %v505_v38 = vld [vmem:[#allocation5 + $0xbb8] sm:$0xff]  ;;  %v512_v15 = vld [vmem:[#allocation5 + $0xbf0] sm:$0xff] }
 0x203   :  { %3856 = vmatprep.subr.bf16.mxu0 %v13582_v51  ;;  %4068 = vmatprep.subr.bf16.mxu1 %v13584_v25  ;;  %v13640_v51 = vcombine.high %v453_v35, %v457_v36  ;;  %v460_v25 = vld [vmem:[#allocation5 + $0xa50] sm:$0xff]  ;;  %v509_v46 = vld [vmem:[#allocation5 + $0xbd8] sm:$0xff] }
 0x204   :  { %3843 = vmatprep.mubr.bf16.mxu0 %v15765_v45  ;;  %4055 = vmatprep.mubr.bf16.mxu1 %v15765_v45  ;;  %v13599_v45 = vcombine.low %v413_v4, %v417_v5  ;;  %v473_v4 = vld [vmem:[#allocation5 + $0xab8] sm:$0xff]  ;;  %v13645_v5 = vcombine.low %v460_v25, %v464_v52 }
 0x206   :  { %3857 = vmatpush1.bf16.msra.mxu0 %v13581_v60  ;;  %4069 = vmatpush1.bf16.msra.mxu1 %v13583_v61  ;;  %v13639_v60 = vcombine.low %v453_v35, %v457_v36  ;;  %v13646_v61 = vcombine.high %v460_v25, %v464_v52  ;;  %v513_v35 = vld [vmem:[#allocation5 + $0xbf8] sm:$0xff]  ;;  %v520_v25 = vld [vmem:[#allocation5 + $0xc30] sm:$0xff] }
 0x207   :  { %3858 = vmatprep.subr.bf16.mxu0 %v13590_v62  ;;  %4070 = vmatprep.subr.bf16.mxu1 %v13592_v63  ;;  %v13648_v62 = vcombine.high %v461_v55, %v465_v23  ;;  %v468_v63 = vld [vmem:[#allocation5 + $0xa90] sm:$0xff]  ;;  %v517_v52 = vld [vmem:[#allocation5 + $0xc18] sm:$0xff] }
 0x208   :  { %v13653_v11 = vcombine.low %v468_v63, %v472_v34 }
 0x209   :  { %3844 = vmatmul.mubr.bf16.gmra.mrb[12].mxu0 %v15771_v56  ;;  %4056 = vmatmul.mubr.bf16.gmra.mrb[12].mxu1 %v15771_v56  ;;  %v13614_v56 = vcombine.high %v428_v14, %v432_v16  ;;  %v488_v14 = vld [vmem:[#allocation5 + $0xb30] sm:$0xff]  ;;  %v485_v16 = vld [vmem:[#allocation5 + $0xb18] sm:$0xff] }
 0x20a   :  { %3859 = vmatpush1.bf16.msra.mxu0 %v13589_v6  ;;  %4071 = vmatpush1.bf16.msra.mxu1 %v13591_v31  ;;  %v13647_v6 = vcombine.low %v461_v55, %v465_v23  ;;  %v13654_v31 = vcombine.high %v468_v63, %v472_v34  ;;  %v521_v55 = vld [vmem:[#allocation5 + $0xc38] sm:$0xff]  ;;  %v528_v63 = vld [vmem:[#allocation5 + $0xc70] sm:$0xff] }
 0x20b   :  { %3860 = vmatprep.subr.bf16.mxu0 %v13598_v7  ;;  %4072 = vmatprep.subr.bf16.mxu1 %v13600_v8  ;;  %v13656_v7 = vcombine.high %v469_v0, %v473_v4  ;;  %v476_v8 = vld [vmem:[#allocation5 + $0xad0] sm:$0xff]  ;;  %v525_v34 = vld [vmem:[#allocation5 + $0xc58] sm:$0xff] }
 0x20c   :  { %3886 = vmatprep.mubr.bf16.mxu0 %v15779_v2  ;;  %4098 = vmatprep.mubr.bf16.mxu1 %v15779_v2  ;;  %v13624_v2 = vcombine.high %v437_v54, %v441_v27  ;;  %v13661_v18 = vcombine.low %v476_v8, %v480_v9  ;;  %v497_v54 = vld [vmem:[#allocation5 + $0xb78] sm:$0xff] }
 0x20e   :  { %3861 = vmatpush1.bf16.msra.mxu0 %v13597_v13  ;;  %4073 = vmatpush1.bf16.msra.mxu1 %v13599_v45  ;;  %v13655_v13 = vcombine.low %v469_v0, %v473_v4  ;;  %v13662_v45 = vcombine.high %v476_v8, %v480_v9  ;;  %v529_v0 = vld [vmem:[#allocation5 + $0xc78] sm:$0xff]  ;;  %v532_v8 = vld [vmem:[#allocation5 + $0xc90] sm:$0xff] }
 0x20f   :  { %3862 = vmatprep.subr.bf16.mxu0 %v13606_v57  ;;  %4074 = vmatprep.subr.bf16.mxu1 %v13608_v59  ;;  %v13664_v57 = vcombine.high %v477_v10, %v481_v43  ;;  %v484_v59 = vld [vmem:[#allocation5 + $0xb10] sm:$0xff] }
 0x210   :  { %v13669_v27 = vcombine.low %v484_v59, %v488_v14  ;;  %v536_v9 = vld [vmem:[#allocation5 + $0xcb0] sm:$0xff] }
 0x212   :  { %3863 = vmatpush1.bf16.msra.mxu0 %v13605_v19  ;;  %4075 = vmatpush1.bf16.msra.mxu1 %v13607_v20  ;;  %v13663_v19 = vcombine.low %v477_v10, %v481_v43  ;;  %v13670_v20 = vcombine.high %v484_v59, %v488_v14  ;;  %v533_v10 = vld [vmem:[#allocation5 + $0xc98] sm:$0xff]  ;;  %v15845_v59 = vld [vmem:[#allocation5 + $0xcd0] sm:$0xff] }
 0x213   :  { %3864 = vmatprep.subr.bf16.mxu0 %v13614_v56  ;;  %4076 = vmatprep.subr.bf16.mxu1 %v13616_v21  ;;  %v13672_v56 = vcombine.high %v485_v16, %v489_v17  ;;  %v492_v21 = vld [vmem:[#allocation5 + $0xb50] sm:$0xff]  ;;  %v537_v43 = vld [vmem:[#allocation5 + $0xcb8] sm:$0xff] }
 0x214   :  { %v13677_v39 = vcombine.low %v492_v21, %v496_v26  ;;  %v13720_v14 = vcombine.high %v533_v10, %v537_v43 }
 0x216   :  { %3865 = vmatpush1.bf16.msra.mxu0 %v13613_v28  ;;  %4077 = vmatpush1.bf16.msra.mxu1 %v13615_v29  ;;  %v13671_v28 = vcombine.low %v485_v16, %v489_v17  ;;  %v13678_v29 = vcombine.high %v492_v21, %v496_v26  ;;  %v15847_v16 = vld [vmem:[#allocation5 + $0xcf0] sm:$0xff]  ;;  %v15849_v17 = vld [vmem:[#allocation5 + $0xcd8] sm:$0xff]  ;;  %v642_v26 = vld [vmem:[#allocation7] sm:$0xff] }
 0x217   :  { %3866 = vmatprep.subr.bf16.mxu0 %v13622_v32  ;;  %4078 = vmatprep.subr.bf16.mxu1 %v13624_v2  ;;  %v13680_v32 = vcombine.high %v493_v53, %v497_v54  ;;  %v500_v2 = vld [vmem:[#allocation5 + $0xb90] sm:$0xff]  ;;  %v15861_v21 = vld [vmem:[#allocation5 + $0xd38] sm:$0xff] }
 0x218   :  { %v13685_v36 = vcombine.low %v500_v2, %v504_v33 }
 0x21a   :  { %3867 = vmatpush1.bf16.msra.mxu0 %v13621_v58  ;;  %4079 = vmatpush1.bf16.msra.mxu1 %v13623_v40  ;;  %v13679_v58 = vcombine.low %v493_v53, %v497_v54  ;;  %v13686_v40 = vcombine.high %v500_v2, %v504_v33  ;;  %v15879_v2 = vld [vmem:[#allocation5 + $0xd70] sm:$0xff]  ;;  %v15881_v33 = vld [vmem:[#allocation5 + $0xd58] sm:$0xff] }
 0x21b   :  { %3868 = vmatprep.subr.bf16.mxu0 %v13630_v41  ;;  %4080 = vmatprep.subr.bf16.mxu1 %v13632_v44  ;;  %v13688_v41 = vcombine.high %v501_v37, %v505_v38  ;;  %v508_v44 = vld [vmem:[#allocation5 + $0xbd0] sm:$0xff] }
 0x21c   :  { %v13693_v23 = vcombine.low %v508_v44, %v512_v15 }
 0x21e   :  { %3869 = vmatpush1.bf16.msra.mxu0 %v13629_v47  ;;  %4081 = vmatpush1.bf16.msra.mxu1 %v13631_v48  ;;  %v13687_v47 = vcombine.low %v501_v37, %v505_v38  ;;  %v13694_v48 = vcombine.high %v508_v44, %v512_v15  ;;  %v15883_v37 = vld [vmem:[#allocation5 + $0xd78] sm:$0xff]  ;;  %v13725_v38 = vcombine.low %v15845_v59, %v15847_v16 }
 0x21f   :  { %3870 = vmatprep.subr.bf16.mxu0 %v13638_v49  ;;  %4082 = vmatprep.subr.bf16.mxu1 %v13640_v51  ;;  %v13696_v49 = vcombine.high %v509_v46, %v513_v35  ;;  %v516_v51 = vld [vmem:[#allocation5 + $0xc10] sm:$0xff]  ;;  %v15895_v44 = vld [vmem:[#allocation5 + $0xdb8] sm:$0xff] }
 0x220   :  { %v13701_v4 = vcombine.low %v516_v51, %v520_v25 }
 0x222   :  { %3871 = vmatpush1.bf16.msra.mxu0 %v13637_v24  ;;  %4083 = vmatpush1.bf16.msra.mxu1 %v13639_v60  ;;  %v13695_v24 = vcombine.low %v509_v46, %v513_v35  ;;  %v13702_v60 = vcombine.high %v516_v51, %v520_v25 }
 0x223   :  { %3872 = vmatprep.subr.bf16.mxu0 %v13646_v61  ;;  %4084 = vmatprep.subr.bf16.mxu1 %v13648_v62  ;;  %v13704_v61 = vcombine.high %v517_v52, %v521_v55  ;;  %v524_v62 = vld [vmem:[#allocation5 + $0xc50] sm:$0xff] }
 0x226   :  { %3873 = vmatpush1.bf16.msra.mxu0 %v13645_v5  ;;  %4085 = vmatpush1.bf16.msra.mxu1 %v13647_v6  ;;  %v644_v5 = vlaneseq  ;;  %v13703_v6 = vcombine.low %v517_v52, %v521_v55  ;;  %v15920_v55 = vld [vmem:[#allocation5 + $0xdf8] sm:$0xff] }
 0x227   :  { %3874 = vmatprep.subr.bf16.mxu0 %v13654_v31  ;;  %4086 = vmatprep.subr.bf16.mxu1 %v13656_v7  ;;  %v13710_v31 = vcombine.high %v524_v62, %v528_v63  ;;  %v13712_v7 = vcombine.high %v525_v34, %v529_v0 }
 0x22a   :  { %3875 = vmatpush1.bf16.msra.mxu0 %v13653_v11  ;;  %4087 = vmatpush1.bf16.msra.mxu1 %v13655_v13  ;;  %v13709_v11 = vcombine.low %v524_v62, %v528_v63  ;;  %v15843_v13 = vshrl.u32 %v644_v5, 7  ;;  %v15935_v63 = vld [vmem:[#allocation5 + $0xe18] sm:$0xff]  ;;  %v13744_v5 = vcombine.high %v15881_v33, %v15883_v37 }
 0x22b   :  { %3876 = vmatprep.subr.bf16.mxu0 %v13662_v45  ;;  %4088 = vmatprep.subr.bf16.mxu1 %v13664_v57  ;;  %v13711_v45 = vcombine.low %v525_v34, %v529_v0  ;;  %v13718_v57 = vcombine.high %v532_v8, %v536_v9  ;;  %v15937_v34 = vld [vmem:[#allocation5 + $0xe38] sm:$0xff]  ;;  %v15939_v0 = vld [vmem:[#allocation5 + $0xe50] sm:$0xff] }
 0x22c   :  { %17987 = vst [vmem:[#allocation23_spill] sm:$0xff] %v15843_v13  ;;  %v15864_v53 = vsub.s32 0, %v15843_v13  ;;  %v15867_v54 = vsub.s32 2, %v15843_v13 }
 0x22e   :  { %3877 = vmatpush1.bf16.msra.mxu0 %v13661_v18  ;;  %4089 = vmatpush1.bf16.msra.mxu1 %v13663_v19  ;;  %v15851_v18 = vld [vmem:[#allocation5 + $0xcf8] sm:$0xff]  ;;  %v15856_v19 = vld [vmem:[#allocation5 + $0xd30] sm:$0xff]  ;;  %17988 = vst [vmem:[#allocation24_spill] sm:$0xff] %v15864_v53  ;;  %17989 = vst [vmem:[#allocation25_spill] sm:$0xff] %v15867_v54  ;;  %v15915_v25 = vrot.slane %v642_v26, %v15864_v53  ;;  %v15918_v52 = vrot.slane %v642_v26, %v15867_v54 }
 0x22f   :  { %3878 = vmatprep.subr.bf16.mxu0 %v13670_v20  ;;  %4090 = vmatprep.subr.bf16.mxu1 %v13672_v56  ;;  %v15858_v20 = vld [vmem:[#allocation5 + $0xd18] sm:$0xff]  ;;  %v13717_v56 = vcombine.low %v532_v8, %v536_v9  ;;  %v13727_v15 = vcombine.low %v15849_v17, %v15851_v18  ;;  %v16038_v9 = vld [vmem:[#allocation5 + $0xfb0] sm:$0xff] }
 0x230   :  { %v13736_v51 = vcombine.high %v15858_v20, %v15861_v21  ;;  %v16034_v8 = vld [vmem:[#allocation5 + $0xf78] sm:$0xff]  ;;  %17994 = vst [vmem:[#allocation30_spill] sm:$0xff] %v16038_v9 }
 0x231   :  { %17992 = vst [vmem:[#allocation28_spill] sm:$0xff] %v16034_v8 }
 0x232   :  { %3879 = vmatpush1.bf16.msra.mxu0 %v13669_v27  ;;  %4091 = vmatpush1.bf16.msra.mxu1 %v13671_v28  ;;  %v15869_v27 = vld [vmem:[#allocation5 + $0xd50] sm:$0xff]  ;;  %v13719_v28 = vcombine.low %v533_v10, %v537_v43  ;;  %v16021_v10 = vld [vmem:[#allocation5 + $0xf58] sm:$0xff] }
 0x233   :  { %3880 = vmatprep.subr.bf16.mxu0 %v13678_v29  ;;  %4092 = vmatprep.subr.bf16.mxu1 %v13680_v32  ;;  %v13726_v29 = vcombine.high %v15845_v59, %v15847_v16  ;;  %v15877_v32 = vsub.s32 3, %v15843_v13  ;;  %v13742_v62 = vcombine.high %v15869_v27, %v15879_v2  ;;  %v15993_v16 = vld [vmem:[#allocation5 + $0xf10] sm:$0xff]  ;;  %v16005_v59 = vld [vmem:[#allocation5 + $0xf18] sm:$0xff] }
 0x234   :  { %v16036_v43 = vld [vmem:[#allocation5 + $0xf90] sm:$0xff] }
 0x235   :  { %17991 = vst [vmem:[#allocation27_spill] sm:$0xff] %v15877_v32  ;;  %17993 = vst [vmem:[#allocation29_spill] sm:$0xff] %v16036_v43 }
 0x236   :  { %3881 = vmatpush1.bf16.msra.mxu0 %v13677_v39  ;;  %4093 = vmatpush1.bf16.msra.mxu1 %v13679_v58  ;;  %v13728_v39 = vcombine.high %v15849_v17, %v15851_v18  ;;  %v15889_v58 = vld [vmem:[#allocation5 + $0xd90] sm:$0xff]  ;;  %v15977_v18 = vld [vmem:[#allocation5 + $0xeb8] sm:$0xff] }
 0x237   :  { %3882 = vmatprep.subr.bf16.mxu0 %v13686_v40  ;;  %4094 = vmatprep.subr.bf16.mxu1 %v13688_v41  ;;  %v15891_v40 = vld [vmem:[#allocation5 + $0xdb0] sm:$0xff]  ;;  %v15893_v41 = vld [vmem:[#allocation5 + $0xd98] sm:$0xff] }
 0x238   :  { %v16007_v17 = vld [vmem:[#allocation5 + $0xf38] sm:$0xff] }
 0x23a   :  { %3883 = vmatpush1.bf16.msra.mxu0 %v13685_v36  ;;  %4095 = vmatpush1.bf16.msra.mxu1 %v13687_v47  ;;  %v13735_v36 = vcombine.low %v15858_v20, %v15861_v21  ;;  %v15905_v47 = vld [vmem:[#allocation5 + $0xdd0] sm:$0xff] }
 0x23b   :  { %3884 = vmatprep.subr.bf16.mxu0 %v13694_v48  ;;  %4096 = vmatprep.subr.bf16.mxu1 %v13696_v49  ;;  %v15907_v48 = vld [vmem:[#allocation5 + $0xdf0] sm:$0xff]  ;;  %v15909_v49 = vld [vmem:[#allocation5 + $0xdd8] sm:$0xff] }
 0x23c   :  { %v18000_v3 = vcombine.high %v15905_v47, %v15907_v48  ;;  %v18002_v8 = vcombine.low %v15905_v47, %v15907_v48 }
 0x23e   :  { %3885 = vmatpush1.bf16.msra.mxu0 %v13693_v23  ;;  %4097 = vmatpush1.bf16.msra.mxu1 %v13695_v24  ;;  %v15922_v23 = vld [vmem:[#allocation5 + $0xe10] sm:$0xff] }
 0x23f   :  { %3907 = vmatprep.subr.bf16.mxu0 %v13702_v60  ;;  %4119 = vmatprep.subr.bf16.mxu1 %v13704_v61  ;;  %v15924_v24 = vld [vmem:[#allocation5 + $0xe30] sm:$0xff]  ;;  %v15931_v61 = vrot.slane %v642_v26, %v15877_v32 }
 0x241   :  { %3887 = vmatmul.mubr.bf16.vlgmr.msra.gmra.mrb[8].mxu0 %v15787_v1  ;;  %4099 = vmatmul.mubr.bf16.vlgmr.msra.gmra.mrb[8].mxu1 %v15787_v1  ;;  %v15854_v1 = vld [vmem:[#allocation5 + $0xd10] sm:$0xff] }
 0x242   :  { %3908 = vmatpush1.bf16.msra.mxu0 %v13701_v4  ;;  %4120 = vmatpush1.bf16.msra.mxu1 %v13703_v6  ;;  %v13733_v46 = vcombine.low %v15854_v1, %v15856_v19  ;;  %v13734_v35 = vcombine.high %v15854_v1, %v15856_v19  ;;  %v15947_v6 = vld [vmem:[#allocation5 + $0xe70] sm:$0xff] }
 0x243   :  { %3909 = vmatprep.subr.bf16.mxu0 %v13710_v31  ;;  %4121 = vmatprep.subr.bf16.mxu1 %v13712_v7  ;;  %v15949_v31 = vld [vmem:[#allocation5 + $0xe58] sm:$0xff] }
 0x244   :  { %3896 = vmatprep.mubr.bf16.mxu0 %v15789_v12  ;;  %4108 = vmatprep.mubr.bf16.mxu1 %v15789_v12  ;;  %v15874_v12 = vsub.s32 1, %v15843_v13  ;;  %v15951_v7 = vld [vmem:[#allocation5 + $0xe78] sm:$0xff] }
 0x246   :  { %3910 = vmatpush1.bf16.msra.mxu0 %v13709_v11  ;;  %4122 = vmatpush1.bf16.msra.mxu1 %v13711_v45  ;;  %17990 = vst [vmem:[#allocation26_spill] sm:$0xff] %v15874_v12  ;;  %v15928_v60 = vrot.slane %v642_v26, %v15874_v12  ;;  %v15962_v11 = vld [vmem:[#allocation5 + $0xe90] sm:$0xff] }
 0x247   :  { %3911 = vmatprep.subr.bf16.mxu0 %v13718_v57  ;;  %4123 = vmatprep.subr.bf16.mxu1 %v13720_v14  ;;  %v15964_v45 = vld [vmem:[#allocation5 + $0xeb0] sm:$0xff]  ;;  %v15966_v57 = vld [vmem:[#allocation5 + $0xe98] sm:$0xff] }
 0x248   :  { %v15981_v26 = vld [vmem:[#allocation5 + $0xef0] sm:$0xff] }
 0x249   :  { %3897 = vmatmul.mubr.bf16.gmra.mrb[12].mxu0 %v15795_v22  ;;  %4109 = vmatmul.mubr.bf16.gmra.mrb[12].mxu1 %v15795_v22  ;;  %v13741_v22 = vcombine.low %v15869_v27, %v15879_v2  ;;  %v16017_v14 = vld [vmem:[#allocation5 + $0xf50] sm:$0xff]  ;;  %v17995_v27 = vcombine.low %v15881_v33, %v15883_v37  ;;  %v17997_v33 = vcombine.high %v15893_v41, %v15895_v44 }
 0x24a   :  { %3912 = vmatpush1.bf16.msra.mxu0 %v13717_v56  ;;  %4124 = vmatpush1.bf16.msra.mxu1 %v13719_v28  ;;  %v15979_v56 = vld [vmem:[#allocation5 + $0xed0] sm:$0xff] }
 0x24b   :  { %3913 = vmatprep.subr.bf16.mxu0 %v13726_v29  ;;  %4125 = vmatprep.subr.bf16.mxu1 %v13728_v39  ;;  %v15991_v39 = vld [vmem:[#allocation5 + $0xef8] sm:$0xff]  ;;  %v16003_v29 = vld [vmem:[#allocation5 + $0xf30] sm:$0xff] }
 0x24c   :  { %3939 = vmatprep.mubr.bf16.mxu0 %v15803_v30  ;;  %4151 = vmatprep.mubr.bf16.mxu1 %v15803_v30  ;;  %v16019_v28 = vld [vmem:[#allocation5 + $0xf70] sm:$0xff]  ;;  %v16049_v30 = vld [vmem:[#allocation5 + $0xf98] sm:$0xff] }
 0x24e   :  { %3914 = vmatpush1.bf16.msra.mxu0 %v13725_v38  ;;  %4126 = vmatpush1.bf16.msra.mxu1 %v13727_v15  ;;  %v15989_v38 = vld [vmem:[#allocation5 + $0xed8] sm:$0xff] }
 0x24f   :  { %3915 = vmatprep.subr.bf16.mxu0 %v13734_v35  ;;  %4127 = vmatprep.subr.bf16.mxu1 %v13736_v51  ;;  %v16051_v15 = vld [vmem:[#allocation5 + $0xfb8] sm:$0xff] }
 0x252   :  { %3916 = vmatpush1.bf16.msra.mxu0 %v13733_v46  ;;  %4128 = vmatpush1.bf16.msra.mxu1 %v13735_v36 }
 0x253   :  { %3917 = vmatprep.subr.bf16.mxu0 %v13742_v62  ;;  %4129 = vmatprep.subr.bf16.mxu1 %v13744_v5 }
 0x254   :  { %v3517_v35 = vpop.f32.mrb[0].mxu0  ;;  %v3729_v46 = vpop.f32.mrb[0].mxu1 }
 0x255   :  { %v16062_v19 = vadd.f32 %v3517_v35, %v15915_v25  ;;  %v3519_v1 = vpop.f32.mrb[1].mxu0  ;;  %v16071_v51 = vadd.f32 %v3729_v46, %v15918_v52  ;;  %v3731_v62 = vpop.f32.mrb[1].mxu1 }
 0x256   :  { %v16074_v36 = vadd.f32 %v3519_v1, %v15928_v60  ;;  %v3521_v35 = vpop.f32.mrb[2].mxu0  ;;  %3918 = vmatpush1.bf16.msra.mxu0 %v13741_v22  ;;  %v16086_v46 = vadd.f32 %v3731_v62, %v15931_v61  ;;  %v3733_v4 = vpop.f32.mrb[2].mxu1  ;;  %4130 = vmatpush1.bf16.msra.mxu1 %v17995_v27  ;;  %v17996_v22 = vcombine.high %v15889_v58, %v15891_v40 }
 0x257   :  { %v4172_v21 = vmul.f32 %v16062_v19, %v16062_v19  ;;  %v16089_v1 = vadd.f32 %v3521_v35, %v15915_v25  ;;  %v3523_v2 = vpop.f32.mrb[3].mxu0  ;;  %v4174_v20 = vmul.f32 %v16071_v51, %v16071_v51  ;;  %v16102_v5 = vadd.f32 %v3733_v4, %v15918_v52  ;;  %v3735_v32 = vpop.f32.mrb[3].mxu1  ;;  %4131 = vmatprep.subr.bf16.mxu1 %v17997_v33 }
 0x258   :  { %3919 = vmatprep.subr.bf16.mxu0 %v17996_v22  ;;  %v4173_v62 = vmul.f32 %v16074_v36, %v16074_v36  ;;  %v16105_v35 = vadd.f32 %v3523_v2, %v15928_v60  ;;  %v4175_v27 = vmul.f32 %v16086_v46, %v16086_v46  ;;  %v16116_v54 = vadd.f32 %v3735_v32, %v15931_v61 }
 0x259   :  { %v4204_v37 = vmul.f32 %v16062_v19, %v4172_v21  ;;  %v4180_v22 = vmul.f32 %v16089_v1, %v16089_v1  ;;  %v4206_v4 = vmul.f32 %v16071_v51, %v4174_v20  ;;  %v4182_v12 = vmul.f32 %v16102_v5, %v16102_v5 }
 0x25a   :  { %v4205_v2 = vmul.f32 %v16074_v36, %v4173_v62  ;;  %v4181_v33 = vmul.f32 %v16105_v35, %v16105_v35  ;;  %v17998_v21 = vcombine.low %v15889_v58, %v15891_v40  ;;  %v4207_v13 = vmul.f32 %v16086_v46, %v4175_v27 }
 0x25b   :  { %v4236_v53 = vmul.f32 0.044715, %v4204_v37  ;;  %v4212_v32 = vmul.f32 %v16089_v1, %v4180_v22  ;;  %v4183_v20 = vmul.f32 %v16116_v54, %v16116_v54  ;;  %v17999_v62 = vcombine.low %v15893_v41, %v15895_v44 }
 0x25c   :  { %3920 = vmatpush1.bf16.msra.mxu0 %v17998_v21  ;;  %v4238_v50 = vmul.f32 0.044715, %v4206_v4  ;;  %v4237_v42 = vmul.f32 0.044715, %v4205_v2  ;;  %v4214_v58 = vmul.f32 %v16102_v5, %v4182_v12  ;;  %v4213_v40 = vmul.f32 %v16105_v35, %v4181_v33  ;;  %v3527_v37 = vpop.f32.mrb[4].mxu0 }
 0x25d   :  { %4132 = vmatpush1.bf16.msra.mxu1 %v17999_v62  ;;  %3921 = vmatprep.subr.bf16.mxu0 %v18000_v3  ;;  %v18001_v27 = vcombine.high %v15909_v49, %v15920_v55  ;;  %v4268_v22 = vadd.f32 %v16062_v19, %v4236_v53  ;;  %v4239_v21 = vmul.f32 0.044715, %v4207_v13  ;;  %v4244_v41 = vmul.f32 0.044715, %v4212_v32  ;;  %v3739_v62 = vpop.f32.mrb[4].mxu1  ;;  %v3529_v9 = vpop.f32.mrb[5].mxu0 }
 0x25e   :  { %v4215_v44 = vmul.f32 %v16116_v54, %v4183_v20  ;;  %v4270_v3 = vadd.f32 %v16071_v51, %v4238_v50  ;;  %v4269_v4 = vadd.f32 %v16074_v36, %v4237_v42  ;;  %v4246_v12 = vmul.f32 0.044715, %v4214_v58  ;;  %v3741_v33 = vpop.f32.mrb[5].mxu1  ;;  %v3531_v43 = vpop.f32.mrb[6].mxu0 }
 0x25f   :  { %4133 = vmatprep.subr.bf16.mxu1 %v18001_v27  ;;  %v4245_v2 = vmul.f32 0.044715, %v4213_v40  ;;  %v4300_v27 = vmul.f32 0.7978846, %v4268_v22  ;;  %v4271_v13 = vadd.f32 %v16086_v46, %v4239_v21  ;;  %v4276_v53 = vadd.f32 %v16089_v1, %v4244_v41  ;;  %v3743_v20 = vpop.f32.mrb[6].mxu1  ;;  %v16154_v42 = vpop.f32.mrb[7].mxu0 }
 0x260   :  { %3922 = vmatpush1.bf16.msra.mxu0 %v18002_v8  ;;  %v4247_v32 = vmul.f32 0.044715, %v4215_v44  ;;  %v18003_v50 = vcombine.low %v15909_v49, %v15920_v55  ;;  %v18004_v58 = vcombine.high %v15922_v23, %v15924_v24  ;;  %v4302_v40 = vmul.f32 0.7978846, %v4270_v3  ;;  %v16161_v22 = vpop.f32.mrb[7].mxu1 }
 0x261   :  { %v4301_v47 = vmul.f32 0.7978846, %v4269_v4  ;;  %v4278_v48 = vadd.f32 %v16102_v5, %v4246_v12  ;;  %v4277_v8 = vadd.f32 %v16105_v35, %v4245_v2  ;;  %v18005_v21 = vcombine.high %v15935_v63, %v15937_v34 }
 0x262   :  { %4134 = vmatpush1.bf16.msra.mxu1 %v18003_v50  ;;  %3923 = vmatprep.subr.bf16.mxu0 %v18004_v58  ;;  %15309 = vtanh.f32 %v4300_v27  ;;  %v4303_v49 = vmul.f32 0.7978846, %v4271_v13  ;;  %v4308_v55 = vmul.f32 0.7978846, %v4276_v53  ;;  %v4279_v41 = vadd.f32 %v16116_v54, %v4247_v32 }
 0x263   :  { %4135 = vmatprep.subr.bf16.mxu1 %v18005_v21  ;;  %15311 = vtanh.f32 %v4302_v40  ;;  %v4310_v44 = vmul.f32 0.7978846, %v4278_v48  ;;  %v4309_v50 = vmul.f32 0.7978846, %v4277_v8  ;;  %v16168_v3 = vadd.f32 %v3527_v37, %v15915_v25  ;;  %v16221_v48 = vld [vmem:[#allocation5 + $0xfd0] sm:$0xff] }
 0x264   :  { %v18006_v4 = vcombine.low %v15922_v23, %v15924_v24  ;;  %15313 = vtanh.f32 %v4301_v47  ;;  %v4311_v12 = vmul.f32 0.7978846, %v4279_v41  ;;  %v16174_v2 = vadd.f32 %v3739_v62, %v15918_v52 }
 0x265   :  { %v16177_v27 = vadd.f32 %v3529_v9, %v15928_v60  ;;  %v18007_v13 = vcombine.low %v15935_v63, %v15937_v34  ;;  %v18008_v37 = vcombine.high %v15939_v0, %v15947_v6  ;;  %15315 = vtanh.f32 %v4303_v49 }
 0x266   :  { %3924 = vmatpush1.bf16.msra.mxu0 %v18006_v4  ;;  %v4188_v23 = vmul.f32 %v16168_v3, %v16168_v3  ;;  %v16188_v24 = vadd.f32 %v3741_v33, %v15931_v61  ;;  %v16191_v62 = vadd.f32 %v3531_v43, %v15915_v25  ;;  %v18009_v9 = vcombine.high %v15949_v31, %v15951_v7 }
 0x267   :  { %4136 = vmatpush1.bf16.msra.mxu1 %v18007_v13  ;;  %3925 = vmatprep.subr.bf16.mxu0 %v18008_v37  ;;  %15317 = vtanh.f32 %v4308_v55  ;;  %v4190_v63 = vmul.f32 %v16174_v2, %v16174_v2  ;;  %v4189_v34 = vmul.f32 %v16177_v27, %v16177_v27  ;;  %v16201_v53 = vadd.f32 %v3743_v20, %v15918_v52  ;;  %v16239_v37 = vld [vmem:[#allocation5 + $0xfd8] sm:$0xff] }
 0x268   :  { %4137 = vmatprep.subr.bf16.mxu1 %v18009_v9  ;;  %15319 = vtanh.f32 %v4310_v44  ;;  %v4220_v33 = vmul.f32 %v16168_v3, %v4188_v23  ;;  %v4191_v25 = vmul.f32 %v16188_v24, %v16188_v24  ;;  %v4196_v43 = vmul.f32 %v16191_v62, %v16191_v62  ;;  %v16241_v23 = vld [vmem:[#allocation5 + $0xff8] sm:$0xff] }
 0x269   :  { %v18010_v32 = vcombine.low %v15939_v0, %v15947_v6  ;;  %15321 = vtanh.f32 %v4309_v50  ;;  %v4222_v58 = vmul.f32 %v16174_v2, %v4190_v63  ;;  %v4221_v40 = vmul.f32 %v16177_v27, %v4189_v34  ;;  %v16223_v0 = vld [vmem:[#allocation5 + $0xff0] sm:$0xff] }
 0x26a   :  { %v4198_v52 = vmul.f32 %v16201_v53, %v16201_v53  ;;  %v18011_v20 = vcombine.low %v15949_v31, %v15951_v7  ;;  %v18012_v47 = vcombine.high %v15962_v11, %v15964_v45  ;;  %15323 = vtanh.f32 %v4311_v12 }
 0x26b   :  { %3926 = vmatpush1.bf16.msra.mxu0 %v18010_v32  ;;  %v4252_v6 = vmul.f32 0.044715, %v4220_v33  ;;  %v4223_v8 = vmul.f32 %v16188_v24, %v4191_v25  ;;  %v4228_v21 = vmul.f32 %v16191_v62, %v4196_v43  ;;  %v18013_v49 = vcombine.high %v15966_v57, %v15977_v18 }
 0x26c   :  { %4138 = vmatpush1.bf16.msra.mxu1 %v18011_v20  ;;  %3927 = vmatprep.subr.bf16.mxu0 %v18012_v47  ;;  %v4254_v31 = vmul.f32 0.044715, %v4222_v58  ;;  %v4253_v7 = vmul.f32 0.044715, %v4221_v40  ;;  %v4230_v55 = vmul.f32 %v16201_v53, %v4198_v52  ;;  %v13816_v41 = vcombine.high %v16049_v30, %v16051_v15  ;;  %v15310_v9 = vpop.eup %15309 }
 0x26d   :  { %4139 = vmatprep.subr.bf16.mxu1 %v18013_v49  ;;  %v4284_v44 = vadd.f32 %v16168_v3, %v4252_v6  ;;  %v4255_v50 = vmul.f32 0.044715, %v4223_v8  ;;  %v4260_v4 = vmul.f32 0.044715, %v4228_v21  ;;  %v18014_v12 = vcombine.low %v15962_v11, %v15964_v45  ;;  %v15312_v43 = vpop.eup %15311 }
 0x26e   :  { %v13822_v13 = vcombine.high %v16221_v48, %v16223_v0  ;;  %v4286_v63 = vadd.f32 %v16174_v2, %v4254_v31  ;;  %v4285_v34 = vadd.f32 %v16177_v27, %v4253_v7  ;;  %v4262_v33 = vmul.f32 0.044715, %v4230_v55 }
 0x26f   :  { %3928 = vmatpush1.bf16.msra.mxu0 %v18014_v12  ;;  %v16247_v25 = vadd.f32 %v16154_v42, %v15928_v60  ;;  %v18015_v11 = vcombine.low %v15966_v57, %v15977_v18  ;;  %v18016_v45 = vcombine.high %v15979_v56, %v15981_v26  ;;  %v4364_v32 = vadd.f32 1.0, %v15310_v9  ;;  %v15314_v60 = vpop.eup %15313 }
 0x270   :  { %v4316_v58 = vmul.f32 0.7978846, %v4284_v44  ;;  %v4287_v40 = vadd.f32 %v16188_v24, %v4255_v50  ;;  %v4292_v52 = vadd.f32 %v16191_v62, %v4260_v4  ;;  %v18017_v20 = vcombine.high %v15989_v38, %v15991_v39  ;;  %v15316_v6 = vpop.eup %15315 }
 0x271   :  { %4140 = vmatpush1.bf16.msra.mxu1 %v18015_v11  ;;  %3929 = vmatprep.subr.bf16.mxu0 %v18016_v45  ;;  %v4366_v42 = vadd.f32 1.0, %v15312_v43  ;;  %v4318_v47 = vmul.f32 0.7978846, %v4286_v63  ;;  %v4317_v57 = vmul.f32 0.7978846, %v4285_v34  ;;  %v13824_v18 = vcombine.high %v16239_v37, %v16241_v23  ;;  %v15318_v7 = vpop.eup %15317 }
 0x272   :  { %4141 = vmatprep.subr.bf16.mxu1 %v18017_v20  ;;  %v4396_v8 = vmul.f32 0.5, %v4364_v32  ;;  %v4365_v21 = vadd.f32 1.0, %v15314_v60  ;;  %15325 = vtanh.f32 %v4316_v58  ;;  %v4294_v49 = vadd.f32 %v16201_v53, %v4262_v33  ;;  %v15320_v9 = vpop.eup %15319 }
 0x273   :  { %v18018_v31 = vcombine.low %v15979_v56, %v15981_v26  ;;  %v4398_v55 = vmul.f32 0.5, %v4366_v42  ;;  %v4367_v44 = vadd.f32 1.0, %v15316_v6  ;;  %15327 = vtanh.f32 %v4318_v47 }
 0x274   :  { %v4324_v50 = vmul.f32 0.7978846, %v4292_v52  ;;  %v18019_v4 = vcombine.low %v15989_v38, %v15991_v39  ;;  %v18020_v12 = vcombine.high %v15993_v16, %v16003_v29  ;;  %v4372_v63 = vadd.f32 1.0, %v15318_v7  ;;  %v15322_v38 = vpop.eup %15321 }
 0x275   :  { %3930 = vmatpush1.bf16.msra.mxu0 %v18018_v31  ;;  %v4319_v34 = vmul.f32 0.7978846, %v4287_v40  ;;  %v4197_v56 = vmul.f32 %v16247_v25, %v16247_v25  ;;  %v16276_v26 = vadd.f32 %v16161_v22, %v15931_v61  ;;  %v18021_v33 = vcombine.high %v16005_v59, %v16007_v17  ;;  %v15324_v43 = vpop.eup %15323 }
 0x276   :  { %4142 = vmatpush1.bf16.msra.mxu1 %v18019_v4  ;;  %3931 = vmatprep.subr.bf16.mxu0 %v18020_v12  ;;  %v4428_v39 = vmul.f32 %v16062_v19, %v4396_v8  ;;  %v4397_v11 = vmul.f32 0.5, %v4365_v21  ;;  %v4374_v45 = vadd.f32 1.0, %v15320_v9  ;;  %15329 = vtanh.f32 %v4317_v57  ;;  %v18030_v4 = vld [vmem:[#allocation30_spill] sm:$0xff] }
 0x277   :  { %4143 = vmatprep.subr.bf16.mxu1 %v18021_v33  ;;  %v4430_v32 = vmul.f32 %v16071_v51, %v4398_v55  ;;  %v4404_v58 = vmul.f32 0.5, %v4372_v63  ;;  %v4373_v40 = vadd.f32 1.0, %v15322_v38  ;;  %15331 = vtanh.f32 %v4324_v50  ;;  %v18029_v50 = vld [vmem:[#allocation29_spill] sm:$0xff]  ;;  %v4477_v33 = vld [vmem:[#allocation8 + $0x8] sm:$0xff] }
 0x278   :  { %v18022_v61 = vcombine.low %v15993_v16, %v16003_v29  ;;  %v4399_v22 = vmul.f32 0.5, %v4367_v44  ;;  %v4406_v52 = vmul.f32 0.5, %v4374_v45  ;;  %v4375_v20 = vadd.f32 1.0, %v15324_v43  ;;  %v18025_v29 = vld [vmem:[#allocation28_spill] sm:$0xff]  ;;  %v4485_v38 = vld [vmem:[#allocation8 + $0x48] sm:$0xff] }
 0x279   :  { %v4326_v60 = vmul.f32 0.7978846, %v4294_v49  ;;  %v18023_v19 = vcombine.low %v16005_v59, %v16007_v17  ;;  %v18024_v42 = vcombine.high %v16017_v14, %v16019_v28  ;;  %v4436_v51 = vmul.f32 %v16089_v1, %v4404_v58 }
 0x27a   :  { %3932 = vmatpush1.bf16.msra.mxu0 %v18022_v61  ;;  %v4405_v47 = vmul.f32 0.5, %v4373_v40  ;;  %v4229_v57 = vmul.f32 %v16247_v25, %v4197_v56  ;;  %v4199_v16 = vmul.f32 %v16276_v26, %v16276_v26  ;;  %v18026_v6 = vcombine.high %v16021_v10, %v18025_v29 }
 0x27b   :  { %4144 = vmatpush1.bf16.msra.mxu1 %v18023_v19  ;;  %3933 = vmatprep.subr.bf16.mxu0 %v18024_v42  ;;  %v4429_v8 = vmul.f32 %v16074_v36, %v4397_v11  ;;  %v4438_v59 = vmul.f32 %v16102_v5, %v4406_v52  ;;  %v4407_v17 = vmul.f32 0.5, %v4375_v20  ;;  %15333 = vtanh.f32 %v4326_v60  ;;  %v4492_v20 = vld [vmem:[#allocation8 + $0x80] sm:$0xff]  ;;  %v4493_v19 = vld [vmem:[#allocation8 + $0x88] sm:$0xff] }
 0x27c   :  { %4145 = vmatprep.subr.bf16.mxu1 %v18026_v6  ;;  %v16301_v21 = vpack.c.bf16 %v4436_v51, %v4428_v39  ;;  %v4437_v1 = vmul.f32 %v16105_v35, %v4405_v47  ;;  %v4261_v49 = vmul.f32 0.044715, %v4229_v57  ;;  %v4231_v31 = vmul.f32 %v16276_v26, %v4199_v16  ;;  %v15326_v12 = vpop.eup %15325 }
 0x27d   :  { %v18027_v7 = vcombine.low %v16017_v14, %v16019_v28  ;;  %v4431_v55 = vmul.f32 %v16086_v46, %v4399_v22  ;;  %v16309_v44 = vpack.c.bf16 %v4438_v59, %v4430_v32  ;;  %v4439_v36 = vmul.f32 %v16116_v54, %v4407_v17  ;;  %v4476_v54 = vld [vmem:[#allocation8] sm:$0xff]  ;;  %v15328_v63 = vpop.eup %15327  ;;  %v4509_v59 = vld [vmem:[#allocation8 + $0x108] sm:$0xff] }
 0x27e   :  { %v18028_v5 = vcombine.low %v16021_v10, %v18025_v29  ;;  %v18031_v35 = vcombine.high %v18029_v50, %v18030_v4  ;;  %v16318_v9 = vpack.c.bf16 %v4437_v1, %v4429_v8  ;;  %15335 = vtanh.f32 %v4319_v34  ;;  %v4484_v46 = vld [vmem:[#allocation8 + $0x40] sm:$0xff]  ;;  %v18034_v8 = vld [vmem:[#allocation20_spill] sm:$0xff]  ;;  %v4517_v17 = vld [vmem:[#allocation8 + $0x148] sm:$0xff] }
 0x27f   :  { %3934 = vmatpush1.bf16.msra.mxu0 %v18027_v7  ;;  %v4293_v14 = vadd.f32 %v16247_v25, %v4261_v49  ;;  %v4263_v28 = vmul.f32 0.044715, %v4231_v31  ;;  %v16324_v10 = vpack.c.bf16 %v4439_v36, %v4431_v55  ;;  %v4380_v56 = vadd.f32 1.0, %v15326_v12  ;;  %v4524_v12 = vld [vmem:[#allocation8 + $0x180] sm:$0xff] }
 0x280   :  { %4146 = vmatpush1.bf16.msra.mxu1 %v18028_v5  ;;  %3935 = vmatprep.subr.bf16.mxu0 %v18031_v35  ;;  %v18032_v34 = vcombine.low %v18029_v50, %v18030_v4  ;;  %v13821_v45 = vcombine.low %v16221_v48, %v16223_v0  ;;  %v15330_v43 = vpop.eup %15329  ;;  %v13823_v32 = vcombine.low %v16239_v37, %v16241_v23  ;;  %v4382_v61 = vadd.f32 1.0, %v15328_v63  ;;  %v4501_v48 = vld [vmem:[#allocation8 + $0xc8] sm:$0xff]  ;;  %v4508_v23 = vld [vmem:[#allocation8 + $0x100] sm:$0xff]  ;;  %v18035_v50 = vld [vmem:[#allocation21_spill] sm:$0xff] }
 0x281   :  { %4147 = vmatprep.subr.bf16.mxu1 %v13816_v41  ;;  %v4325_v39 = vmul.f32 0.7978846, %v4293_v14  ;;  %v4295_v11 = vadd.f32 %v16276_v26, %v4263_v28  ;;  %v18033_v41 = vcombine.low %v16049_v30, %v16051_v15  ;;  %v13826_v58 = vcombine.high %v4476_v54, %v4484_v46  ;;  %v15332_v40 = vpop.eup %15331  ;;  %v4500_v30 = vld [vmem:[#allocation8 + $0xc0] sm:$0xff]  ;;  %v4525_v63 = vld [vmem:[#allocation8 + $0x188] sm:$0xff] }
 0x282   :  { %v13828_v52 = vcombine.high %v4477_v33, %v4485_v38  ;;  %v4412_v15 = vmul.f32 0.5, %v4380_v56  ;;  %v4388_v60 = vadd.f32 1.0, %v15332_v40  ;;  %v13825_v0 = vcombine.low %v4476_v54, %v4484_v46  ;;  %v4532_v14 = vld [vmem:[#allocation8 + $0x1c0] sm:$0xff]  ;;  %v4533_v56 = vld [vmem:[#allocation8 + $0x1c8] sm:$0xff] }
 0x283   :  { %3936 = vmatpush1.bf16.msra.mxu0 %v18032_v34  ;;  %15337 = vtanh.f32 %v4325_v39  ;;  %v4327_v22 = vmul.f32 0.7978846, %v4295_v11  ;;  %v13827_v51 = vcombine.low %v4477_v33, %v4485_v38  ;;  %v13842_v47 = vcombine.high %v4492_v20, %v4500_v30  ;;  %v4540_v11 = vld [vmem:[#allocation8 + $0x200] sm:$0xff]  ;;  %v4541_v40 = vld [vmem:[#allocation8 + $0x208] sm:$0xff] }
 0x284   :  { %4148 = vmatpush1.bf16.msra.mxu1 %v18033_v41  ;;  %3937 = vmatprep.subr.bf16.mxu0 %v13822_v13  ;;  %v4420_v42 = vmul.f32 0.5, %v4388_v60  ;;  %v4414_v57 = vmul.f32 0.5, %v4382_v61  ;;  %v13844_v37 = vcombine.high %v4493_v19, %v4501_v48  ;;  %v4444_v29 = vmul.f32 %v16168_v3, %v4412_v15  ;;  %v4548_v34 = vld [vmem:[#allocation8 + $0x240] sm:$0xff]  ;;  %v4549_v61 = vld [vmem:[#allocation8 + $0x248] sm:$0xff] }
 0x285   :  { %4149 = vmatprep.subr.bf16.mxu1 %v13824_v18  ;;  %15339 = vtanh.f32 %v4327_v22  ;;  %v15334_v13 = vpop.eup %15333  ;;  %v4516_v18 = vld [vmem:[#allocation8 + $0x140] sm:$0xff]  ;;  %v13841_v31 = vcombine.low %v4492_v20, %v4500_v30  ;;  %v4381_v7 = vadd.f32 1.0, %v15330_v43  ;;  %v13843_v36 = vcombine.low %v4493_v19, %v4501_v48 }
 0x286   :  { %v4390_v16 = vadd.f32 1.0, %v15334_v13  ;;  %v4452_v6 = vmul.f32 %v16191_v62, %v4420_v42  ;;  %v13858_v5 = vcombine.high %v4508_v23, %v4516_v18  ;;  %v4446_v3 = vmul.f32 %v16174_v2, %v4414_v57  ;;  %v4556_v48 = vld [vmem:[#allocation8 + $0x280] sm:$0xff] }
 0x287   :  { %3938 = vmatpush1.bf16.msra.mxu0 %v13821_v45  ;;  %v13860_v4 = vcombine.high %v4509_v59, %v4517_v17  ;;  %v13857_v46 = vcombine.low %v4508_v23, %v4516_v18  ;;  %v4413_v33 = vmul.f32 0.5, %v4381_v7  ;;  %v13874_v39 = vcombine.high %v4524_v12, %v4532_v14  ;;  %v4572_v18 = vld [vmem:[#allocation8 + $0x300] sm:$0xff]  ;;  %v4597_v7 = vld [vmem:[#allocation8 + $0x3c8] sm:$0xff] }
 0x288   :  { %4150 = vmatpush1.bf16.msra.mxu1 %v13823_v32  ;;  %10704 = vmatprep.subr.bf16.mxu0 %v13826_v58  ;;  %v15336_v1 = vpop.eup %15335  ;;  %v4422_v49 = vmul.f32 0.5, %v4390_v16  ;;  %v16347_v55 = vpack.c.bf16 %v4452_v6, %v4444_v29  ;;  %v18036_v32 = vld [vmem:[#allocation22_spill] sm:$0xff]  ;;  %v13876_v58 = vcombine.high %v4525_v63, %v4533_v56  ;;  %v13873_v22 = vcombine.low %v4524_v12, %v4532_v14  ;;  %v4581_v6 = vld [vmem:[#allocation8 + $0x348] sm:$0xff] }
 0x289   :  { %10916 = vmatprep.subr.bf16.mxu1 %v13828_v52  ;;  %v4383_v35 = vadd.f32 1.0, %v15336_v1  ;;  %v13875_v52 = vcombine.low %v4525_v63, %v4533_v56  ;;  %v4445_v20 = vmul.f32 %v16177_v27, %v4413_v33  ;;  %v13890_v60 = vcombine.high %v4540_v11, %v4548_v34  ;;  %v4557_v27 = vld [vmem:[#allocation8 + $0x288] sm:$0xff]  ;;  %v4580_v29 = vld [vmem:[#allocation8 + $0x340] sm:$0xff] }
 0x28a   :  { %3940 = vmatmul.mubr.bf16.vlgmr.msra.gmra.mrb[8].mxu0 %v18034_v8  ;;  %v4454_v62 = vmul.f32 %v16201_v53, %v4422_v49  ;;  %v13859_v53 = vcombine.low %v4509_v59, %v4517_v17  ;;  %v13892_v19 = vcombine.high %v4541_v40, %v4549_v61  ;;  %v13891_v16 = vcombine.low %v4541_v40, %v4549_v61  ;;  %v4588_v1 = vld [vmem:[#allocation8 + $0x380] sm:$0xff]  ;;  %v4613_v12 = vld [vmem:[#allocation8 + $0x448] sm:$0xff] }
 0x28b   :  { %4152 = vmatmul.mubr.bf16.vlgmr.msra.gmra.mrb[8].mxu1 %v18034_v8  ;;  %10705 = vmatpush1.bf16.msra.mxu0 %v13825_v0  ;;  %v4415_v45 = vmul.f32 0.5, %v4383_v35  ;;  %v4564_v0 = vld [vmem:[#allocation8 + $0x2c0] sm:$0xff]  ;;  %v13922_v59 = vcombine.high %v4572_v18, %v4580_v29  ;;  %v4605_v35 = vld [vmem:[#allocation8 + $0x408] sm:$0xff] }
 0x28c   :  { %10917 = vmatpush1.bf16.msra.mxu1 %v13827_v51  ;;  %10706 = vmatprep.subr.bf16.mxu0 %v13842_v47  ;;  %v16353_v54 = vpack.c.bf16 %v4454_v62, %v4446_v3  ;;  %v13889_v47 = vcombine.low %v4540_v11, %v4548_v34  ;;  %v13905_v8 = vcombine.low %v4556_v48, %v4564_v0  ;;  %v4596_v49 = vld [vmem:[#allocation8 + $0x3c0] sm:$0xff] }
 0x28d   :  { %10918 = vmatprep.subr.bf16.mxu1 %v13844_v37  ;;  %3949 = vmatprep.mubr.bf16.mxu0 %v18035_v50  ;;  %v15338_v28 = vpop.eup %15337  ;;  %v4447_v13 = vmul.f32 %v16188_v24, %v4415_v45  ;;  %v13906_v37 = vcombine.high %v4556_v48, %v4564_v0  ;;  %v4573_v24 = vld [vmem:[#allocation8 + $0x308] sm:$0xff]  ;;  %v13938_v3 = vcombine.high %v4588_v1, %v4596_v49  ;;  %v4620_v56 = vld [vmem:[#allocation8 + $0x480] sm:$0xff] }
 0x28e   :  { %4161 = vmatprep.mubr.bf16.mxu1 %v18035_v50  ;;  %v4389_v2 = vadd.f32 1.0, %v15338_v28  ;;  %v13924_v17 = vcombine.high %v4573_v24, %v4581_v6  ;;  %v4604_v50 = vld [vmem:[#allocation8 + $0x400] sm:$0xff]  ;;  %v13937_v14 = vcombine.low %v4588_v1, %v4596_v49  ;;  %v13956_v63 = vcombine.high %v4605_v35, %v4613_v12 }
 0x28f   :  { %10707 = vmatpush1.bf16.msra.mxu0 %v13841_v31  ;;  %v15340_v38 = vpop.eup %15339  ;;  %v4589_v31 = vld [vmem:[#allocation8 + $0x388] sm:$0xff]  ;;  %v4628_v33 = vld [vmem:[#allocation8 + $0x4c0] sm:$0xff] }
 0x290   :  { %10919 = vmatpush1.bf16.msra.mxu1 %v13843_v36  ;;  %10708 = vmatprep.subr.bf16.mxu0 %v13858_v5  ;;  %v4421_v43 = vmul.f32 0.5, %v4389_v2  ;;  %v4391_v41 = vadd.f32 1.0, %v15340_v38  ;;  %v13921_v36 = vcombine.low %v4572_v18, %v4580_v29  ;;  %v13923_v5 = vcombine.low %v4573_v24, %v4581_v6  ;;  %v4621_v2 = vld [vmem:[#allocation8 + $0x488] sm:$0xff]  ;;  %v4636_v45 = vld [vmem:[#allocation8 + $0x500] sm:$0xff] }
 0x291   :  { %10920 = vmatprep.subr.bf16.mxu1 %v13860_v4  ;;  %v13940_v62 = vcombine.high %v4589_v31, %v4597_v7  ;;  %v4612_v4 = vld [vmem:[#allocation8 + $0x440] sm:$0xff]  ;;  %v13939_v28 = vcombine.low %v4589_v31, %v4597_v7  ;;  %v13970_v11 = vcombine.high %v4620_v56, %v4628_v33  ;;  %v4685_v24 = vld [vmem:[#allocation8 + $0x688] sm:$0xff] }
 0x292   :  { %3950 = vmatmul.mubr.bf16.gmra.mrb[12].mxu0 %v18036_v32  ;;  %v4453_v30 = vmul.f32 %v16247_v25, %v4421_v43  ;;  %v4423_v15 = vmul.f32 0.5, %v4391_v41  ;;  %v4565_v25 = vld [vmem:[#allocation8 + $0x2c8] sm:$0xff]  ;;  %v13953_v38 = vcombine.low %v4604_v50, %v4612_v4  ;;  %v4644_v43 = vld [vmem:[#allocation8 + $0x540] sm:$0xff] }
 0x293   :  { %4162 = vmatmul.mubr.bf16.gmra.mrb[12].mxu1 %v18036_v32  ;;  %10709 = vmatpush1.bf16.msra.mxu0 %v13857_v46  ;;  %v13908_v23 = vcombine.high %v4557_v27, %v4565_v25  ;;  %v13954_v46 = vcombine.high %v4604_v50, %v4612_v4  ;;  %v4637_v41 = vld [vmem:[#allocation8 + $0x508] sm:$0xff]  ;;  %v13986_v61 = vcombine.high %v4636_v45, %v4644_v43  ;;  %v4684_v18 = vld [vmem:[#allocation8 + $0x680] sm:$0xff] }
 0x294   :  { %10736 = vmatprep.mubr.bf16.mxu0 %v16318_v9  ;;  %10921 = vmatpush1.bf16.msra.mxu1 %v13859_v53  ;;  %v16362_v42 = vpack.c.bf16 %v4453_v30, %v4445_v20  ;;  %v4455_v51 = vmul.f32 %v16276_v26, %v4423_v15  ;;  %v13907_v26 = vcombine.low %v4557_v27, %v4565_v25  ;;  %v4629_v53 = vld [vmem:[#allocation8 + $0x4c8] sm:$0xff]  ;;  %v4660_v20 = vld [vmem:[#allocation8 + $0x5c0] sm:$0xff] }
 0x295   :  { %10948 = vmatprep.mubr.bf16.mxu1 %v16318_v9  ;;  %10710 = vmatprep.subr.bf16.mxu0 %v13874_v39  ;;  %v13955_v39 = vcombine.low %v4605_v35, %v4613_v12  ;;  %v13972_v34 = vcombine.high %v4621_v2, %v4629_v53  ;;  %v4645_v32 = vld [vmem:[#allocation8 + $0x548] sm:$0xff]  ;;  %v13971_v40 = vcombine.low %v4621_v2, %v4629_v53  ;;  %v4692_v29 = vld [vmem:[#allocation8 + $0x6c0] sm:$0xff] }
 0x296   :  { %10922 = vmatprep.subr.bf16.mxu1 %v13876_v58  ;;  %v16365_v57 = vpack.c.bf16 %v4455_v51, %v4447_v13  ;;  %v13969_v58 = vcombine.low %v4620_v56, %v4628_v33  ;;  %v4653_v30 = vld [vmem:[#allocation8 + $0x588] sm:$0xff]  ;;  %v4668_v13 = vld [vmem:[#allocation8 + $0x600] sm:$0xff] }
 0x297   :  { %10711 = vmatpush1.bf16.msra.mxu0 %v13873_v22  ;;  %v13988_v22 = vcombine.high %v4637_v41, %v4645_v32  ;;  %v4661_v15 = vld [vmem:[#allocation8 + $0x5c8] sm:$0xff]  ;;  %v4676_v51 = vld [vmem:[#allocation8 + $0x640] sm:$0xff] }
 0x298   :  { %10923 = vmatpush1.bf16.msra.mxu1 %v13875_v52  ;;  %10712 = vmatprep.subr.bf16.mxu0 %v13890_v60  ;;  %v4652_v52 = vld [vmem:[#allocation8 + $0x580] sm:$0xff]  ;;  %v13985_v60 = vcombine.low %v4636_v45, %v4644_v43  ;;  %v14004_v0 = vcombine.high %v4653_v30, %v4661_v15  ;;  %v4669_v27 = vld [vmem:[#allocation8 + $0x608] sm:$0xff] }
 0x299   :  { %10924 = vmatprep.subr.bf16.mxu1 %v13892_v19  ;;  %v13987_v19 = vcombine.low %v4637_v41, %v4645_v32  ;;  %v14002_v48 = vcombine.high %v4652_v52, %v4660_v20  ;;  %v4677_v25 = vld [vmem:[#allocation8 + $0x648] sm:$0xff]  ;;  %v4700_v1 = vld [vmem:[#allocation8 + $0x700] sm:$0xff] }
 0x29a   :  { %v4693_v6 = vld [vmem:[#allocation8 + $0x6c8] sm:$0xff]  ;;  %v4708_v49 = vld [vmem:[#allocation8 + $0x740] sm:$0xff] }
 0x29b   :  { %10713 = vmatpush1.bf16.msra.mxu0 %v13889_v47  ;;  %v14001_v47 = vcombine.low %v4652_v52, %v4660_v20  ;;  %v4701_v31 = vld [vmem:[#allocation8 + $0x708] sm:$0xff]  ;;  %v4716_v50 = vld [vmem:[#allocation8 + $0x780] sm:$0xff] }
 0x29c   :  { %10925 = vmatpush1.bf16.msra.mxu1 %v13891_v16  ;;  %10714 = vmatprep.subr.bf16.mxu0 %v13906_v37  ;;  %v14003_v16 = vcombine.low %v4653_v30, %v4661_v15  ;;  %v14018_v37 = vcombine.high %v4668_v13, %v4676_v51  ;;  %v4709_v7 = vld [vmem:[#allocation8 + $0x748] sm:$0xff]  ;;  %v4724_v4 = vld [vmem:[#allocation8 + $0x7c0] sm:$0xff] }
 0x29d   :  { %10926 = vmatprep.subr.bf16.mxu1 %v13908_v23  ;;  %v14020_v23 = vcombine.high %v4669_v27, %v4677_v25  ;;  %v4717_v35 = vld [vmem:[#allocation8 + $0x788] sm:$0xff]  ;;  %v4732_v56 = vld [vmem:[#allocation8 + $0x800] sm:$0xff] }
 0x29e   :  { %v4725_v12 = vld [vmem:[#allocation8 + $0x7c8] sm:$0xff]  ;;  %v4740_v33 = vld [vmem:[#allocation8 + $0x840] sm:$0xff] }
 0x29f   :  { %10715 = vmatpush1.bf16.msra.mxu0 %v13905_v8  ;;  %v14017_v8 = vcombine.low %v4668_v13, %v4676_v51  ;;  %v4733_v2 = vld [vmem:[#allocation8 + $0x808] sm:$0xff]  ;;  %v4748_v45 = vld [vmem:[#allocation8 + $0x880] sm:$0xff] }
 0x2a0   :  { %10927 = vmatpush1.bf16.msra.mxu1 %v13907_v26  ;;  %10716 = vmatprep.subr.bf16.mxu0 %v13922_v59  ;;  %v14019_v26 = vcombine.low %v4669_v27, %v4677_v25  ;;  %v14034_v59 = vcombine.high %v4684_v18, %v4692_v29  ;;  %v4741_v53 = vld [vmem:[#allocation8 + $0x848] sm:$0xff]  ;;  %v4756_v43 = vld [vmem:[#allocation8 + $0x8c0] sm:$0xff] }
 0x2a1   :  { %10928 = vmatprep.subr.bf16.mxu1 %v13924_v17  ;;  %v14036_v17 = vcombine.high %v4685_v24, %v4693_v6  ;;  %v4749_v41 = vld [vmem:[#allocation8 + $0x888] sm:$0xff]  ;;  %v4764_v52 = vld [vmem:[#allocation8 + $0x900] sm:$0xff] }
 0x2a2   :  { %v4757_v32 = vld [vmem:[#allocation8 + $0x8c8] sm:$0xff]  ;;  %v4772_v20 = vld [vmem:[#allocation8 + $0x940] sm:$0xff] }
 0x2a3   :  { %10717 = vmatpush1.bf16.msra.mxu0 %v13921_v36  ;;  %v14033_v36 = vcombine.low %v4684_v18, %v4692_v29  ;;  %v4765_v30 = vld [vmem:[#allocation8 + $0x908] sm:$0xff]  ;;  %v4780_v13 = vld [vmem:[#allocation8 + $0x980] sm:$0xff] }
 0x2a4   :  { %10929 = vmatpush1.bf16.msra.mxu1 %v13923_v5  ;;  %10718 = vmatprep.subr.bf16.mxu0 %v13938_v3  ;;  %v14035_v5 = vcombine.low %v4685_v24, %v4693_v6  ;;  %v14050_v3 = vcombine.high %v4700_v1, %v4708_v49  ;;  %v4773_v15 = vld [vmem:[#allocation8 + $0x948] sm:$0xff]  ;;  %v4788_v51 = vld [vmem:[#allocation8 + $0x9c0] sm:$0xff] }
 0x2a5   :  { %10930 = vmatprep.subr.bf16.mxu1 %v13940_v62  ;;  %v14052_v62 = vcombine.high %v4701_v31, %v4709_v7  ;;  %v4781_v27 = vld [vmem:[#allocation8 + $0x988] sm:$0xff]  ;;  %v4796_v18 = vld [vmem:[#allocation8 + $0xa00] sm:$0xff] }
 0x2a6   :  { %v4789_v25 = vld [vmem:[#allocation8 + $0x9c8] sm:$0xff]  ;;  %v4804_v29 = vld [vmem:[#allocation8 + $0xa40] sm:$0xff] }
 0x2a7   :  { %10719 = vmatpush1.bf16.msra.mxu0 %v13937_v14  ;;  %v14049_v14 = vcombine.low %v4700_v1, %v4708_v49  ;;  %v4797_v24 = vld [vmem:[#allocation8 + $0xa08] sm:$0xff]  ;;  %v4812_v1 = vld [vmem:[#allocation8 + $0xa80] sm:$0xff] }
 0x2a8   :  { %10931 = vmatpush1.bf16.msra.mxu1 %v13939_v28  ;;  %10720 = vmatprep.subr.bf16.mxu0 %v13954_v46  ;;  %v14051_v28 = vcombine.low %v4701_v31, %v4709_v7  ;;  %v14066_v46 = vcombine.high %v4716_v50, %v4724_v4  ;;  %v4805_v6 = vld [vmem:[#allocation8 + $0xa48] sm:$0xff]  ;;  %v4820_v49 = vld [vmem:[#allocation8 + $0xac0] sm:$0xff] }
 0x2a9   :  { %10932 = vmatprep.subr.bf16.mxu1 %v13956_v63  ;;  %v14068_v63 = vcombine.high %v4717_v35, %v4725_v12  ;;  %v4813_v31 = vld [vmem:[#allocation8 + $0xa88] sm:$0xff] }
 0x2aa   :  { %v4821_v7 = vld [vmem:[#allocation8 + $0xac8] sm:$0xff] }
 0x2ab   :  { %10721 = vmatpush1.bf16.msra.mxu0 %v13953_v38  ;;  %v14065_v38 = vcombine.low %v4716_v50, %v4724_v4  ;;  %v4828_v50 = vld [vmem:[#allocation8 + $0xb00] sm:$0xff] }
 0x2ac   :  { %10933 = vmatpush1.bf16.msra.mxu1 %v13955_v39  ;;  %10722 = vmatprep.subr.bf16.mxu0 %v13970_v11  ;;  %v14067_v39 = vcombine.low %v4717_v35, %v4725_v12  ;;  %v14082_v11 = vcombine.high %v4732_v56, %v4740_v33  ;;  %v4836_v4 = vld [vmem:[#allocation8 + $0xb40] sm:$0xff]  ;;  %v4829_v35 = vld [vmem:[#allocation8 + $0xb08] sm:$0xff] }
 0x2ad   :  { %10934 = vmatprep.subr.bf16.mxu1 %v13972_v34  ;;  %v14084_v34 = vcombine.high %v4733_v2, %v4741_v53  ;;  %v4837_v12 = vld [vmem:[#allocation8 + $0xb48] sm:$0xff] }
 0x2af   :  { %10723 = vmatpush1.bf16.msra.mxu0 %v13969_v58  ;;  %v14081_v58 = vcombine.low %v4732_v56, %v4740_v33  ;;  %v4844_v56 = vld [vmem:[#allocation8 + $0xb80] sm:$0xff] }
 0x2b0   :  { %10935 = vmatpush1.bf16.msra.mxu1 %v13971_v40  ;;  %10724 = vmatprep.subr.bf16.mxu0 %v13986_v61  ;;  %v14083_v40 = vcombine.low %v4733_v2, %v4741_v53  ;;  %v14098_v61 = vcombine.high %v4748_v45, %v4756_v43  ;;  %v4852_v33 = vld [vmem:[#allocation8 + $0xbc0] sm:$0xff]  ;;  %v4845_v2 = vld [vmem:[#allocation8 + $0xb88] sm:$0xff] }
 0x2b1   :  { %10936 = vmatprep.subr.bf16.mxu1 %v13988_v22  ;;  %v14100_v22 = vcombine.high %v4749_v41, %v4757_v32  ;;  %v4853_v53 = vld [vmem:[#allocation8 + $0xbc8] sm:$0xff] }
 0x2b3   :  { %10725 = vmatpush1.bf16.msra.mxu0 %v13985_v60  ;;  %v14097_v60 = vcombine.low %v4748_v45, %v4756_v43  ;;  %v4860_v45 = vld [vmem:[#allocation8 + $0xc00] sm:$0xff] }
 0x2b4   :  { %10937 = vmatpush1.bf16.msra.mxu1 %v13987_v19  ;;  %10726 = vmatprep.subr.bf16.mxu0 %v14002_v48  ;;  %v14099_v19 = vcombine.low %v4749_v41, %v4757_v32  ;;  %v14114_v48 = vcombine.high %v4764_v52, %v4772_v20  ;;  %v4868_v43 = vld [vmem:[#allocation8 + $0xc40] sm:$0xff]  ;;  %v4861_v41 = vld [vmem:[#allocation8 + $0xc08] sm:$0xff] }
 0x2b5   :  { %10938 = vmatprep.subr.bf16.mxu1 %v14004_v0  ;;  %v14116_v0 = vcombine.high %v4765_v30, %v4773_v15  ;;  %v4869_v32 = vld [vmem:[#allocation8 + $0xc48] sm:$0xff] }
 0x2b7   :  { %10727 = vmatpush1.bf16.msra.mxu0 %v14001_v47  ;;  %v14113_v47 = vcombine.low %v4764_v52, %v4772_v20  ;;  %v4876_v52 = vld [vmem:[#allocation8 + $0xc80] sm:$0xff] }
 0x2b8   :  { %10939 = vmatpush1.bf16.msra.mxu1 %v14003_v16  ;;  %10728 = vmatprep.subr.bf16.mxu0 %v14018_v37  ;;  %v14115_v16 = vcombine.low %v4765_v30, %v4773_v15  ;;  %v14130_v37 = vcombine.high %v4780_v13, %v4788_v51  ;;  %v4884_v20 = vld [vmem:[#allocation8 + $0xcc0] sm:$0xff]  ;;  %v4877_v30 = vld [vmem:[#allocation8 + $0xc88] sm:$0xff] }
 0x2b9   :  { %10940 = vmatprep.subr.bf16.mxu1 %v14020_v23  ;;  %v14132_v23 = vcombine.high %v4781_v27, %v4789_v25  ;;  %v4885_v15 = vld [vmem:[#allocation8 + $0xcc8] sm:$0xff] }
 0x2bb   :  { %10729 = vmatpush1.bf16.msra.mxu0 %v14017_v8  ;;  %v14129_v8 = vcombine.low %v4780_v13, %v4788_v51  ;;  %v4892_v13 = vld [vmem:[#allocation8 + $0xd00] sm:$0xff] }
 0x2bc   :  { %10941 = vmatpush1.bf16.msra.mxu1 %v14019_v26  ;;  %10730 = vmatprep.subr.bf16.mxu0 %v14034_v59  ;;  %v14131_v26 = vcombine.low %v4781_v27, %v4789_v25  ;;  %v14146_v59 = vcombine.high %v4796_v18, %v4804_v29  ;;  %v4900_v51 = vld [vmem:[#allocation8 + $0xd40] sm:$0xff]  ;;  %v4893_v27 = vld [vmem:[#allocation8 + $0xd08] sm:$0xff] }
 0x2bd   :  { %10942 = vmatprep.subr.bf16.mxu1 %v14036_v17  ;;  %v14148_v17 = vcombine.high %v4797_v24, %v4805_v6  ;;  %v4901_v25 = vld [vmem:[#allocation8 + $0xd48] sm:$0xff] }
 0x2bf   :  { %10731 = vmatpush1.bf16.msra.mxu0 %v14033_v36  ;;  %v14145_v36 = vcombine.low %v4796_v18, %v4804_v29  ;;  %v4908_v18 = vld [vmem:[#allocation8 + $0xd80] sm:$0xff] }
 0x2c0   :  { %10943 = vmatpush1.bf16.msra.mxu1 %v14035_v5  ;;  %10732 = vmatprep.subr.bf16.mxu0 %v14050_v3  ;;  %v14147_v5 = vcombine.low %v4797_v24, %v4805_v6  ;;  %v14162_v3 = vcombine.high %v4812_v1, %v4820_v49  ;;  %v4916_v29 = vld [vmem:[#allocation8 + $0xdc0] sm:$0xff]  ;;  %v4909_v24 = vld [vmem:[#allocation8 + $0xd88] sm:$0xff] }
 0x2c1   :  { %10944 = vmatprep.subr.bf16.mxu1 %v14052_v62  ;;  %v14164_v62 = vcombine.high %v4813_v31, %v4821_v7  ;;  %v4917_v6 = vld [vmem:[#allocation8 + $0xdc8] sm:$0xff] }
 0x2c3   :  { %10733 = vmatpush1.bf16.msra.mxu0 %v14049_v14  ;;  %v14161_v14 = vcombine.low %v4812_v1, %v4820_v49  ;;  %v4924_v1 = vld [vmem:[#allocation8 + $0xe00] sm:$0xff] }
 0x2c4   :  { %10945 = vmatpush1.bf16.msra.mxu1 %v14051_v28  ;;  %10734 = vmatprep.subr.bf16.mxu0 %v14066_v46  ;;  %v14163_v28 = vcombine.low %v4813_v31, %v4821_v7  ;;  %v14178_v46 = vcombine.high %v4828_v50, %v4836_v4  ;;  %v4932_v49 = vld [vmem:[#allocation8 + $0xe40] sm:$0xff]  ;;  %v4925_v31 = vld [vmem:[#allocation8 + $0xe08] sm:$0xff] }
 0x2c5   :  { %10946 = vmatprep.subr.bf16.mxu1 %v14068_v63  ;;  %v14180_v63 = vcombine.high %v4829_v35, %v4837_v12  ;;  %v4933_v7 = vld [vmem:[#allocation8 + $0xe48] sm:$0xff] }
 0x2c7   :  { %10735 = vmatpush1.bf16.msra.mxu0 %v14065_v38  ;;  %v14177_v38 = vcombine.low %v4828_v50, %v4836_v4  ;;  %v4940_v50 = vld [vmem:[#allocation8 + $0xe80] sm:$0xff] }
 0x2c8   :  { %10947 = vmatpush1.bf16.msra.mxu1 %v14067_v39  ;;  %10757 = vmatprep.subr.bf16.mxu0 %v14082_v11  ;;  %v14179_v39 = vcombine.low %v4829_v35, %v4837_v12  ;;  %v14194_v11 = vcombine.high %v4844_v56, %v4852_v33  ;;  %v4948_v4 = vld [vmem:[#allocation8 + $0xec0] sm:$0xff]  ;;  %v4941_v35 = vld [vmem:[#allocation8 + $0xe88] sm:$0xff] }
 0x2c9   :  { %10969 = vmatprep.subr.bf16.mxu1 %v14084_v34  ;;  %v14196_v34 = vcombine.high %v4845_v2, %v4853_v53  ;;  %v4949_v12 = vld [vmem:[#allocation8 + $0xec8] sm:$0xff] }
 0x2ca   :  { %10737 = vmatmul.mubr.bf16.vlgmr.msra.gmra.mrb[16].mxu0 %v16301_v21 }
 0x2cb   :  { %10949 = vmatmul.mubr.bf16.vlgmr.msra.gmra.mrb[16].mxu1 %v16301_v21  ;;  %10746 = vmatprep.mubr.bf16.mxu0 %v16362_v42 }
 0x2cc   :  { %10758 = vmatpush1.bf16.msra.mxu0 %v14081_v58  ;;  %10958 = vmatprep.mubr.bf16.mxu1 %v16362_v42  ;;  %v14193_v58 = vcombine.low %v4844_v56, %v4852_v33  ;;  %v4956_v56 = vld [vmem:[#allocation8 + $0xf00] sm:$0xff] }
 0x2cd   :  { %10970 = vmatpush1.bf16.msra.mxu1 %v14083_v40  ;;  %10759 = vmatprep.subr.bf16.mxu0 %v14098_v61  ;;  %v14195_v40 = vcombine.low %v4845_v2, %v4853_v53  ;;  %v14210_v61 = vcombine.high %v4860_v45, %v4868_v43  ;;  %v4964_v33 = vld [vmem:[#allocation8 + $0xf40] sm:$0xff]  ;;  %v4957_v2 = vld [vmem:[#allocation8 + $0xf08] sm:$0xff] }
 0x2ce   :  { %10971 = vmatprep.subr.bf16.mxu1 %v14100_v22  ;;  %v14212_v22 = vcombine.high %v4861_v41, %v4869_v32  ;;  %v4965_v53 = vld [vmem:[#allocation8 + $0xf48] sm:$0xff] }
 0x2d0   :  { %10760 = vmatpush1.bf16.msra.mxu0 %v14097_v60  ;;  %v14209_v60 = vcombine.low %v4860_v45, %v4868_v43  ;;  %v4972_v45 = vld [vmem:[#allocation8 + $0xf80] sm:$0xff] }
 0x2d1   :  { %10972 = vmatpush1.bf16.msra.mxu1 %v14099_v19  ;;  %10761 = vmatprep.subr.bf16.mxu0 %v14114_v48  ;;  %v14211_v19 = vcombine.low %v4861_v41, %v4869_v32  ;;  %v14226_v48 = vcombine.high %v4876_v52, %v4884_v20  ;;  %v4980_v43 = vld [vmem:[#allocation8 + $0xfc0] sm:$0xff]  ;;  %v4973_v41 = vld [vmem:[#allocation8 + $0xf88] sm:$0xff] }
 0x2d2   :  { %10747 = vmatmul.mubr.bf16.gmra.mrb[20].mxu0 %v16347_v55  ;;  %10973 = vmatprep.subr.bf16.mxu1 %v14116_v0  ;;  %v14228_v0 = vcombine.high %v4877_v30, %v4885_v15  ;;  %v4981_v32 = vld [vmem:[#allocation8 + $0xfc8] sm:$0xff] }
 0x2d3   :  { %10959 = vmatmul.mubr.bf16.gmra.mrb[20].mxu1 %v16347_v55  ;;  %10789 = vmatprep.mubr.bf16.mxu0 %v16324_v10 }
 0x2d4   :  { %10762 = vmatpush1.bf16.msra.mxu0 %v14113_v47  ;;  %11001 = vmatprep.mubr.bf16.mxu1 %v16324_v10  ;;  %v14225_v47 = vcombine.low %v4876_v52, %v4884_v20  ;;  %v4988_v52 = vld [vmem:[#allocation8 + $0x1000] sm:$0xff] }
 0x2d5   :  { %10974 = vmatpush1.bf16.msra.mxu1 %v14115_v16  ;;  %10763 = vmatprep.subr.bf16.mxu0 %v14130_v37  ;;  %v14227_v16 = vcombine.low %v4877_v30, %v4885_v15  ;;  %v14242_v37 = vcombine.high %v4892_v13, %v4900_v51  ;;  %v4996_v20 = vld [vmem:[#allocation8 + $0x1040] sm:$0xff]  ;;  %v4989_v30 = vld [vmem:[#allocation8 + $0x1008] sm:$0xff] }
 0x2d6   :  { %10975 = vmatprep.subr.bf16.mxu1 %v14132_v23  ;;  %v14244_v23 = vcombine.high %v4893_v27, %v4901_v25  ;;  %v4997_v15 = vld [vmem:[#allocation8 + $0x1048] sm:$0xff] }
 0x2d8   :  { %10764 = vmatpush1.bf16.msra.mxu0 %v14129_v8  ;;  %v14241_v8 = vcombine.low %v4892_v13, %v4900_v51  ;;  %v5004_v13 = vld [vmem:[#allocation8 + $0x1080] sm:$0xff] }
 0x2d9   :  { %10976 = vmatpush1.bf16.msra.mxu1 %v14131_v26  ;;  %10765 = vmatprep.subr.bf16.mxu0 %v14146_v59  ;;  %v14243_v26 = vcombine.low %v4893_v27, %v4901_v25  ;;  %v14258_v59 = vcombine.high %v4908_v18, %v4916_v29  ;;  %v5012_v51 = vld [vmem:[#allocation8 + $0x10c0] sm:$0xff]  ;;  %v5005_v27 = vld [vmem:[#allocation8 + $0x1088] sm:$0xff] }
 0x2da   :  { %10977 = vmatprep.subr.bf16.mxu1 %v14148_v17  ;;  %v14260_v17 = vcombine.high %v4909_v24, %v4917_v6  ;;  %v5013_v25 = vld [vmem:[#allocation8 + $0x10c8] sm:$0xff] }
 0x2dc   :  { %10766 = vmatpush1.bf16.msra.mxu0 %v14145_v36  ;;  %v14257_v36 = vcombine.low %v4908_v18, %v4916_v29  ;;  %v5020_v18 = vld [vmem:[#allocation8 + $0x1100] sm:$0xff] }
 0x2dd   :  { %10978 = vmatpush1.bf16.msra.mxu1 %v14147_v5  ;;  %10767 = vmatprep.subr.bf16.mxu0 %v14162_v3  ;;  %v14259_v5 = vcombine.low %v4909_v24, %v4917_v6  ;;  %v14274_v3 = vcombine.high %v4924_v1, %v4932_v49  ;;  %v5028_v29 = vld [vmem:[#allocation8 + $0x1140] sm:$0xff]  ;;  %v5021_v24 = vld [vmem:[#allocation8 + $0x1108] sm:$0xff] }
 0x2de   :  { %10979 = vmatprep.subr.bf16.mxu1 %v14164_v62  ;;  %v14276_v62 = vcombine.high %v4925_v31, %v4933_v7  ;;  %v5029_v6 = vld [vmem:[#allocation8 + $0x1148] sm:$0xff] }
 0x2e0   :  { %10768 = vmatpush1.bf16.msra.mxu0 %v14161_v14  ;;  %v14273_v14 = vcombine.low %v4924_v1, %v4932_v49  ;;  %v5036_v1 = vld [vmem:[#allocation8 + $0x1180] sm:$0xff] }
 0x2e1   :  { %10980 = vmatpush1.bf16.msra.mxu1 %v14163_v28  ;;  %10769 = vmatprep.subr.bf16.mxu0 %v14178_v46  ;;  %v14275_v28 = vcombine.low %v4925_v31, %v4933_v7  ;;  %v14290_v46 = vcombine.high %v4940_v50, %v4948_v4  ;;  %v5044_v49 = vld [vmem:[#allocation8 + $0x11c0] sm:$0xff]  ;;  %v5037_v31 = vld [vmem:[#allocation8 + $0x1188] sm:$0xff] }
 0x2e2   :  { %10981 = vmatprep.subr.bf16.mxu1 %v14180_v63  ;;  %v14292_v63 = vcombine.high %v4941_v35, %v4949_v12  ;;  %v5045_v7 = vld [vmem:[#allocation8 + $0x11c8] sm:$0xff] }
 0x2e4   :  { %10770 = vmatpush1.bf16.msra.mxu0 %v14177_v38  ;;  %v14289_v38 = vcombine.low %v4940_v50, %v4948_v4  ;;  %v5052_v50 = vld [vmem:[#allocation8 + $0x1200] sm:$0xff] }
 0x2e5   :  { %10982 = vmatpush1.bf16.msra.mxu1 %v14179_v39  ;;  %10771 = vmatprep.subr.bf16.mxu0 %v14194_v11  ;;  %v14291_v39 = vcombine.low %v4941_v35, %v4949_v12  ;;  %v14306_v11 = vcombine.high %v4956_v56, %v4964_v33  ;;  %v5060_v4 = vld [vmem:[#allocation8 + $0x1240] sm:$0xff]  ;;  %v5053_v35 = vld [vmem:[#allocation8 + $0x1208] sm:$0xff] }
 0x2e6   :  { %10983 = vmatprep.subr.bf16.mxu1 %v14196_v34  ;;  %v14308_v34 = vcombine.high %v4957_v2, %v4965_v53  ;;  %v5061_v12 = vld [vmem:[#allocation8 + $0x1248] sm:$0xff] }
 0x2e8   :  { %10772 = vmatpush1.bf16.msra.mxu0 %v14193_v58  ;;  %v14305_v58 = vcombine.low %v4956_v56, %v4964_v33  ;;  %v5068_v56 = vld [vmem:[#allocation8 + $0x1280] sm:$0xff] }
 0x2e9   :  { %10984 = vmatpush1.bf16.msra.mxu1 %v14195_v40  ;;  %10773 = vmatprep.subr.bf16.mxu0 %v14210_v61  ;;  %v14307_v40 = vcombine.low %v4957_v2, %v4965_v53  ;;  %v14322_v61 = vcombine.high %v4972_v45, %v4980_v43  ;;  %v5076_v33 = vld [vmem:[#allocation8 + $0x12c0] sm:$0xff]  ;;  %v5069_v2 = vld [vmem:[#allocation8 + $0x1288] sm:$0xff] }
 0x2ea   :  { %10985 = vmatprep.subr.bf16.mxu1 %v14212_v22  ;;  %v14324_v22 = vcombine.high %v4973_v41, %v4981_v32  ;;  %v5077_v53 = vld [vmem:[#allocation8 + $0x12c8] sm:$0xff] }
 0x2ec   :  { %10774 = vmatpush1.bf16.msra.mxu0 %v14209_v60  ;;  %v14321_v60 = vcombine.low %v4972_v45, %v4980_v43  ;;  %v5084_v45 = vld [vmem:[#allocation8 + $0x1300] sm:$0xff] }
 0x2ed   :  { %10986 = vmatpush1.bf16.msra.mxu1 %v14211_v19  ;;  %10775 = vmatprep.subr.bf16.mxu0 %v14226_v48  ;;  %v14323_v19 = vcombine.low %v4973_v41, %v4981_v32  ;;  %v14338_v48 = vcombine.high %v4988_v52, %v4996_v20  ;;  %v5092_v43 = vld [vmem:[#allocation8 + $0x1340] sm:$0xff]  ;;  %v5085_v41 = vld [vmem:[#allocation8 + $0x1308] sm:$0xff] }
 0x2ee   :  { %10987 = vmatprep.subr.bf16.mxu1 %v14228_v0  ;;  %v14340_v0 = vcombine.high %v4989_v30, %v4997_v15  ;;  %v5093_v32 = vld [vmem:[#allocation8 + $0x1348] sm:$0xff] }
 0x2f0   :  { %10776 = vmatpush1.bf16.msra.mxu0 %v14225_v47  ;;  %v14337_v47 = vcombine.low %v4988_v52, %v4996_v20  ;;  %v5100_v52 = vld [vmem:[#allocation8 + $0x1380] sm:$0xff] }
 0x2f1   :  { %10988 = vmatpush1.bf16.msra.mxu1 %v14227_v16  ;;  %10777 = vmatprep.subr.bf16.mxu0 %v14242_v37  ;;  %v14339_v16 = vcombine.low %v4989_v30, %v4997_v15  ;;  %v14354_v37 = vcombine.high %v5004_v13, %v5012_v51  ;;  %v5108_v20 = vld [vmem:[#allocation8 + $0x13c0] sm:$0xff]  ;;  %v5101_v30 = vld [vmem:[#allocation8 + $0x1388] sm:$0xff] }
 0x2f2   :  { %10989 = vmatprep.subr.bf16.mxu1 %v14244_v23  ;;  %v14356_v23 = vcombine.high %v5005_v27, %v5013_v25  ;;  %v5109_v15 = vld [vmem:[#allocation8 + $0x13c8] sm:$0xff] }
 0x2f4   :  { %10778 = vmatpush1.bf16.msra.mxu0 %v14241_v8  ;;  %v14353_v8 = vcombine.low %v5004_v13, %v5012_v51  ;;  %v5116_v13 = vld [vmem:[#allocation8 + $0x1400] sm:$0xff] }
 0x2f5   :  { %10990 = vmatpush1.bf16.msra.mxu1 %v14243_v26  ;;  %10779 = vmatprep.subr.bf16.mxu0 %v14258_v59  ;;  %v14355_v26 = vcombine.low %v5005_v27, %v5013_v25  ;;  %v14370_v59 = vcombine.high %v5020_v18, %v5028_v29  ;;  %v5124_v51 = vld [vmem:[#allocation8 + $0x1440] sm:$0xff]  ;;  %v5117_v27 = vld [vmem:[#allocation8 + $0x1408] sm:$0xff] }
 0x2f6   :  { %10991 = vmatprep.subr.bf16.mxu1 %v14260_v17  ;;  %v14372_v17 = vcombine.high %v5021_v24, %v5029_v6  ;;  %v5125_v25 = vld [vmem:[#allocation8 + $0x1448] sm:$0xff] }
 0x2f8   :  { %10780 = vmatpush1.bf16.msra.mxu0 %v14257_v36  ;;  %v14369_v36 = vcombine.low %v5020_v18, %v5028_v29  ;;  %v5132_v18 = vld [vmem:[#allocation8 + $0x1480] sm:$0xff] }
 0x2f9   :  { %10992 = vmatpush1.bf16.msra.mxu1 %v14259_v5  ;;  %10781 = vmatprep.subr.bf16.mxu0 %v14274_v3  ;;  %v14371_v5 = vcombine.low %v5021_v24, %v5029_v6  ;;  %v14386_v3 = vcombine.high %v5036_v1, %v5044_v49  ;;  %v5140_v29 = vld [vmem:[#allocation8 + $0x14c0] sm:$0xff]  ;;  %v5133_v24 = vld [vmem:[#allocation8 + $0x1488] sm:$0xff] }
 0x2fa   :  { %10993 = vmatprep.subr.bf16.mxu1 %v14276_v62  ;;  %v14388_v62 = vcombine.high %v5037_v31, %v5045_v7  ;;  %v5141_v6 = vld [vmem:[#allocation8 + $0x14c8] sm:$0xff] }
 0x2fc   :  { %10782 = vmatpush1.bf16.msra.mxu0 %v14273_v14  ;;  %v14385_v14 = vcombine.low %v5036_v1, %v5044_v49  ;;  %v5148_v1 = vld [vmem:[#allocation8 + $0x1500] sm:$0xff] }
 0x2fd   :  { %10994 = vmatpush1.bf16.msra.mxu1 %v14275_v28  ;;  %10783 = vmatprep.subr.bf16.mxu0 %v14290_v46  ;;  %v14387_v28 = vcombine.low %v5037_v31, %v5045_v7  ;;  %v14402_v46 = vcombine.high %v5052_v50, %v5060_v4  ;;  %v5156_v49 = vld [vmem:[#allocation8 + $0x1540] sm:$0xff]  ;;  %v5149_v31 = vld [vmem:[#allocation8 + $0x1508] sm:$0xff] }
 0x2fe   :  { %10995 = vmatprep.subr.bf16.mxu1 %v14292_v63  ;;  %v14404_v63 = vcombine.high %v5053_v35, %v5061_v12  ;;  %v5157_v7 = vld [vmem:[#allocation8 + $0x1548] sm:$0xff] }
 0x300   :  { %10784 = vmatpush1.bf16.msra.mxu0 %v14289_v38  ;;  %v14401_v38 = vcombine.low %v5052_v50, %v5060_v4  ;;  %v5164_v50 = vld [vmem:[#allocation8 + $0x1580] sm:$0xff] }
 0x301   :  { %10996 = vmatpush1.bf16.msra.mxu1 %v14291_v39  ;;  %10785 = vmatprep.subr.bf16.mxu0 %v14306_v11  ;;  %v14403_v39 = vcombine.low %v5053_v35, %v5061_v12  ;;  %v14418_v11 = vcombine.high %v5068_v56, %v5076_v33  ;;  %v5172_v4 = vld [vmem:[#allocation8 + $0x15c0] sm:$0xff]  ;;  %v5165_v35 = vld [vmem:[#allocation8 + $0x1588] sm:$0xff] }
 0x302   :  { %10997 = vmatprep.subr.bf16.mxu1 %v14308_v34  ;;  %v14420_v34 = vcombine.high %v5069_v2, %v5077_v53  ;;  %v5173_v12 = vld [vmem:[#allocation8 + $0x15c8] sm:$0xff] }
 0x304   :  { %10786 = vmatpush1.bf16.msra.mxu0 %v14305_v58  ;;  %v14417_v58 = vcombine.low %v5068_v56, %v5076_v33  ;;  %v5180_v56 = vld [vmem:[#allocation8 + $0x1600] sm:$0xff] }
 0x305   :  { %10998 = vmatpush1.bf16.msra.mxu1 %v14307_v40  ;;  %10787 = vmatprep.subr.bf16.mxu0 %v14322_v61  ;;  %v14419_v40 = vcombine.low %v5069_v2, %v5077_v53  ;;  %v14434_v61 = vcombine.high %v5084_v45, %v5092_v43  ;;  %v5188_v33 = vld [vmem:[#allocation8 + $0x1640] sm:$0xff]  ;;  %v5181_v2 = vld [vmem:[#allocation8 + $0x1608] sm:$0xff] }
 0x306   :  { %10999 = vmatprep.subr.bf16.mxu1 %v14324_v22  ;;  %v14436_v22 = vcombine.high %v5085_v41, %v5093_v32  ;;  %v5189_v53 = vld [vmem:[#allocation8 + $0x1648] sm:$0xff] }
 0x308   :  { %10788 = vmatpush1.bf16.msra.mxu0 %v14321_v60  ;;  %v14433_v60 = vcombine.low %v5084_v45, %v5092_v43  ;;  %v5196_v45 = vld [vmem:[#allocation8 + $0x1680] sm:$0xff] }
 0x309   :  { %11000 = vmatpush1.bf16.msra.mxu1 %v14323_v19  ;;  %10810 = vmatprep.subr.bf16.mxu0 %v14338_v48  ;;  %v14435_v19 = vcombine.low %v5085_v41, %v5093_v32  ;;  %v14450_v48 = vcombine.high %v5100_v52, %v5108_v20  ;;  %v5204_v43 = vld [vmem:[#allocation8 + $0x16c0] sm:$0xff]  ;;  %v5197_v41 = vld [vmem:[#allocation8 + $0x1688] sm:$0xff] }
 0x30a   :  { %11022 = vmatprep.subr.bf16.mxu1 %v14340_v0  ;;  %v14452_v0 = vcombine.high %v5101_v30, %v5109_v15  ;;  %v5205_v32 = vld [vmem:[#allocation8 + $0x16c8] sm:$0xff] }
 0x30b   :  { %10790 = vmatmul.mubr.bf16.vlgmr.msra.gmra.mrb[16].mxu0 %v16309_v44 }
 0x30c   :  { %11002 = vmatmul.mubr.bf16.vlgmr.msra.gmra.mrb[16].mxu1 %v16309_v44  ;;  %10799 = vmatprep.mubr.bf16.mxu0 %v16365_v57 }
 0x30d   :  { %11011 = vmatprep.mubr.bf16.mxu1 %v16365_v57  ;;  %10811 = vmatpush1.bf16.msra.mxu0 %v14337_v47  ;;  %v14449_v47 = vcombine.low %v5100_v52, %v5108_v20  ;;  %v5212_v52 = vld [vmem:[#allocation8 + $0x1700] sm:$0xff] }
 0x30e   :  { %11023 = vmatpush1.bf16.msra.mxu1 %v14339_v16  ;;  %10812 = vmatprep.subr.bf16.mxu0 %v14354_v37  ;;  %v14451_v16 = vcombine.low %v5101_v30, %v5109_v15  ;;  %v14466_v37 = vcombine.high %v5116_v13, %v5124_v51  ;;  %v5220_v20 = vld [vmem:[#allocation8 + $0x1740] sm:$0xff]  ;;  %v5213_v30 = vld [vmem:[#allocation8 + $0x1708] sm:$0xff] }
 0x30f   :  { %11024 = vmatprep.subr.bf16.mxu1 %v14356_v23  ;;  %v14468_v23 = vcombine.high %v5117_v27, %v5125_v25  ;;  %v5221_v15 = vld [vmem:[#allocation8 + $0x1748] sm:$0xff] }
 0x311   :  { %10813 = vmatpush1.bf16.msra.mxu0 %v14353_v8  ;;  %v14465_v8 = vcombine.low %v5116_v13, %v5124_v51  ;;  %v5228_v13 = vld [vmem:[#allocation8 + $0x1780] sm:$0xff] }
 0x312   :  { %11025 = vmatpush1.bf16.msra.mxu1 %v14355_v26  ;;  %10814 = vmatprep.subr.bf16.mxu0 %v14370_v59  ;;  %v14467_v26 = vcombine.low %v5117_v27, %v5125_v25  ;;  %v14482_v59 = vcombine.high %v5132_v18, %v5140_v29  ;;  %v5236_v51 = vld [vmem:[#allocation8 + $0x17c0] sm:$0xff]  ;;  %v5229_v27 = vld [vmem:[#allocation8 + $0x1788] sm:$0xff] }
 0x313   :  { %10800 = vmatmul.mubr.bf16.gmra.mrb[20].mxu0 %v16353_v54  ;;  %11026 = vmatprep.subr.bf16.mxu1 %v14372_v17  ;;  %v14484_v17 = vcombine.high %v5133_v24, %v5141_v6  ;;  %v5237_v25 = vld [vmem:[#allocation8 + $0x17c8] sm:$0xff] }
 0x314   :  { %11012 = vmatmul.mubr.bf16.gmra.mrb[20].mxu1 %v16353_v54 }
 0x315   :  { %10815 = vmatpush1.bf16.msra.mxu0 %v14369_v36  ;;  %v14481_v36 = vcombine.low %v5132_v18, %v5140_v29  ;;  %v16381_v18 = vld [vmem:[#allocation8 + $0x1800] sm:$0xff] }
 0x316   :  { %11027 = vmatpush1.bf16.msra.mxu1 %v14371_v5  ;;  %10816 = vmatprep.subr.bf16.mxu0 %v14386_v3  ;;  %v14483_v5 = vcombine.low %v5133_v24, %v5141_v6  ;;  %v14498_v3 = vcombine.high %v5148_v1, %v5156_v49  ;;  %v16383_v29 = vld [vmem:[#allocation8 + $0x1840] sm:$0xff]  ;;  %v16385_v24 = vld [vmem:[#allocation8 + $0x1808] sm:$0xff] }
 0x317   :  { %11028 = vmatprep.subr.bf16.mxu1 %v14388_v62  ;;  %v14500_v62 = vcombine.high %v5149_v31, %v5157_v7  ;;  %v16387_v6 = vld [vmem:[#allocation8 + $0x1848] sm:$0xff] }
 0x319   :  { %10817 = vmatpush1.bf16.msra.mxu0 %v14385_v14  ;;  %v14497_v14 = vcombine.low %v5148_v1, %v5156_v49  ;;  %v18037_v1 = vld [vmem:[#allocation23_spill] sm:$0xff] }
 0x31a   :  { %11029 = vmatpush1.bf16.msra.mxu1 %v14387_v28  ;;  %10818 = vmatprep.subr.bf16.mxu0 %v14402_v46  ;;  %v14499_v28 = vcombine.low %v5149_v31, %v5157_v7  ;;  %v14514_v46 = vcombine.high %v5164_v50, %v5172_v4  ;;  %v16394_v49 = vsub.s32 4, %v18037_v1  ;;  %v16397_v31 = vsub.s32 6, %v18037_v1 }
 0x31b   :  { %11030 = vmatprep.subr.bf16.mxu1 %v14404_v63  ;;  %v14516_v63 = vcombine.high %v5165_v35, %v5173_v12  ;;  %v16400_v7 = vsub.s32 5, %v18037_v1 }
 0x31d   :  { %10819 = vmatpush1.bf16.msra.mxu0 %v14401_v38  ;;  %v14513_v38 = vcombine.low %v5164_v50, %v5172_v4 }
 0x31e   :  { %11031 = vmatpush1.bf16.msra.mxu1 %v14403_v39  ;;  %10820 = vmatprep.subr.bf16.mxu0 %v14418_v11  ;;  %v14515_v39 = vcombine.low %v5165_v35, %v5173_v12  ;;  %v14530_v11 = vcombine.high %v5180_v56, %v5188_v33 }
 0x31f   :  { %11032 = vmatprep.subr.bf16.mxu1 %v14420_v34  ;;  %v14532_v34 = vcombine.high %v5181_v2, %v5189_v53 }
 0x321   :  { %10821 = vmatpush1.bf16.msra.mxu0 %v14417_v58  ;;  %v14529_v58 = vcombine.low %v5180_v56, %v5188_v33 }
 0x322   :  { %11033 = vmatpush1.bf16.msra.mxu1 %v14419_v40  ;;  %10822 = vmatprep.subr.bf16.mxu0 %v14434_v61  ;;  %v14531_v40 = vcombine.low %v5181_v2, %v5189_v53  ;;  %v14546_v61 = vcombine.high %v5196_v45, %v5204_v43 }
 0x323   :  { %11034 = vmatprep.subr.bf16.mxu1 %v14436_v22  ;;  %v14548_v22 = vcombine.high %v5197_v41, %v5205_v32 }
 0x325   :  { %10823 = vmatpush1.bf16.msra.mxu0 %v14433_v60  ;;  %v14545_v60 = vcombine.low %v5196_v45, %v5204_v43 }
 0x326   :  { %11035 = vmatpush1.bf16.msra.mxu1 %v14435_v19  ;;  %10824 = vmatprep.subr.bf16.mxu0 %v14450_v48  ;;  %v14547_v19 = vcombine.low %v5197_v41, %v5205_v32  ;;  %v14562_v48 = vcombine.high %v5212_v52, %v5220_v20 }
 0x327   :  { %11036 = vmatprep.subr.bf16.mxu1 %v14452_v0  ;;  %v14564_v0 = vcombine.high %v5213_v30, %v5221_v15 }
 0x329   :  { %10825 = vmatpush1.bf16.msra.mxu0 %v14449_v47  ;;  %v14561_v47 = vcombine.low %v5212_v52, %v5220_v20 }
 0x32a   :  { %11037 = vmatpush1.bf16.msra.mxu1 %v14451_v16  ;;  %10826 = vmatprep.subr.bf16.mxu0 %v14466_v37  ;;  %v14563_v16 = vcombine.low %v5213_v30, %v5221_v15  ;;  %v14578_v37 = vcombine.high %v5228_v13, %v5236_v51 }
 0x32b   :  { %11038 = vmatprep.subr.bf16.mxu1 %v14468_v23  ;;  %v14580_v23 = vcombine.high %v5229_v27, %v5237_v25 }
 0x32d   :  { %10827 = vmatpush1.bf16.msra.mxu0 %v14465_v8  ;;  %v14577_v8 = vcombine.low %v5228_v13, %v5236_v51 }
 0x32e   :  { %11039 = vmatpush1.bf16.msra.mxu1 %v14467_v26  ;;  %10828 = vmatprep.subr.bf16.mxu0 %v14482_v59  ;;  %v14579_v26 = vcombine.low %v5229_v27, %v5237_v25  ;;  %v14594_v59 = vcombine.high %v16381_v18, %v16383_v29 }
 0x32f   :  { %11040 = vmatprep.subr.bf16.mxu1 %v14484_v17  ;;  %v14596_v17 = vcombine.high %v16385_v24, %v16387_v6 }
 0x331   :  { %10829 = vmatpush1.bf16.msra.mxu0 %v14481_v36  ;;  %v16403_v36 = vsub.s32 7, %v18037_v1 }
 0x332   :  { %11041 = vmatpush1.bf16.msra.mxu1 %v14483_v5  ;;  %10830 = vmatprep.subr.bf16.mxu0 %v14498_v3  ;;  %v15381_v5 = vld [vmem:[#allocation7] sm:$0xff] }
 0x333   :  { %11042 = vmatprep.subr.bf16.mxu1 %v14500_v62  ;;  %v16406_v3 = vrot.slane %v15381_v5, %v16394_v49  ;;  %v16409_v62 = vrot.slane %v15381_v5, %v16397_v31  ;;  %v16412_v50 = vrot.slane %v15381_v5, %v16400_v7  ;;  %v16415_v4 = vrot.slane %v15381_v5, %v16403_v36 }
 0x335   :  { %10831 = vmatpush1.bf16.msra.mxu0 %v14497_v14 }
 0x336   :  { %11043 = vmatpush1.bf16.msra.mxu1 %v14499_v28  ;;  %10832 = vmatprep.subr.bf16.mxu0 %v14514_v46 }
 0x337   :  { %11044 = vmatprep.subr.bf16.mxu1 %v14516_v63 }
 0x339   :  { %10833 = vmatpush1.bf16.msra.mxu0 %v14513_v38 }
 0x33a   :  { %11045 = vmatpush1.bf16.msra.mxu1 %v14515_v39  ;;  %10834 = vmatprep.subr.bf16.mxu0 %v14530_v11 }
 0x33b   :  { %11046 = vmatprep.subr.bf16.mxu1 %v14532_v34 }
 0x33d   :  { %10835 = vmatpush1.bf16.msra.mxu0 %v14529_v58 }
 0x33e   :  { %11047 = vmatpush1.bf16.msra.mxu1 %v14531_v40  ;;  %10836 = vmatprep.subr.bf16.mxu0 %v14546_v61 }
 0x33f   :  { %11048 = vmatprep.subr.bf16.mxu1 %v14548_v22 }
 0x341   :  { %10837 = vmatpush1.bf16.msra.mxu0 %v14545_v60 }
 0x342   :  { %11049 = vmatpush1.bf16.msra.mxu1 %v14547_v19  ;;  %10838 = vmatprep.subr.bf16.mxu0 %v14562_v48 }
 0x343   :  { %11050 = vmatprep.subr.bf16.mxu1 %v14564_v0 }
 0x345   :  { %10839 = vmatpush1.bf16.msra.mxu0 %v14561_v47 }
 0x346   :  { %11051 = vmatpush1.bf16.msra.mxu1 %v14563_v16  ;;  %10840 = vmatprep.subr.bf16.mxu0 %v14578_v37 }
 0x347   :  { %11052 = vmatprep.subr.bf16.mxu1 %v14580_v23 }
 0x349   :  { %10841 = vmatpush1.bf16.msra.mxu0 %v14577_v8 }
 0x34a   :  { %11053 = vmatpush1.bf16.msra.mxu1 %v14579_v26  ;;  %10863 = vmatprep.subr.bf16.mxu0 %v14594_v59 }
 0x34b   :  { %11075 = vmatprep.subr.bf16.mxu1 %v14596_v17 }
 0x35d   :  { %v3941_v35 = vpop.f32.mrb[8].mxu0 }
 0x35e   :  { %v16418_v12 = vadd.f32 %v3941_v35, %v16406_v3  ;;  %v4153_v14 = vpop.f32.mrb[8].mxu1  ;;  %v3943_v28 = vpop.f32.mrb[9].mxu0 }
 0x35f   :  { %v16421_v46 = vadd.f32 %v4153_v14, %v16409_v62  ;;  %v16424_v63 = vadd.f32 %v3943_v28, %v16412_v50  ;;  %v4155_v56 = vpop.f32.mrb[9].mxu1  ;;  %v3945_v33 = vpop.f32.mrb[10].mxu0 }
 0x360   :  { %v4176_v2 = vmul.f32 %v16418_v12, %v16418_v12  ;;  %v16429_v53 = vadd.f32 %v4155_v56, %v16415_v4  ;;  %v16432_v38 = vadd.f32 %v3945_v33, %v16406_v3  ;;  %v4157_v39 = vpop.f32.mrb[10].mxu1  ;;  %v3947_v11 = vpop.f32.mrb[11].mxu0 }
 0x361   :  { %v4178_v34 = vmul.f32 %v16421_v46, %v16421_v46  ;;  %v4177_v45 = vmul.f32 %v16424_v63, %v16424_v63  ;;  %v16439_v43 = vadd.f32 %v4157_v39, %v16409_v62  ;;  %v16442_v41 = vadd.f32 %v3947_v11, %v16412_v50  ;;  %v4159_v32 = vpop.f32.mrb[11].mxu1 }
 0x362   :  { %v4208_v58 = vmul.f32 %v16418_v12, %v4176_v2  ;;  %v4179_v40 = vmul.f32 %v16429_v53, %v16429_v53  ;;  %v4184_v61 = vmul.f32 %v16432_v38, %v16432_v38  ;;  %v16450_v22 = vadd.f32 %v4159_v32, %v16415_v4 }
 0x363   :  { %v4210_v52 = vmul.f32 %v16421_v46, %v4178_v34  ;;  %v4209_v20 = vmul.f32 %v16424_v63, %v4177_v45  ;;  %v4186_v30 = vmul.f32 %v16439_v43, %v16439_v43  ;;  %v4185_v15 = vmul.f32 %v16442_v41, %v16442_v41 }
 0x364   :  { %v4240_v60 = vmul.f32 0.044715, %v4208_v58  ;;  %v4211_v19 = vmul.f32 %v16429_v53, %v4179_v40  ;;  %v4216_v48 = vmul.f32 %v16432_v38, %v4184_v61  ;;  %v4187_v0 = vmul.f32 %v16450_v22, %v16450_v22 }
 0x365   :  { %v4242_v13 = vmul.f32 0.044715, %v4210_v52  ;;  %v4241_v51 = vmul.f32 0.044715, %v4209_v20  ;;  %v4218_v27 = vmul.f32 %v16439_v43, %v4186_v30  ;;  %v4217_v25 = vmul.f32 %v16442_v41, %v4185_v15  ;;  %v3951_v47 = vpop.f32.mrb[12].mxu0 }
 0x366   :  { %v4272_v16 = vadd.f32 %v16418_v12, %v4240_v60  ;;  %v4243_v37 = vmul.f32 0.044715, %v4211_v19  ;;  %v4248_v23 = vmul.f32 0.044715, %v4216_v48  ;;  %v4219_v8 = vmul.f32 %v16450_v22, %v4187_v0  ;;  %v4163_v26 = vpop.f32.mrb[12].mxu1  ;;  %v3953_v59 = vpop.f32.mrb[13].mxu0 }
 0x367   :  { %v4274_v17 = vadd.f32 %v16421_v46, %v4242_v13  ;;  %v4273_v1 = vadd.f32 %v16424_v63, %v4241_v51  ;;  %v4250_v5 = vmul.f32 0.044715, %v4218_v27  ;;  %v4249_v35 = vmul.f32 0.044715, %v4217_v25  ;;  %v4165_v14 = vpop.f32.mrb[13].mxu1  ;;  %v3955_v28 = vpop.f32.mrb[14].mxu0 }
 0x368   :  { %v4304_v56 = vmul.f32 0.7978846, %v4272_v16  ;;  %v4275_v33 = vadd.f32 %v16429_v53, %v4243_v37  ;;  %v4280_v2 = vadd.f32 %v16432_v38, %v4248_v23  ;;  %v4251_v39 = vmul.f32 0.044715, %v4219_v8  ;;  %v4167_v11 = vpop.f32.mrb[14].mxu1  ;;  %v3957_v34 = vpop.f32.mrb[15].mxu0 }
 0x369   :  { %v4306_v45 = vmul.f32 0.7978846, %v4274_v17  ;;  %v4305_v32 = vmul.f32 0.7978846, %v4273_v1  ;;  %v4282_v58 = vadd.f32 %v16439_v43, %v4250_v5  ;;  %v4281_v40 = vadd.f32 %v16442_v41, %v4249_v35  ;;  %v16472_v61 = vpop.f32.mrb[15].mxu1 }
 0x36a   :  { %15341 = vtanh.f32 %v4304_v56  ;;  %v4307_v52 = vmul.f32 0.7978846, %v4275_v33  ;;  %v4312_v20 = vmul.f32 0.7978846, %v4280_v2  ;;  %v4283_v30 = vadd.f32 %v16450_v22, %v4251_v39 }
 0x36b   :  { %15343 = vtanh.f32 %v4306_v45  ;;  %v4314_v15 = vmul.f32 0.7978846, %v4282_v58  ;;  %v4313_v60 = vmul.f32 0.7978846, %v4281_v40  ;;  %v16476_v19 = vadd.f32 %v3951_v47, %v16406_v3 }
 0x36c   :  { %15345 = vtanh.f32 %v4305_v32  ;;  %v4315_v48 = vmul.f32 0.7978846, %v4283_v30  ;;  %v16479_v0 = vadd.f32 %v4163_v26, %v16409_v62  ;;  %v16482_v13 = vadd.f32 %v3953_v59, %v16412_v50 }
 0x36d   :  { %15347 = vtanh.f32 %v4307_v52  ;;  %v4192_v51 = vmul.f32 %v16476_v19, %v16476_v19  ;;  %v16487_v27 = vadd.f32 %v4165_v14, %v16415_v4  ;;  %v16490_v25 = vadd.f32 %v3955_v28, %v16406_v3 }
 0x36e   :  { %15349 = vtanh.f32 %v4312_v20  ;;  %v4194_v47 = vmul.f32 %v16479_v0, %v16479_v0  ;;  %v4193_v16 = vmul.f32 %v16482_v13, %v16482_v13  ;;  %v16497_v37 = vadd.f32 %v4167_v11, %v16409_v62 }
 0x36f   :  { %15351 = vtanh.f32 %v4314_v15  ;;  %v4224_v23 = vmul.f32 %v16476_v19, %v4192_v51  ;;  %v4195_v8 = vmul.f32 %v16487_v27, %v16487_v27  ;;  %v4200_v3 = vmul.f32 %v16490_v25, %v16490_v25 }
 0x370   :  { %15353 = vtanh.f32 %v4313_v60  ;;  %v4226_v26 = vmul.f32 %v16479_v0, %v4194_v47  ;;  %v4225_v59 = vmul.f32 %v16482_v13, %v4193_v16  ;;  %v4202_v17 = vmul.f32 %v16497_v37, %v16497_v37 }
 0x371   :  { %15355 = vtanh.f32 %v4315_v48  ;;  %v4256_v62 = vmul.f32 0.044715, %v4224_v23  ;;  %v4227_v1 = vmul.f32 %v16487_v27, %v4195_v8  ;;  %v4232_v5 = vmul.f32 %v16490_v25, %v4200_v3 }
 0x372   :  { %v4258_v35 = vmul.f32 0.044715, %v4226_v26  ;;  %v4257_v14 = vmul.f32 0.044715, %v4225_v59  ;;  %v4234_v28 = vmul.f32 %v16497_v37, %v4202_v17  ;;  %v16515_v58 = vadd.f32 %v3957_v34, %v16412_v50 }
 0x373   :  { %v4288_v56 = vadd.f32 %v16476_v19, %v4256_v62  ;;  %v4259_v33 = vmul.f32 0.044715, %v4227_v1  ;;  %v4264_v2 = vmul.f32 0.044715, %v4232_v5  ;;  %v14593_v16 = vcombine.low %v16381_v18, %v16383_v29 }
 0x374   :  { %v15342_v39 = vpop.eup %15341  ;;  %v4290_v11 = vadd.f32 %v16479_v0, %v4258_v35  ;;  %v4289_v45 = vadd.f32 %v16482_v13, %v4257_v14  ;;  %v4266_v32 = vmul.f32 0.044715, %v4234_v28  ;;  %v4201_v35 = vmul.f32 %v16515_v58, %v16515_v58 }
 0x375   :  { %v15344_v40 = vpop.eup %15343  ;;  %v4368_v52 = vadd.f32 1.0, %v15342_v39  ;;  %v4320_v20 = vmul.f32 0.7978846, %v4288_v56  ;;  %v4291_v30 = vadd.f32 %v16487_v27, %v4259_v33  ;;  %v4296_v15 = vadd.f32 %v16490_v25, %v4264_v2 }
 0x376   :  { %v15346_v60 = vpop.eup %15345  ;;  %v4370_v48 = vadd.f32 1.0, %v15344_v40  ;;  %v4322_v51 = vmul.f32 0.7978846, %v4290_v11  ;;  %v4321_v47 = vmul.f32 0.7978846, %v4289_v45  ;;  %v4298_v50 = vadd.f32 %v16497_v37, %v4266_v32 }
 0x377   :  { %v15348_v23 = vpop.eup %15347  ;;  %v4400_v8 = vmul.f32 0.5, %v4368_v52  ;;  %v4369_v3 = vadd.f32 1.0, %v15346_v60  ;;  %15357 = vtanh.f32 %v4320_v20  ;;  %v4328_v17 = vmul.f32 0.7978846, %v4296_v15 }
 0x378   :  { %v15350_v34 = vpop.eup %15349  ;;  %v4402_v26 = vmul.f32 0.5, %v4370_v48  ;;  %v4371_v59 = vadd.f32 1.0, %v15348_v23  ;;  %15359 = vtanh.f32 %v4322_v51  ;;  %v4323_v5 = vmul.f32 0.7978846, %v4291_v30  ;;  %v5260_v51 = vld [vmem:[#allocation8 + $0x1880] sm:$0xff] }
 0x379   :  { %v15352_v62 = vpop.eup %15351  ;;  %v4376_v1 = vadd.f32 1.0, %v15350_v34  ;;  %v16526_v14 = vadd.f32 %v16472_v61, %v16415_v4  ;;  %v4432_v56 = vmul.f32 %v16418_v12, %v4400_v8  ;;  %v4401_v33 = vmul.f32 0.5, %v4369_v3  ;;  %v5268_v3 = vld [vmem:[#allocation8 + $0x18c0] sm:$0xff]  ;;  %v5269_v34 = vld [vmem:[#allocation8 + $0x18c8] sm:$0xff] }
 0x37a   :  { %v15354_v28 = vpop.eup %15353  ;;  %v4378_v2 = vadd.f32 1.0, %v15352_v62  ;;  %15361 = vtanh.f32 %v4321_v47  ;;  %v4434_v11 = vmul.f32 %v16421_v46, %v4402_v26  ;;  %v4403_v40 = vmul.f32 0.5, %v4371_v59 }
 0x37b   :  { %v15356_v39 = vpop.eup %15355  ;;  %v4408_v45 = vmul.f32 0.5, %v4376_v1  ;;  %v4377_v32 = vadd.f32 1.0, %v15354_v28  ;;  %15363 = vtanh.f32 %v4328_v17  ;;  %v4330_v30 = vmul.f32 0.7978846, %v4298_v50  ;;  %v5261_v50 = vld [vmem:[#allocation8 + $0x1888] sm:$0xff] }
 0x37c   :  { %v4410_v52 = vmul.f32 0.5, %v4378_v2  ;;  %v4379_v20 = vadd.f32 1.0, %v15356_v39  ;;  %v4233_v61 = vmul.f32 %v16515_v58, %v4201_v35  ;;  %v4203_v12 = vmul.f32 %v16526_v14, %v16526_v14  ;;  %v5276_v2 = vld [vmem:[#allocation8 + $0x1900] sm:$0xff] }
 0x37d   :  { %v4440_v15 = vmul.f32 %v16432_v38, %v4408_v45  ;;  %v4409_v4 = vmul.f32 0.5, %v4377_v32  ;;  %v4433_v60 = vmul.f32 %v16424_v63, %v4401_v33  ;;  %15365 = vtanh.f32 %v4330_v30 }
 0x37e   :  { %v4442_v48 = vmul.f32 %v16439_v43, %v4410_v52  ;;  %v4411_v46 = vmul.f32 0.5, %v4379_v20  ;;  %v4265_v8 = vmul.f32 0.044715, %v4233_v61  ;;  %v4235_v38 = vmul.f32 %v16526_v14, %v4203_v12  ;;  %v5292_v12 = vld [vmem:[#allocation8 + $0x1980] sm:$0xff] }
 0x37f   :  { %v16536_v47 = vpack.c.bf16 %v4440_v15, %v4432_v56  ;;  %v4441_v23 = vmul.f32 %v16442_v41, %v4409_v4  ;;  %v4435_v26 = vmul.f32 %v16429_v53, %v4403_v40  ;;  %v14595_v43 = vcombine.low %v16385_v24, %v16387_v6  ;;  %v5284_v24 = vld [vmem:[#allocation8 + $0x1940] sm:$0xff]  ;;  %v5277_v6 = vld [vmem:[#allocation8 + $0x1908] sm:$0xff] }
 0x380   :  { %v16541_v59 = vpack.c.bf16 %v4442_v48, %v4434_v11  ;;  %v4443_v63 = vmul.f32 %v16450_v22, %v4411_v46  ;;  %15367 = vtanh.f32 %v4323_v5  ;;  %v4297_v41 = vadd.f32 %v16515_v58, %v4265_v8  ;;  %v5285_v5 = vld [vmem:[#allocation8 + $0x1948] sm:$0xff] }
 0x381   :  { %v15358_v17 = vpop.eup %15357  ;;  %v16546_v62 = vpack.c.bf16 %v4441_v23, %v4433_v60  ;;  %v4267_v1 = vmul.f32 0.044715, %v4235_v38  ;;  %v14610_v33 = vcombine.high %v5260_v51, %v5268_v3  ;;  %v14612_v53 = vcombine.high %v5261_v50, %v5269_v34  ;;  %v5300_v60 = vld [vmem:[#allocation8 + $0x19c0] sm:$0xff]  ;;  %v5293_v48 = vld [vmem:[#allocation8 + $0x1988] sm:$0xff] }
 0x382   :  { %v15360_v35 = vpop.eup %15359  ;;  %v16549_v28 = vpack.c.bf16 %v4443_v63, %v4435_v26  ;;  %v4384_v56 = vadd.f32 1.0, %v15358_v17  ;;  %v4329_v39 = vmul.f32 0.7978846, %v4297_v41  ;;  %v14609_v45 = vcombine.low %v5260_v51, %v5268_v3  ;;  %v5301_v46 = vld [vmem:[#allocation8 + $0x19c8] sm:$0xff]  ;;  %v5308_v26 = vld [vmem:[#allocation8 + $0x1a00] sm:$0xff] }
 0x383   :  { %v4299_v22 = vadd.f32 %v16526_v14, %v4267_v1  ;;  %10842 = vmatprep.mubr.bf16.mxu0 %v16546_v62  ;;  %11054 = vmatprep.mubr.bf16.mxu1 %v16546_v62  ;;  %v4386_v40 = vadd.f32 1.0, %v15360_v35  ;;  %v14611_v20 = vcombine.low %v5261_v50, %v5269_v34  ;;  %v14626_v4 = vcombine.high %v5276_v2, %v5284_v24  ;;  %v5316_v17 = vld [vmem:[#allocation8 + $0x1a40] sm:$0xff]  ;;  %v5309_v41 = vld [vmem:[#allocation8 + $0x1a08] sm:$0xff] }
 0x384   :  { %v15362_v11 = vpop.eup %15361  ;;  %10843 = vmatmul.mubr.bf16.vlgmr.msra.gmra.mrb[16].mxu0 %v16536_v47  ;;  %11055 = vmatmul.mubr.bf16.vlgmr.msra.gmra.mrb[16].mxu1 %v16536_v47  ;;  %15369 = vtanh.f32 %v4329_v39  ;;  %v4416_v30 = vmul.f32 0.5, %v4384_v56  ;;  %v14628_v61 = vcombine.high %v5277_v6, %v5285_v5  ;;  %v14625_v8 = vcombine.low %v5276_v2, %v5284_v24  ;;  %v5317_v1 = vld [vmem:[#allocation8 + $0x1a48] sm:$0xff]  ;;  %v5324_v24 = vld [vmem:[#allocation8 + $0x1a80] sm:$0xff] }
 0x385   :  { %v15364_v32 = vpop.eup %15363  ;;  %v4331_v52 = vmul.f32 0.7978846, %v4299_v22  ;;  %10864 = vmatpush1.bf16.msra.mxu0 %v14593_v16  ;;  %11076 = vmatpush1.bf16.msra.mxu1 %v14595_v43  ;;  %v4418_v38 = vmul.f32 0.5, %v4386_v40  ;;  %v14627_v18 = vcombine.low %v5277_v6, %v5285_v5  ;;  %v14642_v29 = vcombine.high %v5292_v12, %v5300_v60  ;;  %v5332_v6 = vld [vmem:[#allocation8 + $0x1ac0] sm:$0xff] }
 0x386   :  { %v4392_v15 = vadd.f32 1.0, %v15364_v32  ;;  %10865 = vmatprep.subr.bf16.mxu0 %v14610_v33  ;;  %11077 = vmatprep.subr.bf16.mxu1 %v14612_v53  ;;  %v4448_v16 = vmul.f32 %v16476_v19, %v4416_v30  ;;  %v14644_v34 = vcombine.high %v5293_v48, %v5301_v46  ;;  %v4385_v35 = vadd.f32 1.0, %v15362_v11  ;;  %v5325_v11 = vld [vmem:[#allocation8 + $0x1a88] sm:$0xff] }
 0x387   :  { %15371 = vtanh.f32 %v4331_v52  ;;  %v15366_v51 = vpop.eup %15365  ;;  %v14641_v33 = vcombine.low %v5292_v12, %v5300_v60  ;;  %v4450_v53 = vmul.f32 %v16479_v0, %v4418_v38  ;;  %v14643_v19 = vcombine.low %v5293_v48, %v5301_v46  ;;  %v5333_v32 = vld [vmem:[#allocation8 + $0x1ac8] sm:$0xff] }
 0x388   :  { %v4424_v23 = vmul.f32 0.5, %v4392_v15  ;;  %v4394_v3 = vadd.f32 1.0, %v15366_v51  ;;  %v14658_v39 = vcombine.high %v5308_v26, %v5316_v17  ;;  %v14660_v22 = vcombine.high %v5309_v41, %v5317_v1  ;;  %v5340_v51 = vld [vmem:[#allocation8 + $0x1b00] sm:$0xff]  ;;  %v5349_v38 = vld [vmem:[#allocation8 + $0x1b48] sm:$0xff] }
 0x389   :  { %10866 = vmatpush1.bf16.msra.mxu0 %v14609_v45  ;;  %11078 = vmatpush1.bf16.msra.mxu1 %v14611_v20  ;;  %v4417_v40 = vmul.f32 0.5, %v4385_v35  ;;  %v14659_v20 = vcombine.low %v5309_v41, %v5317_v1  ;;  %v14674_v30 = vcombine.high %v5324_v24, %v5332_v6  ;;  %v14676_v12 = vcombine.high %v5325_v11, %v5333_v32  ;;  %v5372_v35 = vld [vmem:[#allocation8 + $0x1c00] sm:$0xff] }
 0x38a   :  { %v4456_v50 = vmul.f32 %v16490_v25, %v4424_v23  ;;  %10867 = vmatprep.subr.bf16.mxu0 %v14626_v4  ;;  %11079 = vmatprep.subr.bf16.mxu1 %v14628_v61  ;;  %v15368_v63 = vpop.eup %15367  ;;  %v4426_v43 = vmul.f32 0.5, %v4394_v3  ;;  %v5348_v23 = vld [vmem:[#allocation8 + $0x1b40] sm:$0xff] }
 0x38b   :  { %v4387_v25 = vadd.f32 1.0, %v15368_v63  ;;  %v4449_v60 = vmul.f32 %v16482_v13, %v4417_v40  ;;  %v5357_v63 = vld [vmem:[#allocation8 + $0x1b88] sm:$0xff] }
 0x38c   :  { %v16561_v56 = vpack.c.bf16 %v4456_v50, %v4448_v16  ;;  %v4458_v2 = vmul.f32 %v16497_v37, %v4426_v43  ;;  %v14657_v37 = vcombine.low %v5308_v26, %v5316_v17  ;;  %v14673_v16 = vcombine.low %v5324_v24, %v5332_v6  ;;  %v5356_v26 = vld [vmem:[#allocation8 + $0x1b80] sm:$0xff] }
 0x38d   :  { %10868 = vmatpush1.bf16.msra.mxu0 %v14625_v8  ;;  %11080 = vmatpush1.bf16.msra.mxu1 %v14627_v18  ;;  %v4419_v15 = vmul.f32 0.5, %v4387_v25  ;;  %v5341_v8 = vld [vmem:[#allocation8 + $0x1b08] sm:$0xff]  ;;  %v14675_v50 = vcombine.low %v5325_v11, %v5333_v32  ;;  %v14689_v43 = vcombine.low %v5340_v51, %v5348_v23  ;;  %v5388_v24 = vld [vmem:[#allocation8 + $0x1c80] sm:$0xff] }
 0x38e   :  { %10869 = vmatprep.subr.bf16.mxu0 %v14642_v29  ;;  %11081 = vmatprep.subr.bf16.mxu1 %v14644_v34  ;;  %v15370_v5 = vpop.eup %15369  ;;  %v16565_v45 = vpack.c.bf16 %v4458_v2, %v4450_v53  ;;  %v14692_v34 = vcombine.high %v5341_v8, %v5349_v38  ;;  %v14691_v17 = vcombine.low %v5341_v8, %v5349_v38  ;;  %v5373_v53 = vld [vmem:[#allocation8 + $0x1c08] sm:$0xff]  ;;  %v5396_v6 = vld [vmem:[#allocation8 + $0x1cc0] sm:$0xff] }
 0x38f   :  { %v4393_v52 = vadd.f32 1.0, %v15370_v5  ;;  %v4451_v3 = vmul.f32 %v16487_v27, %v4419_v15  ;;  %v5364_v27 = vld [vmem:[#allocation8 + $0x1bc0] sm:$0xff]  ;;  %v5381_v2 = vld [vmem:[#allocation8 + $0x1c48] sm:$0xff] }
 0x390   :  { %v14706_v41 = vcombine.high %v5356_v26, %v5364_v27  ;;  %v5389_v5 = vld [vmem:[#allocation8 + $0x1c88] sm:$0xff]  ;;  %v14723_v40 = vcombine.low %v5373_v53, %v5381_v2 }
 0x391   :  { %v15372_v0 = vpop.eup %15371  ;;  %10870 = vmatpush1.bf16.msra.mxu0 %v14641_v33  ;;  %11082 = vmatpush1.bf16.msra.mxu1 %v14643_v19  ;;  %v4425_v4 = vmul.f32 0.5, %v4393_v52  ;;  %v5380_v33 = vld [vmem:[#allocation8 + $0x1c40] sm:$0xff]  ;;  %v14705_v19 = vcombine.low %v5356_v26, %v5364_v27  ;;  %v5397_v11 = vld [vmem:[#allocation8 + $0x1cc8] sm:$0xff]  ;;  %v14738_v52 = vcombine.high %v5388_v24, %v5396_v6 }
 0x392   :  { %v4395_v61 = vadd.f32 1.0, %v15372_v0  ;;  %10871 = vmatprep.subr.bf16.mxu0 %v14658_v39  ;;  %11083 = vmatprep.subr.bf16.mxu1 %v14660_v22  ;;  %v14722_v39 = vcombine.high %v5372_v35, %v5380_v33  ;;  %v14724_v22 = vcombine.high %v5373_v53, %v5381_v2  ;;  %v14721_v32 = vcombine.low %v5372_v35, %v5380_v33  ;;  %v5413_v15 = vld [vmem:[#allocation8 + $0x1d48] sm:$0xff] }
 0x393   :  { %v4457_v48 = vmul.f32 %v16515_v58, %v4425_v4  ;;  %v14690_v58 = vcombine.high %v5340_v51, %v5348_v23  ;;  %v14740_v0 = vcombine.high %v5389_v5, %v5397_v11  ;;  %v14737_v4 = vcombine.low %v5388_v24, %v5396_v6  ;;  %v5421_v51 = vld [vmem:[#allocation8 + $0x1d88] sm:$0xff] }
 0x394   :  { %v4427_v46 = vmul.f32 0.5, %v4395_v61  ;;  %v14739_v61 = vcombine.low %v5389_v5, %v5397_v11  ;;  %v5429_v23 = vld [vmem:[#allocation8 + $0x1dc8] sm:$0xff] }
 0x395   :  { %10872 = vmatpush1.bf16.msra.mxu0 %v14657_v37  ;;  %11084 = vmatpush1.bf16.msra.mxu1 %v14659_v20  ;;  %v16570_v18 = vpack.c.bf16 %v4457_v48, %v4449_v60  ;;  %v5404_v37 = vld [vmem:[#allocation8 + $0x1d00] sm:$0xff]  ;;  %v14771_v27 = vcombine.low %v5421_v51, %v5429_v23 }
 0x396   :  { %v4459_v29 = vmul.f32 %v16526_v14, %v4427_v46  ;;  %10873 = vmatprep.subr.bf16.mxu0 %v14674_v30  ;;  %11085 = vmatprep.subr.bf16.mxu1 %v14676_v12  ;;  %v5365_v14 = vld [vmem:[#allocation8 + $0x1bc8] sm:$0xff]  ;;  %v5412_v20 = vld [vmem:[#allocation8 + $0x1d40] sm:$0xff] }
 0x397   :  { %10852 = vmatprep.mubr.bf16.mxu0 %v16570_v18  ;;  %11064 = vmatprep.mubr.bf16.mxu1 %v16570_v18  ;;  %v14708_v1 = vcombine.high %v5357_v63, %v5365_v14  ;;  %v14707_v25 = vcombine.low %v5357_v63, %v5365_v14  ;;  %v5405_v30 = vld [vmem:[#allocation8 + $0x1d08] sm:$0xff]  ;;  %v14754_v12 = vcombine.high %v5404_v37, %v5412_v20  ;;  %v5420_v48 = vld [vmem:[#allocation8 + $0x1d80] sm:$0xff] }
 0x398   :  { %v16573_v13 = vpack.c.bf16 %v4459_v29, %v4451_v3  ;;  %10853 = vmatmul.mubr.bf16.gmra.mrb[20].mxu0 %v16561_v56  ;;  %11065 = vmatmul.mubr.bf16.gmra.mrb[20].mxu1 %v16561_v56  ;;  %v14756_v60 = vcombine.high %v5405_v30, %v5413_v15  ;;  %v5428_v46 = vld [vmem:[#allocation8 + $0x1dc0] sm:$0xff]  ;;  %v14753_v8 = vcombine.low %v5404_v37, %v5412_v20 }
 0x399   :  { %10895 = vmatprep.mubr.bf16.mxu0 %v16549_v28  ;;  %11107 = vmatprep.mubr.bf16.mxu1 %v16549_v28  ;;  %v14755_v38 = vcombine.low %v5405_v30, %v5413_v15  ;;  %v14770_v3 = vcombine.high %v5420_v48, %v5428_v46  ;;  %v14772_v29 = vcombine.high %v5421_v51, %v5429_v23 }
 0x39a   :  { %10874 = vmatpush1.bf16.msra.mxu0 %v14673_v16  ;;  %11086 = vmatpush1.bf16.msra.mxu1 %v14675_v50  ;;  %v5436_v16 = vld [vmem:[#allocation8 + $0x1e00] sm:$0xff]  ;;  %v14769_v26 = vcombine.low %v5420_v48, %v5428_v46 }
 0x39b   :  { %10875 = vmatprep.subr.bf16.mxu0 %v14690_v58  ;;  %11087 = vmatprep.subr.bf16.mxu1 %v14692_v34  ;;  %v5444_v50 = vld [vmem:[#allocation8 + $0x1e40] sm:$0xff]  ;;  %v5437_v58 = vld [vmem:[#allocation8 + $0x1e08] sm:$0xff] }
 0x39c   :  { %v5445_v34 = vld [vmem:[#allocation8 + $0x1e48] sm:$0xff]  ;;  %v14786_v63 = vcombine.high %v5436_v16, %v5444_v50  ;;  %v14785_v35 = vcombine.low %v5436_v16, %v5444_v50 }
 0x39d   :  { %v14788_v14 = vcombine.high %v5437_v58, %v5445_v34  ;;  %v14787_v33 = vcombine.low %v5437_v58, %v5445_v34 }
 0x39e   :  { %10876 = vmatpush1.bf16.msra.mxu0 %v14689_v43  ;;  %11088 = vmatpush1.bf16.msra.mxu1 %v14691_v17  ;;  %v5452_v43 = vld [vmem:[#allocation8 + $0x1e80] sm:$0xff] }
 0x39f   :  { %10877 = vmatprep.subr.bf16.mxu0 %v14706_v41  ;;  %11089 = vmatprep.subr.bf16.mxu1 %v14708_v1  ;;  %v5460_v17 = vld [vmem:[#allocation8 + $0x1ec0] sm:$0xff]  ;;  %v5453_v41 = vld [vmem:[#allocation8 + $0x1e88] sm:$0xff] }
 0x3a0   :  { %v5461_v1 = vld [vmem:[#allocation8 + $0x1ec8] sm:$0xff]  ;;  %v14802_v53 = vcombine.high %v5452_v43, %v5460_v17  ;;  %v14801_v24 = vcombine.low %v5452_v43, %v5460_v17 }
 0x3a1   :  { %v14804_v2 = vcombine.high %v5453_v41, %v5461_v1  ;;  %v14803_v6 = vcombine.low %v5453_v41, %v5461_v1 }
 0x3a2   :  { %10878 = vmatpush1.bf16.msra.mxu0 %v14705_v19  ;;  %11090 = vmatpush1.bf16.msra.mxu1 %v14707_v25  ;;  %v5468_v19 = vld [vmem:[#allocation8 + $0x1f00] sm:$0xff] }
 0x3a3   :  { %10879 = vmatprep.subr.bf16.mxu0 %v14722_v39  ;;  %11091 = vmatprep.subr.bf16.mxu1 %v14724_v22  ;;  %v5476_v25 = vld [vmem:[#allocation8 + $0x1f40] sm:$0xff]  ;;  %v5469_v39 = vld [vmem:[#allocation8 + $0x1f08] sm:$0xff] }
 0x3a4   :  { %v5477_v22 = vld [vmem:[#allocation8 + $0x1f48] sm:$0xff]  ;;  %v14818_v5 = vcombine.high %v5468_v19, %v5476_v25  ;;  %v14817_v37 = vcombine.low %v5468_v19, %v5476_v25 }
 0x3a5   :  { %v14820_v11 = vcombine.high %v5469_v39, %v5477_v22  ;;  %v14819_v20 = vcombine.low %v5469_v39, %v5477_v22 }
 0x3a6   :  { %10880 = vmatpush1.bf16.msra.mxu0 %v14721_v32  ;;  %11092 = vmatpush1.bf16.msra.mxu1 %v14723_v40  ;;  %v5484_v32 = vld [vmem:[#allocation8 + $0x1f80] sm:$0xff] }
 0x3a7   :  { %10881 = vmatprep.subr.bf16.mxu0 %v14738_v52  ;;  %11093 = vmatprep.subr.bf16.mxu1 %v14740_v0  ;;  %v5492_v40 = vld [vmem:[#allocation8 + $0x1fc0] sm:$0xff]  ;;  %v5485_v52 = vld [vmem:[#allocation8 + $0x1f88] sm:$0xff] }
 0x3a8   :  { %v5493_v0 = vld [vmem:[#allocation8 + $0x1fc8] sm:$0xff]  ;;  %v14834_v30 = vcombine.high %v5484_v32, %v5492_v40  ;;  %v14833_v48 = vcombine.low %v5484_v32, %v5492_v40 }
 0x3a9   :  { %v14836_v15 = vcombine.high %v5485_v52, %v5493_v0  ;;  %v14835_v46 = vcombine.low %v5485_v52, %v5493_v0 }
 0x3aa   :  { %10882 = vmatpush1.bf16.msra.mxu0 %v14737_v4  ;;  %11094 = vmatpush1.bf16.msra.mxu1 %v14739_v61  ;;  %v4478_v4 = vld [vmem:[#allocation8 + $0x10] sm:$0xff] }
 0x3ab   :  { %10883 = vmatprep.subr.bf16.mxu0 %v14754_v12  ;;  %11095 = vmatprep.subr.bf16.mxu1 %v14756_v60  ;;  %v4486_v61 = vld [vmem:[#allocation8 + $0x50] sm:$0xff]  ;;  %v4479_v12 = vld [vmem:[#allocation8 + $0x18] sm:$0xff] }
 0x3ac   :  { %v4487_v60 = vld [vmem:[#allocation8 + $0x58] sm:$0xff]  ;;  %v13830_v51 = vcombine.high %v4478_v4, %v4486_v61  ;;  %v13829_v16 = vcombine.low %v4478_v4, %v4486_v61 }
 0x3ad   :  { %v13832_v23 = vcombine.high %v4479_v12, %v4487_v60  ;;  %v13831_v50 = vcombine.low %v4479_v12, %v4487_v60 }
 0x3ae   :  { %10884 = vmatpush1.bf16.msra.mxu0 %v14753_v8  ;;  %11096 = vmatpush1.bf16.msra.mxu1 %v14755_v38  ;;  %v4494_v8 = vld [vmem:[#allocation8 + $0x90] sm:$0xff] }
 0x3af   :  { %10885 = vmatprep.subr.bf16.mxu0 %v14770_v3  ;;  %11097 = vmatprep.subr.bf16.mxu1 %v14772_v29  ;;  %v4502_v38 = vld [vmem:[#allocation8 + $0xd0] sm:$0xff]  ;;  %v4495_v3 = vld [vmem:[#allocation8 + $0x98] sm:$0xff] }
 0x3b0   :  { %v4503_v29 = vld [vmem:[#allocation8 + $0xd8] sm:$0xff]  ;;  %v13846_v58 = vcombine.high %v4494_v8, %v4502_v38  ;;  %v13845_v43 = vcombine.low %v4494_v8, %v4502_v38 }
 0x3b1   :  { %v13848_v34 = vcombine.high %v4495_v3, %v4503_v29  ;;  %v13847_v17 = vcombine.low %v4495_v3, %v4503_v29 }
 0x3b2   :  { %10886 = vmatpush1.bf16.msra.mxu0 %v14769_v26  ;;  %11098 = vmatpush1.bf16.msra.mxu1 %v14771_v27  ;;  %v4510_v26 = vld [vmem:[#allocation8 + $0x110] sm:$0xff] }
 0x3b3   :  { %10887 = vmatprep.subr.bf16.mxu0 %v14786_v63  ;;  %11099 = vmatprep.subr.bf16.mxu1 %v14788_v14  ;;  %v4518_v27 = vld [vmem:[#allocation8 + $0x150] sm:$0xff]  ;;  %v4511_v63 = vld [vmem:[#allocation8 + $0x118] sm:$0xff] }
 0x3b4   :  { %v4519_v14 = vld [vmem:[#allocation8 + $0x158] sm:$0xff]  ;;  %v13862_v41 = vcombine.high %v4510_v26, %v4518_v27  ;;  %v13861_v19 = vcombine.low %v4510_v26, %v4518_v27 }
 0x3b5   :  { %v13864_v1 = vcombine.high %v4511_v63, %v4519_v14  ;;  %v13863_v25 = vcombine.low %v4511_v63, %v4519_v14 }
 0x3b6   :  { %10888 = vmatpush1.bf16.msra.mxu0 %v14785_v35  ;;  %11100 = vmatpush1.bf16.msra.mxu1 %v14787_v33  ;;  %v4526_v35 = vld [vmem:[#allocation8 + $0x190] sm:$0xff] }
 0x3b7   :  { %10889 = vmatprep.subr.bf16.mxu0 %v14802_v53  ;;  %11101 = vmatprep.subr.bf16.mxu1 %v14804_v2  ;;  %v4534_v33 = vld [vmem:[#allocation8 + $0x1d0] sm:$0xff]  ;;  %v4527_v53 = vld [vmem:[#allocation8 + $0x198] sm:$0xff] }
 0x3b8   :  { %v4535_v2 = vld [vmem:[#allocation8 + $0x1d8] sm:$0xff]  ;;  %v13878_v39 = vcombine.high %v4526_v35, %v4534_v33  ;;  %v13877_v32 = vcombine.low %v4526_v35, %v4534_v33 }
 0x3b9   :  { %v13880_v22 = vcombine.high %v4527_v53, %v4535_v2  ;;  %v13879_v40 = vcombine.low %v4527_v53, %v4535_v2 }
 0x3ba   :  { %10890 = vmatpush1.bf16.msra.mxu0 %v14801_v24  ;;  %11102 = vmatpush1.bf16.msra.mxu1 %v14803_v6  ;;  %v4542_v24 = vld [vmem:[#allocation8 + $0x210] sm:$0xff] }
 0x3bb   :  { %10891 = vmatprep.subr.bf16.mxu0 %v14818_v5  ;;  %11103 = vmatprep.subr.bf16.mxu1 %v14820_v11  ;;  %v4550_v6 = vld [vmem:[#allocation8 + $0x250] sm:$0xff]  ;;  %v4543_v5 = vld [vmem:[#allocation8 + $0x218] sm:$0xff] }
 0x3bc   :  { %v4551_v11 = vld [vmem:[#allocation8 + $0x258] sm:$0xff]  ;;  %v13894_v52 = vcombine.high %v4542_v24, %v4550_v6  ;;  %v13893_v4 = vcombine.low %v4542_v24, %v4550_v6 }
 0x3bd   :  { %v13896_v0 = vcombine.high %v4543_v5, %v4551_v11  ;;  %v13895_v61 = vcombine.low %v4543_v5, %v4551_v11 }
 0x3be   :  { %10892 = vmatpush1.bf16.msra.mxu0 %v14817_v37  ;;  %11104 = vmatpush1.bf16.msra.mxu1 %v14819_v20  ;;  %v4558_v37 = vld [vmem:[#allocation8 + $0x290] sm:$0xff] }
 0x3bf   :  { %10893 = vmatprep.subr.bf16.mxu0 %v14834_v30  ;;  %11105 = vmatprep.subr.bf16.mxu1 %v14836_v15  ;;  %v4566_v20 = vld [vmem:[#allocation8 + $0x2d0] sm:$0xff]  ;;  %v4559_v30 = vld [vmem:[#allocation8 + $0x298] sm:$0xff] }
 0x3c0   :  { %v4567_v15 = vld [vmem:[#allocation8 + $0x2d8] sm:$0xff]  ;;  %v13910_v12 = vcombine.high %v4558_v37, %v4566_v20  ;;  %v13909_v8 = vcombine.low %v4558_v37, %v4566_v20 }
 0x3c1   :  { %v13912_v60 = vcombine.high %v4559_v30, %v4567_v15  ;;  %v13911_v38 = vcombine.low %v4559_v30, %v4567_v15 }
 0x3c2   :  { %10894 = vmatpush1.bf16.msra.mxu0 %v14833_v48  ;;  %11106 = vmatpush1.bf16.msra.mxu1 %v14835_v46  ;;  %v4574_v48 = vld [vmem:[#allocation8 + $0x310] sm:$0xff] }
 0x3c3   :  { %11128 = vmatprep.subr.bf16.mxu0 %v13830_v51  ;;  %11340 = vmatprep.subr.bf16.mxu1 %v13832_v23  ;;  %v4582_v46 = vld [vmem:[#allocation8 + $0x350] sm:$0xff]  ;;  %v4575_v51 = vld [vmem:[#allocation8 + $0x318] sm:$0xff] }
 0x3c4   :  { %v4583_v23 = vld [vmem:[#allocation8 + $0x358] sm:$0xff]  ;;  %v13926_v3 = vcombine.high %v4574_v48, %v4582_v46  ;;  %v13925_v26 = vcombine.low %v4574_v48, %v4582_v46 }
 0x3c5   :  { %10896 = vmatmul.mubr.bf16.vlgmr.msra.gmra.mrb[16].mxu0 %v16541_v59  ;;  %11108 = vmatmul.mubr.bf16.vlgmr.msra.gmra.mrb[16].mxu1 %v16541_v59  ;;  %v13928_v29 = vcombine.high %v4575_v51, %v4583_v23  ;;  %v13927_v27 = vcombine.low %v4575_v51, %v4583_v23 }
 0x3c6   :  { %10905 = vmatprep.mubr.bf16.mxu0 %v16573_v13  ;;  %11117 = vmatprep.mubr.bf16.mxu1 %v16573_v13 }
 0x3c7   :  { %11129 = vmatpush1.bf16.msra.mxu0 %v13829_v16  ;;  %11341 = vmatpush1.bf16.msra.mxu1 %v13831_v50  ;;  %v4590_v16 = vld [vmem:[#allocation8 + $0x390] sm:$0xff] }
 0x3c8   :  { %11130 = vmatprep.subr.bf16.mxu0 %v13846_v58  ;;  %11342 = vmatprep.subr.bf16.mxu1 %v13848_v34  ;;  %v4598_v50 = vld [vmem:[#allocation8 + $0x3d0] sm:$0xff]  ;;  %v4591_v58 = vld [vmem:[#allocation8 + $0x398] sm:$0xff] }
 0x3c9   :  { %v4599_v34 = vld [vmem:[#allocation8 + $0x3d8] sm:$0xff]  ;;  %v13942_v63 = vcombine.high %v4590_v16, %v4598_v50  ;;  %v13941_v35 = vcombine.low %v4590_v16, %v4598_v50 }
 0x3ca   :  { %v13944_v14 = vcombine.high %v4591_v58, %v4599_v34  ;;  %v13943_v33 = vcombine.low %v4591_v58, %v4599_v34 }
 0x3cb   :  { %11131 = vmatpush1.bf16.msra.mxu0 %v13845_v43  ;;  %11343 = vmatpush1.bf16.msra.mxu1 %v13847_v17  ;;  %v4606_v43 = vld [vmem:[#allocation8 + $0x410] sm:$0xff] }
 0x3cc   :  { %11132 = vmatprep.subr.bf16.mxu0 %v13862_v41  ;;  %11344 = vmatprep.subr.bf16.mxu1 %v13864_v1  ;;  %v4614_v17 = vld [vmem:[#allocation8 + $0x450] sm:$0xff]  ;;  %v4607_v41 = vld [vmem:[#allocation8 + $0x418] sm:$0xff] }
 0x3cd   :  { %10906 = vmatmul.mubr.bf16.gmra.mrb[20].mxu0 %v16565_v45  ;;  %11118 = vmatmul.mubr.bf16.gmra.mrb[20].mxu1 %v16565_v45  ;;  %v4615_v1 = vld [vmem:[#allocation8 + $0x458] sm:$0xff]  ;;  %v13958_v53 = vcombine.high %v4606_v43, %v4614_v17  ;;  %v13957_v24 = vcombine.low %v4606_v43, %v4614_v17 }
 0x3ce   :  { %11160 = vmatprep.mubr.bf16.mxu0 %v16318_v9  ;;  %11372 = vmatprep.mubr.bf16.mxu1 %v16318_v9  ;;  %v13960_v2 = vcombine.high %v4607_v41, %v4615_v1  ;;  %v13959_v6 = vcombine.low %v4607_v41, %v4615_v1 }
 0x3cf   :  { %11133 = vmatpush1.bf16.msra.mxu0 %v13861_v19  ;;  %11345 = vmatpush1.bf16.msra.mxu1 %v13863_v25  ;;  %v4622_v19 = vld [vmem:[#allocation8 + $0x490] sm:$0xff] }
 0x3d0   :  { %11134 = vmatprep.subr.bf16.mxu0 %v13878_v39  ;;  %11346 = vmatprep.subr.bf16.mxu1 %v13880_v22  ;;  %v4630_v25 = vld [vmem:[#allocation8 + $0x4d0] sm:$0xff]  ;;  %v4623_v39 = vld [vmem:[#allocation8 + $0x498] sm:$0xff] }
 0x3d1   :  { %v4631_v22 = vld [vmem:[#allocation8 + $0x4d8] sm:$0xff]  ;;  %v13974_v5 = vcombine.high %v4622_v19, %v4630_v25  ;;  %v13973_v37 = vcombine.low %v4622_v19, %v4630_v25 }
 0x3d2   :  { %v13976_v11 = vcombine.high %v4623_v39, %v4631_v22  ;;  %v13975_v20 = vcombine.low %v4623_v39, %v4631_v22 }
 0x3d3   :  { %11135 = vmatpush1.bf16.msra.mxu0 %v13877_v32  ;;  %11347 = vmatpush1.bf16.msra.mxu1 %v13879_v40  ;;  %v4638_v32 = vld [vmem:[#allocation8 + $0x510] sm:$0xff] }
 0x3d4   :  { %11136 = vmatprep.subr.bf16.mxu0 %v13894_v52  ;;  %11348 = vmatprep.subr.bf16.mxu1 %v13896_v0  ;;  %v4646_v40 = vld [vmem:[#allocation8 + $0x550] sm:$0xff]  ;;  %v4639_v52 = vld [vmem:[#allocation8 + $0x518] sm:$0xff] }
 0x3d5   :  { %v4647_v0 = vld [vmem:[#allocation8 + $0x558] sm:$0xff]  ;;  %v13990_v30 = vcombine.high %v4638_v32, %v4646_v40  ;;  %v13989_v48 = vcombine.low %v4638_v32, %v4646_v40 }
 0x3d6   :  { %v13992_v15 = vcombine.high %v4639_v52, %v4647_v0  ;;  %v13991_v46 = vcombine.low %v4639_v52, %v4647_v0 }
 0x3d7   :  { %11137 = vmatpush1.bf16.msra.mxu0 %v13893_v4  ;;  %11349 = vmatpush1.bf16.msra.mxu1 %v13895_v61  ;;  %v4654_v4 = vld [vmem:[#allocation8 + $0x590] sm:$0xff] }
 0x3d8   :  { %11138 = vmatprep.subr.bf16.mxu0 %v13910_v12  ;;  %11350 = vmatprep.subr.bf16.mxu1 %v13912_v60  ;;  %v4662_v61 = vld [vmem:[#allocation8 + $0x5d0] sm:$0xff]  ;;  %v4655_v12 = vld [vmem:[#allocation8 + $0x598] sm:$0xff] }
 0x3d9   :  { %v4663_v60 = vld [vmem:[#allocation8 + $0x5d8] sm:$0xff]  ;;  %v14006_v51 = vcombine.high %v4654_v4, %v4662_v61  ;;  %v14005_v16 = vcombine.low %v4654_v4, %v4662_v61 }
 0x3da   :  { %v14008_v23 = vcombine.high %v4655_v12, %v4663_v60  ;;  %v14007_v50 = vcombine.low %v4655_v12, %v4663_v60 }
 0x3db   :  { %11139 = vmatpush1.bf16.msra.mxu0 %v13909_v8  ;;  %11351 = vmatpush1.bf16.msra.mxu1 %v13911_v38  ;;  %v4670_v8 = vld [vmem:[#allocation8 + $0x610] sm:$0xff] }
 0x3dc   :  { %11140 = vmatprep.subr.bf16.mxu0 %v13926_v3  ;;  %11352 = vmatprep.subr.bf16.mxu1 %v13928_v29  ;;  %v4678_v38 = vld [vmem:[#allocation8 + $0x650] sm:$0xff]  ;;  %v4671_v3 = vld [vmem:[#allocation8 + $0x618] sm:$0xff] }
 0x3dd   :  { %v4679_v29 = vld [vmem:[#allocation8 + $0x658] sm:$0xff]  ;;  %v14022_v58 = vcombine.high %v4670_v8, %v4678_v38  ;;  %v14021_v43 = vcombine.low %v4670_v8, %v4678_v38 }
 0x3de   :  { %v14024_v34 = vcombine.high %v4671_v3, %v4679_v29  ;;  %v14023_v17 = vcombine.low %v4671_v3, %v4679_v29 }
 0x3df   :  { %11141 = vmatpush1.bf16.msra.mxu0 %v13925_v26  ;;  %11353 = vmatpush1.bf16.msra.mxu1 %v13927_v27  ;;  %v4686_v26 = vld [vmem:[#allocation8 + $0x690] sm:$0xff] }
 0x3e0   :  { %11142 = vmatprep.subr.bf16.mxu0 %v13942_v63  ;;  %11354 = vmatprep.subr.bf16.mxu1 %v13944_v14  ;;  %v4694_v27 = vld [vmem:[#allocation8 + $0x6d0] sm:$0xff]  ;;  %v4687_v63 = vld [vmem:[#allocation8 + $0x698] sm:$0xff] }
 0x3e1   :  { %v4695_v14 = vld [vmem:[#allocation8 + $0x6d8] sm:$0xff]  ;;  %v14038_v41 = vcombine.high %v4686_v26, %v4694_v27  ;;  %v14037_v19 = vcombine.low %v4686_v26, %v4694_v27 }
 0x3e2   :  { %v14040_v1 = vcombine.high %v4687_v63, %v4695_v14  ;;  %v14039_v25 = vcombine.low %v4687_v63, %v4695_v14 }
 0x3e3   :  { %11143 = vmatpush1.bf16.msra.mxu0 %v13941_v35  ;;  %11355 = vmatpush1.bf16.msra.mxu1 %v13943_v33  ;;  %v4702_v35 = vld [vmem:[#allocation8 + $0x710] sm:$0xff] }
 0x3e4   :  { %11144 = vmatprep.subr.bf16.mxu0 %v13958_v53  ;;  %11356 = vmatprep.subr.bf16.mxu1 %v13960_v2  ;;  %v4710_v33 = vld [vmem:[#allocation8 + $0x750] sm:$0xff]  ;;  %v4703_v53 = vld [vmem:[#allocation8 + $0x718] sm:$0xff] }
 0x3e5   :  { %v4711_v2 = vld [vmem:[#allocation8 + $0x758] sm:$0xff]  ;;  %v14054_v39 = vcombine.high %v4702_v35, %v4710_v33  ;;  %v14053_v32 = vcombine.low %v4702_v35, %v4710_v33 }
 0x3e6   :  { %v14056_v22 = vcombine.high %v4703_v53, %v4711_v2  ;;  %v14055_v40 = vcombine.low %v4703_v53, %v4711_v2 }
 0x3e7   :  { %11145 = vmatpush1.bf16.msra.mxu0 %v13957_v24  ;;  %11357 = vmatpush1.bf16.msra.mxu1 %v13959_v6  ;;  %v4718_v24 = vld [vmem:[#allocation8 + $0x790] sm:$0xff] }
 0x3e8   :  { %11146 = vmatprep.subr.bf16.mxu0 %v13974_v5  ;;  %11358 = vmatprep.subr.bf16.mxu1 %v13976_v11  ;;  %v4726_v6 = vld [vmem:[#allocation8 + $0x7d0] sm:$0xff]  ;;  %v4719_v5 = vld [vmem:[#allocation8 + $0x798] sm:$0xff] }
 0x3e9   :  { %v4727_v11 = vld [vmem:[#allocation8 + $0x7d8] sm:$0xff]  ;;  %v14070_v52 = vcombine.high %v4718_v24, %v4726_v6  ;;  %v14069_v4 = vcombine.low %v4718_v24, %v4726_v6 }
 0x3ea   :  { %v14072_v0 = vcombine.high %v4719_v5, %v4727_v11  ;;  %v14071_v61 = vcombine.low %v4719_v5, %v4727_v11 }
 0x3eb   :  { %11147 = vmatpush1.bf16.msra.mxu0 %v13973_v37  ;;  %11359 = vmatpush1.bf16.msra.mxu1 %v13975_v20  ;;  %v4734_v37 = vld [vmem:[#allocation8 + $0x810] sm:$0xff] }
 0x3ec   :  { %11148 = vmatprep.subr.bf16.mxu0 %v13990_v30  ;;  %11360 = vmatprep.subr.bf16.mxu1 %v13992_v15  ;;  %v4742_v20 = vld [vmem:[#allocation8 + $0x850] sm:$0xff]  ;;  %v4735_v30 = vld [vmem:[#allocation8 + $0x818] sm:$0xff] }
 0x3ed   :  { %v4743_v15 = vld [vmem:[#allocation8 + $0x858] sm:$0xff]  ;;  %v14086_v12 = vcombine.high %v4734_v37, %v4742_v20  ;;  %v14085_v8 = vcombine.low %v4734_v37, %v4742_v20 }
 0x3ee   :  { %v14088_v60 = vcombine.high %v4735_v30, %v4743_v15  ;;  %v14087_v38 = vcombine.low %v4735_v30, %v4743_v15 }
 0x3ef   :  { %11149 = vmatpush1.bf16.msra.mxu0 %v13989_v48  ;;  %11361 = vmatpush1.bf16.msra.mxu1 %v13991_v46  ;;  %v4750_v48 = vld [vmem:[#allocation8 + $0x890] sm:$0xff] }
 0x3f0   :  { %11150 = vmatprep.subr.bf16.mxu0 %v14006_v51  ;;  %11362 = vmatprep.subr.bf16.mxu1 %v14008_v23  ;;  %v4758_v46 = vld [vmem:[#allocation8 + $0x8d0] sm:$0xff]  ;;  %v4751_v51 = vld [vmem:[#allocation8 + $0x898] sm:$0xff] }
 0x3f1   :  { %v4759_v23 = vld [vmem:[#allocation8 + $0x8d8] sm:$0xff]  ;;  %v14102_v3 = vcombine.high %v4750_v48, %v4758_v46  ;;  %v14101_v26 = vcombine.low %v4750_v48, %v4758_v46 }
 0x3f2   :  { %v14104_v29 = vcombine.high %v4751_v51, %v4759_v23  ;;  %v14103_v27 = vcombine.low %v4751_v51, %v4759_v23 }
 0x3f3   :  { %11151 = vmatpush1.bf16.msra.mxu0 %v14005_v16  ;;  %11363 = vmatpush1.bf16.msra.mxu1 %v14007_v50  ;;  %v4766_v16 = vld [vmem:[#allocation8 + $0x910] sm:$0xff] }
 0x3f4   :  { %11152 = vmatprep.subr.bf16.mxu0 %v14022_v58  ;;  %11364 = vmatprep.subr.bf16.mxu1 %v14024_v34  ;;  %v4774_v50 = vld [vmem:[#allocation8 + $0x950] sm:$0xff]  ;;  %v4767_v58 = vld [vmem:[#allocation8 + $0x918] sm:$0xff] }
 0x3f5   :  { %v4775_v34 = vld [vmem:[#allocation8 + $0x958] sm:$0xff]  ;;  %v14118_v63 = vcombine.high %v4766_v16, %v4774_v50  ;;  %v14117_v35 = vcombine.low %v4766_v16, %v4774_v50 }
 0x3f6   :  { %v14120_v14 = vcombine.high %v4767_v58, %v4775_v34  ;;  %v14119_v33 = vcombine.low %v4767_v58, %v4775_v34 }
 0x3f7   :  { %11153 = vmatpush1.bf16.msra.mxu0 %v14021_v43  ;;  %11365 = vmatpush1.bf16.msra.mxu1 %v14023_v17  ;;  %v4782_v43 = vld [vmem:[#allocation8 + $0x990] sm:$0xff] }
 0x3f8   :  { %11154 = vmatprep.subr.bf16.mxu0 %v14038_v41  ;;  %11366 = vmatprep.subr.bf16.mxu1 %v14040_v1  ;;  %v4790_v17 = vld [vmem:[#allocation8 + $0x9d0] sm:$0xff]  ;;  %v4783_v41 = vld [vmem:[#allocation8 + $0x998] sm:$0xff] }
 0x3f9   :  { %v4791_v1 = vld [vmem:[#allocation8 + $0x9d8] sm:$0xff]  ;;  %v14134_v53 = vcombine.high %v4782_v43, %v4790_v17  ;;  %v14133_v24 = vcombine.low %v4782_v43, %v4790_v17 }
 0x3fa   :  { %v14136_v2 = vcombine.high %v4783_v41, %v4791_v1  ;;  %v14135_v6 = vcombine.low %v4783_v41, %v4791_v1 }
 0x3fb   :  { %11155 = vmatpush1.bf16.msra.mxu0 %v14037_v19  ;;  %11367 = vmatpush1.bf16.msra.mxu1 %v14039_v25  ;;  %v4798_v19 = vld [vmem:[#allocation8 + $0xa10] sm:$0xff] }
 0x3fc   :  { %11156 = vmatprep.subr.bf16.mxu0 %v14054_v39  ;;  %11368 = vmatprep.subr.bf16.mxu1 %v14056_v22  ;;  %v4806_v25 = vld [vmem:[#allocation8 + $0xa50] sm:$0xff]  ;;  %v4799_v39 = vld [vmem:[#allocation8 + $0xa18] sm:$0xff] }
 0x3fd   :  { %v4807_v22 = vld [vmem:[#allocation8 + $0xa58] sm:$0xff]  ;;  %v14150_v5 = vcombine.high %v4798_v19, %v4806_v25  ;;  %v14149_v37 = vcombine.low %v4798_v19, %v4806_v25 }
 0x3fe   :  { %v14152_v11 = vcombine.high %v4799_v39, %v4807_v22  ;;  %v14151_v20 = vcombine.low %v4799_v39, %v4807_v22 }
 0x3ff   :  { %11157 = vmatpush1.bf16.msra.mxu0 %v14053_v32  ;;  %11369 = vmatpush1.bf16.msra.mxu1 %v14055_v40  ;;  %v4814_v32 = vld [vmem:[#allocation8 + $0xa90] sm:$0xff] }
 0x400   :  { %11158 = vmatprep.subr.bf16.mxu0 %v14070_v52  ;;  %11370 = vmatprep.subr.bf16.mxu1 %v14072_v0  ;;  %v4822_v40 = vld [vmem:[#allocation8 + $0xad0] sm:$0xff]  ;;  %v4815_v52 = vld [vmem:[#allocation8 + $0xa98] sm:$0xff] }
 0x401   :  { %v4823_v0 = vld [vmem:[#allocation8 + $0xad8] sm:$0xff]  ;;  %v14166_v30 = vcombine.high %v4814_v32, %v4822_v40  ;;  %v14165_v48 = vcombine.low %v4814_v32, %v4822_v40 }
 0x402   :  { %v14168_v15 = vcombine.high %v4815_v52, %v4823_v0  ;;  %v14167_v46 = vcombine.low %v4815_v52, %v4823_v0 }
 0x403   :  { %11159 = vmatpush1.bf16.msra.mxu0 %v14069_v4  ;;  %11371 = vmatpush1.bf16.msra.mxu1 %v14071_v61  ;;  %v4830_v4 = vld [vmem:[#allocation8 + $0xb10] sm:$0xff] }
 0x404   :  { %11181 = vmatprep.subr.bf16.mxu0 %v14086_v12  ;;  %11393 = vmatprep.subr.bf16.mxu1 %v14088_v60  ;;  %v4838_v61 = vld [vmem:[#allocation8 + $0xb50] sm:$0xff]  ;;  %v4831_v12 = vld [vmem:[#allocation8 + $0xb18] sm:$0xff] }
 0x405   :  { %v4839_v60 = vld [vmem:[#allocation8 + $0xb58] sm:$0xff]  ;;  %v14182_v51 = vcombine.high %v4830_v4, %v4838_v61  ;;  %v14181_v16 = vcombine.low %v4830_v4, %v4838_v61 }
 0x406   :  { %11161 = vmatmul.mubr.bf16.vlgmr.msra.gmra.mrb[24].mxu0 %v16301_v21  ;;  %11373 = vmatmul.mubr.bf16.vlgmr.msra.gmra.mrb[24].mxu1 %v16301_v21  ;;  %v14184_v23 = vcombine.high %v4831_v12, %v4839_v60  ;;  %v14183_v50 = vcombine.low %v4831_v12, %v4839_v60 }
 0x407   :  { %11170 = vmatprep.mubr.bf16.mxu0 %v16362_v42  ;;  %11182 = vmatpush1.bf16.msra.mxu0 %v14085_v8  ;;  %v4846_v8 = vld [vmem:[#allocation8 + $0xb90] sm:$0xff] }
 0x408   :  { %11382 = vmatprep.mubr.bf16.mxu1 %v16362_v42  ;;  %11394 = vmatpush1.bf16.msra.mxu1 %v14087_v38  ;;  %v4854_v38 = vld [vmem:[#allocation8 + $0xbd0] sm:$0xff] }
 0x409   :  { %11183 = vmatprep.subr.bf16.mxu0 %v14102_v3  ;;  %11395 = vmatprep.subr.bf16.mxu1 %v14104_v29  ;;  %v4847_v3 = vld [vmem:[#allocation8 + $0xb98] sm:$0xff]  ;;  %v14198_v58 = vcombine.high %v4846_v8, %v4854_v38  ;;  %v14197_v43 = vcombine.low %v4846_v8, %v4854_v38 }
 0x40a   :  { %v4855_v29 = vld [vmem:[#allocation8 + $0xbd8] sm:$0xff] }
 0x40b   :  { %11184 = vmatpush1.bf16.msra.mxu0 %v14101_v26  ;;  %v14200_v34 = vcombine.high %v4847_v3, %v4855_v29  ;;  %v4862_v26 = vld [vmem:[#allocation8 + $0xc10] sm:$0xff]  ;;  %v14199_v17 = vcombine.low %v4847_v3, %v4855_v29 }
 0x40c   :  { %11396 = vmatpush1.bf16.msra.mxu1 %v14103_v27  ;;  %11185 = vmatprep.subr.bf16.mxu0 %v14118_v63  ;;  %v4870_v27 = vld [vmem:[#allocation8 + $0xc50] sm:$0xff]  ;;  %v4863_v63 = vld [vmem:[#allocation8 + $0xc18] sm:$0xff] }
 0x40d   :  { %11397 = vmatprep.subr.bf16.mxu1 %v14120_v14  ;;  %v4871_v14 = vld [vmem:[#allocation8 + $0xc58] sm:$0xff]  ;;  %v14214_v41 = vcombine.high %v4862_v26, %v4870_v27  ;;  %v14213_v19 = vcombine.low %v4862_v26, %v4870_v27 }
 0x40e   :  { %11171 = vmatmul.mubr.bf16.gmra.mrb[28].mxu0 %v16347_v55  ;;  %11383 = vmatmul.mubr.bf16.gmra.mrb[28].mxu1 %v16347_v55  ;;  %v14216_v1 = vcombine.high %v4863_v63, %v4871_v14  ;;  %v14215_v25 = vcombine.low %v4863_v63, %v4871_v14 }
 0x40f   :  { %11186 = vmatpush1.bf16.msra.mxu0 %v14117_v35  ;;  %11213 = vmatprep.mubr.bf16.mxu0 %v16324_v10  ;;  %v4878_v35 = vld [vmem:[#allocation8 + $0xc90] sm:$0xff] }
 0x410   :  { %11398 = vmatpush1.bf16.msra.mxu1 %v14119_v33  ;;  %11425 = vmatprep.mubr.bf16.mxu1 %v16324_v10  ;;  %v4886_v33 = vld [vmem:[#allocation8 + $0xcd0] sm:$0xff] }
 0x411   :  { %11187 = vmatprep.subr.bf16.mxu0 %v14134_v53  ;;  %11399 = vmatprep.subr.bf16.mxu1 %v14136_v2  ;;  %v4879_v53 = vld [vmem:[#allocation8 + $0xc98] sm:$0xff]  ;;  %v14230_v39 = vcombine.high %v4878_v35, %v4886_v33  ;;  %v14229_v32 = vcombine.low %v4878_v35, %v4886_v33 }
 0x412   :  { %v4887_v2 = vld [vmem:[#allocation8 + $0xcd8] sm:$0xff] }
 0x413   :  { %11188 = vmatpush1.bf16.msra.mxu0 %v14133_v24  ;;  %v14232_v22 = vcombine.high %v4879_v53, %v4887_v2  ;;  %v4894_v24 = vld [vmem:[#allocation8 + $0xd10] sm:$0xff]  ;;  %v14231_v40 = vcombine.low %v4879_v53, %v4887_v2 }
 0x414   :  { %11400 = vmatpush1.bf16.msra.mxu1 %v14135_v6  ;;  %11189 = vmatprep.subr.bf16.mxu0 %v14150_v5  ;;  %v4902_v6 = vld [vmem:[#allocation8 + $0xd50] sm:$0xff]  ;;  %v4895_v5 = vld [vmem:[#allocation8 + $0xd18] sm:$0xff] }
 0x415   :  { %11401 = vmatprep.subr.bf16.mxu1 %v14152_v11  ;;  %v4903_v11 = vld [vmem:[#allocation8 + $0xd58] sm:$0xff]  ;;  %v14246_v52 = vcombine.high %v4894_v24, %v4902_v6  ;;  %v14245_v4 = vcombine.low %v4894_v24, %v4902_v6 }
 0x416   :  { %v14248_v0 = vcombine.high %v4895_v5, %v4903_v11  ;;  %v14247_v61 = vcombine.low %v4895_v5, %v4903_v11 }
 0x417   :  { %11190 = vmatpush1.bf16.msra.mxu0 %v14149_v37  ;;  %v4910_v37 = vld [vmem:[#allocation8 + $0xd90] sm:$0xff] }
 0x418   :  { %11402 = vmatpush1.bf16.msra.mxu1 %v14151_v20  ;;  %11191 = vmatprep.subr.bf16.mxu0 %v14166_v30  ;;  %v4918_v20 = vld [vmem:[#allocation8 + $0xdd0] sm:$0xff]  ;;  %v4911_v30 = vld [vmem:[#allocation8 + $0xd98] sm:$0xff] }
 0x419   :  { %11403 = vmatprep.subr.bf16.mxu1 %v14168_v15  ;;  %v4919_v15 = vld [vmem:[#allocation8 + $0xdd8] sm:$0xff]  ;;  %v14262_v12 = vcombine.high %v4910_v37, %v4918_v20  ;;  %v14261_v8 = vcombine.low %v4910_v37, %v4918_v20 }
 0x41a   :  { %v14264_v60 = vcombine.high %v4911_v30, %v4919_v15  ;;  %v14263_v38 = vcombine.low %v4911_v30, %v4919_v15 }
 0x41b   :  { %11192 = vmatpush1.bf16.msra.mxu0 %v14165_v48  ;;  %v4926_v48 = vld [vmem:[#allocation8 + $0xe10] sm:$0xff] }
 0x41c   :  { %11404 = vmatpush1.bf16.msra.mxu1 %v14167_v46  ;;  %11193 = vmatprep.subr.bf16.mxu0 %v14182_v51  ;;  %v4934_v46 = vld [vmem:[#allocation8 + $0xe50] sm:$0xff]  ;;  %v4927_v51 = vld [vmem:[#allocation8 + $0xe18] sm:$0xff] }
 0x41d   :  { %11405 = vmatprep.subr.bf16.mxu1 %v14184_v23  ;;  %v4935_v23 = vld [vmem:[#allocation8 + $0xe58] sm:$0xff]  ;;  %v14278_v3 = vcombine.high %v4926_v48, %v4934_v46  ;;  %v14277_v26 = vcombine.low %v4926_v48, %v4934_v46 }
 0x41e   :  { %v14280_v29 = vcombine.high %v4927_v51, %v4935_v23  ;;  %v14279_v27 = vcombine.low %v4927_v51, %v4935_v23 }
 0x41f   :  { %11194 = vmatpush1.bf16.msra.mxu0 %v14181_v16  ;;  %v4942_v16 = vld [vmem:[#allocation8 + $0xe90] sm:$0xff] }
 0x420   :  { %11406 = vmatpush1.bf16.msra.mxu1 %v14183_v50  ;;  %11195 = vmatprep.subr.bf16.mxu0 %v14198_v58  ;;  %v4950_v50 = vld [vmem:[#allocation8 + $0xed0] sm:$0xff]  ;;  %v4943_v58 = vld [vmem:[#allocation8 + $0xe98] sm:$0xff] }
 0x421   :  { %11407 = vmatprep.subr.bf16.mxu1 %v14200_v34  ;;  %v4951_v34 = vld [vmem:[#allocation8 + $0xed8] sm:$0xff]  ;;  %v14294_v63 = vcombine.high %v4942_v16, %v4950_v50  ;;  %v14293_v35 = vcombine.low %v4942_v16, %v4950_v50 }
 0x422   :  { %v14296_v14 = vcombine.high %v4943_v58, %v4951_v34  ;;  %v14295_v33 = vcombine.low %v4943_v58, %v4951_v34 }
 0x423   :  { %11196 = vmatpush1.bf16.msra.mxu0 %v14197_v43  ;;  %v4958_v43 = vld [vmem:[#allocation8 + $0xf10] sm:$0xff] }
 0x424   :  { %11408 = vmatpush1.bf16.msra.mxu1 %v14199_v17  ;;  %11197 = vmatprep.subr.bf16.mxu0 %v14214_v41  ;;  %v4966_v17 = vld [vmem:[#allocation8 + $0xf50] sm:$0xff]  ;;  %v4959_v41 = vld [vmem:[#allocation8 + $0xf18] sm:$0xff] }
 0x425   :  { %11409 = vmatprep.subr.bf16.mxu1 %v14216_v1  ;;  %v4967_v1 = vld [vmem:[#allocation8 + $0xf58] sm:$0xff]  ;;  %v14310_v53 = vcombine.high %v4958_v43, %v4966_v17  ;;  %v14309_v24 = vcombine.low %v4958_v43, %v4966_v17 }
 0x426   :  { %v14312_v2 = vcombine.high %v4959_v41, %v4967_v1  ;;  %v14311_v6 = vcombine.low %v4959_v41, %v4967_v1 }
 0x427   :  { %11198 = vmatpush1.bf16.msra.mxu0 %v14213_v19  ;;  %v4974_v19 = vld [vmem:[#allocation8 + $0xf90] sm:$0xff] }
 0x428   :  { %11410 = vmatpush1.bf16.msra.mxu1 %v14215_v25  ;;  %11199 = vmatprep.subr.bf16.mxu0 %v14230_v39  ;;  %v4982_v25 = vld [vmem:[#allocation8 + $0xfd0] sm:$0xff]  ;;  %v4975_v39 = vld [vmem:[#allocation8 + $0xf98] sm:$0xff] }
 0x429   :  { %11411 = vmatprep.subr.bf16.mxu1 %v14232_v22  ;;  %v4983_v22 = vld [vmem:[#allocation8 + $0xfd8] sm:$0xff]  ;;  %v14326_v5 = vcombine.high %v4974_v19, %v4982_v25  ;;  %v14325_v37 = vcombine.low %v4974_v19, %v4982_v25 }
 0x42a   :  { %v14328_v11 = vcombine.high %v4975_v39, %v4983_v22  ;;  %v14327_v20 = vcombine.low %v4975_v39, %v4983_v22 }
 0x42b   :  { %11200 = vmatpush1.bf16.msra.mxu0 %v14229_v32  ;;  %v4990_v32 = vld [vmem:[#allocation8 + $0x1010] sm:$0xff] }
 0x42c   :  { %11412 = vmatpush1.bf16.msra.mxu1 %v14231_v40  ;;  %11201 = vmatprep.subr.bf16.mxu0 %v14246_v52  ;;  %v4998_v40 = vld [vmem:[#allocation8 + $0x1050] sm:$0xff]  ;;  %v4991_v52 = vld [vmem:[#allocation8 + $0x1018] sm:$0xff] }
 0x42d   :  { %11413 = vmatprep.subr.bf16.mxu1 %v14248_v0  ;;  %v4999_v0 = vld [vmem:[#allocation8 + $0x1058] sm:$0xff]  ;;  %v14342_v30 = vcombine.high %v4990_v32, %v4998_v40  ;;  %v14341_v48 = vcombine.low %v4990_v32, %v4998_v40 }
 0x42e   :  { %v14344_v15 = vcombine.high %v4991_v52, %v4999_v0  ;;  %v14343_v46 = vcombine.low %v4991_v52, %v4999_v0 }
 0x42f   :  { %11202 = vmatpush1.bf16.msra.mxu0 %v14245_v4  ;;  %v5006_v4 = vld [vmem:[#allocation8 + $0x1090] sm:$0xff] }
 0x430   :  { %11414 = vmatpush1.bf16.msra.mxu1 %v14247_v61  ;;  %11203 = vmatprep.subr.bf16.mxu0 %v14262_v12  ;;  %v5014_v61 = vld [vmem:[#allocation8 + $0x10d0] sm:$0xff]  ;;  %v5007_v12 = vld [vmem:[#allocation8 + $0x1098] sm:$0xff] }
 0x431   :  { %11415 = vmatprep.subr.bf16.mxu1 %v14264_v60  ;;  %v5015_v60 = vld [vmem:[#allocation8 + $0x10d8] sm:$0xff]  ;;  %v14358_v51 = vcombine.high %v5006_v4, %v5014_v61  ;;  %v14357_v16 = vcombine.low %v5006_v4, %v5014_v61 }
 0x432   :  { %v14360_v23 = vcombine.high %v5007_v12, %v5015_v60  ;;  %v14359_v50 = vcombine.low %v5007_v12, %v5015_v60 }
 0x433   :  { %11204 = vmatpush1.bf16.msra.mxu0 %v14261_v8  ;;  %v5022_v8 = vld [vmem:[#allocation8 + $0x1110] sm:$0xff] }
 0x434   :  { %11416 = vmatpush1.bf16.msra.mxu1 %v14263_v38  ;;  %11205 = vmatprep.subr.bf16.mxu0 %v14278_v3  ;;  %v5030_v38 = vld [vmem:[#allocation8 + $0x1150] sm:$0xff]  ;;  %v5023_v3 = vld [vmem:[#allocation8 + $0x1118] sm:$0xff] }
 0x435   :  { %11417 = vmatprep.subr.bf16.mxu1 %v14280_v29  ;;  %v5031_v29 = vld [vmem:[#allocation8 + $0x1158] sm:$0xff]  ;;  %v14374_v58 = vcombine.high %v5022_v8, %v5030_v38  ;;  %v14373_v43 = vcombine.low %v5022_v8, %v5030_v38 }
 0x436   :  { %v14376_v34 = vcombine.high %v5023_v3, %v5031_v29  ;;  %v14375_v17 = vcombine.low %v5023_v3, %v5031_v29 }
 0x437   :  { %11206 = vmatpush1.bf16.msra.mxu0 %v14277_v26  ;;  %v5038_v26 = vld [vmem:[#allocation8 + $0x1190] sm:$0xff] }
 0x438   :  { %11418 = vmatpush1.bf16.msra.mxu1 %v14279_v27  ;;  %11207 = vmatprep.subr.bf16.mxu0 %v14294_v63  ;;  %v5046_v27 = vld [vmem:[#allocation8 + $0x11d0] sm:$0xff]  ;;  %v5039_v63 = vld [vmem:[#allocation8 + $0x1198] sm:$0xff] }
 0x439   :  { %11419 = vmatprep.subr.bf16.mxu1 %v14296_v14  ;;  %v5047_v14 = vld [vmem:[#allocation8 + $0x11d8] sm:$0xff]  ;;  %v14390_v41 = vcombine.high %v5038_v26, %v5046_v27  ;;  %v14389_v19 = vcombine.low %v5038_v26, %v5046_v27 }
 0x43a   :  { %v14392_v1 = vcombine.high %v5039_v63, %v5047_v14  ;;  %v14391_v25 = vcombine.low %v5039_v63, %v5047_v14 }
 0x43b   :  { %11208 = vmatpush1.bf16.msra.mxu0 %v14293_v35  ;;  %v5054_v35 = vld [vmem:[#allocation8 + $0x1210] sm:$0xff] }
 0x43c   :  { %11420 = vmatpush1.bf16.msra.mxu1 %v14295_v33  ;;  %11209 = vmatprep.subr.bf16.mxu0 %v14310_v53  ;;  %v5062_v33 = vld [vmem:[#allocation8 + $0x1250] sm:$0xff]  ;;  %v5055_v53 = vld [vmem:[#allocation8 + $0x1218] sm:$0xff] }
 0x43d   :  { %11421 = vmatprep.subr.bf16.mxu1 %v14312_v2  ;;  %v5063_v2 = vld [vmem:[#allocation8 + $0x1258] sm:$0xff]  ;;  %v14406_v39 = vcombine.high %v5054_v35, %v5062_v33  ;;  %v14405_v32 = vcombine.low %v5054_v35, %v5062_v33 }
 0x43e   :  { %v14408_v22 = vcombine.high %v5055_v53, %v5063_v2  ;;  %v14407_v40 = vcombine.low %v5055_v53, %v5063_v2 }
 0x43f   :  { %11210 = vmatpush1.bf16.msra.mxu0 %v14309_v24  ;;  %v5070_v24 = vld [vmem:[#allocation8 + $0x1290] sm:$0xff] }
 0x440   :  { %11422 = vmatpush1.bf16.msra.mxu1 %v14311_v6  ;;  %11211 = vmatprep.subr.bf16.mxu0 %v14326_v5  ;;  %v5078_v6 = vld [vmem:[#allocation8 + $0x12d0] sm:$0xff]  ;;  %v5071_v5 = vld [vmem:[#allocation8 + $0x1298] sm:$0xff] }
 0x441   :  { %11423 = vmatprep.subr.bf16.mxu1 %v14328_v11  ;;  %v5079_v11 = vld [vmem:[#allocation8 + $0x12d8] sm:$0xff]  ;;  %v14422_v52 = vcombine.high %v5070_v24, %v5078_v6  ;;  %v14421_v4 = vcombine.low %v5070_v24, %v5078_v6 }
 0x442   :  { %v14424_v0 = vcombine.high %v5071_v5, %v5079_v11  ;;  %v14423_v61 = vcombine.low %v5071_v5, %v5079_v11 }
 0x443   :  { %11212 = vmatpush1.bf16.msra.mxu0 %v14325_v37  ;;  %v5086_v37 = vld [vmem:[#allocation8 + $0x1310] sm:$0xff] }
 0x444   :  { %11424 = vmatpush1.bf16.msra.mxu1 %v14327_v20  ;;  %11234 = vmatprep.subr.bf16.mxu0 %v14342_v30  ;;  %v5094_v20 = vld [vmem:[#allocation8 + $0x1350] sm:$0xff]  ;;  %v5087_v30 = vld [vmem:[#allocation8 + $0x1318] sm:$0xff] }
 0x445   :  { %11446 = vmatprep.subr.bf16.mxu1 %v14344_v15  ;;  %v5095_v15 = vld [vmem:[#allocation8 + $0x1358] sm:$0xff]  ;;  %v14438_v12 = vcombine.high %v5086_v37, %v5094_v20  ;;  %v14437_v8 = vcombine.low %v5086_v37, %v5094_v20 }
 0x446   :  { %11214 = vmatmul.mubr.bf16.vlgmr.msra.gmra.mrb[24].mxu0 %v16309_v44  ;;  %v14440_v60 = vcombine.high %v5087_v30, %v5095_v15  ;;  %v14439_v38 = vcombine.low %v5087_v30, %v5095_v15 }
 0x447   :  { %11426 = vmatmul.mubr.bf16.vlgmr.msra.gmra.mrb[24].mxu1 %v16309_v44  ;;  %11223 = vmatprep.mubr.bf16.mxu0 %v16365_v57 }
 0x448   :  { %11235 = vmatpush1.bf16.msra.mxu0 %v14341_v48  ;;  %11435 = vmatprep.mubr.bf16.mxu1 %v16365_v57  ;;  %v5102_v48 = vld [vmem:[#allocation8 + $0x1390] sm:$0xff] }
 0x449   :  { %11447 = vmatpush1.bf16.msra.mxu1 %v14343_v46  ;;  %11236 = vmatprep.subr.bf16.mxu0 %v14358_v51  ;;  %v5110_v46 = vld [vmem:[#allocation8 + $0x13d0] sm:$0xff]  ;;  %v5103_v51 = vld [vmem:[#allocation8 + $0x1398] sm:$0xff] }
 0x44a   :  { %11448 = vmatprep.subr.bf16.mxu1 %v14360_v23  ;;  %v5111_v23 = vld [vmem:[#allocation8 + $0x13d8] sm:$0xff]  ;;  %v14454_v3 = vcombine.high %v5102_v48, %v5110_v46  ;;  %v14453_v26 = vcombine.low %v5102_v48, %v5110_v46 }
 0x44b   :  { %v14456_v29 = vcombine.high %v5103_v51, %v5111_v23  ;;  %v14455_v27 = vcombine.low %v5103_v51, %v5111_v23 }
 0x44c   :  { %11237 = vmatpush1.bf16.msra.mxu0 %v14357_v16  ;;  %v5118_v16 = vld [vmem:[#allocation8 + $0x1410] sm:$0xff] }
 0x44d   :  { %11449 = vmatpush1.bf16.msra.mxu1 %v14359_v50  ;;  %11238 = vmatprep.subr.bf16.mxu0 %v14374_v58  ;;  %v5126_v50 = vld [vmem:[#allocation8 + $0x1450] sm:$0xff]  ;;  %v5119_v58 = vld [vmem:[#allocation8 + $0x1418] sm:$0xff] }
 0x44e   :  { %11224 = vmatmul.mubr.bf16.gmra.mrb[28].mxu0 %v16353_v54  ;;  %11450 = vmatprep.subr.bf16.mxu1 %v14376_v34  ;;  %v5127_v34 = vld [vmem:[#allocation8 + $0x1458] sm:$0xff]  ;;  %v14470_v63 = vcombine.high %v5118_v16, %v5126_v50  ;;  %v14469_v35 = vcombine.low %v5118_v16, %v5126_v50 }
 0x44f   :  { %11436 = vmatmul.mubr.bf16.gmra.mrb[28].mxu1 %v16353_v54  ;;  %11266 = vmatprep.mubr.bf16.mxu0 %v16546_v62  ;;  %v14472_v14 = vcombine.high %v5119_v58, %v5127_v34  ;;  %v14471_v33 = vcombine.low %v5119_v58, %v5127_v34 }
 0x450   :  { %11239 = vmatpush1.bf16.msra.mxu0 %v14373_v43  ;;  %11478 = vmatprep.mubr.bf16.mxu1 %v16546_v62  ;;  %v5134_v43 = vld [vmem:[#allocation8 + $0x1490] sm:$0xff] }
 0x451   :  { %11451 = vmatpush1.bf16.msra.mxu1 %v14375_v17  ;;  %11240 = vmatprep.subr.bf16.mxu0 %v14390_v41  ;;  %v5142_v17 = vld [vmem:[#allocation8 + $0x14d0] sm:$0xff]  ;;  %v5135_v41 = vld [vmem:[#allocation8 + $0x1498] sm:$0xff] }
 0x452   :  { %11452 = vmatprep.subr.bf16.mxu1 %v14392_v1  ;;  %v5143_v1 = vld [vmem:[#allocation8 + $0x14d8] sm:$0xff]  ;;  %v14486_v53 = vcombine.high %v5134_v43, %v5142_v17  ;;  %v14485_v24 = vcombine.low %v5134_v43, %v5142_v17 }
 0x453   :  { %v14488_v2 = vcombine.high %v5135_v41, %v5143_v1  ;;  %v14487_v6 = vcombine.low %v5135_v41, %v5143_v1 }
 0x454   :  { %11241 = vmatpush1.bf16.msra.mxu0 %v14389_v19  ;;  %v5150_v19 = vld [vmem:[#allocation8 + $0x1510] sm:$0xff] }
 0x455   :  { %11453 = vmatpush1.bf16.msra.mxu1 %v14391_v25  ;;  %11242 = vmatprep.subr.bf16.mxu0 %v14406_v39  ;;  %v5158_v25 = vld [vmem:[#allocation8 + $0x1550] sm:$0xff]  ;;  %v5151_v39 = vld [vmem:[#allocation8 + $0x1518] sm:$0xff] }
 0x456   :  { %11454 = vmatprep.subr.bf16.mxu1 %v14408_v22  ;;  %v5159_v22 = vld [vmem:[#allocation8 + $0x1558] sm:$0xff]  ;;  %v14502_v5 = vcombine.high %v5150_v19, %v5158_v25  ;;  %v14501_v37 = vcombine.low %v5150_v19, %v5158_v25 }
 0x457   :  { %v14504_v11 = vcombine.high %v5151_v39, %v5159_v22  ;;  %v14503_v20 = vcombine.low %v5151_v39, %v5159_v22 }
 0x458   :  { %11243 = vmatpush1.bf16.msra.mxu0 %v14405_v32  ;;  %v5166_v32 = vld [vmem:[#allocation8 + $0x1590] sm:$0xff] }
 0x459   :  { %11455 = vmatpush1.bf16.msra.mxu1 %v14407_v40  ;;  %11244 = vmatprep.subr.bf16.mxu0 %v14422_v52  ;;  %v5174_v40 = vld [vmem:[#allocation8 + $0x15d0] sm:$0xff]  ;;  %v5167_v52 = vld [vmem:[#allocation8 + $0x1598] sm:$0xff] }
 0x45a   :  { %11456 = vmatprep.subr.bf16.mxu1 %v14424_v0  ;;  %v5175_v0 = vld [vmem:[#allocation8 + $0x15d8] sm:$0xff]  ;;  %v14518_v30 = vcombine.high %v5166_v32, %v5174_v40  ;;  %v14517_v48 = vcombine.low %v5166_v32, %v5174_v40 }
 0x45b   :  { %v14520_v15 = vcombine.high %v5167_v52, %v5175_v0  ;;  %v14519_v46 = vcombine.low %v5167_v52, %v5175_v0 }
 0x45c   :  { %11245 = vmatpush1.bf16.msra.mxu0 %v14421_v4  ;;  %v5182_v4 = vld [vmem:[#allocation8 + $0x1610] sm:$0xff] }
 0x45d   :  { %11457 = vmatpush1.bf16.msra.mxu1 %v14423_v61  ;;  %11246 = vmatprep.subr.bf16.mxu0 %v14438_v12  ;;  %v5190_v61 = vld [vmem:[#allocation8 + $0x1650] sm:$0xff]  ;;  %v5183_v12 = vld [vmem:[#allocation8 + $0x1618] sm:$0xff] }
 0x45e   :  { %11458 = vmatprep.subr.bf16.mxu1 %v14440_v60  ;;  %v5191_v60 = vld [vmem:[#allocation8 + $0x1658] sm:$0xff]  ;;  %v14534_v51 = vcombine.high %v5182_v4, %v5190_v61  ;;  %v14533_v16 = vcombine.low %v5182_v4, %v5190_v61 }
 0x45f   :  { %v14536_v23 = vcombine.high %v5183_v12, %v5191_v60  ;;  %v14535_v50 = vcombine.low %v5183_v12, %v5191_v60 }
 0x460   :  { %11247 = vmatpush1.bf16.msra.mxu0 %v14437_v8  ;;  %v5198_v8 = vld [vmem:[#allocation8 + $0x1690] sm:$0xff] }
 0x461   :  { %11459 = vmatpush1.bf16.msra.mxu1 %v14439_v38  ;;  %11248 = vmatprep.subr.bf16.mxu0 %v14454_v3  ;;  %v5206_v38 = vld [vmem:[#allocation8 + $0x16d0] sm:$0xff]  ;;  %v5199_v3 = vld [vmem:[#allocation8 + $0x1698] sm:$0xff] }
 0x462   :  { %11460 = vmatprep.subr.bf16.mxu1 %v14456_v29  ;;  %v5207_v29 = vld [vmem:[#allocation8 + $0x16d8] sm:$0xff]  ;;  %v14550_v58 = vcombine.high %v5198_v8, %v5206_v38  ;;  %v14549_v43 = vcombine.low %v5198_v8, %v5206_v38 }
 0x463   :  { %v14552_v34 = vcombine.high %v5199_v3, %v5207_v29  ;;  %v14551_v17 = vcombine.low %v5199_v3, %v5207_v29 }
 0x464   :  { %11249 = vmatpush1.bf16.msra.mxu0 %v14453_v26  ;;  %v5214_v26 = vld [vmem:[#allocation8 + $0x1710] sm:$0xff] }
 0x465   :  { %11461 = vmatpush1.bf16.msra.mxu1 %v14455_v27  ;;  %11250 = vmatprep.subr.bf16.mxu0 %v14470_v63  ;;  %v5222_v27 = vld [vmem:[#allocation8 + $0x1750] sm:$0xff]  ;;  %v5215_v63 = vld [vmem:[#allocation8 + $0x1718] sm:$0xff] }
 0x466   :  { %11462 = vmatprep.subr.bf16.mxu1 %v14472_v14  ;;  %v5223_v14 = vld [vmem:[#allocation8 + $0x1758] sm:$0xff]  ;;  %v14566_v41 = vcombine.high %v5214_v26, %v5222_v27  ;;  %v14565_v19 = vcombine.low %v5214_v26, %v5222_v27 }
 0x467   :  { %v14568_v1 = vcombine.high %v5215_v63, %v5223_v14  ;;  %v14567_v25 = vcombine.low %v5215_v63, %v5223_v14 }
 0x468   :  { %11251 = vmatpush1.bf16.msra.mxu0 %v14469_v35  ;;  %v5230_v35 = vld [vmem:[#allocation8 + $0x1790] sm:$0xff] }
 0x469   :  { %11463 = vmatpush1.bf16.msra.mxu1 %v14471_v33  ;;  %11252 = vmatprep.subr.bf16.mxu0 %v14486_v53  ;;  %v5238_v33 = vld [vmem:[#allocation8 + $0x17d0] sm:$0xff]  ;;  %v5231_v53 = vld [vmem:[#allocation8 + $0x1798] sm:$0xff] }
 0x46a   :  { %11464 = vmatprep.subr.bf16.mxu1 %v14488_v2  ;;  %v5239_v2 = vld [vmem:[#allocation8 + $0x17d8] sm:$0xff]  ;;  %v14582_v39 = vcombine.high %v5230_v35, %v5238_v33  ;;  %v14581_v32 = vcombine.low %v5230_v35, %v5238_v33 }
 0x46b   :  { %v14584_v22 = vcombine.high %v5231_v53, %v5239_v2  ;;  %v14583_v40 = vcombine.low %v5231_v53, %v5239_v2 }
 0x46c   :  { %11253 = vmatpush1.bf16.msra.mxu0 %v14485_v24  ;;  %v5246_v24 = vld [vmem:[#allocation8 + $0x1810] sm:$0xff] }
 0x46d   :  { %11465 = vmatpush1.bf16.msra.mxu1 %v14487_v6  ;;  %11254 = vmatprep.subr.bf16.mxu0 %v14502_v5  ;;  %v5254_v6 = vld [vmem:[#allocation8 + $0x1850] sm:$0xff]  ;;  %v5247_v5 = vld [vmem:[#allocation8 + $0x1818] sm:$0xff] }
 0x46e   :  { %11466 = vmatprep.subr.bf16.mxu1 %v14504_v11  ;;  %v5255_v11 = vld [vmem:[#allocation8 + $0x1858] sm:$0xff]  ;;  %v14598_v52 = vcombine.high %v5246_v24, %v5254_v6  ;;  %v14597_v4 = vcombine.low %v5246_v24, %v5254_v6 }
 0x46f   :  { %v14600_v0 = vcombine.high %v5247_v5, %v5255_v11  ;;  %v14599_v61 = vcombine.low %v5247_v5, %v5255_v11 }
 0x470   :  { %11255 = vmatpush1.bf16.msra.mxu0 %v14501_v37  ;;  %v5262_v37 = vld [vmem:[#allocation8 + $0x1890] sm:$0xff] }
 0x471   :  { %11467 = vmatpush1.bf16.msra.mxu1 %v14503_v20  ;;  %11256 = vmatprep.subr.bf16.mxu0 %v14518_v30  ;;  %v5270_v20 = vld [vmem:[#allocation8 + $0x18d0] sm:$0xff]  ;;  %v5263_v30 = vld [vmem:[#allocation8 + $0x1898] sm:$0xff] }
 0x472   :  { %11468 = vmatprep.subr.bf16.mxu1 %v14520_v15  ;;  %v5271_v15 = vld [vmem:[#allocation8 + $0x18d8] sm:$0xff]  ;;  %v14614_v12 = vcombine.high %v5262_v37, %v5270_v20  ;;  %v14613_v8 = vcombine.low %v5262_v37, %v5270_v20 }
 0x473   :  { %v14616_v60 = vcombine.high %v5263_v30, %v5271_v15  ;;  %v14615_v38 = vcombine.low %v5263_v30, %v5271_v15  ;;  %v5343_v37 = vld [vmem:[#allocation8 + $0x1b18] sm:$0xff] }
 0x474   :  { %11257 = vmatpush1.bf16.msra.mxu0 %v14517_v48  ;;  %v5278_v48 = vld [vmem:[#allocation8 + $0x1910] sm:$0xff]  ;;  %v5351_v20 = vld [vmem:[#allocation8 + $0x1b58] sm:$0xff] }
 0x475   :  { %11469 = vmatpush1.bf16.msra.mxu1 %v14519_v46  ;;  %11258 = vmatprep.subr.bf16.mxu0 %v14534_v51  ;;  %v5286_v46 = vld [vmem:[#allocation8 + $0x1950] sm:$0xff]  ;;  %v5279_v51 = vld [vmem:[#allocation8 + $0x1918] sm:$0xff] }
 0x476   :  { %11470 = vmatprep.subr.bf16.mxu1 %v14536_v23  ;;  %v5287_v23 = vld [vmem:[#allocation8 + $0x1958] sm:$0xff]  ;;  %v14630_v3 = vcombine.high %v5278_v48, %v5286_v46  ;;  %v14629_v26 = vcombine.low %v5278_v48, %v5286_v46 }
 0x477   :  { %v14632_v29 = vcombine.high %v5279_v51, %v5287_v23  ;;  %v14631_v27 = vcombine.low %v5279_v51, %v5287_v23  ;;  %v14696_v23 = vcombine.high %v5343_v37, %v5351_v20 }
 0x478   :  { %11259 = vmatpush1.bf16.msra.mxu0 %v14533_v16  ;;  %v5294_v16 = vld [vmem:[#allocation8 + $0x1990] sm:$0xff] }
 0x479   :  { %11471 = vmatpush1.bf16.msra.mxu1 %v14535_v50  ;;  %11260 = vmatprep.subr.bf16.mxu0 %v14550_v58  ;;  %v5302_v50 = vld [vmem:[#allocation8 + $0x19d0] sm:$0xff]  ;;  %v5295_v58 = vld [vmem:[#allocation8 + $0x1998] sm:$0xff] }
 0x47a   :  { %11472 = vmatprep.subr.bf16.mxu1 %v14552_v34  ;;  %v5303_v34 = vld [vmem:[#allocation8 + $0x19d8] sm:$0xff]  ;;  %v14646_v63 = vcombine.high %v5294_v16, %v5302_v50  ;;  %v14645_v35 = vcombine.low %v5294_v16, %v5302_v50  ;;  %v14695_v50 = vcombine.low %v5343_v37, %v5351_v20 }
 0x47b   :  { %v14648_v14 = vcombine.high %v5295_v58, %v5303_v34  ;;  %v14647_v33 = vcombine.low %v5295_v58, %v5303_v34 }
 0x47c   :  { %11261 = vmatpush1.bf16.msra.mxu0 %v14549_v43  ;;  %v5310_v43 = vld [vmem:[#allocation8 + $0x1a10] sm:$0xff] }
 0x47d   :  { %11473 = vmatpush1.bf16.msra.mxu1 %v14551_v17  ;;  %11262 = vmatprep.subr.bf16.mxu0 %v14566_v41  ;;  %v5318_v17 = vld [vmem:[#allocation8 + $0x1a50] sm:$0xff]  ;;  %v5311_v41 = vld [vmem:[#allocation8 + $0x1a18] sm:$0xff] }
 0x47e   :  { %11474 = vmatprep.subr.bf16.mxu1 %v14568_v1  ;;  %v5319_v1 = vld [vmem:[#allocation8 + $0x1a58] sm:$0xff]  ;;  %v14662_v53 = vcombine.high %v5310_v43, %v5318_v17  ;;  %v14661_v24 = vcombine.low %v5310_v43, %v5318_v17 }
 0x47f   :  { %v14664_v2 = vcombine.high %v5311_v41, %v5319_v1  ;;  %v14663_v6 = vcombine.low %v5311_v41, %v5319_v1  ;;  %v5375_v43 = vld [vmem:[#allocation8 + $0x1c18] sm:$0xff] }
 0x480   :  { %11263 = vmatpush1.bf16.msra.mxu0 %v14565_v19  ;;  %v5326_v19 = vld [vmem:[#allocation8 + $0x1a90] sm:$0xff]  ;;  %v5383_v17 = vld [vmem:[#allocation8 + $0x1c58] sm:$0xff] }
 0x481   :  { %11475 = vmatpush1.bf16.msra.mxu1 %v14567_v25  ;;  %11264 = vmatprep.subr.bf16.mxu0 %v14582_v39  ;;  %v5334_v25 = vld [vmem:[#allocation8 + $0x1ad0] sm:$0xff]  ;;  %v5327_v39 = vld [vmem:[#allocation8 + $0x1a98] sm:$0xff] }
 0x482   :  { %11476 = vmatprep.subr.bf16.mxu1 %v14584_v22  ;;  %v5335_v22 = vld [vmem:[#allocation8 + $0x1ad8] sm:$0xff]  ;;  %v14678_v5 = vcombine.high %v5326_v19, %v5334_v25 }
 0x483   :  { %v14680_v11 = vcombine.high %v5327_v39, %v5335_v22 }
 0x484   :  { %11265 = vmatpush1.bf16.msra.mxu0 %v14581_v32  ;;  %v5342_v32 = vld [vmem:[#allocation8 + $0x1b10] sm:$0xff] }
 0x485   :  { %11477 = vmatpush1.bf16.msra.mxu1 %v14583_v40  ;;  %11287 = vmatprep.subr.bf16.mxu0 %v14598_v52 }
 0x486   :  { %11499 = vmatprep.subr.bf16.mxu1 %v14600_v0  ;;  %v5350_v0 = vld [vmem:[#allocation8 + $0x1b50] sm:$0xff] }
 0x487   :  { %11267 = vmatmul.mubr.bf16.vlgmr.msra.gmra.mrb[24].mxu0 %v16536_v47  ;;  %v14694_v51 = vcombine.high %v5342_v32, %v5350_v0  ;;  %v14693_v16 = vcombine.low %v5342_v32, %v5350_v0  ;;  %v14727_v0 = vcombine.low %v5375_v43, %v5383_v17 }
 0x488   :  { %11479 = vmatmul.mubr.bf16.vlgmr.msra.gmra.mrb[24].mxu1 %v16536_v47  ;;  %11276 = vmatprep.mubr.bf16.mxu0 %v16570_v18 }
 0x489   :  { %11288 = vmatpush1.bf16.msra.mxu0 %v14597_v4  ;;  %11488 = vmatprep.mubr.bf16.mxu1 %v16570_v18  ;;  %v14677_v4 = vcombine.low %v5326_v19, %v5334_v25 }
 0x48a   :  { %11500 = vmatpush1.bf16.msra.mxu1 %v14599_v61  ;;  %11289 = vmatprep.subr.bf16.mxu0 %v14614_v12  ;;  %v14679_v61 = vcombine.low %v5327_v39, %v5335_v22  ;;  %v14728_v22 = vcombine.high %v5375_v43, %v5383_v17 }
 0x48b   :  { %11501 = vmatprep.subr.bf16.mxu1 %v14616_v60 }
 0x48d   :  { %11290 = vmatpush1.bf16.msra.mxu0 %v14613_v8  ;;  %v5358_v8 = vld [vmem:[#allocation8 + $0x1b90] sm:$0xff] }
 0x48e   :  { %11502 = vmatpush1.bf16.msra.mxu1 %v14615_v38  ;;  %11291 = vmatprep.subr.bf16.mxu0 %v14630_v3  ;;  %v5366_v38 = vld [vmem:[#allocation8 + $0x1bd0] sm:$0xff]  ;;  %v5359_v3 = vld [vmem:[#allocation8 + $0x1b98] sm:$0xff] }
 0x48f   :  { %11277 = vmatmul.mubr.bf16.gmra.mrb[28].mxu0 %v16561_v56  ;;  %11503 = vmatprep.subr.bf16.mxu1 %v14632_v29  ;;  %v5367_v29 = vld [vmem:[#allocation8 + $0x1bd8] sm:$0xff]  ;;  %v14710_v58 = vcombine.high %v5358_v8, %v5366_v38 }
 0x490   :  { %11489 = vmatmul.mubr.bf16.gmra.mrb[28].mxu1 %v16561_v56  ;;  %11319 = vmatprep.mubr.bf16.mxu0 %v16549_v28  ;;  %v14712_v34 = vcombine.high %v5359_v3, %v5367_v29 }
 0x491   :  { %11292 = vmatpush1.bf16.msra.mxu0 %v14629_v26  ;;  %11531 = vmatprep.mubr.bf16.mxu1 %v16549_v28  ;;  %v5374_v26 = vld [vmem:[#allocation8 + $0x1c10] sm:$0xff] }
 0x492   :  { %11504 = vmatpush1.bf16.msra.mxu1 %v14631_v27  ;;  %11293 = vmatprep.subr.bf16.mxu0 %v14646_v63  ;;  %v5382_v27 = vld [vmem:[#allocation8 + $0x1c50] sm:$0xff] }
 0x493   :  { %11505 = vmatprep.subr.bf16.mxu1 %v14648_v14  ;;  %v14726_v19 = vcombine.high %v5374_v26, %v5382_v27  ;;  %v14725_v32 = vcombine.low %v5374_v26, %v5382_v27 }
 0x495   :  { %11294 = vmatpush1.bf16.msra.mxu0 %v14645_v35  ;;  %v14709_v35 = vcombine.low %v5358_v8, %v5366_v38 }
 0x496   :  { %11506 = vmatpush1.bf16.msra.mxu1 %v14647_v33  ;;  %11295 = vmatprep.subr.bf16.mxu0 %v14662_v53  ;;  %v14711_v33 = vcombine.low %v5359_v3, %v5367_v29 }
 0x497   :  { %11507 = vmatprep.subr.bf16.mxu1 %v14664_v2 }
 0x498   :  { %v16613_v40 = vpop.f32.mrb[16].mxu0  ;;  %v16615_v52 = vpop.f32.mrb[16].mxu1 }
 0x499   :  { %11296 = vmatpush1.bf16.msra.mxu0 %v14661_v24  ;;  %v16617_v30 = vpop.f32.mrb[17].mxu0  ;;  %v16619_v15 = vpop.f32.mrb[17].mxu1  ;;  %v5390_v24 = vld [vmem:[#allocation8 + $0x1c90] sm:$0xff] }
 0x49a   :  { %11508 = vmatpush1.bf16.msra.mxu1 %v14663_v6  ;;  %11297 = vmatprep.subr.bf16.mxu0 %v14678_v5  ;;  %v16621_v12 = vpop.f32.mrb[18].mxu0  ;;  %v16623_v60 = vpop.f32.mrb[18].mxu1  ;;  %v5398_v6 = vld [vmem:[#allocation8 + $0x1cd0] sm:$0xff]  ;;  %v5391_v5 = vld [vmem:[#allocation8 + $0x1c98] sm:$0xff] }
 0x49b   :  { %11509 = vmatprep.subr.bf16.mxu1 %v14680_v11  ;;  %v16625_v48 = vpop.f32.mrb[19].mxu0  ;;  %v16627_v46 = vpop.f32.mrb[19].mxu1  ;;  %v5399_v11 = vld [vmem:[#allocation8 + $0x1cd8] sm:$0xff]  ;;  %v14742_v37 = vcombine.high %v5390_v24, %v5398_v6  ;;  %v14741_v8 = vcombine.low %v5390_v24, %v5398_v6 }
 0x49c   :  { %v14744_v20 = vcombine.high %v5391_v5, %v5399_v11  ;;  %v14743_v38 = vcombine.low %v5391_v5, %v5399_v11 }
 0x49d   :  { %11298 = vmatpush1.bf16.msra.mxu0 %v14677_v4  ;;  %v5406_v4 = vld [vmem:[#allocation8 + $0x1d10] sm:$0xff] }
 0x49e   :  { %11510 = vmatpush1.bf16.msra.mxu1 %v14679_v61  ;;  %11299 = vmatprep.subr.bf16.mxu0 %v14694_v51  ;;  %v5414_v61 = vld [vmem:[#allocation8 + $0x1d50] sm:$0xff]  ;;  %v5407_v51 = vld [vmem:[#allocation8 + $0x1d18] sm:$0xff] }
 0x49f   :  { %11511 = vmatprep.subr.bf16.mxu1 %v14696_v23  ;;  %v5415_v23 = vld [vmem:[#allocation8 + $0x1d58] sm:$0xff]  ;;  %v14758_v3 = vcombine.high %v5406_v4, %v5414_v61  ;;  %v14757_v26 = vcombine.low %v5406_v4, %v5414_v61 }
 0x4a0   :  { %v16629_v63 = vpop.f32.mrb[20].mxu0  ;;  %v16631_v14 = vpop.f32.mrb[20].mxu1  ;;  %v14760_v29 = vcombine.high %v5407_v51, %v5415_v23  ;;  %v14759_v27 = vcombine.low %v5407_v51, %v5415_v23 }
 0x4a1   :  { %11300 = vmatpush1.bf16.msra.mxu0 %v14693_v16  ;;  %v16633_v41 = vpop.f32.mrb[21].mxu0  ;;  %v16635_v1 = vpop.f32.mrb[21].mxu1  ;;  %v5422_v16 = vld [vmem:[#allocation8 + $0x1d90] sm:$0xff] }
 0x4a2   :  { %11512 = vmatpush1.bf16.msra.mxu1 %v14695_v50  ;;  %v16637_v53 = vpop.f32.mrb[22].mxu0  ;;  %v16639_v2 = vpop.f32.mrb[22].mxu1  ;;  %11301 = vmatprep.subr.bf16.mxu0 %v14710_v58  ;;  %v5430_v50 = vld [vmem:[#allocation8 + $0x1dd0] sm:$0xff]  ;;  %v5423_v58 = vld [vmem:[#allocation8 + $0x1d98] sm:$0xff] }
 0x4a3   :  { %11513 = vmatprep.subr.bf16.mxu1 %v14712_v34  ;;  %v16641_v25 = vpop.f32.mrb[23].mxu0  ;;  %v16643_v39 = vpop.f32.mrb[23].mxu1  ;;  %v5431_v34 = vld [vmem:[#allocation8 + $0x1dd8] sm:$0xff]  ;;  %v14774_v43 = vcombine.high %v5422_v16, %v5430_v50  ;;  %v14773_v24 = vcombine.low %v5422_v16, %v5430_v50 }
 0x4a4   :  { %v14776_v17 = vcombine.high %v5423_v58, %v5431_v34  ;;  %v14775_v6 = vcombine.low %v5423_v58, %v5431_v34 }
 0x4a5   :  { %11302 = vmatpush1.bf16.msra.mxu0 %v14709_v35  ;;  %v5438_v35 = vld [vmem:[#allocation8 + $0x1e10] sm:$0xff] }
 0x4a6   :  { %11514 = vmatpush1.bf16.msra.mxu1 %v14711_v33  ;;  %11303 = vmatprep.subr.bf16.mxu0 %v14726_v19  ;;  %v5446_v33 = vld [vmem:[#allocation8 + $0x1e50] sm:$0xff]  ;;  %v5439_v19 = vld [vmem:[#allocation8 + $0x1e18] sm:$0xff] }
 0x4a7   :  { %11515 = vmatprep.subr.bf16.mxu1 %v14728_v22  ;;  %v5447_v22 = vld [vmem:[#allocation8 + $0x1e58] sm:$0xff]  ;;  %v14790_v5 = vcombine.high %v5438_v35, %v5446_v33  ;;  %v14789_v4 = vcombine.low %v5438_v35, %v5446_v33 }
 0x4a8   :  { %v14792_v11 = vcombine.high %v5439_v19, %v5447_v22  ;;  %v14791_v61 = vcombine.low %v5439_v19, %v5447_v22 }
 0x4a9   :  { %11304 = vmatpush1.bf16.msra.mxu0 %v14725_v32  ;;  %v5454_v32 = vld [vmem:[#allocation8 + $0x1e90] sm:$0xff] }
 0x4aa   :  { %11516 = vmatpush1.bf16.msra.mxu1 %v14727_v0  ;;  %11305 = vmatprep.subr.bf16.mxu0 %v14742_v37  ;;  %v5462_v0 = vld [vmem:[#allocation8 + $0x1ed0] sm:$0xff]  ;;  %v5455_v37 = vld [vmem:[#allocation8 + $0x1e98] sm:$0xff] }
 0x4ab   :  { %11517 = vmatprep.subr.bf16.mxu1 %v14744_v20  ;;  %v5463_v20 = vld [vmem:[#allocation8 + $0x1ed8] sm:$0xff]  ;;  %v14806_v51 = vcombine.high %v5454_v32, %v5462_v0  ;;  %v14805_v16 = vcombine.low %v5454_v32, %v5462_v0 }
 0x4ac   :  { %v14808_v23 = vcombine.high %v5455_v37, %v5463_v20  ;;  %v14807_v50 = vcombine.low %v5455_v37, %v5463_v20 }
 0x4ad   :  { %11306 = vmatpush1.bf16.msra.mxu0 %v14741_v8  ;;  %v5470_v8 = vld [vmem:[#allocation8 + $0x1f10] sm:$0xff] }
 0x4ae   :  { %11518 = vmatpush1.bf16.msra.mxu1 %v14743_v38  ;;  %11307 = vmatprep.subr.bf16.mxu0 %v14758_v3  ;;  %v5478_v38 = vld [vmem:[#allocation8 + $0x1f50] sm:$0xff]  ;;  %v5471_v3 = vld [vmem:[#allocation8 + $0x1f18] sm:$0xff] }
 0x4af   :  { %11519 = vmatprep.subr.bf16.mxu1 %v14760_v29  ;;  %v5479_v29 = vld [vmem:[#allocation8 + $0x1f58] sm:$0xff]  ;;  %v14822_v58 = vcombine.high %v5470_v8, %v5478_v38  ;;  %v14821_v35 = vcombine.low %v5470_v8, %v5478_v38 }
 0x4b0   :  { %v14824_v34 = vcombine.high %v5471_v3, %v5479_v29  ;;  %v14823_v33 = vcombine.low %v5471_v3, %v5479_v29 }
 0x4b1   :  { %11308 = vmatpush1.bf16.msra.mxu0 %v14757_v26  ;;  %v5486_v26 = vld [vmem:[#allocation8 + $0x1f90] sm:$0xff] }
 0x4b2   :  { %11520 = vmatpush1.bf16.msra.mxu1 %v14759_v27  ;;  %11309 = vmatprep.subr.bf16.mxu0 %v14774_v43  ;;  %v5494_v27 = vld [vmem:[#allocation8 + $0x1fd0] sm:$0xff]  ;;  %v5487_v43 = vld [vmem:[#allocation8 + $0x1f98] sm:$0xff] }
 0x4b3   :  { %11521 = vmatprep.subr.bf16.mxu1 %v14776_v17  ;;  %v5495_v17 = vld [vmem:[#allocation8 + $0x1fd8] sm:$0xff]  ;;  %v14838_v19 = vcombine.high %v5486_v26, %v5494_v27  ;;  %v14837_v32 = vcombine.low %v5486_v26, %v5494_v27 }
 0x4b4   :  { %v14840_v22 = vcombine.high %v5487_v43, %v5495_v17  ;;  %v14839_v0 = vcombine.low %v5487_v43, %v5495_v17 }
 0x4b5   :  { %11310 = vmatpush1.bf16.msra.mxu0 %v14773_v24  ;;  %v4480_v24 = vld [vmem:[#allocation8 + $0x20] sm:$0xff] }
 0x4b6   :  { %11522 = vmatpush1.bf16.msra.mxu1 %v14775_v6  ;;  %11311 = vmatprep.subr.bf16.mxu0 %v14790_v5  ;;  %v4488_v6 = vld [vmem:[#allocation8 + $0x60] sm:$0xff]  ;;  %v4481_v5 = vld [vmem:[#allocation8 + $0x28] sm:$0xff] }
 0x4b7   :  { %11523 = vmatprep.subr.bf16.mxu1 %v14792_v11  ;;  %v4489_v11 = vld [vmem:[#allocation8 + $0x68] sm:$0xff]  ;;  %v13834_v37 = vcombine.high %v4480_v24, %v4488_v6  ;;  %v13833_v8 = vcombine.low %v4480_v24, %v4488_v6 }
 0x4b8   :  { %v13836_v20 = vcombine.high %v4481_v5, %v4489_v11  ;;  %v13835_v38 = vcombine.low %v4481_v5, %v4489_v11 }
 0x4b9   :  { %11312 = vmatpush1.bf16.msra.mxu0 %v14789_v4  ;;  %v4496_v4 = vld [vmem:[#allocation8 + $0xa0] sm:$0xff] }
 0x4ba   :  { %11524 = vmatpush1.bf16.msra.mxu1 %v14791_v61  ;;  %11313 = vmatprep.subr.bf16.mxu0 %v14806_v51  ;;  %v4504_v61 = vld [vmem:[#allocation8 + $0xe0] sm:$0xff]  ;;  %v4497_v51 = vld [vmem:[#allocation8 + $0xa8] sm:$0xff] }
 0x4bb   :  { %11525 = vmatprep.subr.bf16.mxu1 %v14808_v23  ;;  %v4505_v23 = vld [vmem:[#allocation8 + $0xe8] sm:$0xff]  ;;  %v13850_v3 = vcombine.high %v4496_v4, %v4504_v61  ;;  %v13849_v26 = vcombine.low %v4496_v4, %v4504_v61 }
 0x4bc   :  { %v13852_v29 = vcombine.high %v4497_v51, %v4505_v23  ;;  %v13851_v27 = vcombine.low %v4497_v51, %v4505_v23 }
 0x4bd   :  { %11314 = vmatpush1.bf16.msra.mxu0 %v14805_v16  ;;  %v4512_v16 = vld [vmem:[#allocation8 + $0x120] sm:$0xff] }
 0x4be   :  { %11526 = vmatpush1.bf16.msra.mxu1 %v14807_v50  ;;  %11315 = vmatprep.subr.bf16.mxu0 %v14822_v58  ;;  %v4520_v50 = vld [vmem:[#allocation8 + $0x160] sm:$0xff]  ;;  %v4513_v58 = vld [vmem:[#allocation8 + $0x128] sm:$0xff] }
 0x4bf   :  { %11527 = vmatprep.subr.bf16.mxu1 %v14824_v34  ;;  %v4521_v34 = vld [vmem:[#allocation8 + $0x168] sm:$0xff]  ;;  %v13866_v43 = vcombine.high %v4512_v16, %v4520_v50  ;;  %v13865_v24 = vcombine.low %v4512_v16, %v4520_v50 }
 0x4c0   :  { %v13868_v17 = vcombine.high %v4513_v58, %v4521_v34  ;;  %v13867_v6 = vcombine.low %v4513_v58, %v4521_v34 }
 0x4c1   :  { %11316 = vmatpush1.bf16.msra.mxu0 %v14821_v35  ;;  %v4528_v35 = vld [vmem:[#allocation8 + $0x1a0] sm:$0xff] }
 0x4c2   :  { %11528 = vmatpush1.bf16.msra.mxu1 %v14823_v33  ;;  %11317 = vmatprep.subr.bf16.mxu0 %v14838_v19  ;;  %v4536_v33 = vld [vmem:[#allocation8 + $0x1e0] sm:$0xff]  ;;  %v4529_v19 = vld [vmem:[#allocation8 + $0x1a8] sm:$0xff] }
 0x4c3   :  { %11529 = vmatprep.subr.bf16.mxu1 %v14840_v22  ;;  %v4537_v22 = vld [vmem:[#allocation8 + $0x1e8] sm:$0xff]  ;;  %v13882_v5 = vcombine.high %v4528_v35, %v4536_v33  ;;  %v13881_v4 = vcombine.low %v4528_v35, %v4536_v33 }
 0x4c4   :  { %v13884_v11 = vcombine.high %v4529_v19, %v4537_v22  ;;  %v13883_v61 = vcombine.low %v4529_v19, %v4537_v22 }
 0x4c5   :  { %11318 = vmatpush1.bf16.msra.mxu0 %v14837_v32  ;;  %v4544_v32 = vld [vmem:[#allocation8 + $0x220] sm:$0xff] }
 0x4c6   :  { %11530 = vmatpush1.bf16.msra.mxu1 %v14839_v0  ;;  %11552 = vmatprep.subr.bf16.mxu0 %v13834_v37  ;;  %v4552_v0 = vld [vmem:[#allocation8 + $0x260] sm:$0xff]  ;;  %v4545_v37 = vld [vmem:[#allocation8 + $0x228] sm:$0xff] }
 0x4c7   :  { %11764 = vmatprep.subr.bf16.mxu1 %v13836_v20  ;;  %v4553_v20 = vld [vmem:[#allocation8 + $0x268] sm:$0xff]  ;;  %v13898_v51 = vcombine.high %v4544_v32, %v4552_v0  ;;  %v13897_v16 = vcombine.low %v4544_v32, %v4552_v0 }
 0x4c8   :  { %11320 = vmatmul.mubr.bf16.vlgmr.msra.gmra.mrb[24].mxu0 %v16541_v59  ;;  %v13900_v23 = vcombine.high %v4545_v37, %v4553_v20  ;;  %v13899_v50 = vcombine.low %v4545_v37, %v4553_v20 }
 0x4c9   :  { %11532 = vmatmul.mubr.bf16.vlgmr.msra.gmra.mrb[24].mxu1 %v16541_v59  ;;  %11329 = vmatprep.mubr.bf16.mxu0 %v16573_v13 }
 0x4ca   :  { %11541 = vmatprep.mubr.bf16.mxu1 %v16573_v13  ;;  %11553 = vmatpush1.bf16.msra.mxu0 %v13833_v8  ;;  %v4560_v8 = vld [vmem:[#allocation8 + $0x2a0] sm:$0xff] }
 0x4cb   :  { %11765 = vmatpush1.bf16.msra.mxu1 %v13835_v38  ;;  %11554 = vmatprep.subr.bf16.mxu0 %v13850_v3  ;;  %v4568_v38 = vld [vmem:[#allocation8 + $0x2e0] sm:$0xff]  ;;  %v4561_v3 = vld [vmem:[#allocation8 + $0x2a8] sm:$0xff] }
 0x4cc   :  { %11766 = vmatprep.subr.bf16.mxu1 %v13852_v29  ;;  %v4569_v29 = vld [vmem:[#allocation8 + $0x2e8] sm:$0xff]  ;;  %v13914_v58 = vcombine.high %v4560_v8, %v4568_v38  ;;  %v13913_v35 = vcombine.low %v4560_v8, %v4568_v38 }
 0x4cd   :  { %v13916_v34 = vcombine.high %v4561_v3, %v4569_v29  ;;  %v13915_v33 = vcombine.low %v4561_v3, %v4569_v29 }
 0x4ce   :  { %11555 = vmatpush1.bf16.msra.mxu0 %v13849_v26  ;;  %v4576_v26 = vld [vmem:[#allocation8 + $0x320] sm:$0xff] }
 0x4cf   :  { %11767 = vmatpush1.bf16.msra.mxu1 %v13851_v27  ;;  %11556 = vmatprep.subr.bf16.mxu0 %v13866_v43  ;;  %v4584_v27 = vld [vmem:[#allocation8 + $0x360] sm:$0xff]  ;;  %v4577_v43 = vld [vmem:[#allocation8 + $0x328] sm:$0xff] }
 0x4d0   :  { %11330 = vmatmul.mubr.bf16.gmra.mrb[28].mxu0 %v16565_v45  ;;  %11768 = vmatprep.subr.bf16.mxu1 %v13868_v17  ;;  %v4585_v17 = vld [vmem:[#allocation8 + $0x368] sm:$0xff]  ;;  %v13930_v19 = vcombine.high %v4576_v26, %v4584_v27  ;;  %v13929_v32 = vcombine.low %v4576_v26, %v4584_v27 }
 0x4d1   :  { %11542 = vmatmul.mubr.bf16.gmra.mrb[28].mxu1 %v16565_v45  ;;  %11584 = vmatprep.mubr.bf16.mxu0 %v16318_v9  ;;  %v13932_v22 = vcombine.high %v4577_v43, %v4585_v17  ;;  %v13931_v0 = vcombine.low %v4577_v43, %v4585_v17 }
 0x4d2   :  { %11557 = vmatpush1.bf16.msra.mxu0 %v13865_v24  ;;  %11796 = vmatprep.mubr.bf16.mxu1 %v16318_v9  ;;  %v4592_v24 = vld [vmem:[#allocation8 + $0x3a0] sm:$0xff] }
 0x4d3   :  { %11769 = vmatpush1.bf16.msra.mxu1 %v13867_v6  ;;  %11558 = vmatprep.subr.bf16.mxu0 %v13882_v5  ;;  %v4600_v6 = vld [vmem:[#allocation8 + $0x3e0] sm:$0xff]  ;;  %v4593_v5 = vld [vmem:[#allocation8 + $0x3a8] sm:$0xff] }
 0x4d4   :  { %11770 = vmatprep.subr.bf16.mxu1 %v13884_v11  ;;  %v4601_v11 = vld [vmem:[#allocation8 + $0x3e8] sm:$0xff]  ;;  %v13946_v37 = vcombine.high %v4592_v24, %v4600_v6  ;;  %v13945_v8 = vcombine.low %v4592_v24, %v4600_v6 }
 0x4d5   :  { %v13948_v20 = vcombine.high %v4593_v5, %v4601_v11  ;;  %v13947_v38 = vcombine.low %v4593_v5, %v4601_v11 }
 0x4d6   :  { %11559 = vmatpush1.bf16.msra.mxu0 %v13881_v4  ;;  %v4608_v4 = vld [vmem:[#allocation8 + $0x420] sm:$0xff] }
 0x4d7   :  { %11771 = vmatpush1.bf16.msra.mxu1 %v13883_v61  ;;  %11560 = vmatprep.subr.bf16.mxu0 %v13898_v51  ;;  %v4616_v61 = vld [vmem:[#allocation8 + $0x460] sm:$0xff]  ;;  %v4609_v51 = vld [vmem:[#allocation8 + $0x428] sm:$0xff] }
 0x4d8   :  { %11772 = vmatprep.subr.bf16.mxu1 %v13900_v23  ;;  %v4617_v23 = vld [vmem:[#allocation8 + $0x468] sm:$0xff]  ;;  %v13962_v3 = vcombine.high %v4608_v4, %v4616_v61  ;;  %v13961_v26 = vcombine.low %v4608_v4, %v4616_v61 }
 0x4d9   :  { %v13964_v29 = vcombine.high %v4609_v51, %v4617_v23  ;;  %v13963_v27 = vcombine.low %v4609_v51, %v4617_v23 }
 0x4da   :  { %11561 = vmatpush1.bf16.msra.mxu0 %v13897_v16  ;;  %v4624_v16 = vld [vmem:[#allocation8 + $0x4a0] sm:$0xff] }
 0x4db   :  { %11773 = vmatpush1.bf16.msra.mxu1 %v13899_v50  ;;  %11562 = vmatprep.subr.bf16.mxu0 %v13914_v58  ;;  %v4632_v50 = vld [vmem:[#allocation8 + $0x4e0] sm:$0xff]  ;;  %v4625_v58 = vld [vmem:[#allocation8 + $0x4a8] sm:$0xff] }
 0x4dc   :  { %11774 = vmatprep.subr.bf16.mxu1 %v13916_v34  ;;  %v4633_v34 = vld [vmem:[#allocation8 + $0x4e8] sm:$0xff]  ;;  %v13978_v43 = vcombine.high %v4624_v16, %v4632_v50  ;;  %v13977_v24 = vcombine.low %v4624_v16, %v4632_v50 }
 0x4dd   :  { %v13980_v17 = vcombine.high %v4625_v58, %v4633_v34  ;;  %v13979_v6 = vcombine.low %v4625_v58, %v4633_v34 }
 0x4de   :  { %11563 = vmatpush1.bf16.msra.mxu0 %v13913_v35  ;;  %v4640_v35 = vld [vmem:[#allocation8 + $0x520] sm:$0xff] }
 0x4df   :  { %11775 = vmatpush1.bf16.msra.mxu1 %v13915_v33  ;;  %11564 = vmatprep.subr.bf16.mxu0 %v13930_v19  ;;  %v4648_v33 = vld [vmem:[#allocation8 + $0x560] sm:$0xff]  ;;  %v4641_v19 = vld [vmem:[#allocation8 + $0x528] sm:$0xff] }
 0x4e0   :  { %11776 = vmatprep.subr.bf16.mxu1 %v13932_v22  ;;  %v4649_v22 = vld [vmem:[#allocation8 + $0x568] sm:$0xff]  ;;  %v13994_v5 = vcombine.high %v4640_v35, %v4648_v33  ;;  %v13993_v4 = vcombine.low %v4640_v35, %v4648_v33 }
 0x4e1   :  { %v13996_v11 = vcombine.high %v4641_v19, %v4649_v22  ;;  %v13995_v61 = vcombine.low %v4641_v19, %v4649_v22 }
 0x4e2   :  { %11565 = vmatpush1.bf16.msra.mxu0 %v13929_v32  ;;  %v4656_v32 = vld [vmem:[#allocation8 + $0x5a0] sm:$0xff] }
 0x4e3   :  { %11777 = vmatpush1.bf16.msra.mxu1 %v13931_v0  ;;  %11566 = vmatprep.subr.bf16.mxu0 %v13946_v37  ;;  %v4664_v0 = vld [vmem:[#allocation8 + $0x5e0] sm:$0xff]  ;;  %v4657_v37 = vld [vmem:[#allocation8 + $0x5a8] sm:$0xff] }
 0x4e4   :  { %11778 = vmatprep.subr.bf16.mxu1 %v13948_v20  ;;  %v4665_v20 = vld [vmem:[#allocation8 + $0x5e8] sm:$0xff]  ;;  %v14010_v51 = vcombine.high %v4656_v32, %v4664_v0  ;;  %v14009_v16 = vcombine.low %v4656_v32, %v4664_v0 }
 0x4e5   :  { %v14012_v23 = vcombine.high %v4657_v37, %v4665_v20  ;;  %v14011_v50 = vcombine.low %v4657_v37, %v4665_v20 }
 0x4e6   :  { %11567 = vmatpush1.bf16.msra.mxu0 %v13945_v8  ;;  %v4672_v8 = vld [vmem:[#allocation8 + $0x620] sm:$0xff] }
 0x4e7   :  { %11779 = vmatpush1.bf16.msra.mxu1 %v13947_v38  ;;  %11568 = vmatprep.subr.bf16.mxu0 %v13962_v3  ;;  %v4680_v38 = vld [vmem:[#allocation8 + $0x660] sm:$0xff]  ;;  %v4673_v3 = vld [vmem:[#allocation8 + $0x628] sm:$0xff] }
 0x4e8   :  { %11780 = vmatprep.subr.bf16.mxu1 %v13964_v29  ;;  %v4681_v29 = vld [vmem:[#allocation8 + $0x668] sm:$0xff]  ;;  %v14026_v58 = vcombine.high %v4672_v8, %v4680_v38  ;;  %v14025_v35 = vcombine.low %v4672_v8, %v4680_v38 }
 0x4e9   :  { %v14028_v34 = vcombine.high %v4673_v3, %v4681_v29  ;;  %v14027_v33 = vcombine.low %v4673_v3, %v4681_v29 }
 0x4ea   :  { %11569 = vmatpush1.bf16.msra.mxu0 %v13961_v26  ;;  %v4688_v26 = vld [vmem:[#allocation8 + $0x6a0] sm:$0xff] }
 0x4eb   :  { %11781 = vmatpush1.bf16.msra.mxu1 %v13963_v27  ;;  %11570 = vmatprep.subr.bf16.mxu0 %v13978_v43  ;;  %v4696_v27 = vld [vmem:[#allocation8 + $0x6e0] sm:$0xff]  ;;  %v4689_v43 = vld [vmem:[#allocation8 + $0x6a8] sm:$0xff] }
 0x4ec   :  { %11782 = vmatprep.subr.bf16.mxu1 %v13980_v17  ;;  %v4697_v17 = vld [vmem:[#allocation8 + $0x6e8] sm:$0xff]  ;;  %v14042_v19 = vcombine.high %v4688_v26, %v4696_v27  ;;  %v14041_v32 = vcombine.low %v4688_v26, %v4696_v27 }
 0x4ed   :  { %v14044_v22 = vcombine.high %v4689_v43, %v4697_v17  ;;  %v14043_v0 = vcombine.low %v4689_v43, %v4697_v17 }
 0x4ee   :  { %11571 = vmatpush1.bf16.msra.mxu0 %v13977_v24  ;;  %v4704_v24 = vld [vmem:[#allocation8 + $0x720] sm:$0xff] }
 0x4ef   :  { %11783 = vmatpush1.bf16.msra.mxu1 %v13979_v6  ;;  %11572 = vmatprep.subr.bf16.mxu0 %v13994_v5  ;;  %v4712_v6 = vld [vmem:[#allocation8 + $0x760] sm:$0xff]  ;;  %v4705_v5 = vld [vmem:[#allocation8 + $0x728] sm:$0xff] }
 0x4f0   :  { %11784 = vmatprep.subr.bf16.mxu1 %v13996_v11  ;;  %v4713_v11 = vld [vmem:[#allocation8 + $0x768] sm:$0xff]  ;;  %v14058_v37 = vcombine.high %v4704_v24, %v4712_v6  ;;  %v14057_v8 = vcombine.low %v4704_v24, %v4712_v6 }
 0x4f1   :  { %v14060_v20 = vcombine.high %v4705_v5, %v4713_v11  ;;  %v14059_v38 = vcombine.low %v4705_v5, %v4713_v11 }
 0x4f2   :  { %11573 = vmatpush1.bf16.msra.mxu0 %v13993_v4  ;;  %v4720_v4 = vld [vmem:[#allocation8 + $0x7a0] sm:$0xff] }
 0x4f3   :  { %11785 = vmatpush1.bf16.msra.mxu1 %v13995_v61  ;;  %11574 = vmatprep.subr.bf16.mxu0 %v14010_v51  ;;  %v4728_v61 = vld [vmem:[#allocation8 + $0x7e0] sm:$0xff]  ;;  %v4721_v51 = vld [vmem:[#allocation8 + $0x7a8] sm:$0xff] }
 0x4f4   :  { %11786 = vmatprep.subr.bf16.mxu1 %v14012_v23  ;;  %v4729_v23 = vld [vmem:[#allocation8 + $0x7e8] sm:$0xff]  ;;  %v14074_v3 = vcombine.high %v4720_v4, %v4728_v61  ;;  %v14073_v26 = vcombine.low %v4720_v4, %v4728_v61 }
 0x4f5   :  { %v14076_v29 = vcombine.high %v4721_v51, %v4729_v23  ;;  %v14075_v27 = vcombine.low %v4721_v51, %v4729_v23 }
 0x4f6   :  { %11575 = vmatpush1.bf16.msra.mxu0 %v14009_v16  ;;  %v4736_v16 = vld [vmem:[#allocation8 + $0x820] sm:$0xff] }
 0x4f7   :  { %11787 = vmatpush1.bf16.msra.mxu1 %v14011_v50  ;;  %11576 = vmatprep.subr.bf16.mxu0 %v14026_v58  ;;  %v4744_v50 = vld [vmem:[#allocation8 + $0x860] sm:$0xff]  ;;  %v4737_v58 = vld [vmem:[#allocation8 + $0x828] sm:$0xff] }
 0x4f8   :  { %11788 = vmatprep.subr.bf16.mxu1 %v14028_v34  ;;  %v4745_v34 = vld [vmem:[#allocation8 + $0x868] sm:$0xff]  ;;  %v14090_v43 = vcombine.high %v4736_v16, %v4744_v50  ;;  %v14089_v24 = vcombine.low %v4736_v16, %v4744_v50 }
 0x4f9   :  { %v14092_v17 = vcombine.high %v4737_v58, %v4745_v34  ;;  %v14091_v6 = vcombine.low %v4737_v58, %v4745_v34 }
 0x4fa   :  { %11577 = vmatpush1.bf16.msra.mxu0 %v14025_v35  ;;  %v4752_v35 = vld [vmem:[#allocation8 + $0x8a0] sm:$0xff] }
 0x4fb   :  { %11789 = vmatpush1.bf16.msra.mxu1 %v14027_v33  ;;  %11578 = vmatprep.subr.bf16.mxu0 %v14042_v19  ;;  %v4760_v33 = vld [vmem:[#allocation8 + $0x8e0] sm:$0xff]  ;;  %v4753_v19 = vld [vmem:[#allocation8 + $0x8a8] sm:$0xff] }
 0x4fc   :  { %11790 = vmatprep.subr.bf16.mxu1 %v14044_v22  ;;  %v4761_v22 = vld [vmem:[#allocation8 + $0x8e8] sm:$0xff]  ;;  %v14106_v5 = vcombine.high %v4752_v35, %v4760_v33  ;;  %v14105_v4 = vcombine.low %v4752_v35, %v4760_v33 }
 0x4fd   :  { %v14108_v11 = vcombine.high %v4753_v19, %v4761_v22  ;;  %v14107_v61 = vcombine.low %v4753_v19, %v4761_v22 }
 0x4fe   :  { %11579 = vmatpush1.bf16.msra.mxu0 %v14041_v32  ;;  %v4768_v32 = vld [vmem:[#allocation8 + $0x920] sm:$0xff] }
 0x4ff   :  { %11791 = vmatpush1.bf16.msra.mxu1 %v14043_v0  ;;  %11580 = vmatprep.subr.bf16.mxu0 %v14058_v37  ;;  %v4776_v0 = vld [vmem:[#allocation8 + $0x960] sm:$0xff]  ;;  %v4769_v37 = vld [vmem:[#allocation8 + $0x928] sm:$0xff] }
 0x500   :  { %11792 = vmatprep.subr.bf16.mxu1 %v14060_v20  ;;  %v4777_v20 = vld [vmem:[#allocation8 + $0x968] sm:$0xff]  ;;  %v14122_v51 = vcombine.high %v4768_v32, %v4776_v0  ;;  %v14121_v16 = vcombine.low %v4768_v32, %v4776_v0 }
 0x501   :  { %v14124_v23 = vcombine.high %v4769_v37, %v4777_v20  ;;  %v14123_v50 = vcombine.low %v4769_v37, %v4777_v20 }
 0x502   :  { %11581 = vmatpush1.bf16.msra.mxu0 %v14057_v8  ;;  %v4784_v8 = vld [vmem:[#allocation8 + $0x9a0] sm:$0xff] }
 0x503   :  { %11793 = vmatpush1.bf16.msra.mxu1 %v14059_v38  ;;  %11582 = vmatprep.subr.bf16.mxu0 %v14074_v3  ;;  %v4792_v38 = vld [vmem:[#allocation8 + $0x9e0] sm:$0xff]  ;;  %v4785_v3 = vld [vmem:[#allocation8 + $0x9a8] sm:$0xff] }
 0x504   :  { %11794 = vmatprep.subr.bf16.mxu1 %v14076_v29  ;;  %v4793_v29 = vld [vmem:[#allocation8 + $0x9e8] sm:$0xff]  ;;  %v14138_v58 = vcombine.high %v4784_v8, %v4792_v38  ;;  %v14137_v35 = vcombine.low %v4784_v8, %v4792_v38 }
 0x505   :  { %v14140_v34 = vcombine.high %v4785_v3, %v4793_v29  ;;  %v14139_v33 = vcombine.low %v4785_v3, %v4793_v29 }
 0x506   :  { %11583 = vmatpush1.bf16.msra.mxu0 %v14073_v26  ;;  %v4800_v26 = vld [vmem:[#allocation8 + $0xa20] sm:$0xff] }
 0x507   :  { %11795 = vmatpush1.bf16.msra.mxu1 %v14075_v27  ;;  %11605 = vmatprep.subr.bf16.mxu0 %v14090_v43  ;;  %v4808_v27 = vld [vmem:[#allocation8 + $0xa60] sm:$0xff]  ;;  %v4801_v43 = vld [vmem:[#allocation8 + $0xa28] sm:$0xff] }
 0x508   :  { %11817 = vmatprep.subr.bf16.mxu1 %v14092_v17  ;;  %v4809_v17 = vld [vmem:[#allocation8 + $0xa68] sm:$0xff]  ;;  %v14154_v19 = vcombine.high %v4800_v26, %v4808_v27  ;;  %v14153_v32 = vcombine.low %v4800_v26, %v4808_v27 }
 0x509   :  { %11585 = vmatmul.mubr.bf16.vlgmr.msra.gmra.mrb[32].mxu0 %v16301_v21  ;;  %v14156_v22 = vcombine.high %v4801_v43, %v4809_v17  ;;  %v14155_v0 = vcombine.low %v4801_v43, %v4809_v17 }
 0x50a   :  { %11797 = vmatmul.mubr.bf16.vlgmr.msra.gmra.mrb[32].mxu1 %v16301_v21  ;;  %11594 = vmatprep.mubr.bf16.mxu0 %v16362_v42 }
 0x50b   :  { %11606 = vmatpush1.bf16.msra.mxu0 %v14089_v24  ;;  %11806 = vmatprep.mubr.bf16.mxu1 %v16362_v42  ;;  %v4816_v24 = vld [vmem:[#allocation8 + $0xaa0] sm:$0xff] }
 0x50c   :  { %11818 = vmatpush1.bf16.msra.mxu1 %v14091_v6  ;;  %11607 = vmatprep.subr.bf16.mxu0 %v14106_v5  ;;  %v4824_v6 = vld [vmem:[#allocation8 + $0xae0] sm:$0xff]  ;;  %v4817_v5 = vld [vmem:[#allocation8 + $0xaa8] sm:$0xff] }
 0x50d   :  { %11819 = vmatprep.subr.bf16.mxu1 %v14108_v11  ;;  %v4825_v11 = vld [vmem:[#allocation8 + $0xae8] sm:$0xff]  ;;  %v14170_v37 = vcombine.high %v4816_v24, %v4824_v6  ;;  %v14169_v8 = vcombine.low %v4816_v24, %v4824_v6 }
 0x50e   :  { %v14172_v20 = vcombine.high %v4817_v5, %v4825_v11  ;;  %v14171_v38 = vcombine.low %v4817_v5, %v4825_v11 }
 0x50f   :  { %11608 = vmatpush1.bf16.msra.mxu0 %v14105_v4  ;;  %v4832_v4 = vld [vmem:[#allocation8 + $0xb20] sm:$0xff] }
 0x510   :  { %11820 = vmatpush1.bf16.msra.mxu1 %v14107_v61  ;;  %11609 = vmatprep.subr.bf16.mxu0 %v14122_v51  ;;  %v4840_v61 = vld [vmem:[#allocation8 + $0xb60] sm:$0xff]  ;;  %v4833_v51 = vld [vmem:[#allocation8 + $0xb28] sm:$0xff] }
 0x511   :  { %11595 = vmatmul.mubr.bf16.gmra.mrb[36].mxu0 %v16347_v55  ;;  %11821 = vmatprep.subr.bf16.mxu1 %v14124_v23  ;;  %v4841_v23 = vld [vmem:[#allocation8 + $0xb68] sm:$0xff]  ;;  %v14186_v3 = vcombine.high %v4832_v4, %v4840_v61  ;;  %v14185_v26 = vcombine.low %v4832_v4, %v4840_v61 }
 0x512   :  { %11807 = vmatmul.mubr.bf16.gmra.mrb[36].mxu1 %v16347_v55  ;;  %11637 = vmatprep.mubr.bf16.mxu0 %v16324_v10  ;;  %v14188_v29 = vcombine.high %v4833_v51, %v4841_v23  ;;  %v14187_v27 = vcombine.low %v4833_v51, %v4841_v23 }
 0x513   :  { %11610 = vmatpush1.bf16.msra.mxu0 %v14121_v16  ;;  %11849 = vmatprep.mubr.bf16.mxu1 %v16324_v10  ;;  %v4848_v16 = vld [vmem:[#allocation8 + $0xba0] sm:$0xff] }
 0x514   :  { %11822 = vmatpush1.bf16.msra.mxu1 %v14123_v50  ;;  %11611 = vmatprep.subr.bf16.mxu0 %v14138_v58  ;;  %v4856_v50 = vld [vmem:[#allocation8 + $0xbe0] sm:$0xff]  ;;  %v4849_v58 = vld [vmem:[#allocation8 + $0xba8] sm:$0xff] }
 0x515   :  { %11823 = vmatprep.subr.bf16.mxu1 %v14140_v34  ;;  %v4857_v34 = vld [vmem:[#allocation8 + $0xbe8] sm:$0xff]  ;;  %v14202_v43 = vcombine.high %v4848_v16, %v4856_v50  ;;  %v14201_v24 = vcombine.low %v4848_v16, %v4856_v50 }
 0x516   :  { %v14204_v17 = vcombine.high %v4849_v58, %v4857_v34  ;;  %v14203_v6 = vcombine.low %v4849_v58, %v4857_v34 }
 0x517   :  { %11612 = vmatpush1.bf16.msra.mxu0 %v14137_v35  ;;  %v4864_v35 = vld [vmem:[#allocation8 + $0xc20] sm:$0xff] }
 0x518   :  { %11824 = vmatpush1.bf16.msra.mxu1 %v14139_v33  ;;  %11613 = vmatprep.subr.bf16.mxu0 %v14154_v19  ;;  %v4872_v33 = vld [vmem:[#allocation8 + $0xc60] sm:$0xff]  ;;  %v4865_v19 = vld [vmem:[#allocation8 + $0xc28] sm:$0xff] }
 0x519   :  { %11825 = vmatprep.subr.bf16.mxu1 %v14156_v22  ;;  %v4873_v22 = vld [vmem:[#allocation8 + $0xc68] sm:$0xff]  ;;  %v14218_v5 = vcombine.high %v4864_v35, %v4872_v33  ;;  %v14217_v4 = vcombine.low %v4864_v35, %v4872_v33 }
 0x51a   :  { %v14220_v11 = vcombine.high %v4865_v19, %v4873_v22  ;;  %v14219_v61 = vcombine.low %v4865_v19, %v4873_v22 }
 0x51b   :  { %11614 = vmatpush1.bf16.msra.mxu0 %v14153_v32  ;;  %v4880_v32 = vld [vmem:[#allocation8 + $0xca0] sm:$0xff] }
 0x51c   :  { %11826 = vmatpush1.bf16.msra.mxu1 %v14155_v0  ;;  %11615 = vmatprep.subr.bf16.mxu0 %v14170_v37  ;;  %v4888_v0 = vld [vmem:[#allocation8 + $0xce0] sm:$0xff]  ;;  %v4881_v37 = vld [vmem:[#allocation8 + $0xca8] sm:$0xff] }
 0x51d   :  { %11827 = vmatprep.subr.bf16.mxu1 %v14172_v20  ;;  %v4889_v20 = vld [vmem:[#allocation8 + $0xce8] sm:$0xff]  ;;  %v14234_v51 = vcombine.high %v4880_v32, %v4888_v0  ;;  %v14233_v16 = vcombine.low %v4880_v32, %v4888_v0 }
 0x51e   :  { %v14236_v23 = vcombine.high %v4881_v37, %v4889_v20  ;;  %v14235_v50 = vcombine.low %v4881_v37, %v4889_v20 }
 0x51f   :  { %11616 = vmatpush1.bf16.msra.mxu0 %v14169_v8  ;;  %v4896_v8 = vld [vmem:[#allocation8 + $0xd20] sm:$0xff] }
 0x520   :  { %11828 = vmatpush1.bf16.msra.mxu1 %v14171_v38  ;;  %11617 = vmatprep.subr.bf16.mxu0 %v14186_v3  ;;  %v4904_v38 = vld [vmem:[#allocation8 + $0xd60] sm:$0xff]  ;;  %v4897_v3 = vld [vmem:[#allocation8 + $0xd28] sm:$0xff] }
 0x521   :  { %11829 = vmatprep.subr.bf16.mxu1 %v14188_v29  ;;  %v4905_v29 = vld [vmem:[#allocation8 + $0xd68] sm:$0xff]  ;;  %v14250_v58 = vcombine.high %v4896_v8, %v4904_v38  ;;  %v14249_v35 = vcombine.low %v4896_v8, %v4904_v38 }
 0x522   :  { %v14252_v34 = vcombine.high %v4897_v3, %v4905_v29  ;;  %v14251_v33 = vcombine.low %v4897_v3, %v4905_v29 }
 0x523   :  { %11618 = vmatpush1.bf16.msra.mxu0 %v14185_v26  ;;  %v4912_v26 = vld [vmem:[#allocation8 + $0xda0] sm:$0xff] }
 0x524   :  { %11830 = vmatpush1.bf16.msra.mxu1 %v14187_v27  ;;  %11619 = vmatprep.subr.bf16.mxu0 %v14202_v43  ;;  %v4920_v27 = vld [vmem:[#allocation8 + $0xde0] sm:$0xff]  ;;  %v4913_v43 = vld [vmem:[#allocation8 + $0xda8] sm:$0xff] }
 0x525   :  { %11831 = vmatprep.subr.bf16.mxu1 %v14204_v17  ;;  %v4921_v17 = vld [vmem:[#allocation8 + $0xde8] sm:$0xff]  ;;  %v14266_v19 = vcombine.high %v4912_v26, %v4920_v27  ;;  %v14265_v32 = vcombine.low %v4912_v26, %v4920_v27 }
 0x526   :  { %v14268_v22 = vcombine.high %v4913_v43, %v4921_v17  ;;  %v14267_v0 = vcombine.low %v4913_v43, %v4921_v17 }
 0x527   :  { %11620 = vmatpush1.bf16.msra.mxu0 %v14201_v24  ;;  %v4928_v24 = vld [vmem:[#allocation8 + $0xe20] sm:$0xff] }
 0x528   :  { %11832 = vmatpush1.bf16.msra.mxu1 %v14203_v6  ;;  %11621 = vmatprep.subr.bf16.mxu0 %v14218_v5  ;;  %v4936_v6 = vld [vmem:[#allocation8 + $0xe60] sm:$0xff]  ;;  %v4929_v5 = vld [vmem:[#allocation8 + $0xe28] sm:$0xff] }
 0x529   :  { %11833 = vmatprep.subr.bf16.mxu1 %v14220_v11  ;;  %v4937_v11 = vld [vmem:[#allocation8 + $0xe68] sm:$0xff]  ;;  %v14282_v37 = vcombine.high %v4928_v24, %v4936_v6  ;;  %v14281_v8 = vcombine.low %v4928_v24, %v4936_v6 }
 0x52a   :  { %v14284_v20 = vcombine.high %v4929_v5, %v4937_v11  ;;  %v14283_v38 = vcombine.low %v4929_v5, %v4937_v11 }
 0x52b   :  { %11622 = vmatpush1.bf16.msra.mxu0 %v14217_v4  ;;  %v4944_v4 = vld [vmem:[#allocation8 + $0xea0] sm:$0xff] }
 0x52c   :  { %11834 = vmatpush1.bf16.msra.mxu1 %v14219_v61  ;;  %11623 = vmatprep.subr.bf16.mxu0 %v14234_v51  ;;  %v4952_v61 = vld [vmem:[#allocation8 + $0xee0] sm:$0xff]  ;;  %v4945_v51 = vld [vmem:[#allocation8 + $0xea8] sm:$0xff] }
 0x52d   :  { %11835 = vmatprep.subr.bf16.mxu1 %v14236_v23  ;;  %v4953_v23 = vld [vmem:[#allocation8 + $0xee8] sm:$0xff]  ;;  %v14298_v3 = vcombine.high %v4944_v4, %v4952_v61  ;;  %v14297_v26 = vcombine.low %v4944_v4, %v4952_v61 }
 0x52e   :  { %v14300_v29 = vcombine.high %v4945_v51, %v4953_v23  ;;  %v14299_v27 = vcombine.low %v4945_v51, %v4953_v23 }
 0x52f   :  { %11624 = vmatpush1.bf16.msra.mxu0 %v14233_v16  ;;  %v4960_v16 = vld [vmem:[#allocation8 + $0xf20] sm:$0xff] }
 0x530   :  { %11836 = vmatpush1.bf16.msra.mxu1 %v14235_v50  ;;  %11625 = vmatprep.subr.bf16.mxu0 %v14250_v58  ;;  %v4968_v50 = vld [vmem:[#allocation8 + $0xf60] sm:$0xff]  ;;  %v4961_v58 = vld [vmem:[#allocation8 + $0xf28] sm:$0xff] }
 0x531   :  { %11837 = vmatprep.subr.bf16.mxu1 %v14252_v34  ;;  %v4969_v34 = vld [vmem:[#allocation8 + $0xf68] sm:$0xff]  ;;  %v14314_v43 = vcombine.high %v4960_v16, %v4968_v50  ;;  %v14313_v24 = vcombine.low %v4960_v16, %v4968_v50 }
 0x532   :  { %v14316_v17 = vcombine.high %v4961_v58, %v4969_v34  ;;  %v14315_v6 = vcombine.low %v4961_v58, %v4969_v34 }
 0x533   :  { %11626 = vmatpush1.bf16.msra.mxu0 %v14249_v35  ;;  %v4976_v35 = vld [vmem:[#allocation8 + $0xfa0] sm:$0xff] }
 0x534   :  { %11838 = vmatpush1.bf16.msra.mxu1 %v14251_v33  ;;  %11627 = vmatprep.subr.bf16.mxu0 %v14266_v19  ;;  %v4984_v33 = vld [vmem:[#allocation8 + $0xfe0] sm:$0xff]  ;;  %v4977_v19 = vld [vmem:[#allocation8 + $0xfa8] sm:$0xff] }
 0x535   :  { %11839 = vmatprep.subr.bf16.mxu1 %v14268_v22  ;;  %v4985_v22 = vld [vmem:[#allocation8 + $0xfe8] sm:$0xff]  ;;  %v14330_v5 = vcombine.high %v4976_v35, %v4984_v33  ;;  %v14329_v4 = vcombine.low %v4976_v35, %v4984_v33 }
 0x536   :  { %v14332_v11 = vcombine.high %v4977_v19, %v4985_v22  ;;  %v14331_v61 = vcombine.low %v4977_v19, %v4985_v22 }
 0x537   :  { %11628 = vmatpush1.bf16.msra.mxu0 %v14265_v32  ;;  %v4992_v32 = vld [vmem:[#allocation8 + $0x1020] sm:$0xff] }
 0x538   :  { %11840 = vmatpush1.bf16.msra.mxu1 %v14267_v0  ;;  %11629 = vmatprep.subr.bf16.mxu0 %v14282_v37  ;;  %v5000_v0 = vld [vmem:[#allocation8 + $0x1060] sm:$0xff]  ;;  %v4993_v37 = vld [vmem:[#allocation8 + $0x1028] sm:$0xff] }
 0x539   :  { %11841 = vmatprep.subr.bf16.mxu1 %v14284_v20  ;;  %v5001_v20 = vld [vmem:[#allocation8 + $0x1068] sm:$0xff]  ;;  %v14346_v51 = vcombine.high %v4992_v32, %v5000_v0  ;;  %v14345_v16 = vcombine.low %v4992_v32, %v5000_v0 }
 0x53a   :  { %v14348_v23 = vcombine.high %v4993_v37, %v5001_v20  ;;  %v14347_v50 = vcombine.low %v4993_v37, %v5001_v20 }
 0x53b   :  { %11630 = vmatpush1.bf16.msra.mxu0 %v14281_v8  ;;  %v5008_v8 = vld [vmem:[#allocation8 + $0x10a0] sm:$0xff] }
 0x53c   :  { %11842 = vmatpush1.bf16.msra.mxu1 %v14283_v38  ;;  %11631 = vmatprep.subr.bf16.mxu0 %v14298_v3  ;;  %v5016_v38 = vld [vmem:[#allocation8 + $0x10e0] sm:$0xff]  ;;  %v5009_v3 = vld [vmem:[#allocation8 + $0x10a8] sm:$0xff] }
 0x53d   :  { %11843 = vmatprep.subr.bf16.mxu1 %v14300_v29  ;;  %v5017_v29 = vld [vmem:[#allocation8 + $0x10e8] sm:$0xff]  ;;  %v14362_v58 = vcombine.high %v5008_v8, %v5016_v38  ;;  %v14361_v35 = vcombine.low %v5008_v8, %v5016_v38 }
 0x53e   :  { %v14364_v34 = vcombine.high %v5009_v3, %v5017_v29  ;;  %v14363_v33 = vcombine.low %v5009_v3, %v5017_v29 }
 0x53f   :  { %11632 = vmatpush1.bf16.msra.mxu0 %v14297_v26  ;;  %v5024_v26 = vld [vmem:[#allocation8 + $0x1120] sm:$0xff] }
 0x540   :  { %11844 = vmatpush1.bf16.msra.mxu1 %v14299_v27  ;;  %11633 = vmatprep.subr.bf16.mxu0 %v14314_v43  ;;  %v5032_v27 = vld [vmem:[#allocation8 + $0x1160] sm:$0xff]  ;;  %v5025_v43 = vld [vmem:[#allocation8 + $0x1128] sm:$0xff] }
 0x541   :  { %11845 = vmatprep.subr.bf16.mxu1 %v14316_v17  ;;  %v5033_v17 = vld [vmem:[#allocation8 + $0x1168] sm:$0xff]  ;;  %v14378_v19 = vcombine.high %v5024_v26, %v5032_v27  ;;  %v14377_v32 = vcombine.low %v5024_v26, %v5032_v27 }
 0x542   :  { %v14380_v22 = vcombine.high %v5025_v43, %v5033_v17  ;;  %v14379_v0 = vcombine.low %v5025_v43, %v5033_v17 }
 0x543   :  { %11634 = vmatpush1.bf16.msra.mxu0 %v14313_v24  ;;  %v5040_v24 = vld [vmem:[#allocation8 + $0x11a0] sm:$0xff] }
 0x544   :  { %11846 = vmatpush1.bf16.msra.mxu1 %v14315_v6  ;;  %11635 = vmatprep.subr.bf16.mxu0 %v14330_v5  ;;  %v5048_v6 = vld [vmem:[#allocation8 + $0x11e0] sm:$0xff]  ;;  %v5041_v5 = vld [vmem:[#allocation8 + $0x11a8] sm:$0xff] }
 0x545   :  { %11847 = vmatprep.subr.bf16.mxu1 %v14332_v11  ;;  %v5049_v11 = vld [vmem:[#allocation8 + $0x11e8] sm:$0xff]  ;;  %v14394_v37 = vcombine.high %v5040_v24, %v5048_v6  ;;  %v14393_v8 = vcombine.low %v5040_v24, %v5048_v6 }
 0x546   :  { %v14396_v20 = vcombine.high %v5041_v5, %v5049_v11  ;;  %v14395_v38 = vcombine.low %v5041_v5, %v5049_v11 }
 0x547   :  { %11636 = vmatpush1.bf16.msra.mxu0 %v14329_v4  ;;  %v5056_v4 = vld [vmem:[#allocation8 + $0x1220] sm:$0xff] }
 0x548   :  { %11848 = vmatpush1.bf16.msra.mxu1 %v14331_v61  ;;  %11658 = vmatprep.subr.bf16.mxu0 %v14346_v51  ;;  %v5064_v61 = vld [vmem:[#allocation8 + $0x1260] sm:$0xff]  ;;  %v5057_v51 = vld [vmem:[#allocation8 + $0x1228] sm:$0xff] }
 0x549   :  { %11870 = vmatprep.subr.bf16.mxu1 %v14348_v23  ;;  %v5065_v23 = vld [vmem:[#allocation8 + $0x1268] sm:$0xff]  ;;  %v14410_v3 = vcombine.high %v5056_v4, %v5064_v61  ;;  %v14409_v26 = vcombine.low %v5056_v4, %v5064_v61 }
 0x54a   :  { %11638 = vmatmul.mubr.bf16.vlgmr.msra.gmra.mrb[32].mxu0 %v16309_v44  ;;  %v14412_v29 = vcombine.high %v5057_v51, %v5065_v23  ;;  %v14411_v27 = vcombine.low %v5057_v51, %v5065_v23 }
 0x54b   :  { %11850 = vmatmul.mubr.bf16.vlgmr.msra.gmra.mrb[32].mxu1 %v16309_v44  ;;  %11647 = vmatprep.mubr.bf16.mxu0 %v16365_v57 }
 0x54c   :  { %11659 = vmatpush1.bf16.msra.mxu0 %v14345_v16  ;;  %11859 = vmatprep.mubr.bf16.mxu1 %v16365_v57  ;;  %v5072_v16 = vld [vmem:[#allocation8 + $0x12a0] sm:$0xff] }
 0x54d   :  { %11871 = vmatpush1.bf16.msra.mxu1 %v14347_v50  ;;  %11660 = vmatprep.subr.bf16.mxu0 %v14362_v58  ;;  %v5080_v50 = vld [vmem:[#allocation8 + $0x12e0] sm:$0xff]  ;;  %v5073_v58 = vld [vmem:[#allocation8 + $0x12a8] sm:$0xff] }
 0x54e   :  { %11872 = vmatprep.subr.bf16.mxu1 %v14364_v34  ;;  %v5081_v34 = vld [vmem:[#allocation8 + $0x12e8] sm:$0xff]  ;;  %v14426_v43 = vcombine.high %v5072_v16, %v5080_v50  ;;  %v14425_v24 = vcombine.low %v5072_v16, %v5080_v50 }
 0x54f   :  { %v14428_v17 = vcombine.high %v5073_v58, %v5081_v34  ;;  %v14427_v6 = vcombine.low %v5073_v58, %v5081_v34 }
 0x550   :  { %11661 = vmatpush1.bf16.msra.mxu0 %v14361_v35  ;;  %v5088_v35 = vld [vmem:[#allocation8 + $0x1320] sm:$0xff] }
 0x551   :  { %11873 = vmatpush1.bf16.msra.mxu1 %v14363_v33  ;;  %11662 = vmatprep.subr.bf16.mxu0 %v14378_v19  ;;  %v5096_v33 = vld [vmem:[#allocation8 + $0x1360] sm:$0xff]  ;;  %v5089_v19 = vld [vmem:[#allocation8 + $0x1328] sm:$0xff] }
 0x552   :  { %11648 = vmatmul.mubr.bf16.gmra.mrb[36].mxu0 %v16353_v54  ;;  %11874 = vmatprep.subr.bf16.mxu1 %v14380_v22  ;;  %v5097_v22 = vld [vmem:[#allocation8 + $0x1368] sm:$0xff]  ;;  %v14442_v5 = vcombine.high %v5088_v35, %v5096_v33  ;;  %v14441_v4 = vcombine.low %v5088_v35, %v5096_v33 }
 0x553   :  { %11860 = vmatmul.mubr.bf16.gmra.mrb[36].mxu1 %v16353_v54  ;;  %11690 = vmatprep.mubr.bf16.mxu0 %v16546_v62  ;;  %v14444_v11 = vcombine.high %v5089_v19, %v5097_v22  ;;  %v14443_v61 = vcombine.low %v5089_v19, %v5097_v22 }
 0x554   :  { %11663 = vmatpush1.bf16.msra.mxu0 %v14377_v32  ;;  %11902 = vmatprep.mubr.bf16.mxu1 %v16546_v62  ;;  %v5104_v32 = vld [vmem:[#allocation8 + $0x13a0] sm:$0xff] }
 0x555   :  { %11875 = vmatpush1.bf16.msra.mxu1 %v14379_v0  ;;  %11664 = vmatprep.subr.bf16.mxu0 %v14394_v37  ;;  %v5112_v0 = vld [vmem:[#allocation8 + $0x13e0] sm:$0xff]  ;;  %v5105_v37 = vld [vmem:[#allocation8 + $0x13a8] sm:$0xff] }
 0x556   :  { %11876 = vmatprep.subr.bf16.mxu1 %v14396_v20  ;;  %v5113_v20 = vld [vmem:[#allocation8 + $0x13e8] sm:$0xff]  ;;  %v14458_v51 = vcombine.high %v5104_v32, %v5112_v0  ;;  %v14457_v16 = vcombine.low %v5104_v32, %v5112_v0 }
 0x557   :  { %v14460_v23 = vcombine.high %v5105_v37, %v5113_v20  ;;  %v14459_v50 = vcombine.low %v5105_v37, %v5113_v20 }
 0x558   :  { %11665 = vmatpush1.bf16.msra.mxu0 %v14393_v8  ;;  %v5120_v8 = vld [vmem:[#allocation8 + $0x1420] sm:$0xff] }
 0x559   :  { %11877 = vmatpush1.bf16.msra.mxu1 %v14395_v38  ;;  %11666 = vmatprep.subr.bf16.mxu0 %v14410_v3  ;;  %v5128_v38 = vld [vmem:[#allocation8 + $0x1460] sm:$0xff]  ;;  %v5121_v3 = vld [vmem:[#allocation8 + $0x1428] sm:$0xff] }
 0x55a   :  { %11878 = vmatprep.subr.bf16.mxu1 %v14412_v29  ;;  %v5129_v29 = vld [vmem:[#allocation8 + $0x1468] sm:$0xff]  ;;  %v14474_v58 = vcombine.high %v5120_v8, %v5128_v38  ;;  %v14473_v35 = vcombine.low %v5120_v8, %v5128_v38 }
 0x55b   :  { %v14476_v34 = vcombine.high %v5121_v3, %v5129_v29  ;;  %v14475_v33 = vcombine.low %v5121_v3, %v5129_v29 }
 0x55c   :  { %11667 = vmatpush1.bf16.msra.mxu0 %v14409_v26  ;;  %v5136_v26 = vld [vmem:[#allocation8 + $0x14a0] sm:$0xff] }
 0x55d   :  { %11879 = vmatpush1.bf16.msra.mxu1 %v14411_v27  ;;  %11668 = vmatprep.subr.bf16.mxu0 %v14426_v43  ;;  %v5144_v27 = vld [vmem:[#allocation8 + $0x14e0] sm:$0xff]  ;;  %v5137_v43 = vld [vmem:[#allocation8 + $0x14a8] sm:$0xff] }
 0x55e   :  { %11880 = vmatprep.subr.bf16.mxu1 %v14428_v17  ;;  %v5145_v17 = vld [vmem:[#allocation8 + $0x14e8] sm:$0xff]  ;;  %v14490_v19 = vcombine.high %v5136_v26, %v5144_v27  ;;  %v14489_v32 = vcombine.low %v5136_v26, %v5144_v27 }
 0x55f   :  { %v14492_v22 = vcombine.high %v5137_v43, %v5145_v17  ;;  %v14491_v0 = vcombine.low %v5137_v43, %v5145_v17 }
 0x560   :  { %11669 = vmatpush1.bf16.msra.mxu0 %v14425_v24  ;;  %v5152_v24 = vld [vmem:[#allocation8 + $0x1520] sm:$0xff] }
 0x561   :  { %11881 = vmatpush1.bf16.msra.mxu1 %v14427_v6  ;;  %11670 = vmatprep.subr.bf16.mxu0 %v14442_v5  ;;  %v5160_v6 = vld [vmem:[#allocation8 + $0x1560] sm:$0xff]  ;;  %v5153_v5 = vld [vmem:[#allocation8 + $0x1528] sm:$0xff] }
 0x562   :  { %11882 = vmatprep.subr.bf16.mxu1 %v14444_v11  ;;  %v5161_v11 = vld [vmem:[#allocation8 + $0x1568] sm:$0xff]  ;;  %v14506_v37 = vcombine.high %v5152_v24, %v5160_v6  ;;  %v14505_v8 = vcombine.low %v5152_v24, %v5160_v6 }
 0x563   :  { %v14508_v20 = vcombine.high %v5153_v5, %v5161_v11  ;;  %v14507_v38 = vcombine.low %v5153_v5, %v5161_v11 }
 0x564   :  { %11671 = vmatpush1.bf16.msra.mxu0 %v14441_v4  ;;  %v5168_v4 = vld [vmem:[#allocation8 + $0x15a0] sm:$0xff] }
 0x565   :  { %11883 = vmatpush1.bf16.msra.mxu1 %v14443_v61  ;;  %11672 = vmatprep.subr.bf16.mxu0 %v14458_v51  ;;  %v5176_v61 = vld [vmem:[#allocation8 + $0x15e0] sm:$0xff]  ;;  %v5169_v51 = vld [vmem:[#allocation8 + $0x15a8] sm:$0xff] }
 0x566   :  { %11884 = vmatprep.subr.bf16.mxu1 %v14460_v23  ;;  %v5177_v23 = vld [vmem:[#allocation8 + $0x15e8] sm:$0xff]  ;;  %v14522_v3 = vcombine.high %v5168_v4, %v5176_v61  ;;  %v14521_v26 = vcombine.low %v5168_v4, %v5176_v61 }
 0x567   :  { %v14524_v29 = vcombine.high %v5169_v51, %v5177_v23  ;;  %v14523_v27 = vcombine.low %v5169_v51, %v5177_v23 }
 0x568   :  { %11673 = vmatpush1.bf16.msra.mxu0 %v14457_v16  ;;  %v5184_v16 = vld [vmem:[#allocation8 + $0x1620] sm:$0xff] }
 0x569   :  { %11885 = vmatpush1.bf16.msra.mxu1 %v14459_v50  ;;  %11674 = vmatprep.subr.bf16.mxu0 %v14474_v58  ;;  %v5192_v50 = vld [vmem:[#allocation8 + $0x1660] sm:$0xff]  ;;  %v5185_v58 = vld [vmem:[#allocation8 + $0x1628] sm:$0xff] }
 0x56a   :  { %11886 = vmatprep.subr.bf16.mxu1 %v14476_v34  ;;  %v5193_v34 = vld [vmem:[#allocation8 + $0x1668] sm:$0xff]  ;;  %v14538_v43 = vcombine.high %v5184_v16, %v5192_v50  ;;  %v14537_v24 = vcombine.low %v5184_v16, %v5192_v50 }
 0x56b   :  { %v14540_v17 = vcombine.high %v5185_v58, %v5193_v34  ;;  %v14539_v6 = vcombine.low %v5185_v58, %v5193_v34 }
 0x56c   :  { %11675 = vmatpush1.bf16.msra.mxu0 %v14473_v35  ;;  %v5200_v35 = vld [vmem:[#allocation8 + $0x16a0] sm:$0xff] }
 0x56d   :  { %11887 = vmatpush1.bf16.msra.mxu1 %v14475_v33  ;;  %11676 = vmatprep.subr.bf16.mxu0 %v14490_v19  ;;  %v5208_v33 = vld [vmem:[#allocation8 + $0x16e0] sm:$0xff]  ;;  %v5201_v19 = vld [vmem:[#allocation8 + $0x16a8] sm:$0xff] }
 0x56e   :  { %11888 = vmatprep.subr.bf16.mxu1 %v14492_v22  ;;  %v5209_v22 = vld [vmem:[#allocation8 + $0x16e8] sm:$0xff]  ;;  %v14554_v5 = vcombine.high %v5200_v35, %v5208_v33  ;;  %v14553_v4 = vcombine.low %v5200_v35, %v5208_v33 }
 0x56f   :  { %v14556_v11 = vcombine.high %v5201_v19, %v5209_v22  ;;  %v14555_v61 = vcombine.low %v5201_v19, %v5209_v22 }
 0x570   :  { %11677 = vmatpush1.bf16.msra.mxu0 %v14489_v32  ;;  %v5216_v32 = vld [vmem:[#allocation8 + $0x1720] sm:$0xff] }
 0x571   :  { %11889 = vmatpush1.bf16.msra.mxu1 %v14491_v0  ;;  %11678 = vmatprep.subr.bf16.mxu0 %v14506_v37  ;;  %v5224_v0 = vld [vmem:[#allocation8 + $0x1760] sm:$0xff]  ;;  %v5217_v37 = vld [vmem:[#allocation8 + $0x1728] sm:$0xff] }
 0x572   :  { %11890 = vmatprep.subr.bf16.mxu1 %v14508_v20  ;;  %v5225_v20 = vld [vmem:[#allocation8 + $0x1768] sm:$0xff]  ;;  %v14570_v51 = vcombine.high %v5216_v32, %v5224_v0  ;;  %v14569_v16 = vcombine.low %v5216_v32, %v5224_v0 }
 0x573   :  { %v14572_v23 = vcombine.high %v5217_v37, %v5225_v20  ;;  %v14571_v50 = vcombine.low %v5217_v37, %v5225_v20 }
 0x574   :  { %11679 = vmatpush1.bf16.msra.mxu0 %v14505_v8  ;;  %v5232_v8 = vld [vmem:[#allocation8 + $0x17a0] sm:$0xff] }
 0x575   :  { %11891 = vmatpush1.bf16.msra.mxu1 %v14507_v38  ;;  %11680 = vmatprep.subr.bf16.mxu0 %v14522_v3  ;;  %v5240_v38 = vld [vmem:[#allocation8 + $0x17e0] sm:$0xff]  ;;  %v5233_v3 = vld [vmem:[#allocation8 + $0x17a8] sm:$0xff] }
 0x576   :  { %11892 = vmatprep.subr.bf16.mxu1 %v14524_v29  ;;  %v5241_v29 = vld [vmem:[#allocation8 + $0x17e8] sm:$0xff]  ;;  %v14586_v58 = vcombine.high %v5232_v8, %v5240_v38  ;;  %v14585_v35 = vcombine.low %v5232_v8, %v5240_v38 }
 0x577   :  { %v14588_v34 = vcombine.high %v5233_v3, %v5241_v29  ;;  %v14587_v33 = vcombine.low %v5233_v3, %v5241_v29 }
 0x578   :  { %11681 = vmatpush1.bf16.msra.mxu0 %v14521_v26  ;;  %v5248_v26 = vld [vmem:[#allocation8 + $0x1820] sm:$0xff] }
 0x579   :  { %11893 = vmatpush1.bf16.msra.mxu1 %v14523_v27  ;;  %11682 = vmatprep.subr.bf16.mxu0 %v14538_v43  ;;  %v5256_v27 = vld [vmem:[#allocation8 + $0x1860] sm:$0xff]  ;;  %v5249_v43 = vld [vmem:[#allocation8 + $0x1828] sm:$0xff] }
 0x57a   :  { %11894 = vmatprep.subr.bf16.mxu1 %v14540_v17  ;;  %v5257_v17 = vld [vmem:[#allocation8 + $0x1868] sm:$0xff]  ;;  %v14602_v19 = vcombine.high %v5248_v26, %v5256_v27  ;;  %v14601_v32 = vcombine.low %v5248_v26, %v5256_v27 }
 0x57b   :  { %v14604_v22 = vcombine.high %v5249_v43, %v5257_v17  ;;  %v14603_v0 = vcombine.low %v5249_v43, %v5257_v17 }
 0x57c   :  { %11683 = vmatpush1.bf16.msra.mxu0 %v14537_v24  ;;  %v5264_v24 = vld [vmem:[#allocation8 + $0x18a0] sm:$0xff] }
 0x57d   :  { %11895 = vmatpush1.bf16.msra.mxu1 %v14539_v6  ;;  %11684 = vmatprep.subr.bf16.mxu0 %v14554_v5  ;;  %v5272_v6 = vld [vmem:[#allocation8 + $0x18e0] sm:$0xff]  ;;  %v5265_v5 = vld [vmem:[#allocation8 + $0x18a8] sm:$0xff] }
 0x57e   :  { %11896 = vmatprep.subr.bf16.mxu1 %v14556_v11  ;;  %v5273_v11 = vld [vmem:[#allocation8 + $0x18e8] sm:$0xff]  ;;  %v14618_v37 = vcombine.high %v5264_v24, %v5272_v6  ;;  %v14617_v8 = vcombine.low %v5264_v24, %v5272_v6 }
 0x57f   :  { %v14620_v20 = vcombine.high %v5265_v5, %v5273_v11  ;;  %v14619_v38 = vcombine.low %v5265_v5, %v5273_v11 }
 0x580   :  { %11685 = vmatpush1.bf16.msra.mxu0 %v14553_v4  ;;  %v5280_v4 = vld [vmem:[#allocation8 + $0x1920] sm:$0xff] }
 0x581   :  { %11897 = vmatpush1.bf16.msra.mxu1 %v14555_v61  ;;  %11686 = vmatprep.subr.bf16.mxu0 %v14570_v51  ;;  %v5288_v61 = vld [vmem:[#allocation8 + $0x1960] sm:$0xff]  ;;  %v5281_v51 = vld [vmem:[#allocation8 + $0x1928] sm:$0xff] }
 0x582   :  { %11898 = vmatprep.subr.bf16.mxu1 %v14572_v23  ;;  %v5289_v23 = vld [vmem:[#allocation8 + $0x1968] sm:$0xff]  ;;  %v14634_v3 = vcombine.high %v5280_v4, %v5288_v61  ;;  %v14633_v26 = vcombine.low %v5280_v4, %v5288_v61 }
 0x583   :  { %v14636_v29 = vcombine.high %v5281_v51, %v5289_v23  ;;  %v14635_v27 = vcombine.low %v5281_v51, %v5289_v23 }
 0x584   :  { %11687 = vmatpush1.bf16.msra.mxu0 %v14569_v16  ;;  %v5296_v16 = vld [vmem:[#allocation8 + $0x19a0] sm:$0xff] }
 0x585   :  { %11899 = vmatpush1.bf16.msra.mxu1 %v14571_v50  ;;  %11688 = vmatprep.subr.bf16.mxu0 %v14586_v58  ;;  %v5304_v50 = vld [vmem:[#allocation8 + $0x19e0] sm:$0xff]  ;;  %v5297_v58 = vld [vmem:[#allocation8 + $0x19a8] sm:$0xff] }
 0x586   :  { %11900 = vmatprep.subr.bf16.mxu1 %v14588_v34  ;;  %v5305_v34 = vld [vmem:[#allocation8 + $0x19e8] sm:$0xff]  ;;  %v14650_v43 = vcombine.high %v5296_v16, %v5304_v50  ;;  %v14649_v24 = vcombine.low %v5296_v16, %v5304_v50 }
 0x587   :  { %v14652_v17 = vcombine.high %v5297_v58, %v5305_v34  ;;  %v14651_v6 = vcombine.low %v5297_v58, %v5305_v34  ;;  %v5345_v50 = vld [vmem:[#allocation8 + $0x1b28] sm:$0xff] }
 0x588   :  { %11689 = vmatpush1.bf16.msra.mxu0 %v14585_v35  ;;  %v5312_v35 = vld [vmem:[#allocation8 + $0x1a20] sm:$0xff]  ;;  %v5353_v58 = vld [vmem:[#allocation8 + $0x1b68] sm:$0xff] }
 0x589   :  { %11901 = vmatpush1.bf16.msra.mxu1 %v14587_v33  ;;  %11711 = vmatprep.subr.bf16.mxu0 %v14602_v19  ;;  %v5320_v33 = vld [vmem:[#allocation8 + $0x1a60] sm:$0xff]  ;;  %v5313_v19 = vld [vmem:[#allocation8 + $0x1a28] sm:$0xff] }
 0x58a   :  { %11923 = vmatprep.subr.bf16.mxu1 %v14604_v22  ;;  %v5321_v22 = vld [vmem:[#allocation8 + $0x1a68] sm:$0xff]  ;;  %v14666_v5 = vcombine.high %v5312_v35, %v5320_v33  ;;  %v14665_v4 = vcombine.low %v5312_v35, %v5320_v33 }
 0x58b   :  { %11691 = vmatmul.mubr.bf16.vlgmr.msra.gmra.mrb[32].mxu0 %v16536_v47  ;;  %v14668_v11 = vcombine.high %v5313_v19, %v5321_v22  ;;  %v14667_v61 = vcombine.low %v5313_v19, %v5321_v22  ;;  %v14700_v22 = vcombine.high %v5345_v50, %v5353_v58 }
 0x58c   :  { %11903 = vmatmul.mubr.bf16.vlgmr.msra.gmra.mrb[32].mxu1 %v16536_v47  ;;  %11700 = vmatprep.mubr.bf16.mxu0 %v16570_v18 }
 0x58d   :  { %11712 = vmatpush1.bf16.msra.mxu0 %v14601_v32  ;;  %11912 = vmatprep.mubr.bf16.mxu1 %v16570_v18  ;;  %v5328_v32 = vld [vmem:[#allocation8 + $0x1aa0] sm:$0xff] }
 0x58e   :  { %11924 = vmatpush1.bf16.msra.mxu1 %v14603_v0  ;;  %11713 = vmatprep.subr.bf16.mxu0 %v14618_v37  ;;  %v5336_v0 = vld [vmem:[#allocation8 + $0x1ae0] sm:$0xff]  ;;  %v5329_v37 = vld [vmem:[#allocation8 + $0x1aa8] sm:$0xff] }
 0x58f   :  { %11925 = vmatprep.subr.bf16.mxu1 %v14620_v20  ;;  %v5337_v20 = vld [vmem:[#allocation8 + $0x1ae8] sm:$0xff]  ;;  %v14682_v51 = vcombine.high %v5328_v32, %v5336_v0 }
 0x591   :  { %11714 = vmatpush1.bf16.msra.mxu0 %v14617_v8  ;;  %v14684_v8 = vcombine.high %v5329_v37, %v5337_v20 }
 0x592   :  { %11926 = vmatpush1.bf16.msra.mxu1 %v14619_v38  ;;  %11715 = vmatprep.subr.bf16.mxu0 %v14634_v3  ;;  %v5344_v38 = vld [vmem:[#allocation8 + $0x1b20] sm:$0xff] }
 0x593   :  { %11701 = vmatmul.mubr.bf16.gmra.mrb[36].mxu0 %v16561_v56  ;;  %11927 = vmatprep.subr.bf16.mxu1 %v14636_v29  ;;  %v5352_v3 = vld [vmem:[#allocation8 + $0x1b60] sm:$0xff] }
 0x594   :  { %11913 = vmatmul.mubr.bf16.gmra.mrb[36].mxu1 %v16561_v56  ;;  %11743 = vmatprep.mubr.bf16.mxu0 %v16549_v28  ;;  %v14698_v33 = vcombine.high %v5344_v38, %v5352_v3 }
 0x595   :  { %11716 = vmatpush1.bf16.msra.mxu0 %v14633_v26  ;;  %11955 = vmatprep.mubr.bf16.mxu1 %v16549_v28  ;;  %v14681_v26 = vcombine.low %v5328_v32, %v5336_v0  ;;  %v5369_v32 = vld [vmem:[#allocation8 + $0x1be8] sm:$0xff]  ;;  %v14699_v0 = vcombine.low %v5345_v50, %v5353_v58 }
 0x596   :  { %11928 = vmatpush1.bf16.msra.mxu1 %v14635_v27  ;;  %11717 = vmatprep.subr.bf16.mxu0 %v14650_v43  ;;  %v14683_v43 = vcombine.low %v5329_v37, %v5337_v20 }
 0x597   :  { %11929 = vmatprep.subr.bf16.mxu1 %v14652_v17 }
 0x599   :  { %11718 = vmatpush1.bf16.msra.mxu0 %v14649_v24  ;;  %v5360_v24 = vld [vmem:[#allocation8 + $0x1ba0] sm:$0xff] }
 0x59a   :  { %11930 = vmatpush1.bf16.msra.mxu1 %v14651_v6  ;;  %11719 = vmatprep.subr.bf16.mxu0 %v14666_v5  ;;  %v5368_v6 = vld [vmem:[#allocation8 + $0x1be0] sm:$0xff]  ;;  %v14697_v5 = vcombine.low %v5344_v38, %v5352_v3 }
 0x59b   :  { %11931 = vmatprep.subr.bf16.mxu1 %v14668_v11  ;;  %v16677_v23 = vpop.f32.mrb[24].mxu0  ;;  %v5361_v11 = vld [vmem:[#allocation8 + $0x1ba8] sm:$0xff]  ;;  %v14714_v20 = vcombine.high %v5360_v24, %v5368_v6  ;;  %v14713_v3 = vcombine.low %v5360_v24, %v5368_v6 }
 0x59c   :  { %v16679_v29 = vpop.f32.mrb[24].mxu1  ;;  %v16681_v16 = vpop.f32.mrb[25].mxu0  ;;  %v14715_v50 = vcombine.low %v5361_v11, %v5369_v32 }
 0x59d   :  { %18038 = vst [vmem:[#allocation28_spill] sm:$0xff] %v16679_v29  ;;  %11720 = vmatpush1.bf16.msra.mxu0 %v14665_v4  ;;  %v16683_v34 = vpop.f32.mrb[25].mxu1  ;;  %v16685_v27 = vpop.f32.mrb[26].mxu0  ;;  %v5376_v4 = vld [vmem:[#allocation8 + $0x1c20] sm:$0xff]  ;;  %v5401_v29 = vld [vmem:[#allocation8 + $0x1ce8] sm:$0xff] }
 0x59e   :  { %18039 = vst [vmem:[#allocation29_spill] sm:$0xff] %v16683_v34  ;;  %11932 = vmatpush1.bf16.msra.mxu1 %v14667_v61  ;;  %11721 = vmatprep.subr.bf16.mxu0 %v14682_v51  ;;  %v16687_v17 = vpop.f32.mrb[26].mxu1  ;;  %v16689_v35 = vpop.f32.mrb[27].mxu0  ;;  %v5385_v34 = vld [vmem:[#allocation8 + $0x1c68] sm:$0xff] }
 0x59f   :  { %18040 = vst [vmem:[#allocation30_spill] sm:$0xff] %v16687_v17  ;;  %11933 = vmatprep.subr.bf16.mxu1 %v14684_v8  ;;  %v16691_v19 = vpop.f32.mrb[27].mxu1  ;;  %v14716_v8 = vcombine.high %v5361_v11, %v5369_v32  ;;  %v5377_v17 = vld [vmem:[#allocation8 + $0x1c28] sm:$0xff]  ;;  %v5408_v32 = vld [vmem:[#allocation8 + $0x1d20] sm:$0xff] }
 0x5a0   :  { %18041 = vst [vmem:[#allocation20_spill] sm:$0xff] %v16691_v19  ;;  %v5384_v19 = vld [vmem:[#allocation8 + $0x1c60] sm:$0xff]  ;;  %v14731_v6 = vcombine.low %v5377_v17, %v5385_v34 }
 0x5a1   :  { %11722 = vmatpush1.bf16.msra.mxu0 %v14681_v26  ;;  %v14729_v24 = vcombine.low %v5376_v4, %v5384_v19 }
 0x5a2   :  { %11934 = vmatpush1.bf16.msra.mxu1 %v14683_v43  ;;  %11723 = vmatprep.subr.bf16.mxu0 %v14698_v33 }
 0x5a3   :  { %11935 = vmatprep.subr.bf16.mxu1 %v14700_v22  ;;  %v16693_v37 = vpop.f32.mrb[28].mxu0  ;;  %v14730_v22 = vcombine.high %v5376_v4, %v5384_v19  ;;  %v5432_v19 = vld [vmem:[#allocation8 + $0x1de0] sm:$0xff]  ;;  %v5425_v4 = vld [vmem:[#allocation8 + $0x1da8] sm:$0xff] }
 0x5a4   :  { %18042 = vst [vmem:[#allocation21_spill] sm:$0xff] %v16693_v37  ;;  %v16695_v61 = vpop.f32.mrb[28].mxu1  ;;  %v16697_v51 = vpop.f32.mrb[29].mxu0  ;;  %v5400_v37 = vld [vmem:[#allocation8 + $0x1ce0] sm:$0xff] }
 0x5a5   :  { %18043 = vst [vmem:[#allocation22_spill] sm:$0xff] %v16695_v61  ;;  %18044 = vst [vmem:[#allocation23_spill] sm:$0xff] %v16697_v51  ;;  %11724 = vmatpush1.bf16.msra.mxu0 %v14697_v5  ;;  %v16699_v38 = vpop.f32.mrb[29].mxu1  ;;  %v16701_v26 = vpop.f32.mrb[30].mxu0  ;;  %v14732_v61 = vcombine.high %v5377_v17, %v5385_v34  ;;  %v5392_v51 = vld [vmem:[#allocation8 + $0x1ca0] sm:$0xff]  ;;  %v5393_v5 = vld [vmem:[#allocation8 + $0x1ca8] sm:$0xff] }
 0x5a6   :  { %18045 = vst [vmem:[#allocation31_spill] sm:$0xff] %v16699_v38  ;;  %18046 = vst [vmem:[#allocation32_spill] sm:$0xff] %v16701_v26  ;;  %11936 = vmatpush1.bf16.msra.mxu1 %v14699_v0  ;;  %v16703_v58 = vpop.f32.mrb[30].mxu1  ;;  %v16705_v43 = vpop.f32.mrb[31].mxu0  ;;  %11725 = vmatprep.subr.bf16.mxu0 %v14714_v20  ;;  %v14746_v0 = vcombine.high %v5392_v51, %v5400_v37  ;;  %v14748_v11 = vcombine.high %v5393_v5, %v5401_v29  ;;  %v5409_v20 = vld [vmem:[#allocation8 + $0x1d28] sm:$0xff] }
 0x5a7   :  { %18047 = vst [vmem:[#allocation33_spill] sm:$0xff] %v16703_v58  ;;  %18048 = vst [vmem:[#allocation34_spill] sm:$0xff] %v16705_v43  ;;  %v16707_v33 = vpop.f32.mrb[31].mxu1  ;;  %11937 = vmatprep.subr.bf16.mxu1 %v14716_v8  ;;  %v5416_v58 = vld [vmem:[#allocation8 + $0x1d60] sm:$0xff]  ;;  %v5417_v38 = vld [vmem:[#allocation8 + $0x1d68] sm:$0xff]  ;;  %v14747_v43 = vcombine.low %v5393_v5, %v5401_v29 }
 0x5a8   :  { %18049 = vst [vmem:[#allocation35_spill] sm:$0xff] %v16707_v33  ;;  %v14745_v33 = vcombine.low %v5392_v51, %v5400_v37  ;;  %v14762_v8 = vcombine.high %v5408_v32, %v5416_v58  ;;  %v14764_v26 = vcombine.high %v5409_v20, %v5417_v38  ;;  %v5433_v34 = vld [vmem:[#allocation8 + $0x1de8] sm:$0xff]  ;;  %v14761_v17 = vcombine.low %v5408_v32, %v5416_v58  ;;  %v5448_v37 = vld [vmem:[#allocation8 + $0x1e60] sm:$0xff] }
 0x5a9   :  { %11726 = vmatpush1.bf16.msra.mxu0 %v14713_v3  ;;  %v5424_v3 = vld [vmem:[#allocation8 + $0x1da0] sm:$0xff]  ;;  %v5441_v51 = vld [vmem:[#allocation8 + $0x1e28] sm:$0xff]  ;;  %v14779_v5 = vcombine.low %v5425_v4, %v5433_v34 }
 0x5aa   :  { %11938 = vmatpush1.bf16.msra.mxu1 %v14715_v50  ;;  %11727 = vmatprep.subr.bf16.mxu0 %v14730_v22  ;;  %v14778_v50 = vcombine.high %v5424_v3, %v5432_v19  ;;  %v14780_v22 = vcombine.high %v5425_v4, %v5433_v34  ;;  %v14777_v29 = vcombine.low %v5424_v3, %v5432_v19  ;;  %v5464_v58 = vld [vmem:[#allocation8 + $0x1ee0] sm:$0xff]  ;;  %v5465_v32 = vld [vmem:[#allocation8 + $0x1ee8] sm:$0xff] }
 0x5ab   :  { %11939 = vmatprep.subr.bf16.mxu1 %v14732_v61  ;;  %v14763_v61 = vcombine.low %v5409_v20, %v5417_v38  ;;  %v5480_v3 = vld [vmem:[#allocation8 + $0x1f60] sm:$0xff]  ;;  %v5473_v19 = vld [vmem:[#allocation8 + $0x1f28] sm:$0xff] }
 0x5ad   :  { %11728 = vmatpush1.bf16.msra.mxu0 %v14729_v24  ;;  %v5440_v24 = vld [vmem:[#allocation8 + $0x1e20] sm:$0xff] }
 0x5ae   :  { %11940 = vmatpush1.bf16.msra.mxu1 %v14731_v6  ;;  %11729 = vmatprep.subr.bf16.mxu0 %v14746_v0  ;;  %v5449_v6 = vld [vmem:[#allocation8 + $0x1e68] sm:$0xff]  ;;  %v14794_v0 = vcombine.high %v5440_v24, %v5448_v37  ;;  %v14793_v38 = vcombine.low %v5440_v24, %v5448_v37  ;;  %v5496_v24 = vld [vmem:[#allocation8 + $0x1fe0] sm:$0xff] }
 0x5af   :  { %11941 = vmatprep.subr.bf16.mxu1 %v14748_v11  ;;  %v14796_v11 = vcombine.high %v5441_v51, %v5449_v6  ;;  %v5489_v37 = vld [vmem:[#allocation8 + $0x1fa8] sm:$0xff] }
 0x5b1   :  { %11730 = vmatpush1.bf16.msra.mxu0 %v14745_v33  ;;  %v5456_v33 = vld [vmem:[#allocation8 + $0x1ea0] sm:$0xff] }
 0x5b2   :  { %11942 = vmatpush1.bf16.msra.mxu1 %v14747_v43  ;;  %11731 = vmatprep.subr.bf16.mxu0 %v14762_v8  ;;  %v5457_v43 = vld [vmem:[#allocation8 + $0x1ea8] sm:$0xff]  ;;  %v14810_v20 = vcombine.high %v5456_v33, %v5464_v58  ;;  %v14809_v4 = vcombine.low %v5456_v33, %v5464_v58  ;;  %v4490_v33 = vld [vmem:[#allocation8 + $0x70] sm:$0xff]  ;;  %v4483_v58 = vld [vmem:[#allocation8 + $0x38] sm:$0xff] }
 0x5b3   :  { %11943 = vmatprep.subr.bf16.mxu1 %v14764_v26  ;;  %v14795_v26 = vcombine.low %v5441_v51, %v5449_v6  ;;  %v14812_v8 = vcombine.high %v5457_v43, %v5465_v32  ;;  %v14811_v34 = vcombine.low %v5457_v43, %v5465_v32 }
 0x5b5   :  { %11732 = vmatpush1.bf16.msra.mxu0 %v14761_v17  ;;  %v5472_v17 = vld [vmem:[#allocation8 + $0x1f20] sm:$0xff] }
 0x5b6   :  { %11944 = vmatpush1.bf16.msra.mxu1 %v14763_v61  ;;  %11733 = vmatprep.subr.bf16.mxu0 %v14778_v50  ;;  %v5481_v61 = vld [vmem:[#allocation8 + $0x1f68] sm:$0xff]  ;;  %v14826_v50 = vcombine.high %v5472_v17, %v5480_v3  ;;  %v14825_v51 = vcombine.low %v5472_v17, %v5480_v3  ;;  %v4506_v17 = vld [vmem:[#allocation8 + $0xf0] sm:$0xff]  ;;  %v4499_v3 = vld [vmem:[#allocation8 + $0xb8] sm:$0xff] }
 0x5b7   :  { %11945 = vmatprep.subr.bf16.mxu1 %v14780_v22  ;;  %v14828_v22 = vcombine.high %v5473_v19, %v5481_v61  ;;  %v14827_v6 = vcombine.low %v5473_v19, %v5481_v61  ;;  %v4507_v19 = vld [vmem:[#allocation8 + $0xf8] sm:$0xff] }
 0x5b9   :  { %11734 = vmatpush1.bf16.msra.mxu0 %v14777_v29  ;;  %v5488_v29 = vld [vmem:[#allocation8 + $0x1fa0] sm:$0xff] }
 0x5ba   :  { %11946 = vmatpush1.bf16.msra.mxu1 %v14779_v5  ;;  %11735 = vmatprep.subr.bf16.mxu0 %v14794_v0  ;;  %v5497_v5 = vld [vmem:[#allocation8 + $0x1fe8] sm:$0xff]  ;;  %v14842_v0 = vcombine.high %v5488_v29, %v5496_v24  ;;  %v14841_v43 = vcombine.low %v5488_v29, %v5496_v24  ;;  %v4514_v29 = vld [vmem:[#allocation8 + $0x130] sm:$0xff] }
 0x5bb   :  { %11947 = vmatprep.subr.bf16.mxu1 %v14796_v11  ;;  %v14844_v11 = vcombine.high %v5489_v37, %v5497_v5  ;;  %v14843_v32 = vcombine.low %v5489_v37, %v5497_v5  ;;  %v4522_v24 = vld [vmem:[#allocation8 + $0x170] sm:$0xff]  ;;  %v4515_v37 = vld [vmem:[#allocation8 + $0x138] sm:$0xff] }
 0x5bc   :  { %v4523_v5 = vld [vmem:[#allocation8 + $0x178] sm:$0xff] }
 0x5bd   :  { %11736 = vmatpush1.bf16.msra.mxu0 %v14793_v38  ;;  %v4482_v38 = vld [vmem:[#allocation8 + $0x30] sm:$0xff] }
 0x5be   :  { %11948 = vmatpush1.bf16.msra.mxu1 %v14795_v26  ;;  %11737 = vmatprep.subr.bf16.mxu0 %v14810_v20  ;;  %v4491_v26 = vld [vmem:[#allocation8 + $0x78] sm:$0xff]  ;;  %v13838_v20 = vcombine.high %v4482_v38, %v4490_v33  ;;  %v13837_v61 = vcombine.low %v4482_v38, %v4490_v33  ;;  %v4530_v38 = vld [vmem:[#allocation8 + $0x1b0] sm:$0xff] }
 0x5bf   :  { %11949 = vmatprep.subr.bf16.mxu1 %v14812_v8  ;;  %v13840_v8 = vcombine.high %v4483_v58, %v4491_v26  ;;  %v4538_v33 = vld [vmem:[#allocation8 + $0x1f0] sm:$0xff] }
 0x5c1   :  { %11738 = vmatpush1.bf16.msra.mxu0 %v14809_v4  ;;  %v4498_v4 = vld [vmem:[#allocation8 + $0xb0] sm:$0xff] }
 0x5c2   :  { %11950 = vmatpush1.bf16.msra.mxu1 %v14811_v34  ;;  %11739 = vmatprep.subr.bf16.mxu0 %v14826_v50  ;;  %v13839_v34 = vcombine.low %v4483_v58, %v4491_v26  ;;  %v13854_v50 = vcombine.high %v4498_v4, %v4506_v17  ;;  %v4531_v58 = vld [vmem:[#allocation8 + $0x1b8] sm:$0xff] }
 0x5c3   :  { %11951 = vmatprep.subr.bf16.mxu1 %v14828_v22  ;;  %v13856_v22 = vcombine.high %v4499_v3, %v4507_v19  ;;  %v4539_v26 = vld [vmem:[#allocation8 + $0x1f8] sm:$0xff] }
 0x5c5   :  { %11740 = vmatpush1.bf16.msra.mxu0 %v14825_v51  ;;  %v13853_v51 = vcombine.low %v4498_v4, %v4506_v17  ;;  %v4546_v4 = vld [vmem:[#allocation8 + $0x230] sm:$0xff] }
 0x5c6   :  { %11952 = vmatpush1.bf16.msra.mxu1 %v14827_v6  ;;  %11741 = vmatprep.subr.bf16.mxu0 %v14842_v0  ;;  %v13855_v6 = vcombine.low %v4499_v3, %v4507_v19  ;;  %v13870_v0 = vcombine.high %v4514_v29, %v4522_v24  ;;  %v4554_v17 = vld [vmem:[#allocation8 + $0x270] sm:$0xff]  ;;  %v4547_v3 = vld [vmem:[#allocation8 + $0x238] sm:$0xff] }
 0x5c7   :  { %11953 = vmatprep.subr.bf16.mxu1 %v14844_v11  ;;  %v13872_v11 = vcombine.high %v4515_v37, %v4523_v5  ;;  %v4555_v19 = vld [vmem:[#allocation8 + $0x278] sm:$0xff] }
 0x5c9   :  { %11742 = vmatpush1.bf16.msra.mxu0 %v14841_v43  ;;  %v13869_v43 = vcombine.low %v4514_v29, %v4522_v24  ;;  %v4562_v29 = vld [vmem:[#allocation8 + $0x2b0] sm:$0xff] }
 0x5ca   :  { %11954 = vmatpush1.bf16.msra.mxu1 %v14843_v32  ;;  %11976 = vmatprep.subr.bf16.mxu0 %v13838_v20  ;;  %v13871_v32 = vcombine.low %v4515_v37, %v4523_v5  ;;  %v13886_v20 = vcombine.high %v4530_v38, %v4538_v33  ;;  %v4570_v24 = vld [vmem:[#allocation8 + $0x2f0] sm:$0xff]  ;;  %v4563_v37 = vld [vmem:[#allocation8 + $0x2b8] sm:$0xff] }
 0x5cb   :  { %12188 = vmatprep.subr.bf16.mxu1 %v13840_v8  ;;  %v13888_v8 = vcombine.high %v4531_v58, %v4539_v26  ;;  %v4571_v5 = vld [vmem:[#allocation8 + $0x2f8] sm:$0xff] }
 0x5cc   :  { %11744 = vmatmul.mubr.bf16.vlgmr.msra.gmra.mrb[32].mxu0 %v16541_v59 }
 0x5cd   :  { %11956 = vmatmul.mubr.bf16.vlgmr.msra.gmra.mrb[32].mxu1 %v16541_v59  ;;  %11753 = vmatprep.mubr.bf16.mxu0 %v16573_v13 }
 0x5ce   :  { %11965 = vmatprep.mubr.bf16.mxu1 %v16573_v13  ;;  %11977 = vmatpush1.bf16.msra.mxu0 %v13837_v61  ;;  %v13885_v61 = vcombine.low %v4530_v38, %v4538_v33  ;;  %v4586_v38 = vld [vmem:[#allocation8 + $0x370] sm:$0xff]  ;;  %v4579_v33 = vld [vmem:[#allocation8 + $0x338] sm:$0xff] }
 0x5cf   :  { %12189 = vmatpush1.bf16.msra.mxu1 %v13839_v34  ;;  %11978 = vmatprep.subr.bf16.mxu0 %v13854_v50  ;;  %v13887_v34 = vcombine.low %v4531_v58, %v4539_v26  ;;  %v13902_v50 = vcombine.high %v4546_v4, %v4554_v17  ;;  %v13917_v58 = vcombine.low %v4562_v29, %v4570_v24 }
 0x5d0   :  { %12190 = vmatprep.subr.bf16.mxu1 %v13856_v22  ;;  %v13904_v22 = vcombine.high %v4547_v3, %v4555_v19  ;;  %v13919_v26 = vcombine.low %v4563_v37, %v4571_v5 }
 0x5d2   :  { %11979 = vmatpush1.bf16.msra.mxu0 %v13853_v51  ;;  %v13901_v51 = vcombine.low %v4546_v4, %v4554_v17  ;;  %v4602_v4 = vld [vmem:[#allocation8 + $0x3f0] sm:$0xff]  ;;  %v4595_v17 = vld [vmem:[#allocation8 + $0x3b8] sm:$0xff] }
 0x5d3   :  { %12191 = vmatpush1.bf16.msra.mxu1 %v13855_v6  ;;  %11980 = vmatprep.subr.bf16.mxu0 %v13870_v0  ;;  %v13903_v6 = vcombine.low %v4547_v3, %v4555_v19  ;;  %v13918_v0 = vcombine.high %v4562_v29, %v4570_v24  ;;  %v4618_v29 = vld [vmem:[#allocation8 + $0x470] sm:$0xff]  ;;  %v4611_v24 = vld [vmem:[#allocation8 + $0x438] sm:$0xff] }
 0x5d4   :  { %11754 = vmatmul.mubr.bf16.gmra.mrb[36].mxu0 %v16565_v45  ;;  %12192 = vmatprep.subr.bf16.mxu1 %v13872_v11  ;;  %v13920_v11 = vcombine.high %v4563_v37, %v4571_v5 }
 0x5d5   :  { %11966 = vmatmul.mubr.bf16.gmra.mrb[36].mxu1 %v16565_v45  ;;  %12008 = vmatprep.mubr.bf16.mxu0 %v16318_v9 }
 0x5d6   :  { %11981 = vmatpush1.bf16.msra.mxu0 %v13869_v43  ;;  %12220 = vmatprep.mubr.bf16.mxu1 %v16318_v9  ;;  %v4578_v9 = vld [vmem:[#allocation8 + $0x330] sm:$0xff]  ;;  %v4587_v43 = vld [vmem:[#allocation8 + $0x378] sm:$0xff] }
 0x5d7   :  { %12193 = vmatpush1.bf16.msra.mxu1 %v13871_v32  ;;  %11982 = vmatprep.subr.bf16.mxu0 %v13886_v20  ;;  %v13934_v32 = vcombine.high %v4578_v9, %v4586_v38  ;;  %v13936_v20 = vcombine.high %v4579_v33, %v4587_v43  ;;  %v13933_v3 = vcombine.low %v4578_v9, %v4586_v38  ;;  %v4634_v9 = vld [vmem:[#allocation8 + $0x4f0] sm:$0xff]  ;;  %v4627_v38 = vld [vmem:[#allocation8 + $0x4b8] sm:$0xff] }
 0x5d8   :  { %12194 = vmatprep.subr.bf16.mxu1 %v13888_v8  ;;  %v4594_v8 = vld [vmem:[#allocation8 + $0x3b0] sm:$0xff]  ;;  %v13935_v19 = vcombine.low %v4579_v33, %v4587_v43 }
 0x5d9   :  { %v13949_v37 = vcombine.low %v4594_v8, %v4602_v4 }
 0x5da   :  { %11983 = vmatpush1.bf16.msra.mxu0 %v13885_v61  ;;  %v4603_v61 = vld [vmem:[#allocation8 + $0x3f8] sm:$0xff] }
 0x5db   :  { %12195 = vmatpush1.bf16.msra.mxu1 %v13887_v34  ;;  %11984 = vmatprep.subr.bf16.mxu0 %v13902_v50  ;;  %v13950_v34 = vcombine.high %v4594_v8, %v4602_v4  ;;  %v13952_v50 = vcombine.high %v4595_v17, %v4603_v61  ;;  %v13951_v5 = vcombine.low %v4595_v17, %v4603_v61  ;;  %v4650_v8 = vld [vmem:[#allocation8 + $0x570] sm:$0xff]  ;;  %v4643_v4 = vld [vmem:[#allocation8 + $0x538] sm:$0xff] }
 0x5dc   :  { %12196 = vmatprep.subr.bf16.mxu1 %v13904_v22  ;;  %v4610_v22 = vld [vmem:[#allocation8 + $0x430] sm:$0xff] }
 0x5dd   :  { %v13965_v33 = vcombine.low %v4610_v22, %v4618_v29 }
 0x5de   :  { %11985 = vmatpush1.bf16.msra.mxu0 %v13901_v51  ;;  %v4619_v51 = vld [vmem:[#allocation8 + $0x478] sm:$0xff] }
 0x5df   :  { %12197 = vmatpush1.bf16.msra.mxu1 %v13903_v6  ;;  %11986 = vmatprep.subr.bf16.mxu0 %v13918_v0  ;;  %v13966_v6 = vcombine.high %v4610_v22, %v4618_v29  ;;  %v13968_v0 = vcombine.high %v4611_v24, %v4619_v51  ;;  %v13967_v43 = vcombine.low %v4611_v24, %v4619_v51  ;;  %v4666_v22 = vld [vmem:[#allocation8 + $0x5f0] sm:$0xff]  ;;  %v4659_v29 = vld [vmem:[#allocation8 + $0x5b8] sm:$0xff] }
 0x5e0   :  { %12198 = vmatprep.subr.bf16.mxu1 %v13920_v11  ;;  %v4626_v11 = vld [vmem:[#allocation8 + $0x4b0] sm:$0xff] }
 0x5e1   :  { %v13981_v17 = vcombine.low %v4626_v11, %v4634_v9 }
 0x5e2   :  { %11987 = vmatpush1.bf16.msra.mxu0 %v13917_v58  ;;  %v4635_v58 = vld [vmem:[#allocation8 + $0x4f8] sm:$0xff] }
 0x5e3   :  { %12199 = vmatpush1.bf16.msra.mxu1 %v13919_v26  ;;  %11988 = vmatprep.subr.bf16.mxu0 %v13934_v32  ;;  %v13982_v26 = vcombine.high %v4626_v11, %v4634_v9  ;;  %v13984_v32 = vcombine.high %v4627_v38, %v4635_v58  ;;  %v13983_v61 = vcombine.low %v4627_v38, %v4635_v58  ;;  %v4682_v11 = vld [vmem:[#allocation8 + $0x670] sm:$0xff]  ;;  %v4675_v9 = vld [vmem:[#allocation8 + $0x638] sm:$0xff] }
 0x5e4   :  { %12200 = vmatprep.subr.bf16.mxu1 %v13936_v20  ;;  %v4642_v20 = vld [vmem:[#allocation8 + $0x530] sm:$0xff] }
 0x5e5   :  { %v13997_v24 = vcombine.low %v4642_v20, %v4650_v8 }
 0x5e6   :  { %11989 = vmatpush1.bf16.msra.mxu0 %v13933_v3  ;;  %v4651_v3 = vld [vmem:[#allocation8 + $0x578] sm:$0xff] }
 0x5e7   :  { %12201 = vmatpush1.bf16.msra.mxu1 %v13935_v19  ;;  %11990 = vmatprep.subr.bf16.mxu0 %v13950_v34  ;;  %v13998_v19 = vcombine.high %v4642_v20, %v4650_v8  ;;  %v14000_v34 = vcombine.high %v4643_v4, %v4651_v3  ;;  %v13999_v51 = vcombine.low %v4643_v4, %v4651_v3  ;;  %v4698_v20 = vld [vmem:[#allocation8 + $0x6f0] sm:$0xff]  ;;  %v4691_v8 = vld [vmem:[#allocation8 + $0x6b8] sm:$0xff] }
 0x5e8   :  { %12202 = vmatprep.subr.bf16.mxu1 %v13952_v50  ;;  %v4658_v50 = vld [vmem:[#allocation8 + $0x5b0] sm:$0xff] }
 0x5e9   :  { %v14013_v38 = vcombine.low %v4658_v50, %v4666_v22 }
 0x5ea   :  { %11991 = vmatpush1.bf16.msra.mxu0 %v13949_v37  ;;  %v4667_v37 = vld [vmem:[#allocation8 + $0x5f8] sm:$0xff] }
 0x5eb   :  { %12203 = vmatpush1.bf16.msra.mxu1 %v13951_v5  ;;  %11992 = vmatprep.subr.bf16.mxu0 %v13966_v6  ;;  %v14014_v5 = vcombine.high %v4658_v50, %v4666_v22  ;;  %v14016_v6 = vcombine.high %v4659_v29, %v4667_v37  ;;  %v14015_v58 = vcombine.low %v4659_v29, %v4667_v37  ;;  %v4714_v50 = vld [vmem:[#allocation8 + $0x770] sm:$0xff]  ;;  %v4707_v22 = vld [vmem:[#allocation8 + $0x738] sm:$0xff] }
 0x5ec   :  { %12204 = vmatprep.subr.bf16.mxu1 %v13968_v0  ;;  %v4674_v0 = vld [vmem:[#allocation8 + $0x630] sm:$0xff] }
 0x5ed   :  { %v14029_v4 = vcombine.low %v4674_v0, %v4682_v11 }
 0x5ee   :  { %11993 = vmatpush1.bf16.msra.mxu0 %v13965_v33  ;;  %v4683_v33 = vld [vmem:[#allocation8 + $0x678] sm:$0xff] }
 0x5ef   :  { %12205 = vmatpush1.bf16.msra.mxu1 %v13967_v43  ;;  %11994 = vmatprep.subr.bf16.mxu0 %v13982_v26  ;;  %v14030_v43 = vcombine.high %v4674_v0, %v4682_v11  ;;  %v14032_v26 = vcombine.high %v4675_v9, %v4683_v33  ;;  %v14031_v3 = vcombine.low %v4675_v9, %v4683_v33  ;;  %v4730_v0 = vld [vmem:[#allocation8 + $0x7f0] sm:$0xff]  ;;  %v4723_v11 = vld [vmem:[#allocation8 + $0x7b8] sm:$0xff] }
 0x5f0   :  { %12206 = vmatprep.subr.bf16.mxu1 %v13984_v32  ;;  %v4690_v32 = vld [vmem:[#allocation8 + $0x6b0] sm:$0xff] }
 0x5f1   :  { %v14045_v29 = vcombine.low %v4690_v32, %v4698_v20 }
 0x5f2   :  { %11995 = vmatpush1.bf16.msra.mxu0 %v13981_v17  ;;  %v4699_v17 = vld [vmem:[#allocation8 + $0x6f8] sm:$0xff] }
 0x5f3   :  { %12207 = vmatpush1.bf16.msra.mxu1 %v13983_v61  ;;  %11996 = vmatprep.subr.bf16.mxu0 %v13998_v19  ;;  %v14046_v61 = vcombine.high %v4690_v32, %v4698_v20  ;;  %v14048_v19 = vcombine.high %v4691_v8, %v4699_v17  ;;  %v14047_v37 = vcombine.low %v4691_v8, %v4699_v17  ;;  %v4746_v32 = vld [vmem:[#allocation8 + $0x870] sm:$0xff]  ;;  %v4739_v20 = vld [vmem:[#allocation8 + $0x838] sm:$0xff] }
 0x5f4   :  { %12208 = vmatprep.subr.bf16.mxu1 %v14000_v34  ;;  %v4706_v34 = vld [vmem:[#allocation8 + $0x730] sm:$0xff] }
 0x5f5   :  { %v14061_v9 = vcombine.low %v4706_v34, %v4714_v50 }
 0x5f6   :  { %11997 = vmatpush1.bf16.msra.mxu0 %v13997_v24  ;;  %v4715_v24 = vld [vmem:[#allocation8 + $0x778] sm:$0xff] }
 0x5f7   :  { %12209 = vmatpush1.bf16.msra.mxu1 %v13999_v51  ;;  %11998 = vmatprep.subr.bf16.mxu0 %v14014_v5  ;;  %v14062_v51 = vcombine.high %v4706_v34, %v4714_v50  ;;  %v14064_v5 = vcombine.high %v4707_v22, %v4715_v24  ;;  %v14063_v33 = vcombine.low %v4707_v22, %v4715_v24  ;;  %v4762_v34 = vld [vmem:[#allocation8 + $0x8f0] sm:$0xff]  ;;  %v4755_v50 = vld [vmem:[#allocation8 + $0x8b8] sm:$0xff] }
 0x5f8   :  { %12210 = vmatprep.subr.bf16.mxu1 %v14016_v6  ;;  %v4722_v6 = vld [vmem:[#allocation8 + $0x7b0] sm:$0xff]  ;;  %v4763_v22 = vld [vmem:[#allocation8 + $0x8f8] sm:$0xff] }
 0x5f9   :  { %v14077_v8 = vcombine.low %v4722_v6, %v4730_v0 }
 0x5fa   :  { %11999 = vmatpush1.bf16.msra.mxu0 %v14013_v38  ;;  %v4731_v38 = vld [vmem:[#allocation8 + $0x7f8] sm:$0xff] }
 0x5fb   :  { %12211 = vmatpush1.bf16.msra.mxu1 %v14015_v58  ;;  %12000 = vmatprep.subr.bf16.mxu0 %v14030_v43  ;;  %v14078_v58 = vcombine.high %v4722_v6, %v4730_v0  ;;  %v14080_v43 = vcombine.high %v4723_v11, %v4731_v38  ;;  %v14079_v17 = vcombine.low %v4723_v11, %v4731_v38  ;;  %v4778_v6 = vld [vmem:[#allocation8 + $0x970] sm:$0xff]  ;;  %v4771_v0 = vld [vmem:[#allocation8 + $0x938] sm:$0xff] }
 0x5fc   :  { %12212 = vmatprep.subr.bf16.mxu1 %v14032_v26  ;;  %v4738_v26 = vld [vmem:[#allocation8 + $0x830] sm:$0xff]  ;;  %v4779_v11 = vld [vmem:[#allocation8 + $0x978] sm:$0xff] }
 0x5fd   :  { %v14093_v24 = vcombine.low %v4738_v26, %v4746_v32 }
 0x5fe   :  { %12001 = vmatpush1.bf16.msra.mxu0 %v14029_v4  ;;  %v4747_v4 = vld [vmem:[#allocation8 + $0x878] sm:$0xff] }
 0x5ff   :  { %12213 = vmatpush1.bf16.msra.mxu1 %v14031_v3  ;;  %12002 = vmatprep.subr.bf16.mxu0 %v14046_v61  ;;  %v14094_v3 = vcombine.high %v4738_v26, %v4746_v32  ;;  %v14096_v61 = vcombine.high %v4739_v20, %v4747_v4  ;;  %v4794_v26 = vld [vmem:[#allocation8 + $0x9f0] sm:$0xff]  ;;  %v4787_v32 = vld [vmem:[#allocation8 + $0x9b8] sm:$0xff] }
 0x600   :  { %12214 = vmatprep.subr.bf16.mxu1 %v14048_v19  ;;  %v4754_v19 = vld [vmem:[#allocation8 + $0x8b0] sm:$0xff] }
 0x601   :  { %v14109_v38 = vcombine.low %v4754_v19, %v4762_v34 }
 0x602   :  { %12003 = vmatpush1.bf16.msra.mxu0 %v14045_v29  ;;  %v14095_v29 = vcombine.low %v4739_v20, %v4747_v4  ;;  %v4795_v20 = vld [vmem:[#allocation8 + $0x9f8] sm:$0xff]  ;;  %v14127_v4 = vcombine.low %v4771_v0, %v4779_v11 }
 0x603   :  { %12215 = vmatpush1.bf16.msra.mxu1 %v14047_v37  ;;  %12004 = vmatprep.subr.bf16.mxu0 %v14062_v51  ;;  %v14110_v37 = vcombine.high %v4754_v19, %v4762_v34  ;;  %v14112_v51 = vcombine.high %v4755_v50, %v4763_v22  ;;  %v4811_v19 = vld [vmem:[#allocation8 + $0xa78] sm:$0xff] }
 0x604   :  { %12216 = vmatprep.subr.bf16.mxu1 %v14064_v5  ;;  %v4770_v5 = vld [vmem:[#allocation8 + $0x930] sm:$0xff] }
 0x606   :  { %12005 = vmatpush1.bf16.msra.mxu0 %v14061_v9  ;;  %v14111_v9 = vcombine.low %v4755_v50, %v4763_v22  ;;  %v14143_v50 = vcombine.low %v4787_v32, %v4795_v20 }
 0x607   :  { %12217 = vmatpush1.bf16.msra.mxu1 %v14063_v33  ;;  %12006 = vmatprep.subr.bf16.mxu0 %v14078_v58  ;;  %v14126_v33 = vcombine.high %v4770_v5, %v4778_v6  ;;  %v14128_v58 = vcombine.high %v4771_v0, %v4779_v11 }
 0x608   :  { %12218 = vmatprep.subr.bf16.mxu1 %v14080_v43  ;;  %v4786_v43 = vld [vmem:[#allocation8 + $0x9b0] sm:$0xff] }
 0x609   :  { %v14141_v34 = vcombine.low %v4786_v43, %v4794_v26 }
 0x60a   :  { %12007 = vmatpush1.bf16.msra.mxu0 %v14077_v8  ;;  %v14142_v8 = vcombine.high %v4786_v43, %v4794_v26 }
 0x60b   :  { %12219 = vmatpush1.bf16.msra.mxu1 %v14079_v17  ;;  %12029 = vmatprep.subr.bf16.mxu0 %v14094_v3  ;;  %v4802_v17 = vld [vmem:[#allocation8 + $0xa30] sm:$0xff] }
 0x60c   :  { %12241 = vmatprep.subr.bf16.mxu1 %v14096_v61  ;;  %v4810_v3 = vld [vmem:[#allocation8 + $0xa70] sm:$0xff]  ;;  %v4803_v61 = vld [vmem:[#allocation8 + $0xa38] sm:$0xff] }
 0x60d   :  { %12009 = vmatmul.mubr.bf16.vlgmr.msra.gmra.mrb[40].mxu0 %v16301_v21  ;;  %v14158_v22 = vcombine.high %v4802_v17, %v4810_v3 }
 0x60e   :  { %12221 = vmatmul.mubr.bf16.vlgmr.msra.gmra.mrb[40].mxu1 %v16301_v21  ;;  %12018 = vmatprep.mubr.bf16.mxu0 %v16362_v42  ;;  %v14125_v21 = vcombine.low %v4770_v5, %v4778_v6  ;;  %v4827_v5 = vld [vmem:[#allocation8 + $0xaf8] sm:$0xff]  ;;  %v14159_v6 = vcombine.low %v4803_v61, %v4811_v19 }
 0x60f   :  { %12030 = vmatpush1.bf16.msra.mxu0 %v14093_v24  ;;  %12230 = vmatprep.mubr.bf16.mxu1 %v16362_v42  ;;  %v14144_v42 = vcombine.high %v4787_v32, %v4795_v20  ;;  %v14160_v24 = vcombine.high %v4803_v61, %v4811_v19  ;;  %v4850_v20 = vld [vmem:[#allocation8 + $0xbb0] sm:$0xff] }
 0x610   :  { %12242 = vmatpush1.bf16.msra.mxu1 %v14095_v29  ;;  %12031 = vmatprep.subr.bf16.mxu0 %v14110_v37  ;;  %v4818_v29 = vld [vmem:[#allocation8 + $0xab0] sm:$0xff] }
 0x611   :  { %12243 = vmatprep.subr.bf16.mxu1 %v14112_v51  ;;  %v4826_v37 = vld [vmem:[#allocation8 + $0xaf0] sm:$0xff]  ;;  %v4819_v51 = vld [vmem:[#allocation8 + $0xab8] sm:$0xff] }
 0x612   :  { %v14174_v0 = vcombine.high %v4818_v29, %v4826_v37  ;;  %v14176_v11 = vcombine.high %v4819_v51, %v4827_v5  ;;  %v14175_v43 = vcombine.low %v4819_v51, %v4827_v5  ;;  %v4866_v19 = vld [vmem:[#allocation8 + $0xc30] sm:$0xff] }
 0x613   :  { %12032 = vmatpush1.bf16.msra.mxu0 %v14109_v38  ;;  %v4842_v38 = vld [vmem:[#allocation8 + $0xb70] sm:$0xff] }
 0x614   :  { %12244 = vmatpush1.bf16.msra.mxu1 %v14111_v9  ;;  %12033 = vmatprep.subr.bf16.mxu0 %v14126_v33  ;;  %v4835_v9 = vld [vmem:[#allocation8 + $0xb38] sm:$0xff]  ;;  %v4882_v5 = vld [vmem:[#allocation8 + $0xcb0] sm:$0xff] }
 0x615   :  { %12019 = vmatmul.mubr.bf16.gmra.mrb[44].mxu0 %v16347_v55  ;;  %12245 = vmatprep.subr.bf16.mxu1 %v14128_v58  ;;  %v4843_v33 = vld [vmem:[#allocation8 + $0xb78] sm:$0xff]  ;;  %v14173_v58 = vcombine.low %v4818_v29, %v4826_v37 }
 0x616   :  { %12231 = vmatmul.mubr.bf16.gmra.mrb[44].mxu1 %v16347_v55  ;;  %12061 = vmatprep.mubr.bf16.mxu0 %v16324_v10  ;;  %v14157_v55 = vcombine.low %v4802_v17, %v4810_v3  ;;  %v14192_v32 = vcombine.high %v4835_v9, %v4843_v33  ;;  %v14191_v17 = vcombine.low %v4835_v9, %v4843_v33  ;;  %v4898_v33 = vld [vmem:[#allocation8 + $0xd30] sm:$0xff] }
 0x617   :  { %12034 = vmatpush1.bf16.msra.mxu0 %v14125_v21  ;;  %12273 = vmatprep.mubr.bf16.mxu1 %v16324_v10  ;;  %v4834_v10 = vld [vmem:[#allocation8 + $0xb30] sm:$0xff] }
 0x618   :  { %12246 = vmatpush1.bf16.msra.mxu1 %v14127_v4  ;;  %12035 = vmatprep.subr.bf16.mxu0 %v14142_v8  ;;  %v14190_v26 = vcombine.high %v4834_v10, %v4842_v38  ;;  %v4858_v21 = vld [vmem:[#allocation8 + $0xbf0] sm:$0xff]  ;;  %v4851_v4 = vld [vmem:[#allocation8 + $0xbb8] sm:$0xff] }
 0x619   :  { %12247 = vmatprep.subr.bf16.mxu1 %v14144_v42  ;;  %v4859_v8 = vld [vmem:[#allocation8 + $0xbf8] sm:$0xff]  ;;  %v14189_v42 = vcombine.low %v4834_v10, %v4842_v38  ;;  %v14206_v3 = vcombine.high %v4850_v20, %v4858_v21 }
 0x61a   :  { %v14208_v61 = vcombine.high %v4851_v4, %v4859_v8  ;;  %v14207_v29 = vcombine.low %v4851_v4, %v4859_v8  ;;  %v4914_v8 = vld [vmem:[#allocation8 + $0xdb0] sm:$0xff] }
 0x61b   :  { %12036 = vmatpush1.bf16.msra.mxu0 %v14141_v34  ;;  %v4874_v34 = vld [vmem:[#allocation8 + $0xc70] sm:$0xff] }
 0x61c   :  { %12248 = vmatpush1.bf16.msra.mxu1 %v14143_v50  ;;  %12037 = vmatprep.subr.bf16.mxu0 %v14158_v22  ;;  %v4867_v50 = vld [vmem:[#allocation8 + $0xc38] sm:$0xff]  ;;  %v14222_v37 = vcombine.high %v4866_v19, %v4874_v34 }
 0x61d   :  { %12249 = vmatprep.subr.bf16.mxu1 %v14160_v24  ;;  %v4875_v22 = vld [vmem:[#allocation8 + $0xc78] sm:$0xff]  ;;  %v14205_v24 = vcombine.low %v4850_v20, %v4858_v21 }
 0x61e   :  { %v14224_v51 = vcombine.high %v4867_v50, %v4875_v22  ;;  %v14223_v10 = vcombine.low %v4867_v50, %v4875_v22  ;;  %v4930_v22 = vld [vmem:[#allocation8 + $0xe30] sm:$0xff] }
 0x61f   :  { %12038 = vmatpush1.bf16.msra.mxu0 %v14157_v55  ;;  %v4890_v55 = vld [vmem:[#allocation8 + $0xcf0] sm:$0xff] }
 0x620   :  { %12250 = vmatpush1.bf16.msra.mxu1 %v14159_v6  ;;  %12039 = vmatprep.subr.bf16.mxu0 %v14174_v0  ;;  %v4883_v6 = vld [vmem:[#allocation8 + $0xcb8] sm:$0xff]  ;;  %v14238_v38 = vcombine.high %v4882_v5, %v4890_v55 }
 0x621   :  { %12251 = vmatprep.subr.bf16.mxu1 %v14176_v11  ;;  %v4891_v0 = vld [vmem:[#allocation8 + $0xcf8] sm:$0xff]  ;;  %v14221_v11 = vcombine.low %v4866_v19, %v4874_v34 }
 0x622   :  { %v14240_v9 = vcombine.high %v4883_v6, %v4891_v0  ;;  %v14239_v20 = vcombine.low %v4883_v6, %v4891_v0  ;;  %v4946_v0 = vld [vmem:[#allocation8 + $0xeb0] sm:$0xff] }
 0x623   :  { %12040 = vmatpush1.bf16.msra.mxu0 %v14173_v58  ;;  %v4906_v58 = vld [vmem:[#allocation8 + $0xd70] sm:$0xff] }
 0x624   :  { %12252 = vmatpush1.bf16.msra.mxu1 %v14175_v43  ;;  %12041 = vmatprep.subr.bf16.mxu0 %v14190_v26  ;;  %v4899_v43 = vld [vmem:[#allocation8 + $0xd38] sm:$0xff]  ;;  %v14254_v21 = vcombine.high %v4898_v33, %v4906_v58 }
 0x625   :  { %12253 = vmatprep.subr.bf16.mxu1 %v14192_v32  ;;  %v4907_v26 = vld [vmem:[#allocation8 + $0xd78] sm:$0xff]  ;;  %v14237_v32 = vcombine.low %v4882_v5, %v4890_v55 }
 0x626   :  { %v14256_v4 = vcombine.high %v4899_v43, %v4907_v26  ;;  %v14255_v19 = vcombine.low %v4899_v43, %v4907_v26  ;;  %v4962_v26 = vld [vmem:[#allocation8 + $0xf30] sm:$0xff] }
 0x627   :  { %12042 = vmatpush1.bf16.msra.mxu0 %v14189_v42  ;;  %v4922_v42 = vld [vmem:[#allocation8 + $0xdf0] sm:$0xff] }
 0x628   :  { %12254 = vmatpush1.bf16.msra.mxu1 %v14191_v17  ;;  %12043 = vmatprep.subr.bf16.mxu0 %v14206_v3  ;;  %v4915_v17 = vld [vmem:[#allocation8 + $0xdb8] sm:$0xff]  ;;  %v14270_v34 = vcombine.high %v4914_v8, %v4922_v42 }
 0x629   :  { %12255 = vmatprep.subr.bf16.mxu1 %v14208_v61  ;;  %v4923_v3 = vld [vmem:[#allocation8 + $0xdf8] sm:$0xff]  ;;  %v14253_v61 = vcombine.low %v4898_v33, %v4906_v58 }
 0x62a   :  { %v14272_v50 = vcombine.high %v4915_v17, %v4923_v3  ;;  %v14271_v5 = vcombine.low %v4915_v17, %v4923_v3  ;;  %v4978_v3 = vld [vmem:[#allocation8 + $0xfb0] sm:$0xff] }
 0x62b   :  { %12044 = vmatpush1.bf16.msra.mxu0 %v14205_v24  ;;  %v4938_v24 = vld [vmem:[#allocation8 + $0xe70] sm:$0xff] }
 0x62c   :  { %12256 = vmatpush1.bf16.msra.mxu1 %v14207_v29  ;;  %12045 = vmatprep.subr.bf16.mxu0 %v14222_v37  ;;  %v4931_v29 = vld [vmem:[#allocation8 + $0xe38] sm:$0xff]  ;;  %v14286_v55 = vcombine.high %v4930_v22, %v4938_v24 }
 0x62d   :  { %12257 = vmatprep.subr.bf16.mxu1 %v14224_v51  ;;  %v4939_v37 = vld [vmem:[#allocation8 + $0xe78] sm:$0xff]  ;;  %v14269_v51 = vcombine.low %v4914_v8, %v4922_v42 }
 0x62e   :  { %v14288_v6 = vcombine.high %v4931_v29, %v4939_v37  ;;  %v14287_v33 = vcombine.low %v4931_v29, %v4939_v37  ;;  %v4994_v37 = vld [vmem:[#allocation8 + $0x1030] sm:$0xff] }
 0x62f   :  { %12046 = vmatpush1.bf16.msra.mxu0 %v14221_v11  ;;  %v4954_v11 = vld [vmem:[#allocation8 + $0xef0] sm:$0xff] }
 0x630   :  { %12258 = vmatpush1.bf16.msra.mxu1 %v14223_v10  ;;  %12047 = vmatprep.subr.bf16.mxu0 %v14238_v38  ;;  %v4947_v10 = vld [vmem:[#allocation8 + $0xeb8] sm:$0xff]  ;;  %v14302_v58 = vcombine.high %v4946_v0, %v4954_v11 }
 0x631   :  { %12259 = vmatprep.subr.bf16.mxu1 %v14240_v9  ;;  %v4955_v38 = vld [vmem:[#allocation8 + $0xef8] sm:$0xff]  ;;  %v14285_v9 = vcombine.low %v4930_v22, %v4938_v24 }
 0x632   :  { %v14304_v43 = vcombine.high %v4947_v10, %v4955_v38  ;;  %v14303_v8 = vcombine.low %v4947_v10, %v4955_v38  ;;  %v5010_v38 = vld [vmem:[#allocation8 + $0x10b0] sm:$0xff] }
 0x633   :  { %12048 = vmatpush1.bf16.msra.mxu0 %v14237_v32  ;;  %v4970_v32 = vld [vmem:[#allocation8 + $0xf70] sm:$0xff] }
 0x634   :  { %12260 = vmatpush1.bf16.msra.mxu1 %v14239_v20  ;;  %12049 = vmatprep.subr.bf16.mxu0 %v14254_v21  ;;  %v4963_v20 = vld [vmem:[#allocation8 + $0xf38] sm:$0xff]  ;;  %v14318_v42 = vcombine.high %v4962_v26, %v4970_v32 }
 0x635   :  { %12261 = vmatprep.subr.bf16.mxu1 %v14256_v4  ;;  %v4971_v21 = vld [vmem:[#allocation8 + $0xf78] sm:$0xff]  ;;  %v14301_v4 = vcombine.low %v4946_v0, %v4954_v11 }
 0x636   :  { %v14320_v17 = vcombine.high %v4963_v20, %v4971_v21  ;;  %v14319_v22 = vcombine.low %v4963_v20, %v4971_v21  ;;  %v5026_v21 = vld [vmem:[#allocation8 + $0x1130] sm:$0xff] }
 0x637   :  { %12050 = vmatpush1.bf16.msra.mxu0 %v14253_v61  ;;  %v4986_v61 = vld [vmem:[#allocation8 + $0xff0] sm:$0xff] }
 0x638   :  { %12262 = vmatpush1.bf16.msra.mxu1 %v14255_v19  ;;  %12051 = vmatprep.subr.bf16.mxu0 %v14270_v34  ;;  %v4979_v19 = vld [vmem:[#allocation8 + $0xfb8] sm:$0xff]  ;;  %v14334_v24 = vcombine.high %v4978_v3, %v4986_v61 }
 0x639   :  { %12263 = vmatprep.subr.bf16.mxu1 %v14272_v50  ;;  %v4987_v34 = vld [vmem:[#allocation8 + $0xff8] sm:$0xff]  ;;  %v14317_v50 = vcombine.low %v4962_v26, %v4970_v32 }
 0x63a   :  { %v14336_v29 = vcombine.high %v4979_v19, %v4987_v34  ;;  %v14335_v0 = vcombine.low %v4979_v19, %v4987_v34  ;;  %v5042_v34 = vld [vmem:[#allocation8 + $0x11b0] sm:$0xff] }
 0x63b   :  { %12052 = vmatpush1.bf16.msra.mxu0 %v14269_v51  ;;  %v5002_v51 = vld [vmem:[#allocation8 + $0x1070] sm:$0xff] }
 0x63c   :  { %12264 = vmatpush1.bf16.msra.mxu1 %v14271_v5  ;;  %12053 = vmatprep.subr.bf16.mxu0 %v14286_v55  ;;  %v4995_v5 = vld [vmem:[#allocation8 + $0x1038] sm:$0xff]  ;;  %v14350_v11 = vcombine.high %v4994_v37, %v5002_v51 }
 0x63d   :  { %12265 = vmatprep.subr.bf16.mxu1 %v14288_v6  ;;  %v5003_v55 = vld [vmem:[#allocation8 + $0x1078] sm:$0xff]  ;;  %v14333_v6 = vcombine.low %v4978_v3, %v4986_v61 }
 0x63e   :  { %v14352_v10 = vcombine.high %v4995_v5, %v5003_v55  ;;  %v14351_v26 = vcombine.low %v4995_v5, %v5003_v55  ;;  %v5066_v5 = vld [vmem:[#allocation8 + $0x1270] sm:$0xff]  ;;  %v5059_v55 = vld [vmem:[#allocation8 + $0x1238] sm:$0xff] }
 0x63f   :  { %12054 = vmatpush1.bf16.msra.mxu0 %v14285_v9  ;;  %v5018_v9 = vld [vmem:[#allocation8 + $0x10f0] sm:$0xff] }
 0x640   :  { %12266 = vmatpush1.bf16.msra.mxu1 %v14287_v33  ;;  %12055 = vmatprep.subr.bf16.mxu0 %v14302_v58  ;;  %v5011_v33 = vld [vmem:[#allocation8 + $0x10b8] sm:$0xff]  ;;  %v14366_v32 = vcombine.high %v5010_v38, %v5018_v9 }
 0x641   :  { %12267 = vmatprep.subr.bf16.mxu1 %v14304_v43  ;;  %v5019_v58 = vld [vmem:[#allocation8 + $0x10f8] sm:$0xff]  ;;  %v14349_v43 = vcombine.low %v4994_v37, %v5002_v51  ;;  %v5058_v51 = vld [vmem:[#allocation8 + $0x1230] sm:$0xff] }
 0x642   :  { %v14368_v20 = vcombine.high %v5011_v33, %v5019_v58  ;;  %v14367_v3 = vcombine.low %v5011_v33, %v5019_v58  ;;  %v5082_v33 = vld [vmem:[#allocation8 + $0x12f0] sm:$0xff]  ;;  %v5075_v58 = vld [vmem:[#allocation8 + $0x12b8] sm:$0xff] }
 0x643   :  { %12056 = vmatpush1.bf16.msra.mxu0 %v14301_v4  ;;  %v5034_v4 = vld [vmem:[#allocation8 + $0x1170] sm:$0xff] }
 0x644   :  { %12268 = vmatpush1.bf16.msra.mxu1 %v14303_v8  ;;  %12057 = vmatprep.subr.bf16.mxu0 %v14318_v42  ;;  %v5027_v8 = vld [vmem:[#allocation8 + $0x1138] sm:$0xff]  ;;  %v14382_v61 = vcombine.high %v5026_v21, %v5034_v4 }
 0x645   :  { %12269 = vmatprep.subr.bf16.mxu1 %v14320_v17  ;;  %v5035_v42 = vld [vmem:[#allocation8 + $0x1178] sm:$0xff]  ;;  %v14365_v17 = vcombine.low %v5010_v38, %v5018_v9  ;;  %v5074_v9 = vld [vmem:[#allocation8 + $0x12b0] sm:$0xff] }
 0x646   :  { %v14384_v19 = vcombine.high %v5027_v8, %v5035_v42 }
 0x647   :  { %12058 = vmatpush1.bf16.msra.mxu0 %v14317_v50  ;;  %v5050_v50 = vld [vmem:[#allocation8 + $0x11f0] sm:$0xff] }
 0x648   :  { %12270 = vmatpush1.bf16.msra.mxu1 %v14319_v22  ;;  %12059 = vmatprep.subr.bf16.mxu0 %v14334_v24  ;;  %v5043_v22 = vld [vmem:[#allocation8 + $0x11b8] sm:$0xff]  ;;  %v14398_v37 = vcombine.high %v5042_v34, %v5050_v50 }
 0x649   :  { %12271 = vmatprep.subr.bf16.mxu1 %v14336_v29  ;;  %v5051_v24 = vld [vmem:[#allocation8 + $0x11f8] sm:$0xff]  ;;  %v14383_v29 = vcombine.low %v5027_v8, %v5035_v42  ;;  %v14429_v42 = vcombine.low %v5074_v9, %v5082_v33 }
 0x64a   :  { %v5099_v8 = vld [vmem:[#allocation8 + $0x1378] sm:$0xff] }
 0x64b   :  { %12060 = vmatpush1.bf16.msra.mxu0 %v14333_v6  ;;  %v5067_v6 = vld [vmem:[#allocation8 + $0x1278] sm:$0xff] }
 0x64c   :  { %12272 = vmatpush1.bf16.msra.mxu1 %v14335_v0  ;;  %12082 = vmatprep.subr.bf16.mxu0 %v14350_v11  ;;  %v14397_v0 = vcombine.low %v5042_v34, %v5050_v50  ;;  %v14399_v11 = vcombine.low %v5043_v22, %v5051_v24  ;;  %v14416_v38 = vcombine.high %v5059_v55, %v5067_v6  ;;  %v5114_v34 = vld [vmem:[#allocation8 + $0x13f0] sm:$0xff]  ;;  %v5107_v50 = vld [vmem:[#allocation8 + $0x13b8] sm:$0xff] }
 0x64d   :  { %12294 = vmatprep.subr.bf16.mxu1 %v14352_v10  ;;  %v14414_v10 = vcombine.high %v5058_v51, %v5066_v5 }
 0x64e   :  { %12062 = vmatmul.mubr.bf16.vlgmr.msra.gmra.mrb[40].mxu0 %v16309_v44 }
 0x64f   :  { %12274 = vmatmul.mubr.bf16.vlgmr.msra.gmra.mrb[40].mxu1 %v16309_v44  ;;  %12071 = vmatprep.mubr.bf16.mxu0 %v16365_v57  ;;  %v14381_v44 = vcombine.low %v5026_v21, %v5034_v4  ;;  %v5098_v21 = vld [vmem:[#allocation8 + $0x1370] sm:$0xff]  ;;  %v5091_v4 = vld [vmem:[#allocation8 + $0x1338] sm:$0xff] }
 0x650   :  { %12083 = vmatpush1.bf16.msra.mxu0 %v14349_v43  ;;  %12283 = vmatprep.mubr.bf16.mxu1 %v16365_v57  ;;  %v14400_v57 = vcombine.high %v5043_v22, %v5051_v24  ;;  %v5083_v43 = vld [vmem:[#allocation8 + $0x12f8] sm:$0xff] }
 0x651   :  { %12295 = vmatpush1.bf16.msra.mxu1 %v14351_v26  ;;  %12084 = vmatprep.subr.bf16.mxu0 %v14366_v32  ;;  %v14415_v26 = vcombine.low %v5059_v55, %v5067_v6  ;;  %v14430_v32 = vcombine.high %v5074_v9, %v5082_v33  ;;  %v5115_v22 = vld [vmem:[#allocation8 + $0x13f8] sm:$0xff]  ;;  %v5146_v9 = vld [vmem:[#allocation8 + $0x14f0] sm:$0xff] }
 0x652   :  { %12296 = vmatprep.subr.bf16.mxu1 %v14368_v20  ;;  %v14432_v20 = vcombine.high %v5075_v58, %v5083_v43  ;;  %v5131_v55 = vld [vmem:[#allocation8 + $0x1478] sm:$0xff] }
 0x653   :  { %v5139_v33 = vld [vmem:[#allocation8 + $0x14b8] sm:$0xff] }
 0x654   :  { %12085 = vmatpush1.bf16.msra.mxu0 %v14365_v17  ;;  %v14431_v17 = vcombine.low %v5075_v58, %v5083_v43  ;;  %v5147_v58 = vld [vmem:[#allocation8 + $0x14f8] sm:$0xff] }
 0x655   :  { %12297 = vmatpush1.bf16.msra.mxu1 %v14367_v3  ;;  %12086 = vmatprep.subr.bf16.mxu0 %v14382_v61  ;;  %v14448_v61 = vcombine.high %v5091_v4, %v5099_v8 }
 0x656   :  { %12072 = vmatmul.mubr.bf16.gmra.mrb[44].mxu0 %v16353_v54  ;;  %12298 = vmatprep.subr.bf16.mxu1 %v14384_v19  ;;  %v5106_v19 = vld [vmem:[#allocation8 + $0x13b0] sm:$0xff] }
 0x657   :  { %12284 = vmatmul.mubr.bf16.gmra.mrb[44].mxu1 %v16353_v54  ;;  %12114 = vmatprep.mubr.bf16.mxu0 %v16546_v62  ;;  %v14413_v54 = vcombine.low %v5058_v51, %v5066_v5  ;;  %v5130_v51 = vld [vmem:[#allocation8 + $0x1470] sm:$0xff]  ;;  %v5123_v5 = vld [vmem:[#allocation8 + $0x1438] sm:$0xff]  ;;  %v14461_v6 = vcombine.low %v5106_v19, %v5114_v34 }
 0x658   :  { %12087 = vmatpush1.bf16.msra.mxu0 %v14381_v44  ;;  %12326 = vmatprep.mubr.bf16.mxu1 %v16546_v62  ;;  %v5090_v62 = vld [vmem:[#allocation8 + $0x1330] sm:$0xff]  ;;  %v14447_v44 = vcombine.low %v5091_v4, %v5099_v8  ;;  %v5163_v4 = vld [vmem:[#allocation8 + $0x1578] sm:$0xff] }
 0x659   :  { %12299 = vmatpush1.bf16.msra.mxu1 %v14383_v29  ;;  %12088 = vmatprep.subr.bf16.mxu0 %v14398_v37  ;;  %v14446_v3 = vcombine.high %v5090_v62, %v5098_v21  ;;  %v14445_v24 = vcombine.low %v5090_v62, %v5098_v21  ;;  %v14462_v29 = vcombine.high %v5106_v19, %v5114_v34  ;;  %v5162_v62 = vld [vmem:[#allocation8 + $0x1570] sm:$0xff]  ;;  %v5155_v21 = vld [vmem:[#allocation8 + $0x1538] sm:$0xff] }
 0x65a   :  { %12300 = vmatprep.subr.bf16.mxu1 %v14400_v57  ;;  %v14464_v37 = vcombine.high %v5107_v50, %v5115_v22  ;;  %v5122_v57 = vld [vmem:[#allocation8 + $0x1430] sm:$0xff]  ;;  %v5171_v34 = vld [vmem:[#allocation8 + $0x15b8] sm:$0xff] }
 0x65b   :  { %v14477_v43 = vcombine.low %v5122_v57, %v5130_v51  ;;  %v5178_v19 = vld [vmem:[#allocation8 + $0x15f0] sm:$0xff] }
 0x65c   :  { %12089 = vmatpush1.bf16.msra.mxu0 %v14397_v0  ;;  %v14463_v0 = vcombine.low %v5107_v50, %v5115_v22  ;;  %v5179_v50 = vld [vmem:[#allocation8 + $0x15f8] sm:$0xff] }
 0x65d   :  { %12301 = vmatpush1.bf16.msra.mxu1 %v14399_v11  ;;  %12090 = vmatprep.subr.bf16.mxu0 %v14414_v10  ;;  %v14478_v11 = vcombine.high %v5122_v57, %v5130_v51  ;;  %v14480_v10 = vcombine.high %v5123_v5, %v5131_v55  ;;  %v5194_v57 = vld [vmem:[#allocation8 + $0x1670] sm:$0xff]  ;;  %v5187_v51 = vld [vmem:[#allocation8 + $0x1638] sm:$0xff] }
 0x65e   :  { %12302 = vmatprep.subr.bf16.mxu1 %v14416_v38  ;;  %v5138_v38 = vld [vmem:[#allocation8 + $0x14b0] sm:$0xff] }
 0x65f   :  { %v14493_v8 = vcombine.low %v5138_v38, %v5146_v9 }
 0x660   :  { %12091 = vmatpush1.bf16.msra.mxu0 %v14413_v54  ;;  %v14479_v54 = vcombine.low %v5123_v5, %v5131_v55  ;;  %v5195_v5 = vld [vmem:[#allocation8 + $0x1678] sm:$0xff] }
 0x661   :  { %12303 = vmatpush1.bf16.msra.mxu1 %v14415_v26  ;;  %12092 = vmatprep.subr.bf16.mxu0 %v14430_v32  ;;  %v14494_v26 = vcombine.high %v5138_v38, %v5146_v9  ;;  %v14496_v32 = vcombine.high %v5139_v33, %v5147_v58  ;;  %v5210_v38 = vld [vmem:[#allocation8 + $0x16f0] sm:$0xff]  ;;  %v5203_v9 = vld [vmem:[#allocation8 + $0x16b8] sm:$0xff] }
 0x662   :  { %12304 = vmatprep.subr.bf16.mxu1 %v14432_v20  ;;  %v5154_v20 = vld [vmem:[#allocation8 + $0x1530] sm:$0xff] }
 0x663   :  { %v14509_v22 = vcombine.low %v5154_v20, %v5162_v62 }
 0x664   :  { %12093 = vmatpush1.bf16.msra.mxu0 %v14429_v42  ;;  %v14495_v42 = vcombine.low %v5139_v33, %v5147_v58  ;;  %v5211_v33 = vld [vmem:[#allocation8 + $0x16f8] sm:$0xff] }
 0x665   :  { %12305 = vmatpush1.bf16.msra.mxu1 %v14431_v17  ;;  %12094 = vmatprep.subr.bf16.mxu0 %v14446_v3  ;;  %v14510_v17 = vcombine.high %v5154_v20, %v5162_v62  ;;  %v14512_v3 = vcombine.high %v5155_v21, %v5163_v4  ;;  %v5226_v20 = vld [vmem:[#allocation8 + $0x1770] sm:$0xff]  ;;  %v5219_v62 = vld [vmem:[#allocation8 + $0x1738] sm:$0xff] }
 0x666   :  { %12306 = vmatprep.subr.bf16.mxu1 %v14448_v61  ;;  %v5170_v61 = vld [vmem:[#allocation8 + $0x15b0] sm:$0xff] }
 0x667   :  { %v14525_v55 = vcombine.low %v5170_v61, %v5178_v19 }
 0x668   :  { %12095 = vmatpush1.bf16.msra.mxu0 %v14445_v24  ;;  %v14511_v24 = vcombine.low %v5155_v21, %v5163_v4  ;;  %v5227_v21 = vld [vmem:[#allocation8 + $0x1778] sm:$0xff] }
 0x669   :  { %12307 = vmatpush1.bf16.msra.mxu1 %v14447_v44  ;;  %12096 = vmatprep.subr.bf16.mxu0 %v14462_v29  ;;  %v14526_v44 = vcombine.high %v5170_v61, %v5178_v19  ;;  %v14528_v29 = vcombine.high %v5171_v34, %v5179_v50  ;;  %v5242_v61 = vld [vmem:[#allocation8 + $0x17f0] sm:$0xff]  ;;  %v5235_v19 = vld [vmem:[#allocation8 + $0x17b8] sm:$0xff] }
 0x66a   :  { %12308 = vmatprep.subr.bf16.mxu1 %v14464_v37  ;;  %v5186_v37 = vld [vmem:[#allocation8 + $0x1630] sm:$0xff] }
 0x66b   :  { %v14541_v58 = vcombine.low %v5186_v37, %v5194_v57 }
 0x66c   :  { %12097 = vmatpush1.bf16.msra.mxu0 %v14461_v6  ;;  %v14527_v6 = vcombine.low %v5171_v34, %v5179_v50  ;;  %v5243_v34 = vld [vmem:[#allocation8 + $0x17f8] sm:$0xff] }
 0x66d   :  { %12309 = vmatpush1.bf16.msra.mxu1 %v14463_v0  ;;  %12098 = vmatprep.subr.bf16.mxu0 %v14478_v11  ;;  %v14542_v0 = vcombine.high %v5186_v37, %v5194_v57  ;;  %v14544_v11 = vcombine.high %v5187_v51, %v5195_v5  ;;  %v5258_v37 = vld [vmem:[#allocation8 + $0x1870] sm:$0xff]  ;;  %v5251_v57 = vld [vmem:[#allocation8 + $0x1838] sm:$0xff] }
 0x66e   :  { %12310 = vmatprep.subr.bf16.mxu1 %v14480_v10  ;;  %v5202_v10 = vld [vmem:[#allocation8 + $0x16b0] sm:$0xff] }
 0x66f   :  { %v14557_v4 = vcombine.low %v5202_v10, %v5210_v38 }
 0x670   :  { %12099 = vmatpush1.bf16.msra.mxu0 %v14477_v43  ;;  %v14543_v43 = vcombine.low %v5187_v51, %v5195_v5  ;;  %v5259_v51 = vld [vmem:[#allocation8 + $0x1878] sm:$0xff] }
 0x671   :  { %12311 = vmatpush1.bf16.msra.mxu1 %v14479_v54  ;;  %12100 = vmatprep.subr.bf16.mxu0 %v14494_v26  ;;  %v14558_v54 = vcombine.high %v5202_v10, %v5210_v38  ;;  %v14560_v26 = vcombine.high %v5203_v9, %v5211_v33  ;;  %v5274_v10 = vld [vmem:[#allocation8 + $0x18f0] sm:$0xff]  ;;  %v5267_v38 = vld [vmem:[#allocation8 + $0x18b8] sm:$0xff] }
 0x672   :  { %12312 = vmatprep.subr.bf16.mxu1 %v14496_v32  ;;  %v5218_v32 = vld [vmem:[#allocation8 + $0x1730] sm:$0xff] }
 0x673   :  { %v14573_v50 = vcombine.low %v5218_v32, %v5226_v20 }
 0x674   :  { %12101 = vmatpush1.bf16.msra.mxu0 %v14493_v8  ;;  %v14559_v8 = vcombine.low %v5203_v9, %v5211_v33  ;;  %v5275_v9 = vld [vmem:[#allocation8 + $0x18f8] sm:$0xff] }
 0x675   :  { %12313 = vmatpush1.bf16.msra.mxu1 %v14495_v42  ;;  %12102 = vmatprep.subr.bf16.mxu0 %v14510_v17  ;;  %v14574_v42 = vcombine.high %v5218_v32, %v5226_v20  ;;  %v14576_v17 = vcombine.high %v5219_v62, %v5227_v21  ;;  %v5290_v32 = vld [vmem:[#allocation8 + $0x1970] sm:$0xff]  ;;  %v5283_v20 = vld [vmem:[#allocation8 + $0x1938] sm:$0xff] }
 0x676   :  { %12314 = vmatprep.subr.bf16.mxu1 %v14512_v3  ;;  %v5234_v3 = vld [vmem:[#allocation8 + $0x17b0] sm:$0xff] }
 0x677   :  { %v14589_v5 = vcombine.low %v5234_v3, %v5242_v61 }
 0x678   :  { %12103 = vmatpush1.bf16.msra.mxu0 %v14509_v22  ;;  %v14575_v22 = vcombine.low %v5219_v62, %v5227_v21  ;;  %v5291_v62 = vld [vmem:[#allocation8 + $0x1978] sm:$0xff] }
 0x679   :  { %12315 = vmatpush1.bf16.msra.mxu1 %v14511_v24  ;;  %12104 = vmatprep.subr.bf16.mxu0 %v14526_v44  ;;  %v14590_v24 = vcombine.high %v5234_v3, %v5242_v61  ;;  %v14592_v44 = vcombine.high %v5235_v19, %v5243_v34  ;;  %v5306_v3 = vld [vmem:[#allocation8 + $0x19f0] sm:$0xff]  ;;  %v5299_v61 = vld [vmem:[#allocation8 + $0x19b8] sm:$0xff] }
 0x67a   :  { %12316 = vmatprep.subr.bf16.mxu1 %v14528_v29  ;;  %v5250_v29 = vld [vmem:[#allocation8 + $0x1830] sm:$0xff] }
 0x67b   :  { %v14605_v33 = vcombine.low %v5250_v29, %v5258_v37 }
 0x67c   :  { %12105 = vmatpush1.bf16.msra.mxu0 %v14525_v55  ;;  %v14591_v55 = vcombine.low %v5235_v19, %v5243_v34  ;;  %v5307_v19 = vld [vmem:[#allocation8 + $0x19f8] sm:$0xff]  ;;  %v14639_v34 = vcombine.low %v5283_v20, %v5291_v62 }
 0x67d   :  { %12317 = vmatpush1.bf16.msra.mxu1 %v14527_v6  ;;  %12106 = vmatprep.subr.bf16.mxu0 %v14542_v0  ;;  %v14606_v6 = vcombine.high %v5250_v29, %v5258_v37  ;;  %v14608_v0 = vcombine.high %v5251_v57, %v5259_v51  ;;  %v5323_v29 = vld [vmem:[#allocation8 + $0x1a78] sm:$0xff] }
 0x67e   :  { %12318 = vmatprep.subr.bf16.mxu1 %v14544_v11  ;;  %v5266_v11 = vld [vmem:[#allocation8 + $0x18b0] sm:$0xff] }
 0x67f   :  { %v14621_v21 = vcombine.low %v5266_v11, %v5274_v10 }
 0x680   :  { %12107 = vmatpush1.bf16.msra.mxu0 %v14541_v58  ;;  %v14607_v58 = vcombine.low %v5251_v57, %v5259_v51  ;;  %v14655_v57 = vcombine.low %v5299_v61, %v5307_v19 }
 0x681   :  { %12319 = vmatpush1.bf16.msra.mxu1 %v14543_v43  ;;  %12108 = vmatprep.subr.bf16.mxu0 %v14558_v54  ;;  %v14622_v43 = vcombine.high %v5266_v11, %v5274_v10  ;;  %v14624_v54 = vcombine.high %v5267_v38, %v5275_v9  ;;  %v5339_v11 = vld [vmem:[#allocation8 + $0x1af8] sm:$0xff] }
 0x682   :  { %12320 = vmatprep.subr.bf16.mxu1 %v14560_v26  ;;  %v5282_v26 = vld [vmem:[#allocation8 + $0x1930] sm:$0xff] }
 0x684   :  { %12109 = vmatpush1.bf16.msra.mxu0 %v14557_v4  ;;  %v14623_v4 = vcombine.low %v5267_v38, %v5275_v9 }
 0x685   :  { %12321 = vmatpush1.bf16.msra.mxu1 %v14559_v8  ;;  %12110 = vmatprep.subr.bf16.mxu0 %v14574_v42  ;;  %v14638_v8 = vcombine.high %v5282_v26, %v5290_v32  ;;  %v14640_v42 = vcombine.high %v5283_v20, %v5291_v62 }
 0x686   :  { %12322 = vmatprep.subr.bf16.mxu1 %v14576_v17  ;;  %v5298_v17 = vld [vmem:[#allocation8 + $0x19b0] sm:$0xff] }
 0x687   :  { %v14653_v37 = vcombine.low %v5298_v17, %v5306_v3 }
 0x688   :  { %12111 = vmatpush1.bf16.msra.mxu0 %v14573_v50  ;;  %v14654_v50 = vcombine.high %v5298_v17, %v5306_v3 }
 0x689   :  { %12323 = vmatpush1.bf16.msra.mxu1 %v14575_v22  ;;  %12112 = vmatprep.subr.bf16.mxu0 %v14590_v24  ;;  %v5314_v22 = vld [vmem:[#allocation8 + $0x1a30] sm:$0xff] }
 0x68a   :  { %12324 = vmatprep.subr.bf16.mxu1 %v14592_v44  ;;  %v5322_v24 = vld [vmem:[#allocation8 + $0x1a70] sm:$0xff]  ;;  %v5315_v44 = vld [vmem:[#allocation8 + $0x1a38] sm:$0xff] }
 0x68b   :  { %v14670_v51 = vcombine.high %v5314_v22, %v5322_v24  ;;  %v14671_v10 = vcombine.low %v5315_v44, %v5323_v29 }
 0x68c   :  { %12113 = vmatpush1.bf16.msra.mxu0 %v14589_v5  ;;  %v14672_v5 = vcombine.high %v5315_v44, %v5323_v29  ;;  %v5378_v29 = vld [vmem:[#allocation8 + $0x1c30] sm:$0xff] }
 0x68d   :  { %12325 = vmatpush1.bf16.msra.mxu1 %v14591_v55  ;;  %12135 = vmatprep.subr.bf16.mxu0 %v14606_v6  ;;  %v5330_v55 = vld [vmem:[#allocation8 + $0x1ab0] sm:$0xff] }
 0x68e   :  { %12347 = vmatprep.subr.bf16.mxu1 %v14608_v0  ;;  %v5338_v6 = vld [vmem:[#allocation8 + $0x1af0] sm:$0xff]  ;;  %v5331_v0 = vld [vmem:[#allocation8 + $0x1ab8] sm:$0xff] }
 0x68f   :  { %12115 = vmatmul.mubr.bf16.vlgmr.msra.gmra.mrb[40].mxu0 %v16536_v47  ;;  %v14686_v38 = vcombine.high %v5330_v55, %v5338_v6  ;;  %v14685_v62 = vcombine.low %v5330_v55, %v5338_v6  ;;  %v5379_v55 = vld [vmem:[#allocation8 + $0x1c38] sm:$0xff] }
 0x690   :  { %12327 = vmatmul.mubr.bf16.vlgmr.msra.gmra.mrb[40].mxu1 %v16536_v47  ;;  %12124 = vmatprep.mubr.bf16.mxu0 %v16570_v18  ;;  %v14637_v47 = vcombine.low %v5282_v26, %v5290_v32  ;;  %v5347_v26 = vld [vmem:[#allocation8 + $0x1b38] sm:$0xff] }
 0x691   :  { %12136 = vmatpush1.bf16.msra.mxu0 %v14605_v33  ;;  %12336 = vmatprep.mubr.bf16.mxu1 %v16570_v18  ;;  %v14656_v18 = vcombine.high %v5299_v61, %v5307_v19  ;;  %v5346_v33 = vld [vmem:[#allocation8 + $0x1b30] sm:$0xff]  ;;  %v5355_v32 = vld [vmem:[#allocation8 + $0x1b78] sm:$0xff] }
 0x692   :  { %12348 = vmatpush1.bf16.msra.mxu1 %v14607_v58  ;;  %12137 = vmatprep.subr.bf16.mxu0 %v14622_v43  ;;  %v5354_v58 = vld [vmem:[#allocation8 + $0x1b70] sm:$0xff]  ;;  %v14704_v61 = vcombine.high %v5347_v26, %v5355_v32  ;;  %v5387_v6 = vld [vmem:[#allocation8 + $0x1c78] sm:$0xff] }
 0x693   :  { %12349 = vmatprep.subr.bf16.mxu1 %v14624_v54  ;;  %v14702_v17 = vcombine.high %v5346_v33, %v5354_v58  ;;  %v5362_v19 = vld [vmem:[#allocation8 + $0x1bb0] sm:$0xff] }
 0x695   :  { %12138 = vmatpush1.bf16.msra.mxu0 %v14621_v21 }
 0x696   :  { %12350 = vmatpush1.bf16.msra.mxu1 %v14623_v4  ;;  %12139 = vmatprep.subr.bf16.mxu0 %v14638_v8  ;;  %v14687_v4 = vcombine.low %v5331_v0, %v5339_v11 }
 0x697   :  { %12125 = vmatmul.mubr.bf16.gmra.mrb[44].mxu0 %v16561_v56  ;;  %12351 = vmatprep.subr.bf16.mxu1 %v14640_v42 }
 0x698   :  { %12337 = vmatmul.mubr.bf16.gmra.mrb[44].mxu1 %v16561_v56  ;;  %12167 = vmatprep.mubr.bf16.mxu0 %v16549_v28  ;;  %v14669_v56 = vcombine.low %v5314_v22, %v5322_v24  ;;  %v14703_v22 = vcombine.low %v5347_v26, %v5355_v32  ;;  %v14736_v26 = vcombine.high %v5379_v55, %v5387_v6  ;;  %v5394_v32 = vld [vmem:[#allocation8 + $0x1cb0] sm:$0xff] }
 0x699   :  { %12140 = vmatpush1.bf16.msra.mxu0 %v14637_v47  ;;  %12379 = vmatprep.mubr.bf16.mxu1 %v16549_v28  ;;  %v14688_v28 = vcombine.high %v5331_v0, %v5339_v11  ;;  %v5370_v47 = vld [vmem:[#allocation8 + $0x1bf0] sm:$0xff] }
 0x69a   :  { %12352 = vmatpush1.bf16.msra.mxu1 %v14639_v34  ;;  %12141 = vmatprep.subr.bf16.mxu0 %v14654_v50  ;;  %v14701_v34 = vcombine.low %v5346_v33, %v5354_v58  ;;  %v5363_v50 = vld [vmem:[#allocation8 + $0x1bb8] sm:$0xff]  ;;  %v14718_v44 = vcombine.high %v5362_v19, %v5370_v47  ;;  %v14717_v11 = vcombine.low %v5362_v19, %v5370_v47 }
 0x69b   :  { %12353 = vmatprep.subr.bf16.mxu1 %v14656_v18  ;;  %v5371_v18 = vld [vmem:[#allocation8 + $0x1bf8] sm:$0xff]  ;;  %v14735_v19 = vcombine.low %v5379_v55, %v5387_v6 }
 0x69c   :  { %v5435_v55 = vld [vmem:[#allocation8 + $0x1df8] sm:$0xff] }
 0x69d   :  { %12142 = vmatpush1.bf16.msra.mxu0 %v14653_v37 }
 0x69e   :  { %12354 = vmatpush1.bf16.msra.mxu1 %v14655_v57  ;;  %12143 = vmatprep.subr.bf16.mxu0 %v14670_v51  ;;  %v14720_v51 = vcombine.high %v5363_v50, %v5371_v18 }
 0x69f   :  { %12355 = vmatprep.subr.bf16.mxu1 %v14672_v5  ;;  %v16741_v9 = vpop.f32.mrb[32].mxu0  ;;  %v5386_v5 = vld [vmem:[#allocation8 + $0x1c70] sm:$0xff] }
 0x6a0   :  { %v16743_v43 = vpop.f32.mrb[32].mxu1  ;;  %v16745_v54 = vpop.f32.mrb[33].mxu0  ;;  %v14734_v58 = vcombine.high %v5378_v29, %v5386_v5 }
 0x6a1   :  { %12144 = vmatpush1.bf16.msra.mxu0 %v14669_v56  ;;  %v16747_v20 = vpop.f32.mrb[33].mxu1  ;;  %v16749_v21 = vpop.f32.mrb[34].mxu0 }
 0x6a2   :  { %12356 = vmatpush1.bf16.msra.mxu1 %v14671_v10  ;;  %12145 = vmatprep.subr.bf16.mxu0 %v14686_v38  ;;  %v16751_v8 = vpop.f32.mrb[34].mxu1  ;;  %v16753_v42 = vpop.f32.mrb[35].mxu0  ;;  %v14719_v10 = vcombine.low %v5363_v50, %v5371_v18  ;;  %v5410_v50 = vld [vmem:[#allocation8 + $0x1d30] sm:$0xff] }
 0x6a3   :  { %12357 = vmatprep.subr.bf16.mxu1 %v14688_v28  ;;  %v16755_v3 = vpop.f32.mrb[35].mxu1  ;;  %v5418_v18 = vld [vmem:[#allocation8 + $0x1d70] sm:$0xff] }
 0x6a4   :  { %v14765_v6 = vcombine.low %v5410_v50, %v5418_v18 }
 0x6a5   :  { %12146 = vmatpush1.bf16.msra.mxu0 %v14685_v62  ;;  %v5402_v62 = vld [vmem:[#allocation8 + $0x1cf0] sm:$0xff] }
 0x6a6   :  { %12358 = vmatpush1.bf16.msra.mxu1 %v14687_v4  ;;  %12147 = vmatprep.subr.bf16.mxu0 %v14702_v17  ;;  %v5395_v4 = vld [vmem:[#allocation8 + $0x1cb8] sm:$0xff]  ;;  %v14750_v47 = vcombine.high %v5394_v32, %v5402_v62 }
 0x6a7   :  { %12359 = vmatprep.subr.bf16.mxu1 %v14704_v61  ;;  %v16757_v24 = vpop.f32.mrb[36].mxu0  ;;  %v5403_v17 = vld [vmem:[#allocation8 + $0x1cf8] sm:$0xff]  ;;  %v14733_v61 = vcombine.low %v5378_v29, %v5386_v5  ;;  %v5434_v29 = vld [vmem:[#allocation8 + $0x1df0] sm:$0xff] }
 0x6a8   :  { %v16759_v37 = vpop.f32.mrb[36].mxu1  ;;  %v16761_v57 = vpop.f32.mrb[37].mxu0  ;;  %v5427_v5 = vld [vmem:[#allocation8 + $0x1db8] sm:$0xff] }
 0x6a9   :  { %12148 = vmatpush1.bf16.msra.mxu0 %v14701_v34  ;;  %v16763_v0 = vpop.f32.mrb[37].mxu1  ;;  %v16765_v56 = vpop.f32.mrb[38].mxu0  ;;  %v14752_v34 = vcombine.high %v5395_v4, %v5403_v17 }
 0x6aa   :  { %12360 = vmatpush1.bf16.msra.mxu1 %v14703_v22  ;;  %v16767_v38 = vpop.f32.mrb[38].mxu1  ;;  %v16769_v28 = vpop.f32.mrb[39].mxu0  ;;  %12149 = vmatprep.subr.bf16.mxu0 %v14718_v44  ;;  %v5411_v22 = vld [vmem:[#allocation8 + $0x1d38] sm:$0xff] }
 0x6ab   :  { %18050 = vst [vmem:[#allocation36_spill] sm:$0xff] %v16767_v38  ;;  %18051 = vst [vmem:[#allocation37_spill] sm:$0xff] %v16769_v28  ;;  %v16771_v33 = vpop.f32.mrb[39].mxu1  ;;  %12361 = vmatprep.subr.bf16.mxu1 %v14720_v51  ;;  %v5419_v44 = vld [vmem:[#allocation8 + $0x1d78] sm:$0xff]  ;;  %v14751_v38 = vcombine.low %v5395_v4, %v5403_v17  ;;  %v14766_v51 = vcombine.high %v5410_v50, %v5418_v18  ;;  %v14783_v17 = vcombine.low %v5427_v5, %v5435_v55  ;;  %v5466_v50 = vld [vmem:[#allocation8 + $0x1ef0] sm:$0xff] }
 0x6ac   :  { %18052 = vst [vmem:[#allocation38_spill] sm:$0xff] %v16771_v33  ;;  %v14749_v33 = vcombine.low %v5394_v32, %v5402_v62  ;;  %v14768_v28 = vcombine.high %v5411_v22, %v5419_v44  ;;  %v5450_v32 = vld [vmem:[#allocation8 + $0x1e70] sm:$0xff]  ;;  %v5443_v62 = vld [vmem:[#allocation8 + $0x1e38] sm:$0xff] }
 0x6ad   :  { %12150 = vmatpush1.bf16.msra.mxu0 %v14717_v11  ;;  %v5426_v11 = vld [vmem:[#allocation8 + $0x1db0] sm:$0xff]  ;;  %v5467_v18 = vld [vmem:[#allocation8 + $0x1ef8] sm:$0xff] }
 0x6ae   :  { %12362 = vmatpush1.bf16.msra.mxu1 %v14719_v10  ;;  %12151 = vmatprep.subr.bf16.mxu0 %v14734_v58  ;;  %v14767_v10 = vcombine.low %v5411_v22, %v5419_v44  ;;  %v14782_v58 = vcombine.high %v5426_v11, %v5434_v29  ;;  %v14781_v4 = vcombine.low %v5426_v11, %v5434_v29  ;;  %v5482_v11 = vld [vmem:[#allocation8 + $0x1f70] sm:$0xff]  ;;  %v5475_v29 = vld [vmem:[#allocation8 + $0x1f38] sm:$0xff] }
 0x6af   :  { %12363 = vmatprep.subr.bf16.mxu1 %v14736_v26  ;;  %v14784_v26 = vcombine.high %v5427_v5, %v5435_v55 }
 0x6b1   :  { %12152 = vmatpush1.bf16.msra.mxu0 %v14733_v61  ;;  %v5442_v61 = vld [vmem:[#allocation8 + $0x1e30] sm:$0xff] }
 0x6b2   :  { %12364 = vmatpush1.bf16.msra.mxu1 %v14735_v19  ;;  %12153 = vmatprep.subr.bf16.mxu0 %v14750_v47  ;;  %v5451_v19 = vld [vmem:[#allocation8 + $0x1e78] sm:$0xff]  ;;  %v14798_v47 = vcombine.high %v5442_v61, %v5450_v32  ;;  %v14797_v22 = vcombine.low %v5442_v61, %v5450_v32  ;;  %v5498_v61 = vld [vmem:[#allocation8 + $0x1ff0] sm:$0xff] }
 0x6b3   :  { %12365 = vmatprep.subr.bf16.mxu1 %v14752_v34  ;;  %v14800_v34 = vcombine.high %v5443_v62, %v5451_v19  ;;  %v5491_v32 = vld [vmem:[#allocation8 + $0x1fb8] sm:$0xff] }
 0x6b5   :  { %12154 = vmatpush1.bf16.msra.mxu0 %v14749_v33  ;;  %v5458_v33 = vld [vmem:[#allocation8 + $0x1eb0] sm:$0xff] }
 0x6b6   :  { %12366 = vmatpush1.bf16.msra.mxu1 %v14751_v38  ;;  %12155 = vmatprep.subr.bf16.mxu0 %v14766_v51  ;;  %v5459_v38 = vld [vmem:[#allocation8 + $0x1eb8] sm:$0xff]  ;;  %v14814_v44 = vcombine.high %v5458_v33, %v5466_v50  ;;  %v14813_v5 = vcombine.low %v5458_v33, %v5466_v50 }
 0x6b7   :  { %12367 = vmatprep.subr.bf16.mxu1 %v14768_v28  ;;  %v14799_v28 = vcombine.low %v5443_v62, %v5451_v19  ;;  %v14816_v51 = vcombine.high %v5459_v38, %v5467_v18  ;;  %v14815_v55 = vcombine.low %v5459_v38, %v5467_v18  ;;  %v5500_v38 = vld [vmem:[#allocation10] sm:$0xff]  ;;  %v18053_v18 = vld [vmem:[#allocation24_spill] sm:$0xff] }
 0x6b9   :  { %12156 = vmatpush1.bf16.msra.mxu0 %v14765_v6  ;;  %v5474_v6 = vld [vmem:[#allocation8 + $0x1f30] sm:$0xff] }
 0x6ba   :  { %12368 = vmatpush1.bf16.msra.mxu1 %v14767_v10  ;;  %12157 = vmatprep.subr.bf16.mxu0 %v14782_v58  ;;  %v5483_v10 = vld [vmem:[#allocation8 + $0x1f78] sm:$0xff]  ;;  %v14830_v58 = vcombine.high %v5474_v6, %v5482_v11  ;;  %v14829_v62 = vcombine.low %v5474_v6, %v5482_v11 }
 0x6bb   :  { %12369 = vmatprep.subr.bf16.mxu1 %v14784_v26  ;;  %v14832_v26 = vcombine.high %v5475_v29, %v5483_v10  ;;  %v14831_v19 = vcombine.low %v5475_v29, %v5483_v10 }
 0x6bd   :  { %12158 = vmatpush1.bf16.msra.mxu0 %v14781_v4  ;;  %v5490_v4 = vld [vmem:[#allocation8 + $0x1fb0] sm:$0xff] }
 0x6be   :  { %12370 = vmatpush1.bf16.msra.mxu1 %v14783_v17  ;;  %12159 = vmatprep.subr.bf16.mxu0 %v14798_v47  ;;  %v5499_v17 = vld [vmem:[#allocation8 + $0x1ff8] sm:$0xff]  ;;  %v14846_v47 = vcombine.high %v5490_v4, %v5498_v61  ;;  %v14845_v33 = vcombine.low %v5490_v4, %v5498_v61 }
 0x6bf   :  { %12371 = vmatprep.subr.bf16.mxu1 %v14800_v34  ;;  %v14848_v34 = vcombine.high %v5491_v32, %v5499_v17  ;;  %v14847_v50 = vcombine.low %v5491_v32, %v5499_v17 }
 0x6c1   :  { %12160 = vmatpush1.bf16.msra.mxu0 %v14797_v22  ;;  %v5507_v22 = vrot.slane %v5500_v38, %v18053_v18 }
 0x6c2   :  { %12372 = vmatpush1.bf16.msra.mxu1 %v14799_v28  ;;  %12161 = vmatprep.subr.bf16.mxu0 %v14814_v44  ;;  %v18054_v28 = vld [vmem:[#allocation26_spill] sm:$0xff] }
 0x6c3   :  { %12373 = vmatprep.subr.bf16.mxu1 %v14816_v51  ;;  %v5511_v44 = vrot.slane %v5500_v38, %v18054_v28  ;;  %v16782_v51 = vadd.f32 %v16613_v40, %v5507_v22  ;;  %v16789_v29 = vadd.f32 %v16621_v12, %v5507_v22  ;;  %v16820_v17 = vadd.f32 %v16629_v63, %v5507_v22 }
 0x6c5   :  { %12162 = vmatpush1.bf16.msra.mxu0 %v14813_v5  ;;  %18055 = vst [vmem:[#allocation24_spill] sm:$0xff] %v16782_v51  ;;  %v16785_v6 = vadd.f32 %v16617_v30, %v5511_v44  ;;  %v18059_v5 = vld [vmem:[#allocation27_spill] sm:$0xff]  ;;  %18062 = vst [vmem:[#allocation40_spill] sm:$0xff] %v16820_v17 }
 0x6c6   :  { %12374 = vmatpush1.bf16.msra.mxu1 %v14815_v55  ;;  %12163 = vmatprep.subr.bf16.mxu0 %v14830_v58  ;;  %v5519_v30 = vrot.slane %v5500_v38, %v18059_v5  ;;  %v12489_v55 = vmul.f32 %v16789_v29, %v16789_v29 }
 0x6c7   :  { %12375 = vmatprep.subr.bf16.mxu1 %v14832_v26  ;;  %18056 = vst [vmem:[#allocation26_spill] sm:$0xff] %v16785_v6  ;;  %v12474_v10 = vmul.f32 %v16785_v6, %v16785_v6 }
 0x6c8   :  { %v16817_v32 = vadd.f32 %v16619_v15, %v5519_v30 }
 0x6c9   :  { %12164 = vmatpush1.bf16.msra.mxu0 %v14829_v62  ;;  %v16823_v62 = vadd.f32 %v16633_v41, %v5511_v44 }
 0x6ca   :  { %12376 = vmatpush1.bf16.msra.mxu1 %v14831_v19  ;;  %12165 = vmatprep.subr.bf16.mxu0 %v14846_v47  ;;  %18061 = vst [vmem:[#allocation39_spill] sm:$0xff] %v16817_v32  ;;  %v16829_v47 = vadd.f32 %v16637_v53, %v5507_v22  ;;  %v12476_v53 = vmul.f32 %v16817_v32, %v16817_v32 }
 0x6cb   :  { %12377 = vmatprep.subr.bf16.mxu1 %v14848_v34  ;;  %18063 = vst [vmem:[#allocation41_spill] sm:$0xff] %v16823_v62  ;;  %v16832_v34 = vadd.f32 %v16641_v25, %v5511_v44  ;;  %v12505_v25 = vmul.f32 %v16820_v17, %v16820_v17 }
 0x6cc   :  { %18065 = vst [vmem:[#allocation43_spill] sm:$0xff] %v16829_v47 }
 0x6cd   :  { %12166 = vmatpush1.bf16.msra.mxu0 %v14845_v33  ;;  %18066 = vst [vmem:[#allocation44_spill] sm:$0xff] %v16832_v34 }
 0x6ce   :  { %12378 = vmatpush1.bf16.msra.mxu1 %v14847_v50 }
 0x6d0   :  { %12168 = vmatmul.mubr.bf16.vlgmr.msra.gmra.mrb[40].mxu0 %v16541_v59 }
 0x6d1   :  { %12380 = vmatmul.mubr.bf16.vlgmr.msra.gmra.mrb[40].mxu1 %v16541_v59  ;;  %12177 = vmatprep.mubr.bf16.mxu0 %v16573_v13  ;;  %v18057_v59 = vld [vmem:[#allocation25_spill] sm:$0xff] }
 0x6d2   :  { %12389 = vmatprep.mubr.bf16.mxu1 %v16573_v13  ;;  %v5515_v11 = vrot.slane %v5500_v38, %v18057_v59  ;;  %v16792_v13 = vadd.f32 %v16625_v48, %v5511_v44  ;;  %v12400_v48 = vadd.f32 %v16785_v6, %v16782_v51  ;;  %v12506_v44 = vmul.f32 %v16823_v62, %v16823_v62 }
 0x6d4   :  { %v16799_v40 = vadd.f32 %v16615_v52, %v5515_v11  ;;  %v12490_v12 = vmul.f32 %v16792_v13, %v16792_v13  ;;  %v16809_v26 = vadd.f32 %v16623_v60, %v5515_v11  ;;  %v12417_v4 = vadd.f32 %v16792_v13, %v16789_v29 }
 0x6d5   :  { %v5523_v52 = vrot.slane %v5500_v38, %v16394_v49  ;;  %v16826_v60 = vadd.f32 %v16627_v46, %v5519_v30  ;;  %v5527_v46 = vrot.slane %v5500_v38, %v16400_v7  ;;  %v16847_v22 = vadd.f32 %v16631_v14, %v5515_v11 }
 0x6d6   :  { %18058 = vst [vmem:[#allocation25_spill] sm:$0xff] %v16799_v40  ;;  %18060 = vst [vmem:[#allocation27_spill] sm:$0xff] %v16809_v26  ;;  %v12475_v61 = vmul.f32 %v16799_v40, %v16799_v40  ;;  %v12554_v19 = vadd.f32 %v12490_v12, %v12489_v55  ;;  %v12401_v33 = vadd.f32 %v16799_v40, %v12400_v48 }
 0x6d7   :  { %18064 = vst [vmem:[#allocation42_spill] sm:$0xff] %v16826_v60  ;;  %v12491_v63 = vmul.f32 %v16809_v26, %v16809_v26  ;;  %v12418_v50 = vadd.f32 %v16809_v26, %v12417_v4  ;;  %v16839_v41 = vadd.f32 %v16677_v23, %v5523_v52  ;;  %18068 = vst [vmem:[#allocation46_spill] sm:$0xff] %v16847_v22 }
 0x6d8   :  { %12178 = vmatmul.mubr.bf16.gmra.mrb[44].mxu0 %v16565_v45  ;;  %v12521_v23 = vmul.f32 %v16829_v47, %v16829_v47  ;;  %v12522_v55 = vmul.f32 %v16832_v34, %v16832_v34  ;;  %v12402_v12 = vadd.f32 %v16817_v32, %v12401_v33  ;;  %v12434_v14 = vadd.f32 %v16823_v62, %v16820_v17 }
 0x6d9   :  { %12390 = vmatmul.mubr.bf16.gmra.mrb[44].mxu1 %v16565_v45  ;;  %v12473_v45 = vmul.f32 %v16782_v51, %v16782_v51  ;;  %18067 = vst [vmem:[#allocation45_spill] sm:$0xff] %v16839_v41  ;;  %v12419_v4 = vadd.f32 %v16826_v60, %v12418_v50  ;;  %v12507_v33 = vmul.f32 %v16847_v22, %v16847_v22 }
 0x6da   :  { %v12588_v50 = vadd.f32 %v12522_v55, %v12521_v23  ;;  %v16880_v62 = vadd.f32 %v16643_v39, %v5519_v30 }
 0x6db   :  { %v12537_v58 = vadd.f32 %v12474_v10, %v12473_v45  ;;  %v12492_v45 = vmul.f32 %v16826_v60, %v16826_v60  ;;  %v12555_v10 = vadd.f32 %v12554_v19, %v12491_v63  ;;  %v16867_v19 = vadd.f32 %v16681_v16, %v5527_v46 }
 0x6dc   :  { %v16870_v63 = vadd.f32 %v16685_v27, %v5523_v52  ;;  %18073 = vst [vmem:[#allocation51_spill] sm:$0xff] %v16880_v62  ;;  %v5531_v16 = vrot.slane %v5500_v38, %v16397_v31  ;;  %v12435_v27 = vadd.f32 %v16847_v22, %v12434_v14  ;;  %v18075_v14 = vld [vmem:[#allocation28_spill] sm:$0xff] }
 0x6dd   :  { %v12538_v15 = vadd.f32 %v12537_v58, %v12475_v61  ;;  %v16861_v58 = vadd.f32 %v16639_v2, %v5515_v11  ;;  %v12477_v61 = vmul.f32 %v16839_v41, %v16839_v41  ;;  %18070 = vst [vmem:[#allocation48_spill] sm:$0xff] %v16867_v19  ;;  %v12451_v2 = vadd.f32 %v16832_v34, %v16829_v47  ;;  %v18077_v34 = vld [vmem:[#allocation21_spill] sm:$0xff] }
 0x6de   :  { %18071 = vst [vmem:[#allocation49_spill] sm:$0xff] %v16870_v63  ;;  %v12556_v11 = vadd.f32 %v12555_v10, %v12492_v45  ;;  %v12478_v45 = vmul.f32 %v16867_v19, %v16867_v19  ;;  %v12493_v39 = vmul.f32 %v16870_v63, %v16870_v63  ;;  %v16907_v47 = vadd.f32 %v18077_v34, %v5523_v52 }
 0x6df   :  { %v12539_v48 = vadd.f32 %v12538_v15, %v12476_v53  ;;  %18069 = vst [vmem:[#allocation47_spill] sm:$0xff] %v16861_v58  ;;  %v12571_v15 = vadd.f32 %v12506_v44, %v12505_v25  ;;  %v16875_v53 = vadd.f32 %v16635_v1, %v5519_v30  ;;  %v12523_v17 = vmul.f32 %v16861_v58, %v16861_v58 }
 0x6e0   :  { %v12403_v25 = vadd.f32 %v16839_v41, %v12402_v12  ;;  %v16888_v1 = vrot.slane %v5500_v38, %v16403_v36  ;;  %v16895_v30 = vadd.f32 %v16689_v35, %v5527_v46  ;;  %v12452_v55 = vadd.f32 %v16861_v58, %v12451_v2  ;;  %18078 = vst [vmem:[#allocation21_spill] sm:$0xff] %v16907_v47  ;;  %v16909_v35 = vld [vmem:[#allocation10 + $0x8] sm:$0xff]  ;;  %v18081_v2 = vld [vmem:[#allocation30_spill] sm:$0xff]  ;;  %v18083_v58 = vld [vmem:[#allocation32_spill] sm:$0xff] }
 0x6e1   :  { %18072 = vst [vmem:[#allocation50_spill] sm:$0xff] %v16875_v53  ;;  %v12540_v44 = vadd.f32 %v12539_v48, %v12477_v61  ;;  %v12508_v10 = vmul.f32 %v16875_v53, %v16875_v53  ;;  %v12572_v23 = vadd.f32 %v12571_v15, %v12507_v33  ;;  %v12420_v12 = vadd.f32 %v16870_v63, %v12419_v4  ;;  %v18079_v33 = vld [vmem:[#allocation29_spill] sm:$0xff] }
 0x6e2   :  { %18074 = vst [vmem:[#allocation52_spill] sm:$0xff] %v16895_v30  ;;  %v12524_v38 = vmul.f32 %v16880_v62, %v16880_v62  ;;  %v12589_v48 = vadd.f32 %v12588_v50, %v12523_v17  ;;  %v16904_v61 = vadd.f32 %v18075_v14, %v5531_v16  ;;  %v12436_v22 = vadd.f32 %v16875_v53, %v12435_v27 }
 0x6e3   :  { %v16914_v15 = vadd.f32 %v18079_v33, %v16888_v1  ;;  %v16917_v4 = vadd.f32 %v18081_v2, %v5531_v16  ;;  %v16920_v63 = vadd.f32 %v18083_v58, %v5523_v52  ;;  %v12404_v17 = vadd.f32 %v16867_v19, %v12403_v25 }
 0x6e4   :  { %18076 = vst [vmem:[#allocation28_spill] sm:$0xff] %v16904_v61  ;;  %v12541_v50 = vadd.f32 %v12540_v44, %v12478_v45  ;;  %v12557_v14 = vadd.f32 %v12556_v11, %v12493_v39  ;;  %v12494_v34 = vmul.f32 %v16895_v30, %v16895_v30  ;;  %v12573_v60 = vadd.f32 %v12572_v23, %v12508_v10  ;;  %v18085_v11 = vld [vmem:[#allocation23_spill] sm:$0xff]  ;;  %v18087_v45 = vld [vmem:[#allocation20_spill] sm:$0xff]  ;;  %v18088_v23 = vld [vmem:[#allocation34_spill] sm:$0xff] }
 0x6e5   :  { %18080 = vst [vmem:[#allocation29_spill] sm:$0xff] %v16914_v15  ;;  %18082 = vst [vmem:[#allocation30_spill] sm:$0xff] %v16917_v4  ;;  %v12453_v27 = vadd.f32 %v16880_v62, %v12452_v55  ;;  %v12421_v53 = vadd.f32 %v16895_v30, %v12420_v12  ;;  %v16929_v33 = vrot.slane %v16909_v35, %v18053_v18  ;;  %v18090_v30 = vld [vmem:[#allocation22_spill] sm:$0xff] }
 0x6e6   :  { %18084 = vst [vmem:[#allocation32_spill] sm:$0xff] %v16920_v63  ;;  %v12590_v2 = vadd.f32 %v12589_v48, %v12524_v38  ;;  %v12479_v52 = vmul.f32 %v16904_v61, %v16904_v61  ;;  %v12509_v58 = vmul.f32 %v16907_v47, %v16907_v47  ;;  %v16936_v25 = vadd.f32 %v18085_v11, %v5527_v46 }
 0x6e7   :  { %v12480_v44 = vmul.f32 %v16914_v15, %v16914_v15  ;;  %v16942_v39 = vadd.f32 %v18087_v45, %v16888_v1  ;;  %v12525_v10 = vmul.f32 %v16920_v63, %v16920_v63  ;;  %v16947_v55 = vadd.f32 %v18088_v23, %v5527_v46 }
 0x6e8   :  { %18086 = vst [vmem:[#allocation23_spill] sm:$0xff] %v16936_v25  ;;  %v12405_v12 = vadd.f32 %v16904_v61, %v12404_v17  ;;  %v12542_v38 = vadd.f32 %v12541_v50, %v12479_v52  ;;  %v12495_v48 = vmul.f32 %v16917_v4, %v16917_v4  ;;  %v12558_v11 = vadd.f32 %v12557_v14, %v12494_v34 }
 0x6e9   :  { %18089 = vst [vmem:[#allocation20_spill] sm:$0xff] %v16947_v55  ;;  %v12422_v62 = vadd.f32 %v16917_v4, %v12421_v53  ;;  %v16954_v26 = vadd.f32 %v18090_v30, %v5531_v16  ;;  %v16958_v45 = vadd.f32 %v16741_v9, %v16929_v33  ;;  %v16962_v46 = vrot.slane %v16909_v35, %v18054_v28  ;;  %v18093_v30 = vld [vmem:[#allocation31_spill] sm:$0xff] }
 0x6ea   :  { %v12437_v17 = vadd.f32 %v16907_v47, %v12436_v22  ;;  %v12574_v50 = vadd.f32 %v12573_v60, %v12509_v58  ;;  %v12510_v52 = vmul.f32 %v16936_v25, %v16936_v25  ;;  %v12454_v14 = vadd.f32 %v16920_v63, %v12453_v27  ;;  %v18095_v60 = vld [vmem:[#allocation33_spill] sm:$0xff] }
 0x6eb   :  { %18091 = vst [vmem:[#allocation34_spill] sm:$0xff] %v16954_v26  ;;  %18092 = vst [vmem:[#allocation22_spill] sm:$0xff] %v16958_v45  ;;  %v12496_v53 = vmul.f32 %v16942_v39, %v16942_v39  ;;  %v16972_v34 = vadd.f32 %v18093_v30, %v16888_v1  ;;  %v12591_v9 = vadd.f32 %v12590_v2, %v12525_v10 }
 0x6ec   :  { %v12526_v23 = vmul.f32 %v16947_v55, %v16947_v55  ;;  %v12406_v4 = vadd.f32 %v16914_v15, %v12405_v12  ;;  %v12543_v22 = vadd.f32 %v12542_v38, %v12480_v44  ;;  %v16978_v58 = vadd.f32 %v18095_v60, %v5531_v16  ;;  %v18098_v38 = vld [vmem:[#allocation35_spill] sm:$0xff] }
 0x6ed   :  { %18094 = vst [vmem:[#allocation31_spill] sm:$0xff] %v16972_v34  ;;  %v16982_v27 = vadd.f32 %v16749_v21, %v16929_v33  ;;  %v12423_v63 = vadd.f32 %v16942_v39, %v12422_v62  ;;  %v12559_v47 = vadd.f32 %v12558_v11, %v12495_v48  ;;  %v12481_v30 = vmul.f32 %v16958_v45, %v16958_v45 }
 0x6ee   :  { %18096 = vst [vmem:[#allocation33_spill] sm:$0xff] %v16978_v58  ;;  %v16989_v2 = vadd.f32 %v16745_v54, %v16962_v46  ;;  %v12511_v44 = vmul.f32 %v16954_v26, %v16954_v26  ;;  %v12438_v16 = vadd.f32 %v16936_v25, %v12437_v17  ;;  %v12575_v10 = vadd.f32 %v12574_v50, %v12510_v52 }
 0x6ef   :  { %v12455_v12 = vadd.f32 %v16947_v55, %v12454_v14  ;;  %v12512_v21 = vmul.f32 %v16972_v34, %v16972_v34  ;;  %v12592_v62 = vadd.f32 %v12591_v9, %v12526_v23  ;;  %v16999_v48 = vadd.f32 %v18098_v38, %v16888_v1 }
 0x6f0   :  { %18097 = vst [vmem:[#allocation53_spill] sm:$0xff] %v16989_v2  ;;  %v5547_v54 = vrot.slane %v16909_v35, %v18057_v59  ;;  %v12527_v11 = vmul.f32 %v16978_v58, %v16978_v58  ;;  %v12407_v60 = vadd.f32 %v16958_v45, %v12406_v4  ;;  %v12497_v17 = vmul.f32 %v16982_v27, %v16982_v27 }
 0x6f1   :  { %18099 = vst [vmem:[#allocation35_spill] sm:$0xff] %v16999_v48  ;;  %v17010_v50 = vadd.f32 %v16753_v42, %v16962_v46  ;;  %v12544_v52 = vadd.f32 %v12543_v22, %v12481_v30  ;;  %v12482_v1 = vmul.f32 %v16989_v2, %v16989_v2  ;;  %v12424_v14 = vadd.f32 %v16982_v27, %v12423_v63 }
 0x6f2   :  { %v17017_v9 = vadd.f32 %v16757_v24, %v16929_v33  ;;  %v12560_v23 = vadd.f32 %v12559_v47, %v12496_v53  ;;  %v12439_v4 = vadd.f32 %v16954_v26, %v12438_v16  ;;  %v12576_v38 = vadd.f32 %v12575_v10, %v12511_v44 }
 0x6f3   :  { %v12456_v55 = vadd.f32 %v16978_v58, %v12455_v12  ;;  %v12528_v42 = vmul.f32 %v16999_v48, %v16999_v48  ;;  %v12593_v25 = vadd.f32 %v12592_v62, %v12527_v11  ;;  %v17024_v22 = vadd.f32 %v16743_v43, %v5547_v54 }
 0x6f4   :  { %18100 = vst [vmem:[#allocation54_spill] sm:$0xff] %v17017_v9  ;;  %v5551_v63 = vrot.slane %v16909_v35, %v18059_v5  ;;  %v12408_v30 = vadd.f32 %v16989_v2, %v12407_v60  ;;  %v12561_v24 = vadd.f32 %v12560_v23, %v12497_v17  ;;  %v17030_v47 = vadd.f32 %v16751_v8, %v5547_v54 }
 0x6f5   :  { %18101 = vst [vmem:[#allocation55_spill] sm:$0xff] %v17024_v22  ;;  %v12498_v53 = vmul.f32 %v17010_v50, %v17010_v50  ;;  %v12545_v44 = vadd.f32 %v12544_v52, %v12482_v1  ;;  %v12425_v16 = vadd.f32 %v17010_v50, %v12424_v14  ;;  %v12513_v10 = vmul.f32 %v17017_v9, %v17017_v9 }
 0x6f6   :  { %v17039_v43 = vadd.f32 %v16761_v57, %v16962_v46  ;;  %v12440_v12 = vadd.f32 %v16972_v34, %v12439_v4  ;;  %v12577_v62 = vadd.f32 %v12576_v38, %v12512_v21  ;;  %v12457_v11 = vadd.f32 %v16999_v48, %v12456_v55  ;;  %v18108_v38 = vld [vmem:[#allocation37_spill] sm:$0xff] }
 0x6f7   :  { %v17045_v8 = vadd.f32 %v16765_v56, %v16929_v33  ;;  %v12594_v60 = vadd.f32 %v12593_v25, %v12528_v42  ;;  %v12483_v17 = vmul.f32 %v17024_v22, %v17024_v22  ;;  %v17050_v52 = vadd.f32 %v16747_v20, %v5551_v63 }
 0x6f8   :  { %18102 = vst [vmem:[#allocation56_spill] sm:$0xff] %v17039_v43  ;;  %v17053_v1 = vadd.f32 %v16755_v3, %v5551_v63  ;;  %v12409_v57 = vadd.f32 %v17024_v22, %v12408_v30  ;;  %v12499_v21 = vmul.f32 %v17030_v47, %v17030_v47  ;;  %v12562_v55 = vadd.f32 %v12561_v24, %v12498_v53 }
 0x6f9   :  { %18103 = vst [vmem:[#allocation57_spill] sm:$0xff] %v17045_v8  ;;  %18104 = vst [vmem:[#allocation58_spill] sm:$0xff] %v17050_v52  ;;  %v12441_v14 = vadd.f32 %v17017_v9, %v12440_v12  ;;  %v12546_v56 = vadd.f32 %v12545_v44, %v12483_v17  ;;  %v12426_v33 = vadd.f32 %v17030_v47, %v12425_v16  ;;  %v18110_v16 = vld [vmem:[#allocation36_spill] sm:$0xff] }
 0x6fa   :  { %18105 = vst [vmem:[#allocation59_spill] sm:$0xff] %v17053_v1  ;;  %v12578_v25 = vadd.f32 %v12577_v62, %v12513_v10  ;;  %v12514_v23 = vmul.f32 %v17039_v43, %v17039_v43  ;;  %v17063_v20 = vadd.f32 %v16759_v37, %v5547_v54  ;;  %v17066_v3 = vadd.f32 %v16763_v0, %v5551_v63 }
 0x6fb   :  { %v12458_v4 = vadd.f32 %v17045_v8, %v12457_v11  ;;  %v17071_v42 = vadd.f32 %v18108_v38, %v16962_v46  ;;  %v12484_v30 = vmul.f32 %v17050_v52, %v17050_v52  ;;  %v12500_v24 = vmul.f32 %v17053_v1, %v17053_v1 }
 0x6fc   :  { %18106 = vst [vmem:[#allocation60_spill] sm:$0xff] %v17063_v20  ;;  %18107 = vst [vmem:[#allocation61_spill] sm:$0xff] %v17066_v3  ;;  %v12529_v53 = vmul.f32 %v17045_v8, %v17045_v8  ;;  %v17081_v37 = vrot.slane %v16909_v35, %v16394_v49  ;;  %v12563_v0 = vadd.f32 %v12562_v55, %v12499_v21 }
 0x6fd   :  { %18109 = vst [vmem:[#allocation37_spill] sm:$0xff] %v17071_v42  ;;  %v12442_v44 = vadd.f32 %v17039_v43, %v12441_v14  ;;  %v17085_v10 = vadd.f32 %v18110_v16, %v5547_v54  ;;  %v17089_v46 = vrot.slane %v16909_v35, %v16400_v7  ;;  %v12410_v12 = vadd.f32 %v17050_v52, %v12409_v57  ;;  %v18112_v54 = vld [vmem:[#allocation38_spill] sm:$0xff] }
 0x6fe   :  { %v12547_v62 = vadd.f32 %v12546_v56, %v12484_v30  ;;  %v12427_v11 = vadd.f32 %v17053_v1, %v12426_v33  ;;  %v12579_v17 = vadd.f32 %v12578_v25, %v12514_v23  ;;  %v12515_v38 = vmul.f32 %v17063_v20, %v17063_v20 }
 0x6ff   :  { %18111 = vst [vmem:[#allocation36_spill] sm:$0xff] %v17085_v10  ;;  %v12516_v21 = vmul.f32 %v17066_v3, %v17066_v3  ;;  %v12459_v55 = vadd.f32 %v17071_v42, %v12458_v4  ;;  %v17099_v14 = vadd.f32 %v18112_v54, %v5551_v63  ;;  %v12595_v8 = vadd.f32 %v12594_v60, %v12529_v53 }
 0x700   :  { %v12530_v57 = vmul.f32 %v17071_v42, %v17071_v42  ;;  %v17108_v33 = vrot.slane %v16909_v35, %v16397_v31  ;;  %v12564_v30 = vadd.f32 %v12563_v0, %v12500_v24  ;;  %v12443_v4 = vadd.f32 %v17063_v20, %v12442_v44 }
 0x701   :  { %18113 = vst [vmem:[#allocation38_spill] sm:$0xff] %v17099_v14  ;;  %v12531_v63 = vmul.f32 %v17085_v10, %v17085_v10  ;;  %v12580_v42 = vadd.f32 %v12579_v17, %v12515_v38  ;;  %v12460_v44 = vadd.f32 %v17085_v10, %v12459_v55  ;;  %v12532_v20 = vmul.f32 %v17099_v14, %v17099_v14 }
 0x702   :  { %v12596_v38 = vadd.f32 %v12595_v8, %v12530_v57  ;;  %v12444_v34 = vadd.f32 %v17066_v3, %v12443_v4 }
 0x703   :  { %v12581_v8 = vadd.f32 %v12580_v42, %v12516_v21 }
 0x704   :  { %v12597_v1 = vadd.f32 %v12596_v38, %v12531_v63 }
 0x7a3   :  { %v12169_v16 = vpop.f32.mrb[40].mxu0 }
 0x7a4   :  { %v17104_v56 = vadd.f32 %v12169_v16, %v17081_v37  ;;  %v12381_v25 = vpop.f32.mrb[40].mxu1  ;;  %v12171_v23 = vpop.f32.mrb[41].mxu0 }
 0x7a5   :  { %v17114_v60 = vadd.f32 %v12171_v23, %v17089_v46  ;;  %v12383_v53 = vpop.f32.mrb[41].mxu1  ;;  %v12173_v54 = vpop.f32.mrb[42].mxu0  ;;  %v17127_v23 = vrot.slane %v16909_v35, %v16403_v36  ;;  %v17133_v43 = vadd.f32 %v12381_v25, %v17108_v33 }
 0x7a6   :  { %18114 = vst [vmem:[#allocation62_spill] sm:$0xff] %v17104_v56  ;;  %v12411_v16 = vadd.f32 %v17104_v56, %v12410_v12  ;;  %v12485_v48 = vmul.f32 %v17104_v56, %v17104_v56  ;;  %v17120_v58 = vadd.f32 %v12173_v54, %v17081_v37  ;;  %v12385_v24 = vpop.f32.mrb[42].mxu1  ;;  %v12175_v0 = vpop.f32.mrb[43].mxu0  ;;  %v18144_v56 = vld [vmem:[#allocation27_spill] sm:$0xff] }
 0x7a7   :  { %18115 = vst [vmem:[#allocation63_spill] sm:$0xff] %v17114_v60  ;;  %v17130_v17 = vadd.f32 %v12175_v0, %v17089_v46  ;;  %v12387_v12 = vpop.f32.mrb[43].mxu1  ;;  %18117 = vst [vmem:[#allocation65_spill] sm:$0xff] %v17133_v43  ;;  %v12486_v9 = vmul.f32 %v17114_v60, %v17114_v60  ;;  %v17147_v26 = vadd.f32 %v12383_v53, %v17127_v23 }
 0x7a8   :  { %18116 = vst [vmem:[#allocation64_spill] sm:$0xff] %v17120_v58  ;;  %v12428_v54 = vadd.f32 %v17120_v58, %v12427_v11  ;;  %v12501_v55 = vmul.f32 %v17120_v58, %v17120_v58  ;;  %v12548_v10 = vadd.f32 %v12547_v62, %v12485_v48  ;;  %v12412_v0 = vadd.f32 %v17114_v60, %v12411_v16  ;;  %v18145_v60 = vld [vmem:[#allocation42_spill] sm:$0xff] }
 0x7a9   :  { %v12502_v35 = vmul.f32 %v17130_v17, %v17130_v17  ;;  %v12461_v11 = vadd.f32 %v17099_v14, %v12460_v44  ;;  %18118 = vst [vmem:[#allocation66_spill] sm:$0xff] %v17147_v26  ;;  %v17150_v48 = vadd.f32 %v12385_v24, %v17108_v33  ;;  %v12487_v16 = vmul.f32 %v17133_v43, %v17133_v43 }
 0x7aa   :  { %v12429_v57 = vadd.f32 %v17130_v17, %v12428_v54  ;;  %v12565_v25 = vadd.f32 %v12564_v30, %v12501_v55  ;;  %v12413_v58 = vadd.f32 %v17133_v43, %v12412_v0  ;;  %v17156_v42 = vadd.f32 %v12387_v12, %v17127_v23  ;;  %v18146_v43 = vld [vmem:[#allocation49_spill] sm:$0xff] }
 0x7ab   :  { %v12179_v62 = vpop.f32.mrb[44].mxu0  ;;  %v12549_v63 = vadd.f32 %v12548_v10, %v12486_v9  ;;  %v12503_v10 = vmul.f32 %v17150_v48, %v17150_v48 }
 0x7ac   :  { %v17159_v21 = vadd.f32 %v12179_v62, %v17081_v37  ;;  %v12391_v30 = vpop.f32.mrb[44].mxu1  ;;  %v12181_v4 = vpop.f32.mrb[45].mxu0  ;;  %v12414_v54 = vadd.f32 %v17147_v26, %v12413_v58  ;;  %v12566_v55 = vadd.f32 %v12565_v25, %v12502_v35  ;;  %v12430_v3 = vadd.f32 %v17150_v48, %v12429_v57 }
 0x7ad   :  { %v17162_v53 = vadd.f32 %v12181_v4, %v17089_v46  ;;  %v12393_v24 = vpop.f32.mrb[45].mxu1  ;;  %v12183_v44 = vpop.f32.mrb[46].mxu0  ;;  %v17173_v4 = vadd.f32 %v12391_v30, %v17108_v33  ;;  %v12598_v30 = vadd.f32 %v12597_v1, %v12532_v20 }
 0x7ae   :  { %18119 = vst [vmem:[#allocation67_spill] sm:$0xff] %v17159_v21  ;;  %v12445_v38 = vadd.f32 %v17159_v21, %v12444_v34  ;;  %v12517_v12 = vmul.f32 %v17159_v21, %v17159_v21  ;;  %v17169_v0 = vadd.f32 %v12183_v44, %v17081_v37  ;;  %v12395_v62 = vpop.f32.mrb[46].mxu1  ;;  %v12185_v14 = vpop.f32.mrb[47].mxu0  ;;  %12415 = vadd.xlane.f32.xlu0 %v12414_v54 }
 0x7af   :  { %18120 = vst [vmem:[#allocation68_spill] sm:$0xff] %v17162_v53  ;;  %18122 = vst [vmem:[#allocation70_spill] sm:$0xff] %v17173_v4  ;;  %v12518_v58 = vmul.f32 %v17162_v53, %v17162_v53  ;;  %v17178_v9 = vadd.f32 %v12185_v14, %v17089_v46  ;;  %v12397_v34 = vpop.f32.mrb[47].mxu1  ;;  %v12504_v44 = vmul.f32 %v17156_v42, %v17156_v42  ;;  %v18151_v22 = vld [vmem:[#allocation64_spill] sm:$0xff] }
 0x7b0   :  { %18121 = vst [vmem:[#allocation69_spill] sm:$0xff] %v17169_v0  ;;  %v12582_v37 = vadd.f32 %v12581_v8, %v12517_v12  ;;  %v12446_v35 = vadd.f32 %v17162_v53, %v12445_v38  ;;  %v12462_v25 = vadd.f32 %v17169_v0, %v12461_v11  ;;  %v12533_v57 = vmul.f32 %v17169_v0, %v17169_v0 }
 0x7b1   :  { %18123 = vst [vmem:[#allocation71_spill] sm:$0xff] %v17178_v9  ;;  %v12567_v21 = vadd.f32 %v12566_v55, %v12503_v10  ;;  %v12550_v46 = vadd.f32 %v12549_v63, %v12487_v16  ;;  %v17189_v14 = vadd.f32 %v12393_v24, %v17127_v23  ;;  %v12534_v54 = vmul.f32 %v17178_v9, %v17178_v9 }
 0x7b2   :  { %v12431_v8 = vadd.f32 %v17156_v42, %v12430_v3  ;;  %v12447_v38 = vadd.f32 %v17173_v4, %v12446_v35  ;;  %v12599_v11 = vadd.f32 %v12598_v30, %v12533_v57  ;;  %v12463_v12 = vadd.f32 %v17178_v9, %v12462_v25  ;;  %v12757_v30 = vld [vmem:[#allocation11] sm:$0xff] }
 0x7b3   :  { %18124 = vst [vmem:[#allocation72_spill] sm:$0xff] %v17189_v14  ;;  %v12568_v0 = vadd.f32 %v12567_v21, %v12504_v44  ;;  %v12583_v1 = vadd.f32 %v12582_v37, %v12518_v58  ;;  %v12519_v20 = vmul.f32 %v17173_v4, %v17173_v4  ;;  %v12488_v16 = vmul.f32 %v17147_v26, %v17147_v26  ;;  %v12758_v44 = vld [vmem:[#allocation11 + $0x8] sm:$0xff] }
 0x7b4   :  { %12432 = vadd.xlane.f32.xlu0 %v12431_v8  ;;  %v17201_v24 = vadd.f32 %v12395_v62, %v17108_v33  ;;  %v12448_v3 = vadd.f32 %v17189_v14, %v12447_v38  ;;  %v12600_v35 = vadd.f32 %v12599_v11, %v12534_v54  ;;  %v12520_v21 = vmul.f32 %v17189_v14, %v17189_v14  ;;  %v12906_v54 = vld [vmem:[#allocation13 + $0x8] sm:$0xff] }
 0x7b5   :  { %12569 = vadd.xlane.f32.xlu1 %v12568_v0  ;;  %v12551_v55 = vadd.f32 %v12550_v46, %v12488_v16  ;;  %v12584_v63 = vadd.f32 %v12583_v1, %v12519_v20  ;;  %v17210_v37 = vadd.f32 %v12397_v34, %v17127_v23  ;;  %v12905_v46 = vld [vmem:[#allocation13] sm:$0xff]  ;;  %v17216_v8 = vrot.slane %v12757_v30, %v18053_v18 }
 0x7b6   :  { %18125 = vst [vmem:[#allocation73_spill] sm:$0xff] %v17201_v24  ;;  %v12464_v10 = vadd.f32 %v17201_v24, %v12463_v12  ;;  %v12535_v58 = vmul.f32 %v17201_v24, %v17201_v24  ;;  %v17219_v23 = vrot.slane %v12758_v44, %v18053_v18  ;;  %v17222_v34 = vrot.slane %v12905_v46, %v18053_v18 }
 0x7b7   :  { %18126 = vst [vmem:[#allocation74_spill] sm:$0xff] %v17210_v37  ;;  %v12585_v33 = vadd.f32 %v12584_v63, %v12520_v21  ;;  %v12536_v25 = vmul.f32 %v17210_v37, %v17210_v37  ;;  %v17225_v38 = vrot.slane %v12906_v54, %v18053_v18  ;;  %v17228_v11 = vrot.slane %v12757_v30, %v18057_v59 }
 0x7b8   :  { %12552 = vadd.xlane.f32.xlu0 %v12551_v55  ;;  %v12465_v0 = vadd.f32 %v17210_v37, %v12464_v10  ;;  %v12601_v62 = vadd.f32 %v12600_v35, %v12535_v58  ;;  %18127 = vst [vmem:[#allocation75_spill] sm:$0xff] %v17222_v34  ;;  %v17231_v12 = vrot.slane %v12758_v44, %v18057_v59 }
 0x7b9   :  { %12449 = vadd.xlane.f32.xlu1 %v12448_v3  ;;  %18128 = vst [vmem:[#allocation76_spill] sm:$0xff] %v17225_v38  ;;  %v17234_v1 = vrot.slane %v12905_v46, %v18057_v59  ;;  %v17237_v20 = vrot.slane %v12906_v54, %v18057_v59  ;;  %v17240_v16 = vrot.slane %v12757_v30, %v18054_v28 }
 0x7ba   :  { %v12602_v57 = vadd.f32 %v12601_v62, %v12536_v25  ;;  %v17243_v3 = vrot.slane %v12758_v44, %v18054_v28  ;;  %v17246_v55 = vrot.slane %v12905_v46, %v18054_v28  ;;  %v17249_v63 = vrot.slane %v12906_v54, %v18054_v28 }
 0x7bb   :  { %18129 = vst [vmem:[#allocation77_spill] sm:$0xff] %v17234_v1  ;;  %18130 = vst [vmem:[#allocation78_spill] sm:$0xff] %v17237_v20  ;;  %v17252_v10 = vrot.slane %v12757_v30, %v18059_v5  ;;  %v17255_v35 = vrot.slane %v12758_v44, %v18059_v5  ;;  %v17258_v59 = vrot.slane %v12905_v46, %v18059_v5 }
 0x7bc   :  { %12586 = vadd.xlane.f32.xlu0 %v12585_v33  ;;  %18131 = vst [vmem:[#allocation79_spill] sm:$0xff] %v17246_v55  ;;  %18132 = vst [vmem:[#allocation80_spill] sm:$0xff] %v17249_v63  ;;  %v17261_v21 = vrot.slane %v12906_v54, %v18059_v5  ;;  %v17264_v58 = vrot.slane %v12757_v30, %v16394_v49  ;;  %v17269_v28 = vrot.slane %v12758_v44, %v16394_v49 }
 0x7bd   :  { %12466 = vadd.xlane.f32.xlu1 %v12465_v0  ;;  %18133 = vst [vmem:[#allocation81_spill] sm:$0xff] %v17258_v59  ;;  %v17272_v0 = vrot.slane %v12905_v46, %v16394_v49  ;;  %v17275_v62 = vrot.slane %v12906_v54, %v16394_v49  ;;  %v17278_v25 = vrot.slane %v12757_v30, %v16397_v31 }
 0x7be   :  { %18134 = vst [vmem:[#allocation82_spill] sm:$0xff] %v17261_v21  ;;  %v17281_v5 = vrot.slane %v12758_v44, %v16397_v31  ;;  %v17290_v21 = vrot.slane %v12757_v30, %v16400_v7  ;;  %v17293_v20 = vrot.slane %v12758_v44, %v16400_v7  ;;  %v17296_v49 = vrot.slane %v12905_v46, %v16400_v7 }
 0x7bf   :  { %18136 = vst [vmem:[#allocation84_spill] sm:$0xff] %v17272_v0  ;;  %18137 = vst [vmem:[#allocation85_spill] sm:$0xff] %v17275_v62  ;;  %v17299_v62 = vrot.slane %v12906_v54, %v16400_v7  ;;  %v17302_v63 = vrot.slane %v12757_v30, %v16403_v36 }
 0x7c0   :  { %18140 = vst [vmem:[#allocation88_spill] sm:$0xff] %v17296_v49 }
 0x7c1   :  { %12603 = vadd.xlane.f32.xlu1 %v12602_v57  ;;  %v17284_v57 = vrot.slane %v12905_v46, %v16397_v31  ;;  %18141 = vst [vmem:[#allocation89_spill] sm:$0xff] %v17299_v62 }
 0x7c3   :  { %18138 = vst [vmem:[#allocation86_spill] sm:$0xff] %v17284_v57  ;;  %v17305_v57 = vrot.slane %v12758_v44, %v16403_v36 }
 0x7c6   :  { %v18198_v4 = vld [vmem:[#allocation85_spill] sm:$0xff] }
 0x7c8   :  { %v18199_v40 = vld [vmem:[#allocation89_spill] sm:$0xff] }
 0x83b   :  { %v12416_v18 = vpop.xlane.xlu0 %12415 }
 0x83c   :  { %v17266_v33 = vmul.f32 0.00048828125, %v12416_v18  ;;  %v17287_v18 = vrot.slane %v12906_v54, %v16397_v31  ;;  %v17308_v31 = vrot.slane %v12905_v46, %v16403_v36 }
 0x83e   :  { %18135 = vst [vmem:[#allocation83_spill] sm:$0xff] %v17266_v33  ;;  %18139 = vst [vmem:[#allocation87_spill] sm:$0xff] %v17287_v18  ;;  %v17311_v18 = vrot.slane %v12906_v54, %v16403_v36  ;;  %v12609_v36 = vmul.f32 %v17266_v33, %v17266_v33  ;;  %v18149_v54 = vld [vmem:[#allocation30_spill] sm:$0xff] }
 0x83f   :  { %18142 = vst [vmem:[#allocation90_spill] sm:$0xff] %v17308_v31 }
 0x840   :  { %18143 = vst [vmem:[#allocation91_spill] sm:$0xff] %v17311_v18  ;;  %v18197_v18 = vld [vmem:[#allocation82_spill] sm:$0xff] }
 0x841   :  { %v12433_v38 = vpop.xlane.xlu0 %12432 }
 0x842   :  { %v12570_v49 = vpop.xlane.xlu1 %12569  ;;  %v17321_v62 = vmul.f32 0.00048828125, %v12433_v38 }
 0x843   :  { %v12606_v38 = vmul.f32 0.00048828125, %v12570_v49 }
 0x844   :  { %v12610_v0 = vmul.f32 %v17321_v62, %v17321_v62  ;;  %v12649_v41 = vsub.f32 %v18151_v22, %v17321_v62  ;;  %v12650_v7 = vsub.f32 %v17130_v17, %v17321_v62  ;;  %v12651_v30 = vsub.f32 %v17150_v48, %v17321_v62 }
 0x845   :  { %v12553_v46 = vpop.xlane.xlu0 %12552  ;;  %v18181_v6 = vsub.f32 %v18144_v56, %v17321_v62  ;;  %v18186_v56 = vsub.f32 %v16942_v39, %v17321_v62 }
 0x846   :  { %v12450_v45 = vpop.xlane.xlu1 %12449  ;;  %v12614_v2 = vsub.f32 %v12606_v38, %v12610_v0  ;;  %v18147_v0 = vld [vmem:[#allocation52_spill] sm:$0xff]  ;;  %v12605_v19 = vmul.f32 0.00048828125, %v12553_v46 }
 0x847   :  { %v17363_v26 = vmul.f32 0.00048828125, %v12450_v45  ;;  %v18150_v45 = vld [vmem:[#allocation59_spill] sm:$0xff] }
 0x848   :  { %v12618_v49 = vmax.f32 %v12614_v2, 0.0  ;;  %v12652_v2 = vsub.f32 %v17156_v42, %v17321_v62  ;;  %v18201_v22 = vld [vmem:[#allocation91_spill] sm:$0xff] }
 0x849   :  { %18148 = vst [vmem:[#allocation27_spill] sm:$0xff] %v17363_v26  ;;  %v12587_v15 = vpop.xlane.xlu0 %12586  ;;  %v12611_v33 = vmul.f32 %v17363_v26, %v17363_v26 }
 0x84a   :  { %v12467_v52 = vpop.xlane.xlu1 %12466  ;;  %v12686_v61 = vadd.f32 1e-05, %v12618_v49  ;;  %v12607_v46 = vmul.f32 0.00048828125, %v12587_v15  ;;  %v12613_v49 = vsub.f32 %v12605_v19, %v12609_v36  ;;  %v18182_v19 = vsub.f32 %v18145_v60, %v17321_v62 }
 0x84b   :  { %v17401_v15 = vmul.f32 0.00048828125, %v12467_v52  ;;  %v18187_v60 = vsub.f32 %v16982_v27, %v17321_v62  ;;  %v18196_v52 = vld [vmem:[#allocation78_spill] sm:$0xff] }
 0x84c   :  { %15373 = vrsqrt.f32 %v12686_v61  ;;  %v12617_v36 = vmax.f32 %v12613_v49, 0.0  ;;  %v12615_v17 = vsub.f32 %v12607_v46, %v12611_v33  ;;  %v18179_v46 = vsub.f32 %v16789_v29, %v17321_v62 }
 0x84d   :  { %18160 = vst [vmem:[#allocation42_spill] sm:$0xff] %v17401_v15  ;;  %v17457_v33 = vmul.f32 %v17401_v15, %v17401_v15  ;;  %v18183_v49 = vsub.f32 %v18146_v43, %v17321_v62  ;;  %v18184_v29 = vsub.f32 %v18147_v0, %v17321_v62  ;;  %v18188_v43 = vsub.f32 %v17010_v50, %v17321_v62  ;;  %v18200_v15 = vld [vmem:[#allocation87_spill] sm:$0xff] }
 0x84e   :  { %v12604_v38 = vpop.xlane.xlu1 %12603  ;;  %v12685_v42 = vadd.f32 1e-05, %v12617_v36  ;;  %v12619_v53 = vmax.f32 %v12615_v17, 0.0  ;;  %v18189_v0 = vsub.f32 %v17030_v47, %v17321_v62 }
 0x84f   :  { %v17423_v51 = vmul.f32 0.00048828125, %v12604_v38  ;;  %v18180_v38 = vsub.f32 %v16792_v13, %v17321_v62  ;;  %v18185_v13 = vsub.f32 %v18149_v54, %v17321_v62  ;;  %v18190_v54 = vsub.f32 %v18150_v45, %v17321_v62 }
 0x850   :  { %15375 = vrsqrt.f32 %v12685_v42 }
 0x856   :  { %v15374_v36 = vpop.eup %15373 }
 0x857   :  { %v12709_v42 = vmul.f32 %v15374_v36, %v18179_v46  ;;  %v12710_v48 = vmul.f32 %v15374_v36, %v18180_v38  ;;  %v12711_v61 = vmul.f32 %v15374_v36, %v18181_v6  ;;  %v12712_v17 = vmul.f32 %v15374_v36, %v18182_v19 }
 0x858   :  { %v12713_v37 = vmul.f32 %v15374_v36, %v18183_v49  ;;  %v12714_v46 = vmul.f32 %v15374_v36, %v18184_v29  ;;  %v12715_v38 = vmul.f32 %v15374_v36, %v18185_v13  ;;  %v12716_v6 = vmul.f32 %v15374_v36, %v18186_v56 }
 0x859   :  { %v12717_v19 = vmul.f32 %v15374_v36, %v18187_v60  ;;  %v12718_v49 = vmul.f32 %v15374_v36, %v18188_v43  ;;  %v12719_v29 = vmul.f32 %v15374_v36, %v18189_v0  ;;  %v12720_v13 = vmul.f32 %v15374_v36, %v18190_v54 }
 0x85a   :  { %v12721_v24 = vmul.f32 %v15374_v36, %v12649_v41  ;;  %v12722_v9 = vmul.f32 %v15374_v36, %v12650_v7  ;;  %v12723_v39 = vmul.f32 %v15374_v36, %v12651_v30  ;;  %v12724_v56 = vmul.f32 %v15374_v36, %v12652_v2  ;;  %v15376_v36 = vpop.eup %15375 }
 0x85b   :  { %v12857_v44 = vmul.f32 %v17216_v8, %v12709_v42  ;;  %v12858_v27 = vmul.f32 %v17240_v16, %v12710_v48  ;;  %v12859_v60 = vmul.f32 %v17228_v11, %v12711_v61  ;;  %v12860_v50 = vmul.f32 %v17252_v10, %v12712_v17 }
 0x85c   :  { %v12861_v43 = vmul.f32 %v17264_v58, %v12713_v37  ;;  %v12862_v47 = vmul.f32 %v17290_v21, %v12714_v46  ;;  %v12863_v0 = vmul.f32 %v17278_v25, %v12715_v38  ;;  %v12864_v62 = vmul.f32 %v17302_v63, %v12716_v6  ;;  %v18191_v6 = vld [vmem:[#allocation84_spill] sm:$0xff] }
 0x85d   :  { %v12865_v41 = vmul.f32 %v17219_v23, %v12717_v19  ;;  %v12866_v7 = vmul.f32 %v17243_v3, %v12718_v49  ;;  %v12867_v30 = vmul.f32 %v17231_v12, %v12719_v29  ;;  %v12868_v2 = vmul.f32 %v17255_v35, %v12720_v13  ;;  %v18192_v49 = vld [vmem:[#allocation88_spill] sm:$0xff] }
 0x85e   :  { %v12869_v45 = vmul.f32 %v17269_v28, %v12721_v24  ;;  %v12870_v48 = vmul.f32 %v17293_v20, %v12722_v9  ;;  %v12871_v37 = vmul.f32 %v17281_v5, %v12723_v39  ;;  %v12872_v61 = vmul.f32 %v17305_v57, %v12724_v56  ;;  %v18193_v24 = vld [vmem:[#allocation86_spill] sm:$0xff]  ;;  %v18194_v13 = vld [vmem:[#allocation76_spill] sm:$0xff] }
 0x85f   :  { %v13005_v42 = vadd.f32 %v17222_v34, %v12857_v44  ;;  %v13006_v17 = vadd.f32 %v17246_v55, %v12858_v27  ;;  %v13007_v46 = vadd.f32 %v17234_v1, %v12859_v60  ;;  %v13008_v38 = vadd.f32 %v17258_v59, %v12860_v50  ;;  %v18195_v56 = vld [vmem:[#allocation80_spill] sm:$0xff] }
 0x860   :  { %v13009_v19 = vadd.f32 %v18191_v6, %v12861_v43  ;;  %v13010_v29 = vadd.f32 %v18192_v49, %v12862_v47  ;;  %v13011_v54 = vadd.f32 %v18193_v24, %v12863_v0  ;;  %v13012_v9 = vadd.f32 %v17308_v31, %v12864_v62 }
 0x861   :  { %v13013_v39 = vadd.f32 %v18194_v13, %v12865_v41  ;;  %v13014_v14 = vadd.f32 %v18195_v56, %v12866_v7  ;;  %v13015_v44 = vadd.f32 %v18196_v52, %v12867_v30  ;;  %v13016_v27 = vadd.f32 %v18197_v18, %v12868_v2 }
 0x862   :  { %v13017_v60 = vadd.f32 %v18198_v4, %v12869_v45  ;;  %v13018_v50 = vadd.f32 %v18199_v40, %v12870_v48  ;;  %v13019_v43 = vadd.f32 %v18200_v15, %v12871_v37  ;;  %v13020_v47 = vadd.f32 %v18201_v22, %v12872_v61  ;;  %v18202_v45 = vld [vmem:[#allocation24_spill] sm:$0xff]  ;;  %v18203_v48 = vld [vmem:[#allocation83_spill] sm:$0xff] }
 0x863   :  { %v14889_v32 = vpack.c.bf16 %v13006_v17, %v13005_v42  ;;  %v14890_v0 = vpack.c.bf16 %v13008_v38, %v13007_v46  ;;  %v14891_v26 = vpack.c.bf16 %v13010_v29, %v13009_v19  ;;  %v14892_v62 = vpack.c.bf16 %v13012_v9, %v13011_v54  ;;  %v18205_v42 = vld [vmem:[#allocation26_spill] sm:$0xff]  ;;  %v18213_v54 = vld [vmem:[#allocation48_spill] sm:$0xff] }
 0x864   :  { %v14893_v31 = vpack.c.bf16 %v13014_v14, %v13013_v39  ;;  %v14894_v41 = vpack.c.bf16 %v13016_v27, %v13015_v44  ;;  %v14895_v13 = vpack.c.bf16 %v13018_v50, %v13017_v60  ;;  %v14896_v7 = vpack.c.bf16 %v13020_v47, %v13019_v43  ;;  %v18217_v60 = vld [vmem:[#allocation29_spill] sm:$0xff]  ;;  %v18219_v47 = vld [vmem:[#allocation22_spill] sm:$0xff] }
 0x865   :  { %13253 = vst [vmem:[#allocation14 + $0x40] sm:$0xff] %v14889_v32  ;;  %13254 = vst [vmem:[#allocation14 + $0x48] sm:$0xff] %v14890_v0  ;;  %v12687_v30 = vadd.f32 1e-05, %v12619_v53  ;;  %v12616_v2 = vsub.f32 %v17423_v51, %v17457_v33  ;;  %v18204_v37 = vsub.f32 %v18202_v45, %v18203_v48  ;;  %v18206_v17 = vsub.f32 %v18205_v42, %v18203_v48  ;;  %v18207_v32 = vld [vmem:[#allocation25_spill] sm:$0xff]  ;;  %v18209_v53 = vld [vmem:[#allocation39_spill] sm:$0xff] }
 0x866   :  { %13255 = vst [vmem:[#allocation14 + $0x50] sm:$0xff] %v14891_v26  ;;  %13256 = vst [vmem:[#allocation14 + $0x58] sm:$0xff] %v14892_v62  ;;  %v18208_v26 = vsub.f32 %v18207_v32, %v18203_v48  ;;  %v18210_v38 = vsub.f32 %v18209_v53, %v18203_v48  ;;  %v18211_v33 = vld [vmem:[#allocation45_spill] sm:$0xff]  ;;  %v18214_v9 = vsub.f32 %v18213_v54, %v18203_v48  ;;  %v18225_v42 = vld [vmem:[#allocation58_spill] sm:$0xff] }
 0x867   :  { %v12693_v61 = vmul.f32 %v15376_v36, %v18204_v37  ;;  %v12694_v46 = vmul.f32 %v15376_v36, %v18206_v17  ;;  %13257 = vst [vmem:[#allocation14 + $0x60] sm:$0xff] %v14893_v31  ;;  %13258 = vst [vmem:[#allocation14 + $0x68] sm:$0xff] %v14894_v41  ;;  %v18212_v19 = vsub.f32 %v18211_v33, %v18203_v48  ;;  %15377 = vrsqrt.f32 %v12687_v30  ;;  %v18221_v41 = vld [vmem:[#allocation53_spill] sm:$0xff]  ;;  %v18223_v37 = vld [vmem:[#allocation55_spill] sm:$0xff] }
 0x868   :  { %13259 = vst [vmem:[#allocation14 + $0x70] sm:$0xff] %v14895_v13  ;;  %13260 = vst [vmem:[#allocation14 + $0x78] sm:$0xff] %v14896_v7  ;;  %v12695_v14 = vmul.f32 %v15376_v36, %v18208_v26  ;;  %v12696_v51 = vmul.f32 %v15376_v36, %v18210_v38  ;;  %v12698_v39 = vmul.f32 %v15376_v36, %v18214_v9  ;;  %v12620_v31 = vmax.f32 %v12616_v2, 0.0  ;;  %v18215_v13 = vld [vmem:[#allocation28_spill] sm:$0xff]  ;;  %v18227_v53 = vld [vmem:[#allocation62_spill] sm:$0xff] }
 0x869   :  { %v12697_v29 = vmul.f32 %v15376_v36, %v18212_v19  ;;  %v18216_v44 = vsub.f32 %v18215_v13, %v18203_v48  ;;  %v18218_v50 = vsub.f32 %v18217_v60, %v18203_v48  ;;  %v18220_v0 = vsub.f32 %v18219_v47, %v18203_v48  ;;  %v18229_v19 = vld [vmem:[#allocation63_spill] sm:$0xff]  ;;  %v18231_v13 = vld [vmem:[#allocation65_spill] sm:$0xff] }
 0x86a   :  { %v18222_v7 = vsub.f32 %v18221_v41, %v18203_v48  ;;  %v18224_v30 = vsub.f32 %v18223_v37, %v18203_v48  ;;  %v18226_v17 = vsub.f32 %v18225_v42, %v18203_v48  ;;  %v12688_v26 = vadd.f32 1e-05, %v12620_v31 }
 0x86b   :  { %v12699_v27 = vmul.f32 %v15376_v36, %v18216_v44  ;;  %v12700_v43 = vmul.f32 %v15376_v36, %v18218_v50  ;;  %v12701_v62 = vmul.f32 %v15376_v36, %v18220_v0  ;;  %v18228_v38 = vsub.f32 %v18227_v53, %v18203_v48  ;;  %v18233_v50 = vld [vmem:[#allocation66_spill] sm:$0xff] }
 0x86c   :  { %v12702_v45 = vmul.f32 %v15376_v36, %v18222_v7  ;;  %v12703_v2 = vmul.f32 %v15376_v36, %v18224_v30  ;;  %v12704_v32 = vmul.f32 %v15376_v36, %v18226_v17  ;;  %v18230_v54 = vsub.f32 %v18229_v19, %v18203_v48  ;;  %v18244_v19 = vld [vmem:[#allocation76_spill] sm:$0xff] }
 0x86d   :  { %v12705_v33 = vmul.f32 %v15376_v36, %v18228_v38  ;;  %v18232_v44 = vsub.f32 %v18231_v13, %v18203_v48  ;;  %v18234_v47 = vsub.f32 %v18233_v50, %v18203_v48  ;;  %v12841_v41 = vmul.f32 %v17216_v8, %v12693_v61  ;;  %v18242_v38 = vld [vmem:[#allocation90_spill] sm:$0xff] }
 0x86e   :  { %v12706_v9 = vmul.f32 %v15376_v36, %v18230_v54  ;;  %v12842_v31 = vmul.f32 %v17240_v16, %v12694_v46  ;;  %v12843_v7 = vmul.f32 %v17228_v11, %v12695_v14  ;;  %15379 = vrsqrt.f32 %v12688_v26 }
 0x86f   :  { %v12707_v60 = vmul.f32 %v15376_v36, %v18232_v44  ;;  %v12708_v0 = vmul.f32 %v15376_v36, %v18234_v47  ;;  %v12844_v37 = vmul.f32 %v17252_v10, %v12696_v51  ;;  %v12845_v30 = vmul.f32 %v17264_v58, %v12697_v29 }
 0x870   :  { %v12846_v42 = vmul.f32 %v17290_v21, %v12698_v39  ;;  %v12847_v17 = vmul.f32 %v17278_v25, %v12699_v27  ;;  %v12848_v53 = vmul.f32 %v17302_v63, %v12700_v43  ;;  %v12849_v48 = vmul.f32 %v17219_v23, %v12701_v62 }
 0x871   :  { %v12850_v36 = vmul.f32 %v17243_v3, %v12702_v45  ;;  %v12851_v61 = vmul.f32 %v17231_v12, %v12703_v2  ;;  %v12852_v46 = vmul.f32 %v17255_v35, %v12704_v32  ;;  %v12853_v14 = vmul.f32 %v17269_v28, %v12705_v33  ;;  %v15378_v13 = vpop.eup %15377 }
 0x872   :  { %v12854_v51 = vmul.f32 %v17293_v20, %v12706_v9  ;;  %v17592_v29 = vmul.f32 %v17281_v5, %v12707_v60  ;;  %v17595_v39 = vmul.f32 %v17305_v57, %v12708_v0  ;;  %v17598_v27 = vadd.f32 %v17222_v34, %v12841_v41  ;;  %v18251_v0 = vld [vmem:[#allocation40_spill] sm:$0xff]  ;;  %v18252_v41 = vld [vmem:[#allocation27_spill] sm:$0xff]  ;;  %v18315_v34 = vld [vmem:[#allocation74_spill] sm:$0xff] }
 0x873   :  { %v17601_v43 = vadd.f32 %v17246_v55, %v12842_v31  ;;  %v17604_v62 = vadd.f32 %v17234_v1, %v12843_v7  ;;  %v17607_v45 = vadd.f32 %v17258_v59, %v12844_v37  ;;  %v17610_v2 = vadd.f32 %v18191_v6, %v12845_v30  ;;  %v18254_v37 = vld [vmem:[#allocation41_spill] sm:$0xff]  ;;  %v18307_v6 = vld [vmem:[#allocation38_spill] sm:$0xff]  ;;  %v18311_v1 = vld [vmem:[#allocation71_spill] sm:$0xff] }
 0x874   :  { %18235 = vst [vmem:[#allocation49_spill] sm:$0xff] %v17598_v27  ;;  %v17613_v32 = vadd.f32 %v18192_v49, %v12846_v42  ;;  %v17616_v26 = vadd.f32 %v18193_v24, %v12847_v17  ;;  %v17619_v33 = vadd.f32 %v18242_v38, %v12848_v53  ;;  %v17622_v54 = vadd.f32 %v18244_v19, %v12849_v48  ;;  %v18256_v17 = vld [vmem:[#allocation46_spill] sm:$0xff]  ;;  %v18284_v27 = vld [vmem:[#allocation43_spill] sm:$0xff]  ;;  %v18301_v38 = vld [vmem:[#allocation57_spill] sm:$0xff] }
 0x875   :  { %18236 = vst [vmem:[#allocation52_spill] sm:$0xff] %v17601_v43  ;;  %18237 = vst [vmem:[#allocation30_spill] sm:$0xff] %v17604_v62  ;;  %v17625_v9 = vadd.f32 %v18195_v56, %v12850_v36  ;;  %v17628_v44 = vadd.f32 %v18196_v52, %v12851_v61  ;;  %v17631_v60 = vadd.f32 %v18197_v18, %v12852_v46  ;;  %v18258_v36 = vld [vmem:[#allocation50_spill] sm:$0xff]  ;;  %v18282_v43 = vld [vmem:[#allocation72_spill] sm:$0xff] }
 0x876   :  { %18238 = vst [vmem:[#allocation59_spill] sm:$0xff] %v17607_v45  ;;  %18239 = vst [vmem:[#allocation64_spill] sm:$0xff] %v17610_v2  ;;  %v17634_v50 = vadd.f32 %v18198_v4, %v12853_v14  ;;  %v17637_v47 = vadd.f32 %v18199_v40, %v12854_v51  ;;  %v18253_v31 = vsub.f32 %v18251_v0, %v18252_v41  ;;  %v18260_v14 = vld [vmem:[#allocation21_spill] sm:$0xff]  ;;  %v18276_v2 = vld [vmem:[#allocation67_spill] sm:$0xff] }
 0x877   :  { %18240 = vst [vmem:[#allocation87_spill] sm:$0xff] %v17613_v32  ;;  %18241 = vst [vmem:[#allocation24_spill] sm:$0xff] %v17616_v26  ;;  %v18255_v30 = vsub.f32 %v18254_v37, %v18252_v41  ;;  %v18257_v53 = vsub.f32 %v18256_v17, %v18252_v41  ;;  %v18259_v61 = vsub.f32 %v18258_v36, %v18252_v41  ;;  %v18274_v26 = vld [vmem:[#allocation61_spill] sm:$0xff]  ;;  %v18278_v45 = vld [vmem:[#allocation68_spill] sm:$0xff] }
 0x878   :  { %18243 = vst [vmem:[#allocation83_spill] sm:$0xff] %v17619_v33  ;;  %18245 = vst [vmem:[#allocation26_spill] sm:$0xff] %v17622_v54  ;;  %v12725_v7 = vmul.f32 %v15378_v13, %v18253_v31  ;;  %v18261_v51 = vsub.f32 %v18260_v14, %v18252_v41  ;;  %v18270_v54 = vld [vmem:[#allocation56_spill] sm:$0xff]  ;;  %v15380_v32 = vpop.eup %15379  ;;  %v18280_v62 = vld [vmem:[#allocation70_spill] sm:$0xff] }
 0x879   :  { %18246 = vst [vmem:[#allocation25_spill] sm:$0xff] %v17625_v9  ;;  %18247 = vst [vmem:[#allocation39_spill] sm:$0xff] %v17628_v44  ;;  %v12726_v42 = vmul.f32 %v15378_v13, %v18255_v30  ;;  %v12727_v48 = vmul.f32 %v15378_v13, %v18257_v53  ;;  %v12728_v46 = vmul.f32 %v15378_v13, %v18259_v61  ;;  %v18266_v44 = vld [vmem:[#allocation31_spill] sm:$0xff]  ;;  %v18268_v9 = vld [vmem:[#allocation54_spill] sm:$0xff] }
 0x87a   :  { %18248 = vst [vmem:[#allocation45_spill] sm:$0xff] %v17631_v60  ;;  %18249 = vst [vmem:[#allocation48_spill] sm:$0xff] %v17634_v50  ;;  %v18262_v50 = vld [vmem:[#allocation23_spill] sm:$0xff]  ;;  %v18264_v60 = vld [vmem:[#allocation34_spill] sm:$0xff]  ;;  %v18267_v17 = vsub.f32 %v18266_v44, %v18252_v41  ;;  %v18269_v36 = vsub.f32 %v18268_v9, %v18252_v41  ;;  %v18271_v14 = vsub.f32 %v18270_v54, %v18252_v41 }
 0x87b   :  { %18250 = vst [vmem:[#allocation28_spill] sm:$0xff] %v17637_v47  ;;  %v12729_v47 = vmul.f32 %v15378_v13, %v18261_v51  ;;  %v18263_v0 = vsub.f32 %v18262_v50, %v18252_v41  ;;  %v18265_v37 = vsub.f32 %v18264_v60, %v18252_v41  ;;  %v18272_v33 = vld [vmem:[#allocation60_spill] sm:$0xff]  ;;  %v18275_v60 = vsub.f32 %v18274_v26, %v18252_v41  ;;  %v18285_v26 = vld [vmem:[#allocation42_spill] sm:$0xff]  ;;  %v18289_v18 = vld [vmem:[#allocation47_spill] sm:$0xff] }
 0x87c   :  { %v12732_v53 = vmul.f32 %v15378_v13, %v18267_v17  ;;  %v12733_v61 = vmul.f32 %v15378_v13, %v18269_v36  ;;  %v12734_v51 = vmul.f32 %v15378_v13, %v18271_v14  ;;  %v18273_v50 = vsub.f32 %v18272_v33, %v18252_v41  ;;  %v18287_v4 = vld [vmem:[#allocation44_spill] sm:$0xff]  ;;  %v18291_v52 = vld [vmem:[#allocation51_spill] sm:$0xff]  ;;  %v18303_v24 = vld [vmem:[#allocation37_spill] sm:$0xff] }
 0x87d   :  { %v12730_v31 = vmul.f32 %v15378_v13, %v18263_v0  ;;  %v12731_v30 = vmul.f32 %v15378_v13, %v18265_v37  ;;  %v12736_v37 = vmul.f32 %v15378_v13, %v18275_v60  ;;  %v18277_v44 = vsub.f32 %v18276_v2, %v18252_v41  ;;  %v18293_v56 = vld [vmem:[#allocation32_spill] sm:$0xff]  ;;  %v18299_v19 = vld [vmem:[#allocation35_spill] sm:$0xff]  ;;  %v18309_v59 = vld [vmem:[#allocation69_spill] sm:$0xff] }
 0x87e   :  { %v12735_v0 = vmul.f32 %v15378_v13, %v18273_v50  ;;  %v18279_v9 = vsub.f32 %v18278_v45, %v18252_v41  ;;  %v18281_v54 = vsub.f32 %v18280_v62, %v18252_v41  ;;  %v18283_v33 = vsub.f32 %v18282_v43, %v18252_v41  ;;  %v18295_v41 = vld [vmem:[#allocation20_spill] sm:$0xff]  ;;  %v18313_v55 = vld [vmem:[#allocation73_spill] sm:$0xff] }
 0x87f   :  { %v12737_v17 = vmul.f32 %v15378_v13, %v18277_v44  ;;  %v18286_v60 = vsub.f32 %v18284_v27, %v18285_v26  ;;  %v18288_v2 = vsub.f32 %v18287_v4, %v18285_v26  ;;  %v18290_v45 = vsub.f32 %v18289_v18, %v18285_v26  ;;  %v18305_v49 = vld [vmem:[#allocation36_spill] sm:$0xff] }
 0x880   :  { %v12738_v36 = vmul.f32 %v15378_v13, %v18279_v9  ;;  %v12739_v14 = vmul.f32 %v15378_v13, %v18281_v54  ;;  %v12740_v50 = vmul.f32 %v15378_v13, %v18283_v33  ;;  %v18292_v62 = vsub.f32 %v18291_v52, %v18285_v26 }
 0x881   :  { %v12741_v40 = vmul.f32 %v15380_v32, %v18286_v60  ;;  %v12742_v44 = vmul.f32 %v15380_v32, %v18288_v2  ;;  %v12743_v9 = vmul.f32 %v15380_v32, %v18290_v45  ;;  %v18294_v43 = vsub.f32 %v18293_v56, %v18285_v26  ;;  %v18297_v60 = vld [vmem:[#allocation33_spill] sm:$0xff] }
 0x882   :  { %v12744_v54 = vmul.f32 %v15380_v32, %v18292_v62  ;;  %v18296_v27 = vsub.f32 %v18295_v41, %v18285_v26  ;;  %v18298_v4 = vsub.f32 %v18297_v60, %v18285_v26  ;;  %v18300_v18 = vsub.f32 %v18299_v19, %v18285_v26 }
 0x883   :  { %v12745_v13 = vmul.f32 %v15380_v32, %v18294_v43  ;;  %v18302_v52 = vsub.f32 %v18301_v38, %v18285_v26  ;;  %v18304_v56 = vsub.f32 %v18303_v24, %v18285_v26  ;;  %v18306_v41 = vsub.f32 %v18305_v49, %v18285_v26 }
 0x884   :  { %v12746_v33 = vmul.f32 %v15380_v32, %v18296_v27  ;;  %v12747_v2 = vmul.f32 %v15380_v32, %v18298_v4  ;;  %v12748_v45 = vmul.f32 %v15380_v32, %v18300_v18  ;;  %v18308_v60 = vsub.f32 %v18307_v6, %v18285_v26 }
 0x885   :  { %v12749_v62 = vmul.f32 %v15380_v32, %v18302_v52  ;;  %v12750_v43 = vmul.f32 %v15380_v32, %v18304_v56  ;;  %v12751_v27 = vmul.f32 %v15380_v32, %v18306_v41  ;;  %v18310_v19 = vsub.f32 %v18309_v59, %v18285_v26 }
 0x886   :  { %v12752_v4 = vmul.f32 %v15380_v32, %v18308_v60  ;;  %v18312_v38 = vsub.f32 %v18311_v1, %v18285_v26  ;;  %v18314_v24 = vsub.f32 %v18313_v55, %v18285_v26  ;;  %v18316_v49 = vsub.f32 %v18315_v34, %v18285_v26  ;;  %v18320_v26 = vld [vmem:[#allocation77_spill] sm:$0xff] }
 0x887   :  { %v12753_v18 = vmul.f32 %v15380_v32, %v18310_v19  ;;  %v12873_v22 = vmul.f32 %v17216_v8, %v12725_v7  ;;  %v12874_v6 = vmul.f32 %v17240_v16, %v12726_v42  ;;  %v12875_v60 = vmul.f32 %v17228_v11, %v12727_v48 }
 0x888   :  { %v12754_v52 = vmul.f32 %v15380_v32, %v18312_v38  ;;  %v12755_v56 = vmul.f32 %v15380_v32, %v18314_v24  ;;  %v12756_v41 = vmul.f32 %v15380_v32, %v18316_v49  ;;  %v12876_v59 = vmul.f32 %v17252_v10, %v12728_v46 }
 0x889   :  { %v12877_v19 = vmul.f32 %v17264_v58, %v12729_v47  ;;  %v12878_v1 = vmul.f32 %v17290_v21, %v12730_v31  ;;  %v12879_v38 = vmul.f32 %v17278_v25, %v12731_v30  ;;  %v12880_v55 = vmul.f32 %v17302_v63, %v12732_v53 }
 0x88a   :  { %v12881_v24 = vmul.f32 %v17219_v23, %v12733_v61  ;;  %v12882_v34 = vmul.f32 %v17243_v3, %v12734_v51  ;;  %v12883_v32 = vmul.f32 %v17231_v12, %v12735_v0  ;;  %v12884_v7 = vmul.f32 %v17255_v35, %v12736_v37 }
 0x88b   :  { %v12885_v42 = vmul.f32 %v17269_v28, %v12737_v17  ;;  %v12886_v48 = vmul.f32 %v17293_v20, %v12738_v36  ;;  %v12887_v47 = vmul.f32 %v17281_v5, %v12739_v14  ;;  %v12888_v46 = vmul.f32 %v17305_v57, %v12740_v50  ;;  %v18319_v50 = vld [vmem:[#allocation79_spill] sm:$0xff] }
 0x88c   :  { %v12889_v31 = vmul.f32 %v17216_v8, %v12741_v40  ;;  %v12890_v30 = vmul.f32 %v17240_v16, %v12742_v44  ;;  %v12891_v53 = vmul.f32 %v17228_v11, %v12743_v9  ;;  %v12892_v61 = vmul.f32 %v17252_v10, %v12744_v54  ;;  %v18321_v44 = vld [vmem:[#allocation81_spill] sm:$0xff]  ;;  %v18322_v9 = vld [vmem:[#allocation84_spill] sm:$0xff] }
 0x88d   :  { %v12893_v51 = vmul.f32 %v17264_v58, %v12745_v13  ;;  %v12894_v0 = vmul.f32 %v17290_v21, %v12746_v33  ;;  %v12895_v37 = vmul.f32 %v17278_v25, %v12747_v2  ;;  %v12896_v17 = vmul.f32 %v17302_v63, %v12748_v45  ;;  %v18317_v63 = vld [vmem:[#allocation91_spill] sm:$0xff]  ;;  %v18323_v54 = vld [vmem:[#allocation88_spill] sm:$0xff]  ;;  %v18324_v13 = vld [vmem:[#allocation86_spill] sm:$0xff] }
 0x88e   :  { %v12897_v36 = vmul.f32 %v17219_v23, %v12749_v62  ;;  %v12898_v14 = vmul.f32 %v17243_v3, %v12750_v43  ;;  %v12899_v40 = vmul.f32 %v17231_v12, %v12751_v27  ;;  %v12900_v8 = vmul.f32 %v17255_v35, %v12752_v4  ;;  %v18318_v25 = vld [vmem:[#allocation75_spill] sm:$0xff]  ;;  %v18325_v33 = vld [vmem:[#allocation90_spill] sm:$0xff]  ;;  %v18327_v62 = vld [vmem:[#allocation80_spill] sm:$0xff] }
 0x88f   :  { %v12901_v11 = vmul.f32 %v17269_v28, %v12753_v18  ;;  %v12902_v16 = vmul.f32 %v17293_v20, %v12754_v52  ;;  %v12903_v10 = vmul.f32 %v17281_v5, %v12755_v56  ;;  %v12904_v21 = vmul.f32 %v17305_v57, %v12756_v41  ;;  %v18328_v43 = vld [vmem:[#allocation78_spill] sm:$0xff]  ;;  %v18330_v18 = vld [vmem:[#allocation85_spill] sm:$0xff] }
 0x890   :  { %v13003_v58 = vadd.f32 %v18200_v15, %v17592_v29  ;;  %v13004_v23 = vadd.f32 %v18317_v63, %v17595_v39  ;;  %v13021_v3 = vadd.f32 %v18318_v25, %v12873_v22  ;;  %v13022_v12 = vadd.f32 %v18319_v50, %v12874_v6  ;;  %v18326_v29 = vld [vmem:[#allocation76_spill] sm:$0xff]  ;;  %v18329_v27 = vld [vmem:[#allocation82_spill] sm:$0xff]  ;;  %v18331_v56 = vld [vmem:[#allocation89_spill] sm:$0xff] }
 0x891   :  { %v13023_v35 = vadd.f32 %v18320_v26, %v12875_v60  ;;  %v13024_v28 = vadd.f32 %v18321_v44, %v12876_v59  ;;  %v13025_v20 = vadd.f32 %v18322_v9, %v12877_v19  ;;  %v13026_v5 = vadd.f32 %v18323_v54, %v12878_v1 }
 0x892   :  { %v13027_v57 = vadd.f32 %v18324_v13, %v12879_v38  ;;  %v13028_v2 = vadd.f32 %v18325_v33, %v12880_v55  ;;  %v13029_v45 = vadd.f32 %v18326_v29, %v12881_v24  ;;  %v13030_v39 = vadd.f32 %v18327_v62, %v12882_v34 }
 0x893   :  { %v13031_v22 = vadd.f32 %v18328_v43, %v12883_v32  ;;  %v13032_v4 = vadd.f32 %v18329_v27, %v12884_v7  ;;  %v13033_v52 = vadd.f32 %v18330_v18, %v12885_v42  ;;  %v13034_v49 = vadd.f32 %v18331_v56, %v12886_v48 }
 0x894   :  { %v13035_v41 = vadd.f32 %v18200_v15, %v12887_v47  ;;  %v13036_v6 = vadd.f32 %v18317_v63, %v12888_v46  ;;  %v13037_v60 = vadd.f32 %v18318_v25, %v12889_v31  ;;  %v13038_v59 = vadd.f32 %v18319_v50, %v12890_v30  ;;  %v18339_v50 = vld [vmem:[#allocation83_spill] sm:$0xff] }
 0x895   :  { %v13039_v19 = vadd.f32 %v18320_v26, %v12891_v53  ;;  %v13040_v1 = vadd.f32 %v18321_v44, %v12892_v61  ;;  %v13041_v38 = vadd.f32 %v18322_v9, %v12893_v51  ;;  %v13042_v55 = vadd.f32 %v18323_v54, %v12894_v0  ;;  %v18332_v53 = vld [vmem:[#allocation49_spill] sm:$0xff]  ;;  %v18333_v61 = vld [vmem:[#allocation52_spill] sm:$0xff]  ;;  %v18334_v0 = vld [vmem:[#allocation30_spill] sm:$0xff] }
 0x896   :  { %v13043_v24 = vadd.f32 %v18324_v13, %v12895_v37  ;;  %v13044_v34 = vadd.f32 %v18325_v33, %v12896_v17  ;;  %v13045_v32 = vadd.f32 %v18326_v29, %v12897_v36  ;;  %v13046_v7 = vadd.f32 %v18327_v62, %v12898_v14  ;;  %v18335_v37 = vld [vmem:[#allocation59_spill] sm:$0xff]  ;;  %v18336_v36 = vld [vmem:[#allocation64_spill] sm:$0xff]  ;;  %v18340_v26 = vld [vmem:[#allocation26_spill] sm:$0xff] }
 0x897   :  { %v13047_v42 = vadd.f32 %v18328_v43, %v12899_v40  ;;  %v13048_v48 = vadd.f32 %v18329_v27, %v12900_v8  ;;  %v13049_v47 = vadd.f32 %v18330_v18, %v12901_v11  ;;  %v13050_v46 = vadd.f32 %v18331_v56, %v12902_v16  ;;  %v18337_v14 = vld [vmem:[#allocation87_spill] sm:$0xff]  ;;  %v18338_v40 = vld [vmem:[#allocation24_spill] sm:$0xff]  ;;  %v18341_v11 = vld [vmem:[#allocation25_spill] sm:$0xff] }
 0x898   :  { %v13051_v31 = vadd.f32 %v18200_v15, %v12903_v10  ;;  %v13052_v30 = vadd.f32 %v18317_v63, %v12904_v21  ;;  %v14881_v51 = vpack.c.bf16 %v18333_v61, %v18332_v53  ;;  %v14882_v17 = vpack.c.bf16 %v18335_v37, %v18334_v0  ;;  %v18342_v16 = vld [vmem:[#allocation39_spill] sm:$0xff]  ;;  %v18343_v9 = vld [vmem:[#allocation45_spill] sm:$0xff]  ;;  %v18344_v10 = vld [vmem:[#allocation48_spill] sm:$0xff] }
 0x899   :  { %v14883_v25 = vpack.c.bf16 %v18337_v14, %v18336_v36  ;;  %v14884_v8 = vpack.c.bf16 %v18339_v50, %v18338_v40  ;;  %v14885_v44 = vpack.c.bf16 %v18341_v11, %v18340_v26  ;;  %v14886_v15 = vpack.c.bf16 %v18343_v9, %v18342_v16  ;;  %v18345_v21 = vld [vmem:[#allocation28_spill] sm:$0xff] }
 0x89a   :  { %v14887_v63 = vpack.c.bf16 %v18345_v21, %v18344_v10  ;;  %v14888_v54 = vpack.c.bf16 %v13004_v23, %v13003_v58  ;;  %v14897_v13 = vpack.c.bf16 %v13022_v12, %v13021_v3  ;;  %v14898_v33 = vpack.c.bf16 %v13024_v28, %v13023_v35  ;;  %13245 = vst [vmem:[#allocation14] sm:$0xff] %v14881_v51 }
 0x89b   :  { %13246 = vst [vmem:[#allocation14 + $0x8] sm:$0xff] %v14882_v17  ;;  %v14899_v29 = vpack.c.bf16 %v13026_v5, %v13025_v20  ;;  %v14900_v62 = vpack.c.bf16 %v13028_v2, %v13027_v57  ;;  %v14901_v43 = vpack.c.bf16 %v13030_v39, %v13029_v45  ;;  %v14902_v27 = vpack.c.bf16 %v13032_v4, %v13031_v22 }
 0x89c   :  { %13247 = vst [vmem:[#allocation14 + $0x10] sm:$0xff] %v14883_v25  ;;  %13248 = vst [vmem:[#allocation14 + $0x18] sm:$0xff] %v14884_v8  ;;  %v14903_v18 = vpack.c.bf16 %v13034_v49, %v13033_v52  ;;  %v14904_v56 = vpack.c.bf16 %v13036_v6, %v13035_v41  ;;  %v14905_v53 = vpack.c.bf16 %v13038_v59, %v13037_v60 }
 0x89d   :  { %13249 = vst [vmem:[#allocation14 + $0x20] sm:$0xff] %v14885_v44  ;;  %13250 = vst [vmem:[#allocation14 + $0x28] sm:$0xff] %v14886_v15  ;;  %v14906_v61 = vpack.c.bf16 %v13040_v1, %v13039_v19  ;;  %v14907_v58 = vpack.c.bf16 %v13042_v55, %v13041_v38  ;;  %v14908_v23 = vpack.c.bf16 %v13044_v34, %v13043_v24 }
 0x89e   :  { %13251 = vst [vmem:[#allocation14 + $0x30] sm:$0xff] %v14887_v63  ;;  %13252 = vst [vmem:[#allocation14 + $0x38] sm:$0xff] %v14888_v54  ;;  %v14909_v3 = vpack.c.bf16 %v13046_v7, %v13045_v32  ;;  %v14910_v12 = vpack.c.bf16 %v13048_v48, %v13047_v42  ;;  %v14911_v35 = vpack.c.bf16 %v13050_v46, %v13049_v47 }
 0x89f   :  { %13261 = vst [vmem:[#allocation14 + $0x80] sm:$0xff] %v14897_v13  ;;  %13262 = vst [vmem:[#allocation14 + $0x88] sm:$0xff] %v14898_v33  ;;  %v14912_v28 = vpack.c.bf16 %v13052_v30, %v13051_v31 }
 0x8a0   :  { %13263 = vst [vmem:[#allocation14 + $0x90] sm:$0xff] %v14899_v29  ;;  %13264 = vst [vmem:[#allocation14 + $0x98] sm:$0xff] %v14900_v62 }
 0x8a1   :  { %13265 = vst [vmem:[#allocation14 + $0xa0] sm:$0xff] %v14901_v43  ;;  %13266 = vst [vmem:[#allocation14 + $0xa8] sm:$0xff] %v14902_v27 }
 0x8a2   :  { %13267 = vst [vmem:[#allocation14 + $0xb0] sm:$0xff] %v14903_v18  ;;  %13268 = vst [vmem:[#allocation14 + $0xb8] sm:$0xff] %v14904_v56 }
 0x8a3   :  { %13269 = vst [vmem:[#allocation14 + $0xc0] sm:$0xff] %v14905_v53  ;;  %13270 = vst [vmem:[#allocation14 + $0xc8] sm:$0xff] %v14906_v61 }
 0x8a4   :  { %13271 = vst [vmem:[#allocation14 + $0xd0] sm:$0xff] %v14907_v58  ;;  %13272 = vst [vmem:[#allocation14 + $0xd8] sm:$0xff] %v14908_v23 }
 0x8a5   :  { %13273 = vst [vmem:[#allocation14 + $0xe0] sm:$0xff] %v14909_v3  ;;  %13274 = vst [vmem:[#allocation14 + $0xe8] sm:$0xff] %v14910_v12 }
 0x8a6   :  { %13275 = vst [vmem:[#allocation14 + $0xf0] sm:$0xff] %v14911_v35  ;;  %13276 = vst [vmem:[#allocation14 + $0xf8] sm:$0xff] %v14912_v28 }
 0x8a7   :  { %15547 = shalt.err (!%p15544_p4)
}
 0x8a8   :  { %s15548_s14 = scalar_lea.hbm %s17839_s7, 4096 }
 0x8a9   :  { %p15549_p5 = scmp.ne.s32.totalorder %s17839_s7, %s15548_s14  ;;  %p15552_p6 = scmp.lt.u32.totalorder %s15548_s14, %s17839_s7 }
 0x8ab   :  { %p15554_p7 = pnand %p15552_p6, %p15549_p5 }
 0x8ad   :  { %15557 = shalt.err (!%p15554_p7)
}
 0x8ae   :  { %13288 = dma.vmem_to_hbm [thread:$0]  %s13283_s27, 4096, %s17839_s7, [#allocation4], %s15572_s1, %s15572_s1, %s15573_s25  }
 0x8af   :  { %15566 = dma.done.wait [#allocation4], 4096  }
 0x8b0   :  { %15567 = vsyncadd [#allocation4], 4294963200 }
 0x8b1   :  { %13292 = vsyncpa [#allocation3], 1 }
 0x8b2   :  { %13293 = vsyncpa [#allocation6], 1 }
 0x8b3   :  { %13294 = vsyncpa [#allocation9], 1 }
 0x8b4   :  { %13295 = vsyncpa [#allocation12], 1 }
 0x8b5   :  { %13296 = vsyncpa [#allocation4], 1 }

</bundles_post_ra>
